<compile_context>
chip_gen: v5e
topology: v5e:2x2
jax: 0.10.0
libtpu: 0.0.40
codegen_flags: <defaults>
</compile_context>

<pallas_src>
import numpy as np
import jax
import jax.numpy as jnp
from jax.experimental import pallas as pl
from jax.experimental.pallas import tpu as pltpu

EPS = 1e-5


def _round_up(x, m):
    return (x + m - 1) // m * m


# ----------------------------------------------------------------------------
# Kernel 1: fused  conv1(1x1 ct) + bn1 + relu + conv2(4x4 ct on 1x1) + bn2 + relu
# ----------------------------------------------------------------------------
def _fc_kernel(z_ref, w1_ref, s1_ref, b1_ref, w2_ref, s2_ref, b2_ref, o_ref):
    z = z_ref[...].astype(jnp.bfloat16)
    h = jnp.dot(z, w1_ref[...], preferred_element_type=jnp.float32)
    h = jnp.maximum(h * s1_ref[...] + b1_ref[...], 0.0)
    h = jnp.dot(h.astype(jnp.bfloat16), w2_ref[...],
                preferred_element_type=jnp.float32)
    h = jnp.maximum(h * s2_ref[...] + b2_ref[...], 0.0)
    o_ref[...] = h.astype(o_ref.dtype)


def fc_stage(z, w1, s1, b1, w2, s2, b2):
    B, K = z.shape
    N1 = w1.shape[1]
    N2 = w2.shape[1]
    return pl.pallas_call(
        _fc_kernel,
        out_shape=jax.ShapeDtypeStruct((B, N2), jnp.float32),
        grid=(1,),
        in_specs=[
            pl.BlockSpec((B, K), lambda i: (0, 0)),
            pl.BlockSpec((K, N1), lambda i: (0, 0)),
            pl.BlockSpec((1, N1), lambda i: (0, 0)),
            pl.BlockSpec((1, N1), lambda i: (0, 0)),
            pl.BlockSpec((N1, N2), lambda i: (0, 0)),
            pl.BlockSpec((1, N2), lambda i: (0, 0)),
            pl.BlockSpec((1, N2), lambda i: (0, 0)),
        ],
        out_specs=pl.BlockSpec((B, N2), lambda i: (0, 0)),
        compiler_params=pltpu.CompilerParams(
            dimension_semantics=("arbitrary",)),
    )(z, w1, s1, b1, w2, s2, b2)


# ----------------------------------------------------------------------------
# Kernel 2: ConvTranspose2d(k=4, stride=2, pad=1)  + folded BN scale/bias (+ ReLU)
#
# Sub-pixel decomposition: for output parity (py,px) and tap (ty,tx) in {0,1}^2,
#   out[2m+py, 2n+px] += xpad[m+py+ty, n+px+tx] @ W[:, :, 3-2ty-py, 3-2tx-px]
# With xpad flattened row-major to (H+2)*(W+2) rows, the tap contribution for all
# (m,n) is ONE contiguous row-slice matmul; positions whose column part >= W are
# junk and are discarded by the wrapper.
# ----------------------------------------------------------------------------
def _make_ct_kernel(H, W, Cout, relu):
    Wp = W + 2
    L = H * Wp

    def kernel(x_ref, w_ref, s_ref, b_ref, o_ref):
        # x_ref: (1, R, Cin) f32  — flattened zero-padded NHWC input, one batch elem
        # w_ref: (4, 4, Cin, Cout) bf16 — [parity, tap, cin, cout]
        # s_ref, b_ref: (1, Cout) f32
        # o_ref: (1, 4, L, Cout)
        for p in range(4):
            py, px = divmod(p, 2)
            acc = jnp.zeros((L, Cout), jnp.float32)
            for t in range(4):
                ty, tx = divmod(t, 2)
                off = (py + ty) * Wp + (px + tx)
                a = x_ref[0, off:off + L, :].astype(jnp.bfloat16)
                acc = acc + jnp.dot(a, w_ref[p, t],
                                    preferred_element_type=jnp.float32)
            y = acc * s_ref[...] + b_ref[...]
            if relu:
                y = jnp.maximum(y, 0.0)
            o_ref[0, p] = y.astype(o_ref.dtype)

    return kernel


def conv_transpose_s2(x, w_packed, scale, bias, *, relu):
    """x: (B,H,W,Cin) f32 NHWC; w_packed: (4,4,Cin,Cout) bf16. -> (B,2H,2W,Cout) f32."""
    B, H, W, Cin = x.shape
    Cout = w_packed.shape[-1]
    Wp = W + 2
    L = H * Wp
    R = _round_up((H + 2) * Wp + 2, 8)          # rows incl. slack for the last tap

    xp = jnp.pad(x, ((0, 0), (1, 1), (1, 1), (0, 0)))            # conv boundary pad
    xf = xp.reshape(B, (H + 2) * Wp, Cin)
    xf = jnp.pad(xf, ((0, 0), (0, R - (H + 2) * Wp), (0, 0)))

    s = scale.reshape(1, Cout).astype(jnp.float32)
    b = bias.reshape(1, Cout).astype(jnp.float32)

    out = pl.pallas_call(
        _make_ct_kernel(H, W, Cout, relu),
        out_shape=jax.ShapeDtypeStruct((B, 4, L, Cout), jnp.float32),
        grid=(B,),
        in_specs=[
            pl.BlockSpec((1, R, Cin), lambda i: (i, 0, 0)),
            pl.BlockSpec((4, 4, Cin, Cout), lambda i: (0, 0, 0, 0)),
            pl.BlockSpec((1, Cout), lambda i: (0, 0)),
            pl.BlockSpec((1, Cout), lambda i: (0, 0)),
        ],
        out_specs=pl.BlockSpec((1, 4, L, Cout), lambda i: (i, 0, 0, 0)),
        compiler_params=pltpu.CompilerParams(
            dimension_semantics=("parallel",)),
    )(xf, w_packed, s, b)

    out = out.reshape(B, 2, 2, H, Wp, Cout)[:, :, :, :, :W, :]    # drop junk cols
    # interleave parities: (b,py,px,m,n,c) -> (b, 2m+py, 2n+px, c)
    return out.transpose(0, 3, 1, 4, 2, 5).reshape(B, 2 * H, 2 * W, Cout)


# ----------------------------------------------------------------------------
# Parameter creation (PyTorch layouts) and one-time packing for the kernels
# ----------------------------------------------------------------------------
def init_raw_params(num_latent, out_channels, key):
    keys = iter(jax.random.split(key, 32))

    def convt(cin, cout, kh, kw):
        w = jax.random.normal(next(keys), (cin, cout, kh, kw), jnp.float32)
        w = (w / np.sqrt(cin * kh * kw)).astype(jnp.bfloat16).astype(jnp.float32)
        b = 0.01 * jax.random.normal(next(keys), (cout,), jnp.float32)
        return {"w": w, "b": b}

    def bn(c):
        return {
            "gamma": 1.0 + 0.1 * jax.random.normal(next(keys), (c,), jnp.float32),
            "beta": 0.1 * jax.random.normal(next(keys), (c,), jnp.float32),
            "mean": 0.1 * jax.random.normal(next(keys), (c,), jnp.float32),
            "var": 0.5 + jnp.abs(jax.random.normal(next(keys), (c,), jnp.float32)),
        }

    return {
        "conv1": convt(num_latent, 512, 1, 1), "bn1": bn(512),
        "conv2": convt(512, 64, 4, 4), "bn2": bn(64),
        "conv3": convt(64, 64, 4, 4), "bn3": bn(64),
        "conv4": convt(64, 32, 4, 4), "bn4": bn(32),
        "conv_final": convt(32, out_channels, 4, 4),
    }


def _fold_bn(bn, conv_bias):
    scale = bn["gamma"] / jnp.sqrt(bn["var"] + EPS)
    bias = bn["beta"] + scale * (conv_bias - bn["mean"])
    return scale.astype(jnp.float32), bias.astype(jnp.float32)


def _pack_ct_weight(w_pt):
    """(Cin,Cout,4,4) PyTorch ConvTranspose2d weight -> (4 parities, 4 taps, Cin, Cout) bf16."""
    parities = []
    for p in range(4):
        py, px = divmod(p, 2)
        taps = []
        for t in range(4):
            ty, tx = divmod(t, 2)
            taps.append(w_pt[:, :, 3 - 2 * ty - py, 3 - 2 * tx - px])
        parities.append(jnp.stack(taps, axis=0))
    return jnp.stack(parities, axis=0).astype(jnp.bfloat16)


def prepare_params(raw):
    s1, b1 = _fold_bn(raw["bn1"], raw["conv1"]["b"])
    s2, b2 = _fold_bn(raw["bn2"], raw["conv2"]["b"])
    s3, b3 = _fold_bn(raw["bn3"], raw["conv3"]["b"])
    s4, b4 = _fold_bn(raw["bn4"], raw["conv4"]["b"])

    w1 = raw["conv1"]["w"][:, :, 0, 0].astype(jnp.bfloat16)                 # (K, 512)
    cin2, cout2, kh2, kw2 = raw["conv2"]["w"].shape
    # columns ordered (ky, kx, cout) so the FC output reshapes straight to NHWC
    w2 = jnp.transpose(raw["conv2"]["w"], (0, 2, 3, 1)).reshape(
        cin2, kh2 * kw2 * cout2).astype(jnp.bfloat16)
    cf = raw["conv_final"]
    kout = cf["w"].shape[1]

    return {
        "w1": w1, "s1": s1.reshape(1, -1), "b1": b1.reshape(1, -1),
        "w2": w2,
        "s2": jnp.tile(s2, kh2 * kw2).reshape(1, -1),
        "b2": jnp.tile(b2, kh2 * kw2).reshape(1, -1),
        "w3": _pack_ct_weight(raw["conv3"]["w"]), "s3": s3, "b3": b3,
        "w4": _pack_ct_weight(raw["conv4"]["w"]), "s4": s4, "b4": b4,
        "wf": _pack_ct_weight(cf["w"]),
        "sf": jnp.ones((kout,), jnp.float32), "bf": cf["b"].astype(jnp.float32),
    }


# ----------------------------------------------------------------------------
# Forward pass
# ----------------------------------------------------------------------------
def conv_decoder_forward(z, p):
    B = z.shape[0]
    h = fc_stage(z.astype(jnp.float32),
                 p["w1"], p["s1"], p["b1"], p["w2"], p["s2"], p["b2"])   # (B, 4*4*64)
    x = h.reshape(B, 4, 4, 64)                                           # NHWC
    x = conv_transpose_s2(x, p["w3"], p["s3"], p["b3"], relu=True)       # (B, 8, 8, 64)
    x = conv_transpose_s2(x, p["w4"], p["s4"], p["b4"], relu=True)       # (B,16,16,32)
    x = conv_transpose_s2(x, p["wf"], p["sf"], p["bf"], relu=False)      # (B,32,32,C)
    return x.transpose(0, 3, 1, 2)                                       # NCHW


# ----------------------------------------------------------------------------
# Pure-JAX reference (NCHW, f32) for a correctness sanity check
# ----------------------------------------------------------------------------
def _ref_bn_relu(x, bn, relu=True):
    g, be = bn["gamma"][None, :, None, None], bn["beta"][None, :, None, None]
    m, v = bn["mean"][None, :, None, None], bn["var"][None, :, None, None]
    y = g * (x - m) / jnp.sqrt(v + EPS) + be
    return jnp.maximum(y, 0.0) if relu else y


def _ref_conv_transpose_s2(x, w, b):
    B, Cin, H, W = x.shape
    Cout = w.shape[1]
    full = jnp.zeros((B, Cout, 2 * H + 2, 2 * W + 2), jnp.float32)
    for ky in range(4):
        for kx in range(4):
            contrib = jnp.einsum("bihw,io->bohw", x, w[:, :, ky, kx])
            full = full.at[:, :, ky:ky + 2 * H:2, kx:kx + 2 * W:2].add(contrib)
    return full[:, :, 1:2 * H + 1, 1:2 * W + 1] + b[None, :, None, None]


def reference_forward(z, raw):
    h = z @ raw["conv1"]["w"][:, :, 0, 0] + raw["conv1"]["b"]
    h = _ref_bn_relu(h[:, :, None, None], raw["bn1"])
    h = jnp.einsum("bi,iohw->bohw", h[:, :, 0, 0], raw["conv2"]["w"]) \
        + raw["conv2"]["b"][None, :, None, None]
    h = _ref_bn_relu(h, raw["bn2"])
    h = _ref_bn_relu(_ref_conv_transpose_s2(h, raw["conv3"]["w"], raw["conv3"]["b"]),
                     raw["bn3"])
    h = _ref_bn_relu(_ref_conv_transpose_s2(h, raw["conv4"]["w"], raw["conv4"]["b"]),
                     raw["bn4"])
    return _ref_conv_transpose_s2(h, raw["conv_final"]["w"], raw["conv_final"]["b"])


if __name__ == "__main__":
    key = jax.random.PRNGKey(0)
    k_param, k_z = jax.random.split(key)

    batch = 2
    num_latent = 8
    output_shape = (3, 32, 32)   # 32x32 output -> the (broken) conv4-reuse branch is skipped

    raw = init_raw_params(num_latent, output_shape[0], k_param)
    params = prepare_params(raw)
    z = jax.random.normal(k_z, (batch, num_latent), jnp.float32)

    fwd = jax.jit(conv_decoder_forward)
    out = jax.block_until_ready(fwd(z, params))

    assert out.shape == (batch, output_shape[0], 32, 32), out.shape
    assert out.dtype == jnp.float32
    assert bool(jnp.all(jnp.isfinite(out)))

    ref = reference_forward(z, raw)
    rel_err = float(jnp.max(jnp.abs(out - ref)) / (jnp.max(jnp.abs(ref)) + 1e-6))
    assert rel_err < 5e-2, f"mismatch vs pure-JAX reference: rel_err={rel_err}"

    print("KERNEL_OK")
</pallas_src>

<mosaic_0001>
module attributes {stable_mosaic.version = 11 : i64} {
  func.func @_fc_kernel(%arg0: i32, %arg1: memref<2x8xf32, #tpu.memory_space<vmem>>, %arg2: memref<8x512xbf16, #tpu.memory_space<vmem>>, %arg3: memref<1x512xf32, #tpu.memory_space<vmem>>, %arg4: memref<1x512xf32, #tpu.memory_space<vmem>>, %arg5: memref<512x1024xbf16, #tpu.memory_space<vmem>>, %arg6: memref<1x1024xf32, #tpu.memory_space<vmem>>, %arg7: memref<1x1024xf32, #tpu.memory_space<vmem>>, %arg8: memref<2x1024xf32, #tpu.memory_space<vmem>>) attributes {dimension_semantics = [#tpu.dimension_semantics<arbitrary>], iteration_bounds = array<i64: 1>, scalar_prefetch = 0 : i64, scratch_operands = 0 : i64, tpu.core_type = #tpu.core_type<tc>, window_params = [{pipeline_mode = #tpu.pipeline_mode<synchronous>, transform_indices = @transform_0, window_bounds = array<i64: 2, 8>}, {pipeline_mode = #tpu.pipeline_mode<synchronous>, transform_indices = @transform_1, window_bounds = array<i64: 8, 512>}, {pipeline_mode = #tpu.pipeline_mode<synchronous>, transform_indices = @transform_2, window_bounds = array<i64: 1, 512>}, {pipeline_mode = #tpu.pipeline_mode<synchronous>, transform_indices = @transform_3, window_bounds = array<i64: 1, 512>}, {pipeline_mode = #tpu.pipeline_mode<synchronous>, transform_indices = @transform_4, window_bounds = array<i64: 512, 1024>}, {pipeline_mode = #tpu.pipeline_mode<synchronous>, transform_indices = @transform_5, window_bounds = array<i64: 1, 1024>}, {pipeline_mode = #tpu.pipeline_mode<synchronous>, transform_indices = @transform_6, window_bounds = array<i64: 1, 1024>}, {pipeline_mode = #tpu.pipeline_mode<synchronous>, transform_indices = @transform_7, window_bounds = array<i64: 2, 1024>}]} {
    %c0 = arith.constant 0 : index
    %c0_0 = arith.constant 0 : index
    %0 = vector.load %arg1[%c0, %c0_0] : memref<2x8xf32, #tpu.memory_space<vmem>>, vector<2x8xf32>
    %1 = arith.truncf %0 : vector<2x8xf32> to vector<2x8xbf16>
    %c0_1 = arith.constant 0 : index
    %c0_2 = arith.constant 0 : index
    %2 = vector.load %arg2[%c0_1, %c0_2] : memref<8x512xbf16, #tpu.memory_space<vmem>>, vector<8x512xbf16>
    %cst = arith.constant dense<0.000000e+00> : vector<2x512xf32>
    %3 = tpu.matmul %1, %2, %cst {dimension_numbers = #tpu.dot_dimension_numbers<[1], [0], [0], [1], [0, 0, 1, 1], [], []>} : vector<2x8xbf16>, vector<8x512xbf16>, vector<2x512xf32> -> vector<2x512xf32>
    %c0_3 = arith.constant 0 : index
    %c0_4 = arith.constant 0 : index
    %4 = vector.load %arg3[%c0_3, %c0_4] : memref<1x512xf32, #tpu.memory_space<vmem>>, vector<1x512xf32>
    %5 = vector.broadcast %4 : vector<1x512xf32> to vector<2x512xf32>
    %6 = arith.mulf %3, %5 : vector<2x512xf32>
    %c0_5 = arith.constant 0 : index
    %c0_6 = arith.constant 0 : index
    %7 = vector.load %arg4[%c0_5, %c0_6] : memref<1x512xf32, #tpu.memory_space<vmem>>, vector<1x512xf32>
    %8 = vector.broadcast %7 : vector<1x512xf32> to vector<2x512xf32>
    %9 = arith.addf %6, %8 : vector<2x512xf32>
    %cst_7 = arith.constant 0.000000e+00 : f32
    %10 = vector.broadcast %cst_7 : f32 to vector<2x512xf32>
    %11 = arith.maximumf %9, %10 : vector<2x512xf32>
    %12 = arith.truncf %11 : vector<2x512xf32> to vector<2x512xbf16>
    %c0_8 = arith.constant 0 : index
    %c0_9 = arith.constant 0 : index
    %13 = vector.load %arg5[%c0_8, %c0_9] : memref<512x1024xbf16, #tpu.memory_space<vmem>>, vector<512x1024xbf16>
    %cst_10 = arith.constant dense<0.000000e+00> : vector<2x1024xf32>
    %14 = tpu.matmul %12, %13, %cst_10 {dimension_numbers = #tpu.dot_dimension_numbers<[1], [0], [0], [1], [0, 0, 1, 1], [], []>} : vector<2x512xbf16>, vector<512x1024xbf16>, vector<2x1024xf32> -> vector<2x1024xf32>
    %c0_11 = arith.constant 0 : index
    %c0_12 = arith.constant 0 : index
    %15 = vector.load %arg6[%c0_11, %c0_12] : memref<1x1024xf32, #tpu.memory_space<vmem>>, vector<1x1024xf32>
    %16 = vector.broadcast %15 : vector<1x1024xf32> to vector<2x1024xf32>
    %17 = arith.mulf %14, %16 : vector<2x1024xf32>
    %c0_13 = arith.constant 0 : index
    %c0_14 = arith.constant 0 : index
    %18 = vector.load %arg7[%c0_13, %c0_14] : memref<1x1024xf32, #tpu.memory_space<vmem>>, vector<1x1024xf32>
    %19 = vector.broadcast %18 : vector<1x1024xf32> to vector<2x1024xf32>
    %20 = arith.addf %17, %19 : vector<2x1024xf32>
    %cst_15 = arith.constant 0.000000e+00 : f32
    %21 = vector.broadcast %cst_15 : f32 to vector<2x1024xf32>
    %22 = arith.maximumf %20, %21 : vector<2x1024xf32>
    %c0_16 = arith.constant 0 : index
    %c0_17 = arith.constant 0 : index
    %23 = vector.load %arg8[%c0_16, %c0_17] : memref<2x1024xf32, #tpu.memory_space<vmem>>, vector<2x1024xf32>
    tpu.vector_store %arg8[%c0_16, %c0_17], %22 {strides = array<i32>} : memref<2x1024xf32, #tpu.memory_space<vmem>>, vector<2x1024xf32>,
    return
  }
  func.func @transform_0(%arg0: i32) -> (i32, i32) {
    %c0_i32 = arith.constant 0 : i32
    %c0_i32_0 = arith.constant 0 : i32
    %c0_i32_1 = arith.constant 0 : i32
    return %c0_i32, %c0_i32_0 : i32, i32
  }
  func.func @transform_1(%arg0: i32) -> (i32, i32) {
    %c0_i32 = arith.constant 0 : i32
    %c0_i32_0 = arith.constant 0 : i32
    %c0_i32_1 = arith.constant 0 : i32
    return %c0_i32, %c0_i32_0 : i32, i32
  }
  func.func @transform_2(%arg0: i32) -> (i32, i32) {
    %c0_i32 = arith.constant 0 : i32
    %c0_i32_0 = arith.constant 0 : i32
    %c0_i32_1 = arith.constant 0 : i32
    return %c0_i32, %c0_i32_0 : i32, i32
  }
  func.func @transform_3(%arg0: i32) -> (i32, i32) {
    %c0_i32 = arith.constant 0 : i32
    %c0_i32_0 = arith.constant 0 : i32
    %c0_i32_1 = arith.constant 0 : i32
    return %c0_i32, %c0_i32_0 : i32, i32
  }
  func.func @transform_4(%arg0: i32) -> (i32, i32) {
    %c0_i32 = arith.constant 0 : i32
    %c0_i32_0 = arith.constant 0 : i32
    %c0_i32_1 = arith.constant 0 : i32
    return %c0_i32, %c0_i32_0 : i32, i32
  }
  func.func @transform_5(%arg0: i32) -> (i32, i32) {
    %c0_i32 = arith.constant 0 : i32
    %c0_i32_0 = arith.constant 0 : i32
    %c0_i32_1 = arith.constant 0 : i32
    return %c0_i32, %c0_i32_0 : i32, i32
  }
  func.func @transform_6(%arg0: i32) -> (i32, i32) {
    %c0_i32 = arith.constant 0 : i32
    %c0_i32_0 = arith.constant 0 : i32
    %c0_i32_1 = arith.constant 0 : i32
    return %c0_i32, %c0_i32_0 : i32, i32
  }
  func.func @transform_7(%arg0: i32) -> (i32, i32) {
    %c0_i32 = arith.constant 0 : i32
    %c0_i32_0 = arith.constant 0 : i32
    %c0_i32_1 = arith.constant 0 : i32
    return %c0_i32, %c0_i32_0 : i32, i32
  }
}

module attributes {stable_mosaic.version = 11 : i64} {
  func.func @kernel(%arg0: i32, %arg1: memref<1x40x64xf32, #tpu.memory_space<vmem>>, %arg2: memref<4x4x64x64xbf16, #tpu.memory_space<vmem>>, %arg3: memref<1x64xf32, #tpu.memory_space<vmem>>, %arg4: memref<1x64xf32, #tpu.memory_space<vmem>>, %arg5: memref<1x4x24x64xf32, #tpu.memory_space<vmem>>) attributes {dimension_semantics = [#tpu.dimension_semantics<parallel>], iteration_bounds = array<i64: 2>, scalar_prefetch = 0 : i64, scratch_operands = 0 : i64, tpu.core_type = #tpu.core_type<tc>, window_params = [{transform_indices = @transform_0, window_bounds = array<i64: 1, 40, 64>}, {pipeline_mode = #tpu.pipeline_mode<synchronous>, transform_indices = @transform_1, window_bounds = array<i64: 4, 4, 64, 64>}, {pipeline_mode = #tpu.pipeline_mode<synchronous>, transform_indices = @transform_2, window_bounds = array<i64: 1, 64>}, {pipeline_mode = #tpu.pipeline_mode<synchronous>, transform_indices = @transform_3, window_bounds = array<i64: 1, 64>}, {transform_indices = @transform_4, window_bounds = array<i64: 1, 4, 24, 64>}]} {
    %cst = arith.constant 0.000000e+00 : f32
    %0 = vector.broadcast %cst : f32 to vector<24x64xf32>
    %c0 = arith.constant 0 : index
    %c0_0 = arith.constant 0 : index
    %c0_1 = arith.constant 0 : index
    %1 = vector.load %arg1[%c0, %c0_0, %c0_1] : memref<1x40x64xf32, #tpu.memory_space<vmem>>, vector<1x24x64xf32>
    %2 = vector.shape_cast %1 : vector<1x24x64xf32> to vector<24x64xf32>
    %3 = arith.truncf %2 : vector<24x64xf32> to vector<24x64xbf16>
    %c0_2 = arith.constant 0 : index
    %c0_3 = arith.constant 0 : index
    %c0_4 = arith.constant 0 : index
    %c0_5 = arith.constant 0 : index
    %4 = vector.load %arg2[%c0_2, %c0_3, %c0_4, %c0_5] : memref<4x4x64x64xbf16, #tpu.memory_space<vmem>>, vector<1x1x64x64xbf16>
    %5 = vector.shape_cast %4 : vector<1x1x64x64xbf16> to vector<64x64xbf16>
    %cst_6 = arith.constant dense<0.000000e+00> : vector<24x64xf32>
    %6 = tpu.matmul %3, %5, %cst_6 {dimension_numbers = #tpu.dot_dimension_numbers<[1], [0], [0], [1], [0, 0, 1, 1], [], []>} : vector<24x64xbf16>, vector<64x64xbf16>, vector<24x64xf32> -> vector<24x64xf32>
    %7 = arith.addf %0, %6 : vector<24x64xf32>
    %c0_7 = arith.constant 0 : index
    %c1 = arith.constant 1 : index
    %c0_8 = arith.constant 0 : index
    %8 = vector.load %arg1[%c0_7, %c1, %c0_8] : memref<1x40x64xf32, #tpu.memory_space<vmem>>, vector<1x24x64xf32>
    %9 = vector.shape_cast %8 : vector<1x24x64xf32> to vector<24x64xf32>
    %10 = arith.truncf %9 : vector<24x64xf32> to vector<24x64xbf16>
    %c0_9 = arith.constant 0 : index
    %c1_10 = arith.constant 1 : index
    %c0_11 = arith.constant 0 : index
    %c0_12 = arith.constant 0 : index
    %11 = vector.load %arg2[%c0_9, %c1_10, %c0_11, %c0_12] : memref<4x4x64x64xbf16, #tpu.memory_space<vmem>>, vector<1x1x64x64xbf16>
    %12 = vector.shape_cast %11 : vector<1x1x64x64xbf16> to vector<64x64xbf16>
    %cst_13 = arith.constant dense<0.000000e+00> : vector<24x64xf32>
    %13 = tpu.matmul %10, %12, %cst_13 {dimension_numbers = #tpu.dot_dimension_numbers<[1], [0], [0], [1], [0, 0, 1, 1], [], []>} : vector<24x64xbf16>, vector<64x64xbf16>, vector<24x64xf32> -> vector<24x64xf32>
    %14 = arith.addf %7, %13 : vector<24x64xf32>
    %c0_14 = arith.constant 0 : index
    %c6 = arith.constant 6 : index
    %c0_15 = arith.constant 0 : index
    %15 = vector.load %arg1[%c0_14, %c6, %c0_15] : memref<1x40x64xf32, #tpu.memory_space<vmem>>, vector<1x24x64xf32>
    %16 = vector.shape_cast %15 : vector<1x24x64xf32> to vector<24x64xf32>
    %17 = arith.truncf %16 : vector<24x64xf32> to vector<24x64xbf16>
    %c0_16 = arith.constant 0 : index
    %c2 = arith.constant 2 : index
    %c0_17 = arith.constant 0 : index
    %c0_18 = arith.constant 0 : index
    %18 = vector.load %arg2[%c0_16, %c2, %c0_17, %c0_18] : memref<4x4x64x64xbf16, #tpu.memory_space<vmem>>, vector<1x1x64x64xbf16>
    %19 = vector.shape_cast %18 : vector<1x1x64x64xbf16> to vector<64x64xbf16>
    %cst_19 = arith.constant dense<0.000000e+00> : vector<24x64xf32>
    %20 = tpu.matmul %17, %19, %cst_19 {dimension_numbers = #tpu.dot_dimension_numbers<[1], [0], [0], [1], [0, 0, 1, 1], [], []>} : vector<24x64xbf16>, vector<64x64xbf16>, vector<24x64xf32> -> vector<24x64xf32>
    %21 = arith.addf %14, %20 : vector<24x64xf32>
    %c0_20 = arith.constant 0 : index
    %c7 = arith.constant 7 : index
    %c0_21 = arith.constant 0 : index
    %22 = vector.load %arg1[%c0_20, %c7, %c0_21] : memref<1x40x64xf32, #tpu.memory_space<vmem>>, vector<1x24x64xf32>
    %23 = vector.shape_cast %22 : vector<1x24x64xf32> to vector<24x64xf32>
    %24 = arith.truncf %23 : vector<24x64xf32> to vector<24x64xbf16>
    %c0_22 = arith.constant 0 : index
    %c3 = arith.constant 3 : index
    %c0_23 = arith.constant 0 : index
    %c0_24 = arith.constant 0 : index
    %25 = vector.load %arg2[%c0_22, %c3, %c0_23, %c0_24] : memref<4x4x64x64xbf16, #tpu.memory_space<vmem>>, vector<1x1x64x64xbf16>
    %26 = vector.shape_cast %25 : vector<1x1x64x64xbf16> to vector<64x64xbf16>
    %cst_25 = arith.constant dense<0.000000e+00> : vector<24x64xf32>
    %27 = tpu.matmul %24, %26, %cst_25 {dimension_numbers = #tpu.dot_dimension_numbers<[1], [0], [0], [1], [0, 0, 1, 1], [], []>} : vector<24x64xbf16>, vector<64x64xbf16>, vector<24x64xf32> -> vector<24x64xf32>
    %28 = arith.addf %21, %27 : vector<24x64xf32>
    %c0_26 = arith.constant 0 : index
    %c0_27 = arith.constant 0 : index
    %29 = vector.load %arg3[%c0_26, %c0_27] : memref<1x64xf32, #tpu.memory_space<vmem>>, vector<1x64xf32>
    %30 = vector.broadcast %29 : vector<1x64xf32> to vector<24x64xf32>
    %31 = arith.mulf %28, %30 : vector<24x64xf32>
    %c0_28 = arith.constant 0 : index
    %c0_29 = arith.constant 0 : index
    %32 = vector.load %arg4[%c0_28, %c0_29] : memref<1x64xf32, #tpu.memory_space<vmem>>, vector<1x64xf32>
    %33 = vector.broadcast %32 : vector<1x64xf32> to vector<24x64xf32>
    %34 = arith.addf %31, %33 : vector<24x64xf32>
    %cst_30 = arith.constant 0.000000e+00 : f32
    %35 = vector.broadcast %cst_30 : f32 to vector<24x64xf32>
    %36 = arith.maximumf %34, %35 : vector<24x64xf32>
    %c0_31 = arith.constant 0 : index
    %c0_32 = arith.constant 0 : index
    %c0_33 = arith.constant 0 : index
    %c0_34 = arith.constant 0 : index
    %37 = vector.load %arg5[%c0_31, %c0_32, %c0_33, %c0_34] : memref<1x4x24x64xf32, #tpu.memory_space<vmem>>, vector<1x1x24x64xf32>
    %38 = vector.shape_cast %37 : vector<1x1x24x64xf32> to vector<24x64xf32>
    %39 = vector.shape_cast %36 : vector<24x64xf32> to vector<1x1x24x64xf32>
    tpu.vector_store %arg5[%c0_31, %c0_32, %c0_33, %c0_34], %39 {strides = array<i32>} : memref<1x4x24x64xf32, #tpu.memory_space<vmem>>, vector<1x1x24x64xf32>,
    %cst_35 = arith.constant 0.000000e+00 : f32
    %40 = vector.broadcast %cst_35 : f32 to vector<24x64xf32>
    %c0_36 = arith.constant 0 : index
    %c1_37 = arith.constant 1 : index
    %c0_38 = arith.constant 0 : index
    %41 = vector.load %arg1[%c0_36, %c1_37, %c0_38] : memref<1x40x64xf32, #tpu.memory_space<vmem>>, vector<1x24x64xf32>
    %42 = vector.shape_cast %41 : vector<1x24x64xf32> to vector<24x64xf32>
    %43 = arith.truncf %42 : vector<24x64xf32> to vector<24x64xbf16>
    %c1_39 = arith.constant 1 : index
    %c0_40 = arith.constant 0 : index
    %c0_41 = arith.constant 0 : index
    %c0_42 = arith.constant 0 : index
    %44 = vector.load %arg2[%c1_39, %c0_40, %c0_41, %c0_42] : memref<4x4x64x64xbf16, #tpu.memory_space<vmem>>, vector<1x1x64x64xbf16>
    %45 = vector.shape_cast %44 : vector<1x1x64x64xbf16> to vector<64x64xbf16>
    %cst_43 = arith.constant dense<0.000000e+00> : vector<24x64xf32>
    %46 = tpu.matmul %43, %45, %cst_43 {dimension_numbers = #tpu.dot_dimension_numbers<[1], [0], [0], [1], [0, 0, 1, 1], [], []>} : vector<24x64xbf16>, vector<64x64xbf16>, vector<24x64xf32> -> vector<24x64xf32>
    %47 = arith.addf %40, %46 : vector<24x64xf32>
    %c0_44 = arith.constant 0 : index
    %c2_45 = arith.constant 2 : index
    %c0_46 = arith.constant 0 : index
    %48 = vector.load %arg1[%c0_44, %c2_45, %c0_46] : memref<1x40x64xf32, #tpu.memory_space<vmem>>, vector<1x24x64xf32>
    %49 = vector.shape_cast %48 : vector<1x24x64xf32> to vector<24x64xf32>
    %50 = arith.truncf %49 : vector<24x64xf32> to vector<24x64xbf16>
    %c1_47 = arith.constant 1 : index
    %c1_48 = arith.constant 1 : index
    %c0_49 = arith.constant 0 : index
    %c0_50 = arith.constant 0 : index
    %51 = vector.load %arg2[%c1_47, %c1_48, %c0_49, %c0_50] : memref<4x4x64x64xbf16, #tpu.memory_space<vmem>>, vector<1x1x64x64xbf16>
    %52 = vector.shape_cast %51 : vector<1x1x64x64xbf16> to vector<64x64xbf16>
    %cst_51 = arith.constant dense<0.000000e+00> : vector<24x64xf32>
    %53 = tpu.matmul %50, %52, %cst_51 {dimension_numbers = #tpu.dot_dimension_numbers<[1], [0], [0], [1], [0, 0, 1, 1], [], []>} : vector<24x64xbf16>, vector<64x64xbf16>, vector<24x64xf32> -> vector<24x64xf32>
    %54 = arith.addf %47, %53 : vector<24x64xf32>
    %c0_52 = arith.constant 0 : index
    %c7_53 = arith.constant 7 : index
    %c0_54 = arith.constant 0 : index
    %55 = vector.load %arg1[%c0_52, %c7_53, %c0_54] : memref<1x40x64xf32, #tpu.memory_space<vmem>>, vector<1x24x64xf32>
    %56 = vector.shape_cast %55 : vector<1x24x64xf32> to vector<24x64xf32>
    %57 = arith.truncf %56 : vector<24x64xf32> to vector<24x64xbf16>
    %c1_55 = arith.constant 1 : index
    %c2_56 = arith.constant 2 : index
    %c0_57 = arith.constant 0 : index
    %c0_58 = arith.constant 0 : index
    %58 = vector.load %arg2[%c1_55, %c2_56, %c0_57, %c0_58] : memref<4x4x64x64xbf16, #tpu.memory_space<vmem>>, vector<1x1x64x64xbf16>
    %59 = vector.shape_cast %58 : vector<1x1x64x64xbf16> to vector<64x64xbf16>
    %cst_59 = arith.constant dense<0.000000e+00> : vector<24x64xf32>
    %60 = tpu.matmul %57, %59, %cst_59 {dimension_numbers = #tpu.dot_dimension_numbers<[1], [0], [0], [1], [0, 0, 1, 1], [], []>} : vector<24x64xbf16>, vector<64x64xbf16>, vector<24x64xf32> -> vector<24x64xf32>
    %61 = arith.addf %54, %60 : vector<24x64xf32>
    %c0_60 = arith.constant 0 : index
    %c8 = arith.constant 8 : index
    %c0_61 = arith.constant 0 : index
    %62 = vector.load %arg1[%c0_60, %c8, %c0_61] : memref<1x40x64xf32, #tpu.memory_space<vmem>>, vector<1x24x64xf32>
    %63 = vector.shape_cast %62 : vector<1x24x64xf32> to vector<24x64xf32>
    %64 = arith.truncf %63 : vector<24x64xf32> to vector<24x64xbf16>
    %c1_62 = arith.constant 1 : index
    %c3_63 = arith.constant 3 : index
    %c0_64 = arith.constant 0 : index
    %c0_65 = arith.constant 0 : index
    %65 = vector.load %arg2[%c1_62, %c3_63, %c0_64, %c0_65] : memref<4x4x64x64xbf16, #tpu.memory_space<vmem>>, vector<1x1x64x64xbf16>
    %66 = vector.shape_cast %65 : vector<1x1x64x64xbf16> to vector<64x64xbf16>
    %cst_66 = arith.constant dense<0.000000e+00> : vector<24x64xf32>
    %67 = tpu.matmul %64, %66, %cst_66 {dimension_numbers = #tpu.dot_dimension_numbers<[1], [0], [0], [1], [0, 0, 1, 1], [], []>} : vector<24x64xbf16>, vector<64x64xbf16>, vector<24x64xf32> -> vector<24x64xf32>
    %68 = arith.addf %61, %67 : vector<24x64xf32>
    %c0_67 = arith.constant 0 : index
    %c0_68 = arith.constant 0 : index
    %69 = vector.load %arg3[%c0_67, %c0_68] : memref<1x64xf32, #tpu.memory_space<vmem>>, vector<1x64xf32>
    %70 = vector.broadcast %69 : vector<1x64xf32> to vector<24x64xf32>
    %71 = arith.mulf %68, %70 : vector<24x64xf32>
    %c0_69 = arith.constant 0 : index
    %c0_70 = arith.constant 0 : index
    %72 = vector.load %arg4[%c0_69, %c0_70] : memref<1x64xf32, #tpu.memory_space<vmem>>, vector<1x64xf32>
    %73 = vector.broadcast %72 : vector<1x64xf32> to vector<24x64xf32>
    %74 = arith.addf %71, %73 : vector<24x64xf32>
    %cst_71 = arith.constant 0.000000e+00 : f32
    %75 = vector.broadcast %cst_71 : f32 to vector<24x64xf32>
    %76 = arith.maximumf %74, %75 : vector<24x64xf32>
    %c0_72 = arith.constant 0 : index
    %c1_73 = arith.constant 1 : index
    %c0_74 = arith.constant 0 : index
    %c0_75 = arith.constant 0 : index
    %77 = vector.load %arg5[%c0_72, %c1_73, %c0_74, %c0_75] : memref<1x4x24x64xf32, #tpu.memory_space<vmem>>, vector<1x1x24x64xf32>
    %78 = vector.shape_cast %77 : vector<1x1x24x64xf32> to vector<24x64xf32>
    %79 = vector.shape_cast %76 : vector<24x64xf32> to vector<1x1x24x64xf32>
    tpu.vector_store %arg5[%c0_72, %c1_73, %c0_74, %c0_75], %79 {strides = array<i32>} : memref<1x4x24x64xf32, #tpu.memory_space<vmem>>, vector<1x1x24x64xf32>,
    %cst_76 = arith.constant 0.000000e+00 : f32
    %80 = vector.broadcast %cst_76 : f32 to vector<24x64xf32>
    %c0_77 = arith.constant 0 : index
    %c6_78 = arith.constant 6 : index
    %c0_79 = arith.constant 0 : index
    %81 = vector.load %arg1[%c0_77, %c6_78, %c0_79] : memref<1x40x64xf32, #tpu.memory_space<vmem>>, vector<1x24x64xf32>
    %82 = vector.shape_cast %81 : vector<1x24x64xf32> to vector<24x64xf32>
    %83 = arith.truncf %82 : vector<24x64xf32> to vector<24x64xbf16>
    %c2_80 = arith.constant 2 : index
    %c0_81 = arith.constant 0 : index
    %c0_82 = arith.constant 0 : index
    %c0_83 = arith.constant 0 : index
    %84 = vector.load %arg2[%c2_80, %c0_81, %c0_82, %c0_83] : memref<4x4x64x64xbf16, #tpu.memory_space<vmem>>, vector<1x1x64x64xbf16>
    %85 = vector.shape_cast %84 : vector<1x1x64x64xbf16> to vector<64x64xbf16>
    %cst_84 = arith.constant dense<0.000000e+00> : vector<24x64xf32>
    %86 = tpu.matmul %83, %85, %cst_84 {dimension_numbers = #tpu.dot_dimension_numbers<[1], [0], [0], [1], [0, 0, 1, 1], [], []>} : vector<24x64xbf16>, vector<64x64xbf16>, vector<24x64xf32> -> vector<24x64xf32>
    %87 = arith.addf %80, %86 : vector<24x64xf32>
    %c0_85 = arith.constant 0 : index
    %c7_86 = arith.constant 7 : index
    %c0_87 = arith.constant 0 : index
    %88 = vector.load %arg1[%c0_85, %c7_86, %c0_87] : memref<1x40x64xf32, #tpu.memory_space<vmem>>, vector<1x24x64xf32>
    %89 = vector.shape_cast %88 : vector<1x24x64xf32> to vector<24x64xf32>
    %90 = arith.truncf %89 : vector<24x64xf32> to vector<24x64xbf16>
    %c2_88 = arith.constant 2 : index
    %c1_89 = arith.constant 1 : index
    %c0_90 = arith.constant 0 : index
    %c0_91 = arith.constant 0 : index
    %91 = vector.load %arg2[%c2_88, %c1_89, %c0_90, %c0_91] : memref<4x4x64x64xbf16, #tpu.memory_space<vmem>>, vector<1x1x64x64xbf16>
    %92 = vector.shape_cast %91 : vector<1x1x64x64xbf16> to vector<64x64xbf16>
    %cst_92 = arith.constant dense<0.000000e+00> : vector<24x64xf32>
    %93 = tpu.matmul %90, %92, %cst_92 {dimension_numbers = #tpu.dot_dimension_numbers<[1], [0], [0], [1], [0, 0, 1, 1], [], []>} : vector<24x64xbf16>, vector<64x64xbf16>, vector<24x64xf32> -> vector<24x64xf32>
    %94 = arith.addf %87, %93 : vector<24x64xf32>
    %c0_93 = arith.constant 0 : index
    %c12 = arith.constant 12 : index
    %c0_94 = arith.constant 0 : index
    %95 = vector.load %arg1[%c0_93, %c12, %c0_94] : memref<1x40x64xf32, #tpu.memory_space<vmem>>, vector<1x24x64xf32>
    %96 = vector.shape_cast %95 : vector<1x24x64xf32> to vector<24x64xf32>
    %97 = arith.truncf %96 : vector<24x64xf32> to vector<24x64xbf16>
    %c2_95 = arith.constant 2 : index
    %c2_96 = arith.constant 2 : index
    %c0_97 = arith.constant 0 : index
    %c0_98 = arith.constant 0 : index
    %98 = vector.load %arg2[%c2_95, %c2_96, %c0_97, %c0_98] : memref<4x4x64x64xbf16, #tpu.memory_space<vmem>>, vector<1x1x64x64xbf16>
    %99 = vector.shape_cast %98 : vector<1x1x64x64xbf16> to vector<64x64xbf16>
    %cst_99 = arith.constant dense<0.000000e+00> : vector<24x64xf32>
    %100 = tpu.matmul %97, %99, %cst_99 {dimension_numbers = #tpu.dot_dimension_numbers<[1], [0], [0], [1], [0, 0, 1, 1], [], []>} : vector<24x64xbf16>, vector<64x64xbf16>, vector<24x64xf32> -> vector<24x64xf32>
    %101 = arith.addf %94, %100 : vector<24x64xf32>
    %c0_100 = arith.constant 0 : index
    %c13 = arith.constant 13 : index
    %c0_101 = arith.constant 0 : index
    %102 = vector.load %arg1[%c0_100, %c13, %c0_101] : memref<1x40x64xf32, #tpu.memory_space<vmem>>, vector<1x24x64xf32>
    %103 = vector.shape_cast %102 : vector<1x24x64xf32> to vector<24x64xf32>
    %104 = arith.truncf %103 : vector<24x64xf32> to vector<24x64xbf16>
    %c2_102 = arith.constant 2 : index
    %c3_103 = arith.constant 3 : index
    %c0_104 = arith.constant 0 : index
    %c0_105 = arith.constant 0 : index
    %105 = vector.load %arg2[%c2_102, %c3_103, %c0_104, %c0_105] : memref<4x4x64x64xbf16, #tpu.memory_space<vmem>>, vector<1x1x64x64xbf16>
    %106 = vector.shape_cast %105 : vector<1x1x64x64xbf16> to vector<64x64xbf16>
    %cst_106 = arith.constant dense<0.000000e+00> : vector<24x64xf32>
    %107 = tpu.matmul %104, %106, %cst_106 {dimension_numbers = #tpu.dot_dimension_numbers<[1], [0], [0], [1], [0, 0, 1, 1], [], []>} : vector<24x64xbf16>, vector<64x64xbf16>, vector<24x64xf32> -> vector<24x64xf32>
    %108 = arith.addf %101, %107 : vector<24x64xf32>
    %c0_107 = arith.constant 0 : index
    %c0_108 = arith.constant 0 : index
    %109 = vector.load %arg3[%c0_107, %c0_108] : memref<1x64xf32, #tpu.memory_space<vmem>>, vector<1x64xf32>
    %110 = vector.broadcast %109 : vector<1x64xf32> to vector<24x64xf32>
    %111 = arith.mulf %108, %110 : vector<24x64xf32>
    %c0_109 = arith.constant 0 : index
    %c0_110 = arith.constant 0 : index
    %112 = vector.load %arg4[%c0_109, %c0_110] : memref<1x64xf32, #tpu.memory_space<vmem>>, vector<1x64xf32>
    %113 = vector.broadcast %112 : vector<1x64xf32> to vector<24x64xf32>
    %114 = arith.addf %111, %113 : vector<24x64xf32>
    %cst_111 = arith.constant 0.000000e+00 : f32
    %115 = vector.broadcast %cst_111 : f32 to vector<24x64xf32>
    %116 = arith.maximumf %114, %115 : vector<24x64xf32>
    %c0_112 = arith.constant 0 : index
    %c2_113 = arith.constant 2 : index
    %c0_114 = arith.constant 0 : index
    %c0_115 = arith.constant 0 : index
    %117 = vector.load %arg5[%c0_112, %c2_113, %c0_114, %c0_115] : memref<1x4x24x64xf32, #tpu.memory_space<vmem>>, vector<1x1x24x64xf32>
    %118 = vector.shape_cast %117 : vector<1x1x24x64xf32> to vector<24x64xf32>
    %119 = vector.shape_cast %116 : vector<24x64xf32> to vector<1x1x24x64xf32>
    tpu.vector_store %arg5[%c0_112, %c2_113, %c0_114, %c0_115], %119 {strides = array<i32>} : memref<1x4x24x64xf32, #tpu.memory_space<vmem>>, vector<1x1x24x64xf32>,
    %cst_116 = arith.constant 0.000000e+00 : f32
    %120 = vector.broadcast %cst_116 : f32 to vector<24x64xf32>
    %c0_117 = arith.constant 0 : index
    %c7_118 = arith.constant 7 : index
    %c0_119 = arith.constant 0 : index
    %121 = vector.load %arg1[%c0_117, %c7_118, %c0_119] : memref<1x40x64xf32, #tpu.memory_space<vmem>>, vector<1x24x64xf32>
    %122 = vector.shape_cast %121 : vector<1x24x64xf32> to vector<24x64xf32>
    %123 = arith.truncf %122 : vector<24x64xf32> to vector<24x64xbf16>
    %c3_120 = arith.constant 3 : index
    %c0_121 = arith.constant 0 : index
    %c0_122 = arith.constant 0 : index
    %c0_123 = arith.constant 0 : index
    %124 = vector.load %arg2[%c3_120, %c0_121, %c0_122, %c0_123] : memref<4x4x64x64xbf16, #tpu.memory_space<vmem>>, vector<1x1x64x64xbf16>
    %125 = vector.shape_cast %124 : vector<1x1x64x64xbf16> to vector<64x64xbf16>
    %cst_124 = arith.constant dense<0.000000e+00> : vector<24x64xf32>
    %126 = tpu.matmul %123, %125, %cst_124 {dimension_numbers = #tpu.dot_dimension_numbers<[1], [0], [0], [1], [0, 0, 1, 1], [], []>} : vector<24x64xbf16>, vector<64x64xbf16>, vector<24x64xf32> -> vector<24x64xf32>
    %127 = arith.addf %120, %126 : vector<24x64xf32>
    %c0_125 = arith.constant 0 : index
    %c8_126 = arith.constant 8 : index
    %c0_127 = arith.constant 0 : index
    %128 = vector.load %arg1[%c0_125, %c8_126, %c0_127] : memref<1x40x64xf32, #tpu.memory_space<vmem>>, vector<1x24x64xf32>
    %129 = vector.shape_cast %128 : vector<1x24x64xf32> to vector<24x64xf32>
    %130 = arith.truncf %129 : vector<24x64xf32> to vector<24x64xbf16>
    %c3_128 = arith.constant 3 : index
    %c1_129 = arith.constant 1 : index
    %c0_130 = arith.constant 0 : index
    %c0_131 = arith.constant 0 : index
    %131 = vector.load %arg2[%c3_128, %c1_129, %c0_130, %c0_131] : memref<4x4x64x64xbf16, #tpu.memory_space<vmem>>, vector<1x1x64x64xbf16>
    %132 = vector.shape_cast %131 : vector<1x1x64x64xbf16> to vector<64x64xbf16>
    %cst_132 = arith.constant dense<0.000000e+00> : vector<24x64xf32>
    %133 = tpu.matmul %130, %132, %cst_132 {dimension_numbers = #tpu.dot_dimension_numbers<[1], [0], [0], [1], [0, 0, 1, 1], [], []>} : vector<24x64xbf16>, vector<64x64xbf16>, vector<24x64xf32> -> vector<24x64xf32>
    %134 = arith.addf %127, %133 : vector<24x64xf32>
    %c0_133 = arith.constant 0 : index
    %c13_134 = arith.constant 13 : index
    %c0_135 = arith.constant 0 : index
    %135 = vector.load %arg1[%c0_133, %c13_134, %c0_135] : memref<1x40x64xf32, #tpu.memory_space<vmem>>, vector<1x24x64xf32>
    %136 = vector.shape_cast %135 : vector<1x24x64xf32> to vector<24x64xf32>
    %137 = arith.truncf %136 : vector<24x64xf32> to vector<24x64xbf16>
    %c3_136 = arith.constant 3 : index
    %c2_137 = arith.constant 2 : index
    %c0_138 = arith.constant 0 : index
    %c0_139 = arith.constant 0 : index
    %138 = vector.load %arg2[%c3_136, %c2_137, %c0_138, %c0_139] : memref<4x4x64x64xbf16, #tpu.memory_space<vmem>>, vector<1x1x64x64xbf16>
    %139 = vector.shape_cast %138 : vector<1x1x64x64xbf16> to vector<64x64xbf16>
    %cst_140 = arith.constant dense<0.000000e+00> : vector<24x64xf32>
    %140 = tpu.matmul %137, %139, %cst_140 {dimension_numbers = #tpu.dot_dimension_numbers<[1], [0], [0], [1], [0, 0, 1, 1], [], []>} : vector<24x64xbf16>, vector<64x64xbf16>, vector<24x64xf32> -> vector<24x64xf32>
    %141 = arith.addf %134, %140 : vector<24x64xf32>
    %c0_141 = arith.constant 0 : index
    %c14 = arith.constant 14 : index
    %c0_142 = arith.constant 0 : index
    %142 = vector.load %arg1[%c0_141, %c14, %c0_142] : memref<1x40x64xf32, #tpu.memory_space<vmem>>, vector<1x24x64xf32>
    %143 = vector.shape_cast %142 : vector<1x24x64xf32> to vector<24x64xf32>
    %144 = arith.truncf %143 : vector<24x64xf32> to vector<24x64xbf16>
    %c3_143 = arith.constant 3 : index
    %c3_144 = arith.constant 3 : index
    %c0_145 = arith.constant 0 : index
    %c0_146 = arith.constant 0 : index
    %145 = vector.load %arg2[%c3_143, %c3_144, %c0_145, %c0_146] : memref<4x4x64x64xbf16, #tpu.memory_space<vmem>>, vector<1x1x64x64xbf16>
    %146 = vector.shape_cast %145 : vector<1x1x64x64xbf16> to vector<64x64xbf16>
    %cst_147 = arith.constant dense<0.000000e+00> : vector<24x64xf32>
    %147 = tpu.matmul %144, %146, %cst_147 {dimension_numbers = #tpu.dot_dimension_numbers<[1], [0], [0], [1], [0, 0, 1, 1], [], []>} : vector<24x64xbf16>, vector<64x64xbf16>, vector<24x64xf32> -> vector<24x64xf32>
    %148 = arith.addf %141, %147 : vector<24x64xf32>
    %c0_148 = arith.constant 0 : index
    %c0_149 = arith.constant 0 : index
    %149 = vector.load %arg3[%c0_148, %c0_149] : memref<1x64xf32, #tpu.memory_space<vmem>>, vector<1x64xf32>
    %150 = vector.broadcast %149 : vector<1x64xf32> to vector<24x64xf32>
    %151 = arith.mulf %148, %150 : vector<24x64xf32>
    %c0_150 = arith.constant 0 : index
    %c0_151 = arith.constant 0 : index
    %152 = vector.load %arg4[%c0_150, %c0_151] : memref<1x64xf32, #tpu.memory_space<vmem>>, vector<1x64xf32>
    %153 = vector.broadcast %152 : vector<1x64xf32> to vector<24x64xf32>
    %154 = arith.addf %151, %153 : vector<24x64xf32>
    %cst_152 = arith.constant 0.000000e+00 : f32
    %155 = vector.broadcast %cst_152 : f32 to vector<24x64xf32>
    %156 = arith.maximumf %154, %155 : vector<24x64xf32>
    %c0_153 = arith.constant 0 : index
    %c3_154 = arith.constant 3 : index
    %c0_155 = arith.constant 0 : index
    %c0_156 = arith.constant 0 : index
    %157 = vector.load %arg5[%c0_153, %c3_154, %c0_155, %c0_156] : memref<1x4x24x64xf32, #tpu.memory_space<vmem>>, vector<1x1x24x64xf32>
    %158 = vector.shape_cast %157 : vector<1x1x24x64xf32> to vector<24x64xf32>
    %159 = vector.shape_cast %156 : vector<24x64xf32> to vector<1x1x24x64xf32>
    tpu.vector_store %arg5[%c0_153, %c3_154, %c0_155, %c0_156], %159 {strides = array<i32>} : memref<1x4x24x64xf32, #tpu.memory_space<vmem>>, vector<1x1x24x64xf32>,
    return
  }
  func.func @transform_0(%arg0: i32) -> (i32, i32, i32) {
    %c0_i32 = arith.constant 0 : i32
    %c0_i32_0 = arith.constant 0 : i32
    %c0_i32_1 = arith.constant 0 : i32
    return %arg0, %c0_i32, %c0_i32_0 : i32, i32, i32
  }
  func.func @transform_1(%arg0: i32) -> (i32, i32, i32, i32) {
    %c0_i32 = arith.constant 0 : i32
    %c0_i32_0 = arith.constant 0 : i32
    %c0_i32_1 = arith.constant 0 : i32
    %c0_i32_2 = arith.constant 0 : i32
    %c0_i32_3 = arith.constant 0 : i32
    return %c0_i32, %c0_i32_0, %c0_i32_1, %c0_i32_2 : i32, i32, i32, i32
  }
  func.func @transform_2(%arg0: i32) -> (i32, i32) {
    %c0_i32 = arith.constant 0 : i32
    %c0_i32_0 = arith.constant 0 : i32
    %c0_i32_1 = arith.constant 0 : i32
    return %c0_i32, %c0_i32_0 : i32, i32
  }
  func.func @transform_3(%arg0: i32) -> (i32, i32) {
    %c0_i32 = arith.constant 0 : i32
    %c0_i32_0 = arith.constant 0 : i32
    %c0_i32_1 = arith.constant 0 : i32
    return %c0_i32, %c0_i32_0 : i32, i32
  }
  func.func @transform_4(%arg0: i32) -> (i32, i32, i32, i32) {
    %c0_i32 = arith.constant 0 : i32
    %c0_i32_0 = arith.constant 0 : i32
    %c0_i32_1 = arith.constant 0 : i32
    %c0_i32_2 = arith.constant 0 : i32
    return %arg0, %c0_i32, %c0_i32_0, %c0_i32_1 : i32, i32, i32, i32
  }
}

module attributes {stable_mosaic.version = 11 : i64} {
  func.func @kernel(%arg0: i32, %arg1: memref<1x104x64xf32, #tpu.memory_space<vmem>>, %arg2: memref<4x4x64x32xbf16, #tpu.memory_space<vmem>>, %arg3: memref<1x32xf32, #tpu.memory_space<vmem>>, %arg4: memref<1x32xf32, #tpu.memory_space<vmem>>, %arg5: memref<1x4x80x32xf32, #tpu.memory_space<vmem>>) attributes {dimension_semantics = [#tpu.dimension_semantics<parallel>], iteration_bounds = array<i64: 2>, scalar_prefetch = 0 : i64, scratch_operands = 0 : i64, tpu.core_type = #tpu.core_type<tc>, window_params = [{transform_indices = @transform_0, window_bounds = array<i64: 1, 104, 64>}, {pipeline_mode = #tpu.pipeline_mode<synchronous>, transform_indices = @transform_1, window_bounds = array<i64: 4, 4, 64, 32>}, {pipeline_mode = #tpu.pipeline_mode<synchronous>, transform_indices = @transform_2, window_bounds = array<i64: 1, 32>}, {pipeline_mode = #tpu.pipeline_mode<synchronous>, transform_indices = @transform_3, window_bounds = array<i64: 1, 32>}, {transform_indices = @transform_4, window_bounds = array<i64: 1, 4, 80, 32>}]} {
    %cst = arith.constant 0.000000e+00 : f32
    %0 = vector.broadcast %cst : f32 to vector<80x32xf32>
    %c0 = arith.constant 0 : index
    %c0_0 = arith.constant 0 : index
    %c0_1 = arith.constant 0 : index
    %1 = vector.load %arg1[%c0, %c0_0, %c0_1] : memref<1x104x64xf32, #tpu.memory_space<vmem>>, vector<1x80x64xf32>
    %2 = vector.shape_cast %1 : vector<1x80x64xf32> to vector<80x64xf32>
    %3 = arith.truncf %2 : vector<80x64xf32> to vector<80x64xbf16>
    %c0_2 = arith.constant 0 : index
    %c0_3 = arith.constant 0 : index
    %c0_4 = arith.constant 0 : index
    %c0_5 = arith.constant 0 : index
    %4 = vector.load %arg2[%c0_2, %c0_3, %c0_4, %c0_5] : memref<4x4x64x32xbf16, #tpu.memory_space<vmem>>, vector<1x1x64x32xbf16>
    %5 = vector.shape_cast %4 : vector<1x1x64x32xbf16> to vector<64x32xbf16>
    %cst_6 = arith.constant dense<0.000000e+00> : vector<80x32xf32>
    %6 = tpu.matmul %3, %5, %cst_6 {dimension_numbers = #tpu.dot_dimension_numbers<[1], [0], [0], [1], [0, 0, 1, 1], [], []>} : vector<80x64xbf16>, vector<64x32xbf16>, vector<80x32xf32> -> vector<80x32xf32>
    %7 = arith.addf %0, %6 : vector<80x32xf32>
    %c0_7 = arith.constant 0 : index
    %c1 = arith.constant 1 : index
    %c0_8 = arith.constant 0 : index
    %8 = vector.load %arg1[%c0_7, %c1, %c0_8] : memref<1x104x64xf32, #tpu.memory_space<vmem>>, vector<1x80x64xf32>
    %9 = vector.shape_cast %8 : vector<1x80x64xf32> to vector<80x64xf32>
    %10 = arith.truncf %9 : vector<80x64xf32> to vector<80x64xbf16>
    %c0_9 = arith.constant 0 : index
    %c1_10 = arith.constant 1 : index
    %c0_11 = arith.constant 0 : index
    %c0_12 = arith.constant 0 : index
    %11 = vector.load %arg2[%c0_9, %c1_10, %c0_11, %c0_12] : memref<4x4x64x32xbf16, #tpu.memory_space<vmem>>, vector<1x1x64x32xbf16>
    %12 = vector.shape_cast %11 : vector<1x1x64x32xbf16> to vector<64x32xbf16>
    %cst_13 = arith.constant dense<0.000000e+00> : vector<80x32xf32>
    %13 = tpu.matmul %10, %12, %cst_13 {dimension_numbers = #tpu.dot_dimension_numbers<[1], [0], [0], [1], [0, 0, 1, 1], [], []>} : vector<80x64xbf16>, vector<64x32xbf16>, vector<80x32xf32> -> vector<80x32xf32>
    %14 = arith.addf %7, %13 : vector<80x32xf32>
    %c0_14 = arith.constant 0 : index
    %c10 = arith.constant 10 : index
    %c0_15 = arith.constant 0 : index
    %15 = vector.load %arg1[%c0_14, %c10, %c0_15] : memref<1x104x64xf32, #tpu.memory_space<vmem>>, vector<1x80x64xf32>
    %16 = vector.shape_cast %15 : vector<1x80x64xf32> to vector<80x64xf32>
    %17 = arith.truncf %16 : vector<80x64xf32> to vector<80x64xbf16>
    %c0_16 = arith.constant 0 : index
    %c2 = arith.constant 2 : index
    %c0_17 = arith.constant 0 : index
    %c0_18 = arith.constant 0 : index
    %18 = vector.load %arg2[%c0_16, %c2, %c0_17, %c0_18] : memref<4x4x64x32xbf16, #tpu.memory_space<vmem>>, vector<1x1x64x32xbf16>
    %19 = vector.shape_cast %18 : vector<1x1x64x32xbf16> to vector<64x32xbf16>
    %cst_19 = arith.constant dense<0.000000e+00> : vector<80x32xf32>
    %20 = tpu.matmul %17, %19, %cst_19 {dimension_numbers = #tpu.dot_dimension_numbers<[1], [0], [0], [1], [0, 0, 1, 1], [], []>} : vector<80x64xbf16>, vector<64x32xbf16>, vector<80x32xf32> -> vector<80x32xf32>
    %21 = arith.addf %14, %20 : vector<80x32xf32>
    %c0_20 = arith.constant 0 : index
    %c11 = arith.constant 11 : index
    %c0_21 = arith.constant 0 : index
    %22 = vector.load %arg1[%c0_20, %c11, %c0_21] : memref<1x104x64xf32, #tpu.memory_space<vmem>>, vector<1x80x64xf32>
    %23 = vector.shape_cast %22 : vector<1x80x64xf32> to vector<80x64xf32>
    %24 = arith.truncf %23 : vector<80x64xf32> to vector<80x64xbf16>
    %c0_22 = arith.constant 0 : index
    %c3 = arith.constant 3 : index
    %c0_23 = arith.constant 0 : index
    %c0_24 = arith.constant 0 : index
    %25 = vector.load %arg2[%c0_22, %c3, %c0_23, %c0_24] : memref<4x4x64x32xbf16, #tpu.memory_space<vmem>>, vector<1x1x64x32xbf16>
    %26 = vector.shape_cast %25 : vector<1x1x64x32xbf16> to vector<64x32xbf16>
    %cst_25 = arith.constant dense<0.000000e+00> : vector<80x32xf32>
    %27 = tpu.matmul %24, %26, %cst_25 {dimension_numbers = #tpu.dot_dimension_numbers<[1], [0], [0], [1], [0, 0, 1, 1], [], []>} : vector<80x64xbf16>, vector<64x32xbf16>, vector<80x32xf32> -> vector<80x32xf32>
    %28 = arith.addf %21, %27 : vector<80x32xf32>
    %c0_26 = arith.constant 0 : index
    %c0_27 = arith.constant 0 : index
    %29 = vector.load %arg3[%c0_26, %c0_27] : memref<1x32xf32, #tpu.memory_space<vmem>>, vector<1x32xf32>
    %30 = vector.broadcast %29 : vector<1x32xf32> to vector<80x32xf32>
    %31 = arith.mulf %28, %30 : vector<80x32xf32>
    %c0_28 = arith.constant 0 : index
    %c0_29 = arith.constant 0 : index
    %32 = vector.load %arg4[%c0_28, %c0_29] : memref<1x32xf32, #tpu.memory_space<vmem>>, vector<1x32xf32>
    %33 = vector.broadcast %32 : vector<1x32xf32> to vector<80x32xf32>
    %34 = arith.addf %31, %33 : vector<80x32xf32>
    %cst_30 = arith.constant 0.000000e+00 : f32
    %35 = vector.broadcast %cst_30 : f32 to vector<80x32xf32>
    %36 = arith.maximumf %34, %35 : vector<80x32xf32>
    %c0_31 = arith.constant 0 : index
    %c0_32 = arith.constant 0 : index
    %c0_33 = arith.constant 0 : index
    %c0_34 = arith.constant 0 : index
    %37 = vector.load %arg5[%c0_31, %c0_32, %c0_33, %c0_34] : memref<1x4x80x32xf32, #tpu.memory_space<vmem>>, vector<1x1x80x32xf32>
    %38 = vector.shape_cast %37 : vector<1x1x80x32xf32> to vector<80x32xf32>
    %39 = vector.shape_cast %36 : vector<80x32xf32> to vector<1x1x80x32xf32>
    tpu.vector_store %arg5[%c0_31, %c0_32, %c0_33, %c0_34], %39 {strides = array<i32>} : memref<1x4x80x32xf32, #tpu.memory_space<vmem>>, vector<1x1x80x32xf32>,
    %cst_35 = arith.constant 0.000000e+00 : f32
    %40 = vector.broadcast %cst_35 : f32 to vector<80x32xf32>
    %c0_36 = arith.constant 0 : index
    %c1_37 = arith.constant 1 : index
    %c0_38 = arith.constant 0 : index
    %41 = vector.load %arg1[%c0_36, %c1_37, %c0_38] : memref<1x104x64xf32, #tpu.memory_space<vmem>>, vector<1x80x64xf32>
    %42 = vector.shape_cast %41 : vector<1x80x64xf32> to vector<80x64xf32>
    %43 = arith.truncf %42 : vector<80x64xf32> to vector<80x64xbf16>
    %c1_39 = arith.constant 1 : index
    %c0_40 = arith.constant 0 : index
    %c0_41 = arith.constant 0 : index
    %c0_42 = arith.constant 0 : index
    %44 = vector.load %arg2[%c1_39, %c0_40, %c0_41, %c0_42] : memref<4x4x64x32xbf16, #tpu.memory_space<vmem>>, vector<1x1x64x32xbf16>
    %45 = vector.shape_cast %44 : vector<1x1x64x32xbf16> to vector<64x32xbf16>
    %cst_43 = arith.constant dense<0.000000e+00> : vector<80x32xf32>
    %46 = tpu.matmul %43, %45, %cst_43 {dimension_numbers = #tpu.dot_dimension_numbers<[1], [0], [0], [1], [0, 0, 1, 1], [], []>} : vector<80x64xbf16>, vector<64x32xbf16>, vector<80x32xf32> -> vector<80x32xf32>
    %47 = arith.addf %40, %46 : vector<80x32xf32>
    %c0_44 = arith.constant 0 : index
    %c2_45 = arith.constant 2 : index
    %c0_46 = arith.constant 0 : index
    %48 = vector.load %arg1[%c0_44, %c2_45, %c0_46] : memref<1x104x64xf32, #tpu.memory_space<vmem>>, vector<1x80x64xf32>
    %49 = vector.shape_cast %48 : vector<1x80x64xf32> to vector<80x64xf32>
    %50 = arith.truncf %49 : vector<80x64xf32> to vector<80x64xbf16>
    %c1_47 = arith.constant 1 : index
    %c1_48 = arith.constant 1 : index
    %c0_49 = arith.constant 0 : index
    %c0_50 = arith.constant 0 : index
    %51 = vector.load %arg2[%c1_47, %c1_48, %c0_49, %c0_50] : memref<4x4x64x32xbf16, #tpu.memory_space<vmem>>, vector<1x1x64x32xbf16>
    %52 = vector.shape_cast %51 : vector<1x1x64x32xbf16> to vector<64x32xbf16>
    %cst_51 = arith.constant dense<0.000000e+00> : vector<80x32xf32>
    %53 = tpu.matmul %50, %52, %cst_51 {dimension_numbers = #tpu.dot_dimension_numbers<[1], [0], [0], [1], [0, 0, 1, 1], [], []>} : vector<80x64xbf16>, vector<64x32xbf16>, vector<80x32xf32> -> vector<80x32xf32>
    %54 = arith.addf %47, %53 : vector<80x32xf32>
    %c0_52 = arith.constant 0 : index
    %c11_53 = arith.constant 11 : index
    %c0_54 = arith.constant 0 : index
    %55 = vector.load %arg1[%c0_52, %c11_53, %c0_54] : memref<1x104x64xf32, #tpu.memory_space<vmem>>, vector<1x80x64xf32>
    %56 = vector.shape_cast %55 : vector<1x80x64xf32> to vector<80x64xf32>
    %57 = arith.truncf %56 : vector<80x64xf32> to vector<80x64xbf16>
    %c1_55 = arith.constant 1 : index
    %c2_56 = arith.constant 2 : index
    %c0_57 = arith.constant 0 : index
    %c0_58 = arith.constant 0 : index
    %58 = vector.load %arg2[%c1_55, %c2_56, %c0_57, %c0_58] : memref<4x4x64x32xbf16, #tpu.memory_space<vmem>>, vector<1x1x64x32xbf16>
    %59 = vector.shape_cast %58 : vector<1x1x64x32xbf16> to vector<64x32xbf16>
    %cst_59 = arith.constant dense<0.000000e+00> : vector<80x32xf32>
    %60 = tpu.matmul %57, %59, %cst_59 {dimension_numbers = #tpu.dot_dimension_numbers<[1], [0], [0], [1], [0, 0, 1, 1], [], []>} : vector<80x64xbf16>, vector<64x32xbf16>, vector<80x32xf32> -> vector<80x32xf32>
    %61 = arith.addf %54, %60 : vector<80x32xf32>
    %c0_60 = arith.constant 0 : index
    %c12 = arith.constant 12 : index
    %c0_61 = arith.constant 0 : index
    %62 = vector.load %arg1[%c0_60, %c12, %c0_61] : memref<1x104x64xf32, #tpu.memory_space<vmem>>, vector<1x80x64xf32>
    %63 = vector.shape_cast %62 : vector<1x80x64xf32> to vector<80x64xf32>
    %64 = arith.truncf %63 : vector<80x64xf32> to vector<80x64xbf16>
    %c1_62 = arith.constant 1 : index
    %c3_63 = arith.constant 3 : index
    %c0_64 = arith.constant 0 : index
    %c0_65 = arith.constant 0 : index
    %65 = vector.load %arg2[%c1_62, %c3_63, %c0_64, %c0_65] : memref<4x4x64x32xbf16, #tpu.memory_space<vmem>>, vector<1x1x64x32xbf16>
    %66 = vector.shape_cast %65 : vector<1x1x64x32xbf16> to vector<64x32xbf16>
    %cst_66 = arith.constant dense<0.000000e+00> : vector<80x32xf32>
    %67 = tpu.matmul %64, %66, %cst_66 {dimension_numbers = #tpu.dot_dimension_numbers<[1], [0], [0], [1], [0, 0, 1, 1], [], []>} : vector<80x64xbf16>, vector<64x32xbf16>, vector<80x32xf32> -> vector<80x32xf32>
    %68 = arith.addf %61, %67 : vector<80x32xf32>
    %c0_67 = arith.constant 0 : index
    %c0_68 = arith.constant 0 : index
    %69 = vector.load %arg3[%c0_67, %c0_68] : memref<1x32xf32, #tpu.memory_space<vmem>>, vector<1x32xf32>
    %70 = vector.broadcast %69 : vector<1x32xf32> to vector<80x32xf32>
    %71 = arith.mulf %68, %70 : vector<80x32xf32>
    %c0_69 = arith.constant 0 : index
    %c0_70 = arith.constant 0 : index
    %72 = vector.load %arg4[%c0_69, %c0_70] : memref<1x32xf32, #tpu.memory_space<vmem>>, vector<1x32xf32>
    %73 = vector.broadcast %72 : vector<1x32xf32> to vector<80x32xf32>
    %74 = arith.addf %71, %73 : vector<80x32xf32>
    %cst_71 = arith.constant 0.000000e+00 : f32
    %75 = vector.broadcast %cst_71 : f32 to vector<80x32xf32>
    %76 = arith.maximumf %74, %75 : vector<80x32xf32>
    %c0_72 = arith.constant 0 : index
    %c1_73 = arith.constant 1 : index
    %c0_74 = arith.constant 0 : index
    %c0_75 = arith.constant 0 : index
    %77 = vector.load %arg5[%c0_72, %c1_73, %c0_74, %c0_75] : memref<1x4x80x32xf32, #tpu.memory_space<vmem>>, vector<1x1x80x32xf32>
    %78 = vector.shape_cast %77 : vector<1x1x80x32xf32> to vector<80x32xf32>
    %79 = vector.shape_cast %76 : vector<80x32xf32> to vector<1x1x80x32xf32>
    tpu.vector_store %arg5[%c0_72, %c1_73, %c0_74, %c0_75], %79 {strides = array<i32>} : memref<1x4x80x32xf32, #tpu.memory_space<vmem>>, vector<1x1x80x32xf32>,
    %cst_76 = arith.constant 0.000000e+00 : f32
    %80 = vector.broadcast %cst_76 : f32 to vector<80x32xf32>
    %c0_77 = arith.constant 0 : index
    %c10_78 = arith.constant 10 : index
    %c0_79 = arith.constant 0 : index
    %81 = vector.load %arg1[%c0_77, %c10_78, %c0_79] : memref<1x104x64xf32, #tpu.memory_space<vmem>>, vector<1x80x64xf32>
    %82 = vector.shape_cast %81 : vector<1x80x64xf32> to vector<80x64xf32>
    %83 = arith.truncf %82 : vector<80x64xf32> to vector<80x64xbf16>
    %c2_80 = arith.constant 2 : index
    %c0_81 = arith.constant 0 : index
    %c0_82 = arith.constant 0 : index
    %c0_83 = arith.constant 0 : index
    %84 = vector.load %arg2[%c2_80, %c0_81, %c0_82, %c0_83] : memref<4x4x64x32xbf16, #tpu.memory_space<vmem>>, vector<1x1x64x32xbf16>
    %85 = vector.shape_cast %84 : vector<1x1x64x32xbf16> to vector<64x32xbf16>
    %cst_84 = arith.constant dense<0.000000e+00> : vector<80x32xf32>
    %86 = tpu.matmul %83, %85, %cst_84 {dimension_numbers = #tpu.dot_dimension_numbers<[1], [0], [0], [1], [0, 0, 1, 1], [], []>} : vector<80x64xbf16>, vector<64x32xbf16>, vector<80x32xf32> -> vector<80x32xf32>
    %87 = arith.addf %80, %86 : vector<80x32xf32>
    %c0_85 = arith.constant 0 : index
    %c11_86 = arith.constant 11 : index
    %c0_87 = arith.constant 0 : index
    %88 = vector.load %arg1[%c0_85, %c11_86, %c0_87] : memref<1x104x64xf32, #tpu.memory_space<vmem>>, vector<1x80x64xf32>
    %89 = vector.shape_cast %88 : vector<1x80x64xf32> to vector<80x64xf32>
    %90 = arith.truncf %89 : vector<80x64xf32> to vector<80x64xbf16>
    %c2_88 = arith.constant 2 : index
    %c1_89 = arith.constant 1 : index
    %c0_90 = arith.constant 0 : index
    %c0_91 = arith.constant 0 : index
    %91 = vector.load %arg2[%c2_88, %c1_89, %c0_90, %c0_91] : memref<4x4x64x32xbf16, #tpu.memory_space<vmem>>, vector<1x1x64x32xbf16>
    %92 = vector.shape_cast %91 : vector<1x1x64x32xbf16> to vector<64x32xbf16>
    %cst_92 = arith.constant dense<0.000000e+00> : vector<80x32xf32>
    %93 = tpu.matmul %90, %92, %cst_92 {dimension_numbers = #tpu.dot_dimension_numbers<[1], [0], [0], [1], [0, 0, 1, 1], [], []>} : vector<80x64xbf16>, vector<64x32xbf16>, vector<80x32xf32> -> vector<80x32xf32>
    %94 = arith.addf %87, %93 : vector<80x32xf32>
    %c0_93 = arith.constant 0 : index
    %c20 = arith.constant 20 : index
    %c0_94 = arith.constant 0 : index
    %95 = vector.load %arg1[%c0_93, %c20, %c0_94] : memref<1x104x64xf32, #tpu.memory_space<vmem>>, vector<1x80x64xf32>
    %96 = vector.shape_cast %95 : vector<1x80x64xf32> to vector<80x64xf32>
    %97 = arith.truncf %96 : vector<80x64xf32> to vector<80x64xbf16>
    %c2_95 = arith.constant 2 : index
    %c2_96 = arith.constant 2 : index
    %c0_97 = arith.constant 0 : index
    %c0_98 = arith.constant 0 : index
    %98 = vector.load %arg2[%c2_95, %c2_96, %c0_97, %c0_98] : memref<4x4x64x32xbf16, #tpu.memory_space<vmem>>, vector<1x1x64x32xbf16>
    %99 = vector.shape_cast %98 : vector<1x1x64x32xbf16> to vector<64x32xbf16>
    %cst_99 = arith.constant dense<0.000000e+00> : vector<80x32xf32>
    %100 = tpu.matmul %97, %99, %cst_99 {dimension_numbers = #tpu.dot_dimension_numbers<[1], [0], [0], [1], [0, 0, 1, 1], [], []>} : vector<80x64xbf16>, vector<64x32xbf16>, vector<80x32xf32> -> vector<80x32xf32>
    %101 = arith.addf %94, %100 : vector<80x32xf32>
    %c0_100 = arith.constant 0 : index
    %c21 = arith.constant 21 : index
    %c0_101 = arith.constant 0 : index
    %102 = vector.load %arg1[%c0_100, %c21, %c0_101] : memref<1x104x64xf32, #tpu.memory_space<vmem>>, vector<1x80x64xf32>
    %103 = vector.shape_cast %102 : vector<1x80x64xf32> to vector<80x64xf32>
    %104 = arith.truncf %103 : vector<80x64xf32> to vector<80x64xbf16>
    %c2_102 = arith.constant 2 : index
    %c3_103 = arith.constant 3 : index
    %c0_104 = arith.constant 0 : index
    %c0_105 = arith.constant 0 : index
    %105 = vector.load %arg2[%c2_102, %c3_103, %c0_104, %c0_105] : memref<4x4x64x32xbf16, #tpu.memory_space<vmem>>, vector<1x1x64x32xbf16>
    %106 = vector.shape_cast %105 : vector<1x1x64x32xbf16> to vector<64x32xbf16>
    %cst_106 = arith.constant dense<0.000000e+00> : vector<80x32xf32>
    %107 = tpu.matmul %104, %106, %cst_106 {dimension_numbers = #tpu.dot_dimension_numbers<[1], [0], [0], [1], [0, 0, 1, 1], [], []>} : vector<80x64xbf16>, vector<64x32xbf16>, vector<80x32xf32> -> vector<80x32xf32>
    %108 = arith.addf %101, %107 : vector<80x32xf32>
    %c0_107 = arith.constant 0 : index
    %c0_108 = arith.constant 0 : index
    %109 = vector.load %arg3[%c0_107, %c0_108] : memref<1x32xf32, #tpu.memory_space<vmem>>, vector<1x32xf32>
    %110 = vector.broadcast %109 : vector<1x32xf32> to vector<80x32xf32>
    %111 = arith.mulf %108, %110 : vector<80x32xf32>
    %c0_109 = arith.constant 0 : index
    %c0_110 = arith.constant 0 : index
    %112 = vector.load %arg4[%c0_109, %c0_110] : memref<1x32xf32, #tpu.memory_space<vmem>>, vector<1x32xf32>
    %113 = vector.broadcast %112 : vector<1x32xf32> to vector<80x32xf32>
    %114 = arith.addf %111, %113 : vector<80x32xf32>
    %cst_111 = arith.constant 0.000000e+00 : f32
    %115 = vector.broadcast %cst_111 : f32 to vector<80x32xf32>
    %116 = arith.maximumf %114, %115 : vector<80x32xf32>
    %c0_112 = arith.constant 0 : index
    %c2_113 = arith.constant 2 : index
    %c0_114 = arith.constant 0 : index
    %c0_115 = arith.constant 0 : index
    %117 = vector.load %arg5[%c0_112, %c2_113, %c0_114, %c0_115] : memref<1x4x80x32xf32, #tpu.memory_space<vmem>>, vector<1x1x80x32xf32>
    %118 = vector.shape_cast %117 : vector<1x1x80x32xf32> to vector<80x32xf32>
    %119 = vector.shape_cast %116 : vector<80x32xf32> to vector<1x1x80x32xf32>
    tpu.vector_store %arg5[%c0_112, %c2_113, %c0_114, %c0_115], %119 {strides = array<i32>} : memref<1x4x80x32xf32, #tpu.memory_space<vmem>>, vector<1x1x80x32xf32>,
    %cst_116 = arith.constant 0.000000e+00 : f32
    %120 = vector.broadcast %cst_116 : f32 to vector<80x32xf32>
    %c0_117 = arith.constant 0 : index
    %c11_118 = arith.constant 11 : index
    %c0_119 = arith.constant 0 : index
    %121 = vector.load %arg1[%c0_117, %c11_118, %c0_119] : memref<1x104x64xf32, #tpu.memory_space<vmem>>, vector<1x80x64xf32>
    %122 = vector.shape_cast %121 : vector<1x80x64xf32> to vector<80x64xf32>
    %123 = arith.truncf %122 : vector<80x64xf32> to vector<80x64xbf16>
    %c3_120 = arith.constant 3 : index
    %c0_121 = arith.constant 0 : index
    %c0_122 = arith.constant 0 : index
    %c0_123 = arith.constant 0 : index
    %124 = vector.load %arg2[%c3_120, %c0_121, %c0_122, %c0_123] : memref<4x4x64x32xbf16, #tpu.memory_space<vmem>>, vector<1x1x64x32xbf16>
    %125 = vector.shape_cast %124 : vector<1x1x64x32xbf16> to vector<64x32xbf16>
    %cst_124 = arith.constant dense<0.000000e+00> : vector<80x32xf32>
    %126 = tpu.matmul %123, %125, %cst_124 {dimension_numbers = #tpu.dot_dimension_numbers<[1], [0], [0], [1], [0, 0, 1, 1], [], []>} : vector<80x64xbf16>, vector<64x32xbf16>, vector<80x32xf32> -> vector<80x32xf32>
    %127 = arith.addf %120, %126 : vector<80x32xf32>
    %c0_125 = arith.constant 0 : index
    %c12_126 = arith.constant 12 : index
    %c0_127 = arith.constant 0 : index
    %128 = vector.load %arg1[%c0_125, %c12_126, %c0_127] : memref<1x104x64xf32, #tpu.memory_space<vmem>>, vector<1x80x64xf32>
    %129 = vector.shape_cast %128 : vector<1x80x64xf32> to vector<80x64xf32>
    %130 = arith.truncf %129 : vector<80x64xf32> to vector<80x64xbf16>
    %c3_128 = arith.constant 3 : index
    %c1_129 = arith.constant 1 : index
    %c0_130 = arith.constant 0 : index
    %c0_131 = arith.constant 0 : index
    %131 = vector.load %arg2[%c3_128, %c1_129, %c0_130, %c0_131] : memref<4x4x64x32xbf16, #tpu.memory_space<vmem>>, vector<1x1x64x32xbf16>
    %132 = vector.shape_cast %131 : vector<1x1x64x32xbf16> to vector<64x32xbf16>
    %cst_132 = arith.constant dense<0.000000e+00> : vector<80x32xf32>
    %133 = tpu.matmul %130, %132, %cst_132 {dimension_numbers = #tpu.dot_dimension_numbers<[1], [0], [0], [1], [0, 0, 1, 1], [], []>} : vector<80x64xbf16>, vector<64x32xbf16>, vector<80x32xf32> -> vector<80x32xf32>
    %134 = arith.addf %127, %133 : vector<80x32xf32>
    %c0_133 = arith.constant 0 : index
    %c21_134 = arith.constant 21 : index
    %c0_135 = arith.constant 0 : index
    %135 = vector.load %arg1[%c0_133, %c21_134, %c0_135] : memref<1x104x64xf32, #tpu.memory_space<vmem>>, vector<1x80x64xf32>
    %136 = vector.shape_cast %135 : vector<1x80x64xf32> to vector<80x64xf32>
    %137 = arith.truncf %136 : vector<80x64xf32> to vector<80x64xbf16>
    %c3_136 = arith.constant 3 : index
    %c2_137 = arith.constant 2 : index
    %c0_138 = arith.constant 0 : index
    %c0_139 = arith.constant 0 : index
    %138 = vector.load %arg2[%c3_136, %c2_137, %c0_138, %c0_139] : memref<4x4x64x32xbf16, #tpu.memory_space<vmem>>, vector<1x1x64x32xbf16>
    %139 = vector.shape_cast %138 : vector<1x1x64x32xbf16> to vector<64x32xbf16>
    %cst_140 = arith.constant dense<0.000000e+00> : vector<80x32xf32>
    %140 = tpu.matmul %137, %139, %cst_140 {dimension_numbers = #tpu.dot_dimension_numbers<[1], [0], [0], [1], [0, 0, 1, 1], [], []>} : vector<80x64xbf16>, vector<64x32xbf16>, vector<80x32xf32> -> vector<80x32xf32>
    %141 = arith.addf %134, %140 : vector<80x32xf32>
    %c0_141 = arith.constant 0 : index
    %c22 = arith.constant 22 : index
    %c0_142 = arith.constant 0 : index
    %142 = vector.load %arg1[%c0_141, %c22, %c0_142] : memref<1x104x64xf32, #tpu.memory_space<vmem>>, vector<1x80x64xf32>
    %143 = vector.shape_cast %142 : vector<1x80x64xf32> to vector<80x64xf32>
    %144 = arith.truncf %143 : vector<80x64xf32> to vector<80x64xbf16>
    %c3_143 = arith.constant 3 : index
    %c3_144 = arith.constant 3 : index
    %c0_145 = arith.constant 0 : index
    %c0_146 = arith.constant 0 : index
    %145 = vector.load %arg2[%c3_143, %c3_144, %c0_145, %c0_146] : memref<4x4x64x32xbf16, #tpu.memory_space<vmem>>, vector<1x1x64x32xbf16>
    %146 = vector.shape_cast %145 : vector<1x1x64x32xbf16> to vector<64x32xbf16>
    %cst_147 = arith.constant dense<0.000000e+00> : vector<80x32xf32>
    %147 = tpu.matmul %144, %146, %cst_147 {dimension_numbers = #tpu.dot_dimension_numbers<[1], [0], [0], [1], [0, 0, 1, 1], [], []>} : vector<80x64xbf16>, vector<64x32xbf16>, vector<80x32xf32> -> vector<80x32xf32>
    %148 = arith.addf %141, %147 : vector<80x32xf32>
    %c0_148 = arith.constant 0 : index
    %c0_149 = arith.constant 0 : index
    %149 = vector.load %arg3[%c0_148, %c0_149] : memref<1x32xf32, #tpu.memory_space<vmem>>, vector<1x32xf32>
    %150 = vector.broadcast %149 : vector<1x32xf32> to vector<80x32xf32>
    %151 = arith.mulf %148, %150 : vector<80x32xf32>
    %c0_150 = arith.constant 0 : index
    %c0_151 = arith.constant 0 : index
    %152 = vector.load %arg4[%c0_150, %c0_151] : memref<1x32xf32, #tpu.memory_space<vmem>>, vector<1x32xf32>
    %153 = vector.broadcast %152 : vector<1x32xf32> to vector<80x32xf32>
    %154 = arith.addf %151, %153 : vector<80x32xf32>
    %cst_152 = arith.constant 0.000000e+00 : f32
    %155 = vector.broadcast %cst_152 : f32 to vector<80x32xf32>
    %156 = arith.maximumf %154, %155 : vector<80x32xf32>
    %c0_153 = arith.constant 0 : index
    %c3_154 = arith.constant 3 : index
    %c0_155 = arith.constant 0 : index
    %c0_156 = arith.constant 0 : index
    %157 = vector.load %arg5[%c0_153, %c3_154, %c0_155, %c0_156] : memref<1x4x80x32xf32, #tpu.memory_space<vmem>>, vector<1x1x80x32xf32>
    %158 = vector.shape_cast %157 : vector<1x1x80x32xf32> to vector<80x32xf32>
    %159 = vector.shape_cast %156 : vector<80x32xf32> to vector<1x1x80x32xf32>
    tpu.vector_store %arg5[%c0_153, %c3_154, %c0_155, %c0_156], %159 {strides = array<i32>} : memref<1x4x80x32xf32, #tpu.memory_space<vmem>>, vector<1x1x80x32xf32>,
    return
  }
  func.func @transform_0(%arg0: i32) -> (i32, i32, i32) {
    %c0_i32 = arith.constant 0 : i32
    %c0_i32_0 = arith.constant 0 : i32
    %c0_i32_1 = arith.constant 0 : i32
    return %arg0, %c0_i32, %c0_i32_0 : i32, i32, i32
  }
  func.func @transform_1(%arg0: i32) -> (i32, i32, i32, i32) {
    %c0_i32 = arith.constant 0 : i32
    %c0_i32_0 = arith.constant 0 : i32
    %c0_i32_1 = arith.constant 0 : i32
    %c0_i32_2 = arith.constant 0 : i32
    %c0_i32_3 = arith.constant 0 : i32
    return %c0_i32, %c0_i32_0, %c0_i32_1, %c0_i32_2 : i32, i32, i32, i32
  }
  func.func @transform_2(%arg0: i32) -> (i32, i32) {
    %c0_i32 = arith.constant 0 : i32
    %c0_i32_0 = arith.constant 0 : i32
    %c0_i32_1 = arith.constant 0 : i32
    return %c0_i32, %c0_i32_0 : i32, i32
  }
  func.func @transform_3(%arg0: i32) -> (i32, i32) {
    %c0_i32 = arith.constant 0 : i32
    %c0_i32_0 = arith.constant 0 : i32
    %c0_i32_1 = arith.constant 0 : i32
    return %c0_i32, %c0_i32_0 : i32, i32
  }
  func.func @transform_4(%arg0: i32) -> (i32, i32, i32, i32) {
    %c0_i32 = arith.constant 0 : i32
    %c0_i32_0 = arith.constant 0 : i32
    %c0_i32_1 = arith.constant 0 : i32
    %c0_i32_2 = arith.constant 0 : i32
    return %arg0, %c0_i32, %c0_i32_0, %c0_i32_1 : i32, i32, i32, i32
  }
}

module attributes {stable_mosaic.version = 11 : i64} {
  func.func @kernel(%arg0: i32, %arg1: memref<1x328x32xf32, #tpu.memory_space<vmem>>, %arg2: memref<4x4x32x3xbf16, #tpu.memory_space<vmem>>, %arg3: memref<1x3xf32, #tpu.memory_space<vmem>>, %arg4: memref<1x3xf32, #tpu.memory_space<vmem>>, %arg5: memref<1x4x288x3xf32, #tpu.memory_space<vmem>>) attributes {dimension_semantics = [#tpu.dimension_semantics<parallel>], iteration_bounds = array<i64: 2>, scalar_prefetch = 0 : i64, scratch_operands = 0 : i64, tpu.core_type = #tpu.core_type<tc>, window_params = [{transform_indices = @transform_0, window_bounds = array<i64: 1, 328, 32>}, {pipeline_mode = #tpu.pipeline_mode<synchronous>, transform_indices = @transform_1, window_bounds = array<i64: 4, 4, 32, 3>}, {pipeline_mode = #tpu.pipeline_mode<synchronous>, transform_indices = @transform_2, window_bounds = array<i64: 1, 3>}, {pipeline_mode = #tpu.pipeline_mode<synchronous>, transform_indices = @transform_3, window_bounds = array<i64: 1, 3>}, {transform_indices = @transform_4, window_bounds = array<i64: 1, 4, 288, 3>}]} {
    %cst = arith.constant 0.000000e+00 : f32
    %0 = vector.broadcast %cst : f32 to vector<288x3xf32>
    %c0 = arith.constant 0 : index
    %c0_0 = arith.constant 0 : index
    %c0_1 = arith.constant 0 : index
    %1 = vector.load %arg1[%c0, %c0_0, %c0_1] : memref<1x328x32xf32, #tpu.memory_space<vmem>>, vector<1x288x32xf32>
    %2 = vector.shape_cast %1 : vector<1x288x32xf32> to vector<288x32xf32>
    %3 = arith.truncf %2 : vector<288x32xf32> to vector<288x32xbf16>
    %c0_2 = arith.constant 0 : index
    %c0_3 = arith.constant 0 : index
    %c0_4 = arith.constant 0 : index
    %c0_5 = arith.constant 0 : index
    %4 = vector.load %arg2[%c0_2, %c0_3, %c0_4, %c0_5] : memref<4x4x32x3xbf16, #tpu.memory_space<vmem>>, vector<1x1x32x3xbf16>
    %5 = vector.shape_cast %4 : vector<1x1x32x3xbf16> to vector<32x3xbf16>
    %cst_6 = arith.constant dense<0.000000e+00> : vector<288x3xf32>
    %6 = tpu.matmul %3, %5, %cst_6 {dimension_numbers = #tpu.dot_dimension_numbers<[1], [0], [0], [1], [0, 0, 1, 1], [], []>} : vector<288x32xbf16>, vector<32x3xbf16>, vector<288x3xf32> -> vector<288x3xf32>
    %7 = arith.addf %0, %6 : vector<288x3xf32>
    %c0_7 = arith.constant 0 : index
    %c1 = arith.constant 1 : index
    %c0_8 = arith.constant 0 : index
    %8 = vector.load %arg1[%c0_7, %c1, %c0_8] : memref<1x328x32xf32, #tpu.memory_space<vmem>>, vector<1x288x32xf32>
    %9 = vector.shape_cast %8 : vector<1x288x32xf32> to vector<288x32xf32>
    %10 = arith.truncf %9 : vector<288x32xf32> to vector<288x32xbf16>
    %c0_9 = arith.constant 0 : index
    %c1_10 = arith.constant 1 : index
    %c0_11 = arith.constant 0 : index
    %c0_12 = arith.constant 0 : index
    %11 = vector.load %arg2[%c0_9, %c1_10, %c0_11, %c0_12] : memref<4x4x32x3xbf16, #tpu.memory_space<vmem>>, vector<1x1x32x3xbf16>
    %12 = vector.shape_cast %11 : vector<1x1x32x3xbf16> to vector<32x3xbf16>
    %cst_13 = arith.constant dense<0.000000e+00> : vector<288x3xf32>
    %13 = tpu.matmul %10, %12, %cst_13 {dimension_numbers = #tpu.dot_dimension_numbers<[1], [0], [0], [1], [0, 0, 1, 1], [], []>} : vector<288x32xbf16>, vector<32x3xbf16>, vector<288x3xf32> -> vector<288x3xf32>
    %14 = arith.addf %7, %13 : vector<288x3xf32>
    %c0_14 = arith.constant 0 : index
    %c18 = arith.constant 18 : index
    %c0_15 = arith.constant 0 : index
    %15 = vector.load %arg1[%c0_14, %c18, %c0_15] : memref<1x328x32xf32, #tpu.memory_space<vmem>>, vector<1x288x32xf32>
    %16 = vector.shape_cast %15 : vector<1x288x32xf32> to vector<288x32xf32>
    %17 = arith.truncf %16 : vector<288x32xf32> to vector<288x32xbf16>
    %c0_16 = arith.constant 0 : index
    %c2 = arith.constant 2 : index
    %c0_17 = arith.constant 0 : index
    %c0_18 = arith.constant 0 : index
    %18 = vector.load %arg2[%c0_16, %c2, %c0_17, %c0_18] : memref<4x4x32x3xbf16, #tpu.memory_space<vmem>>, vector<1x1x32x3xbf16>
    %19 = vector.shape_cast %18 : vector<1x1x32x3xbf16> to vector<32x3xbf16>
    %cst_19 = arith.constant dense<0.000000e+00> : vector<288x3xf32>
    %20 = tpu.matmul %17, %19, %cst_19 {dimension_numbers = #tpu.dot_dimension_numbers<[1], [0], [0], [1], [0, 0, 1, 1], [], []>} : vector<288x32xbf16>, vector<32x3xbf16>, vector<288x3xf32> -> vector<288x3xf32>
    %21 = arith.addf %14, %20 : vector<288x3xf32>
    %c0_20 = arith.constant 0 : index
    %c19 = arith.constant 19 : index
    %c0_21 = arith.constant 0 : index
    %22 = vector.load %arg1[%c0_20, %c19, %c0_21] : memref<1x328x32xf32, #tpu.memory_space<vmem>>, vector<1x288x32xf32>
    %23 = vector.shape_cast %22 : vector<1x288x32xf32> to vector<288x32xf32>
    %24 = arith.truncf %23 : vector<288x32xf32> to vector<288x32xbf16>
    %c0_22 = arith.constant 0 : index
    %c3 = arith.constant 3 : index
    %c0_23 = arith.constant 0 : index
    %c0_24 = arith.constant 0 : index
    %25 = vector.load %arg2[%c0_22, %c3, %c0_23, %c0_24] : memref<4x4x32x3xbf16, #tpu.memory_space<vmem>>, vector<1x1x32x3xbf16>
    %26 = vector.shape_cast %25 : vector<1x1x32x3xbf16> to vector<32x3xbf16>
    %cst_25 = arith.constant dense<0.000000e+00> : vector<288x3xf32>
    %27 = tpu.matmul %24, %26, %cst_25 {dimension_numbers = #tpu.dot_dimension_numbers<[1], [0], [0], [1], [0, 0, 1, 1], [], []>} : vector<288x32xbf16>, vector<32x3xbf16>, vector<288x3xf32> -> vector<288x3xf32>
    %28 = arith.addf %21, %27 : vector<288x3xf32>
    %c0_26 = arith.constant 0 : index
    %c0_27 = arith.constant 0 : index
    %29 = vector.load %arg3[%c0_26, %c0_27] : memref<1x3xf32, #tpu.memory_space<vmem>>, vector<1x3xf32>
    %30 = vector.broadcast %29 : vector<1x3xf32> to vector<288x3xf32>
    %31 = arith.mulf %28, %30 : vector<288x3xf32>
    %c0_28 = arith.constant 0 : index
    %c0_29 = arith.constant 0 : index
    %32 = vector.load %arg4[%c0_28, %c0_29] : memref<1x3xf32, #tpu.memory_space<vmem>>, vector<1x3xf32>
    %33 = vector.broadcast %32 : vector<1x3xf32> to vector<288x3xf32>
    %34 = arith.addf %31, %33 : vector<288x3xf32>
    %c0_30 = arith.constant 0 : index
    %c0_31 = arith.constant 0 : index
    %c0_32 = arith.constant 0 : index
    %c0_33 = arith.constant 0 : index
    %35 = vector.load %arg5[%c0_30, %c0_31, %c0_32, %c0_33] : memref<1x4x288x3xf32, #tpu.memory_space<vmem>>, vector<1x1x288x3xf32>
    %36 = vector.shape_cast %35 : vector<1x1x288x3xf32> to vector<288x3xf32>
    %37 = vector.shape_cast %34 : vector<288x3xf32> to vector<1x1x288x3xf32>
    tpu.vector_store %arg5[%c0_30, %c0_31, %c0_32, %c0_33], %37 {strides = array<i32>} : memref<1x4x288x3xf32, #tpu.memory_space<vmem>>, vector<1x1x288x3xf32>,
    %cst_34 = arith.constant 0.000000e+00 : f32
    %38 = vector.broadcast %cst_34 : f32 to vector<288x3xf32>
    %c0_35 = arith.constant 0 : index
    %c1_36 = arith.constant 1 : index
    %c0_37 = arith.constant 0 : index
    %39 = vector.load %arg1[%c0_35, %c1_36, %c0_37] : memref<1x328x32xf32, #tpu.memory_space<vmem>>, vector<1x288x32xf32>
    %40 = vector.shape_cast %39 : vector<1x288x32xf32> to vector<288x32xf32>
    %41 = arith.truncf %40 : vector<288x32xf32> to vector<288x32xbf16>
    %c1_38 = arith.constant 1 : index
    %c0_39 = arith.constant 0 : index
    %c0_40 = arith.constant 0 : index
    %c0_41 = arith.constant 0 : index
    %42 = vector.load %arg2[%c1_38, %c0_39, %c0_40, %c0_41] : memref<4x4x32x3xbf16, #tpu.memory_space<vmem>>, vector<1x1x32x3xbf16>
    %43 = vector.shape_cast %42 : vector<1x1x32x3xbf16> to vector<32x3xbf16>
    %cst_42 = arith.constant dense<0.000000e+00> : vector<288x3xf32>
    %44 = tpu.matmul %41, %43, %cst_42 {dimension_numbers = #tpu.dot_dimension_numbers<[1], [0], [0], [1], [0, 0, 1, 1], [], []>} : vector<288x32xbf16>, vector<32x3xbf16>, vector<288x3xf32> -> vector<288x3xf32>
    %45 = arith.addf %38, %44 : vector<288x3xf32>
    %c0_43 = arith.constant 0 : index
    %c2_44 = arith.constant 2 : index
    %c0_45 = arith.constant 0 : index
    %46 = vector.load %arg1[%c0_43, %c2_44, %c0_45] : memref<1x328x32xf32, #tpu.memory_space<vmem>>, vector<1x288x32xf32>
    %47 = vector.shape_cast %46 : vector<1x288x32xf32> to vector<288x32xf32>
    %48 = arith.truncf %47 : vector<288x32xf32> to vector<288x32xbf16>
    %c1_46 = arith.constant 1 : index
    %c1_47 = arith.constant 1 : index
    %c0_48 = arith.constant 0 : index
    %c0_49 = arith.constant 0 : index
    %49 = vector.load %arg2[%c1_46, %c1_47, %c0_48, %c0_49] : memref<4x4x32x3xbf16, #tpu.memory_space<vmem>>, vector<1x1x32x3xbf16>
    %50 = vector.shape_cast %49 : vector<1x1x32x3xbf16> to vector<32x3xbf16>
    %cst_50 = arith.constant dense<0.000000e+00> : vector<288x3xf32>
    %51 = tpu.matmul %48, %50, %cst_50 {dimension_numbers = #tpu.dot_dimension_numbers<[1], [0], [0], [1], [0, 0, 1, 1], [], []>} : vector<288x32xbf16>, vector<32x3xbf16>, vector<288x3xf32> -> vector<288x3xf32>
    %52 = arith.addf %45, %51 : vector<288x3xf32>
    %c0_51 = arith.constant 0 : index
    %c19_52 = arith.constant 19 : index
    %c0_53 = arith.constant 0 : index
    %53 = vector.load %arg1[%c0_51, %c19_52, %c0_53] : memref<1x328x32xf32, #tpu.memory_space<vmem>>, vector<1x288x32xf32>
    %54 = vector.shape_cast %53 : vector<1x288x32xf32> to vector<288x32xf32>
    %55 = arith.truncf %54 : vector<288x32xf32> to vector<288x32xbf16>
    %c1_54 = arith.constant 1 : index
    %c2_55 = arith.constant 2 : index
    %c0_56 = arith.constant 0 : index
    %c0_57 = arith.constant 0 : index
    %56 = vector.load %arg2[%c1_54, %c2_55, %c0_56, %c0_57] : memref<4x4x32x3xbf16, #tpu.memory_space<vmem>>, vector<1x1x32x3xbf16>
    %57 = vector.shape_cast %56 : vector<1x1x32x3xbf16> to vector<32x3xbf16>
    %cst_58 = arith.constant dense<0.000000e+00> : vector<288x3xf32>
    %58 = tpu.matmul %55, %57, %cst_58 {dimension_numbers = #tpu.dot_dimension_numbers<[1], [0], [0], [1], [0, 0, 1, 1], [], []>} : vector<288x32xbf16>, vector<32x3xbf16>, vector<288x3xf32> -> vector<288x3xf32>
    %59 = arith.addf %52, %58 : vector<288x3xf32>
    %c0_59 = arith.constant 0 : index
    %c20 = arith.constant 20 : index
    %c0_60 = arith.constant 0 : index
    %60 = vector.load %arg1[%c0_59, %c20, %c0_60] : memref<1x328x32xf32, #tpu.memory_space<vmem>>, vector<1x288x32xf32>
    %61 = vector.shape_cast %60 : vector<1x288x32xf32> to vector<288x32xf32>
    %62 = arith.truncf %61 : vector<288x32xf32> to vector<288x32xbf16>
    %c1_61 = arith.constant 1 : index
    %c3_62 = arith.constant 3 : index
    %c0_63 = arith.constant 0 : index
    %c0_64 = arith.constant 0 : index
    %63 = vector.load %arg2[%c1_61, %c3_62, %c0_63, %c0_64] : memref<4x4x32x3xbf16, #tpu.memory_space<vmem>>, vector<1x1x32x3xbf16>
    %64 = vector.shape_cast %63 : vector<1x1x32x3xbf16> to vector<32x3xbf16>
    %cst_65 = arith.constant dense<0.000000e+00> : vector<288x3xf32>
    %65 = tpu.matmul %62, %64, %cst_65 {dimension_numbers = #tpu.dot_dimension_numbers<[1], [0], [0], [1], [0, 0, 1, 1], [], []>} : vector<288x32xbf16>, vector<32x3xbf16>, vector<288x3xf32> -> vector<288x3xf32>
    %66 = arith.addf %59, %65 : vector<288x3xf32>
    %c0_66 = arith.constant 0 : index
    %c0_67 = arith.constant 0 : index
    %67 = vector.load %arg3[%c0_66, %c0_67] : memref<1x3xf32, #tpu.memory_space<vmem>>, vector<1x3xf32>
    %68 = vector.broadcast %67 : vector<1x3xf32> to vector<288x3xf32>
    %69 = arith.mulf %66, %68 : vector<288x3xf32>
    %c0_68 = arith.constant 0 : index
    %c0_69 = arith.constant 0 : index
    %70 = vector.load %arg4[%c0_68, %c0_69] : memref<1x3xf32, #tpu.memory_space<vmem>>, vector<1x3xf32>
    %71 = vector.broadcast %70 : vector<1x3xf32> to vector<288x3xf32>
    %72 = arith.addf %69, %71 : vector<288x3xf32>
    %c0_70 = arith.constant 0 : index
    %c1_71 = arith.constant 1 : index
    %c0_72 = arith.constant 0 : index
    %c0_73 = arith.constant 0 : index
    %73 = vector.load %arg5[%c0_70, %c1_71, %c0_72, %c0_73] : memref<1x4x288x3xf32, #tpu.memory_space<vmem>>, vector<1x1x288x3xf32>
    %74 = vector.shape_cast %73 : vector<1x1x288x3xf32> to vector<288x3xf32>
    %75 = vector.shape_cast %72 : vector<288x3xf32> to vector<1x1x288x3xf32>
    tpu.vector_store %arg5[%c0_70, %c1_71, %c0_72, %c0_73], %75 {strides = array<i32>} : memref<1x4x288x3xf32, #tpu.memory_space<vmem>>, vector<1x1x288x3xf32>,
    %cst_74 = arith.constant 0.000000e+00 : f32
    %76 = vector.broadcast %cst_74 : f32 to vector<288x3xf32>
    %c0_75 = arith.constant 0 : index
    %c18_76 = arith.constant 18 : index
    %c0_77 = arith.constant 0 : index
    %77 = vector.load %arg1[%c0_75, %c18_76, %c0_77] : memref<1x328x32xf32, #tpu.memory_space<vmem>>, vector<1x288x32xf32>
    %78 = vector.shape_cast %77 : vector<1x288x32xf32> to vector<288x32xf32>
    %79 = arith.truncf %78 : vector<288x32xf32> to vector<288x32xbf16>
    %c2_78 = arith.constant 2 : index
    %c0_79 = arith.constant 0 : index
    %c0_80 = arith.constant 0 : index
    %c0_81 = arith.constant 0 : index
    %80 = vector.load %arg2[%c2_78, %c0_79, %c0_80, %c0_81] : memref<4x4x32x3xbf16, #tpu.memory_space<vmem>>, vector<1x1x32x3xbf16>
    %81 = vector.shape_cast %80 : vector<1x1x32x3xbf16> to vector<32x3xbf16>
    %cst_82 = arith.constant dense<0.000000e+00> : vector<288x3xf32>
    %82 = tpu.matmul %79, %81, %cst_82 {dimension_numbers = #tpu.dot_dimension_numbers<[1], [0], [0], [1], [0, 0, 1, 1], [], []>} : vector<288x32xbf16>, vector<32x3xbf16>, vector<288x3xf32> -> vector<288x3xf32>
    %83 = arith.addf %76, %82 : vector<288x3xf32>
    %c0_83 = arith.constant 0 : index
    %c19_84 = arith.constant 19 : index
    %c0_85 = arith.constant 0 : index
    %84 = vector.load %arg1[%c0_83, %c19_84, %c0_85] : memref<1x328x32xf32, #tpu.memory_space<vmem>>, vector<1x288x32xf32>
    %85 = vector.shape_cast %84 : vector<1x288x32xf32> to vector<288x32xf32>
    %86 = arith.truncf %85 : vector<288x32xf32> to vector<288x32xbf16>
    %c2_86 = arith.constant 2 : index
    %c1_87 = arith.constant 1 : index
    %c0_88 = arith.constant 0 : index
    %c0_89 = arith.constant 0 : index
    %87 = vector.load %arg2[%c2_86, %c1_87, %c0_88, %c0_89] : memref<4x4x32x3xbf16, #tpu.memory_space<vmem>>, vector<1x1x32x3xbf16>
    %88 = vector.shape_cast %87 : vector<1x1x32x3xbf16> to vector<32x3xbf16>
    %cst_90 = arith.constant dense<0.000000e+00> : vector<288x3xf32>
    %89 = tpu.matmul %86, %88, %cst_90 {dimension_numbers = #tpu.dot_dimension_numbers<[1], [0], [0], [1], [0, 0, 1, 1], [], []>} : vector<288x32xbf16>, vector<32x3xbf16>, vector<288x3xf32> -> vector<288x3xf32>
    %90 = arith.addf %83, %89 : vector<288x3xf32>
    %c0_91 = arith.constant 0 : index
    %c36 = arith.constant 36 : index
    %c0_92 = arith.constant 0 : index
    %91 = vector.load %arg1[%c0_91, %c36, %c0_92] : memref<1x328x32xf32, #tpu.memory_space<vmem>>, vector<1x288x32xf32>
    %92 = vector.shape_cast %91 : vector<1x288x32xf32> to vector<288x32xf32>
    %93 = arith.truncf %92 : vector<288x32xf32> to vector<288x32xbf16>
    %c2_93 = arith.constant 2 : index
    %c2_94 = arith.constant 2 : index
    %c0_95 = arith.constant 0 : index
    %c0_96 = arith.constant 0 : index
    %94 = vector.load %arg2[%c2_93, %c2_94, %c0_95, %c0_96] : memref<4x4x32x3xbf16, #tpu.memory_space<vmem>>, vector<1x1x32x3xbf16>
    %95 = vector.shape_cast %94 : vector<1x1x32x3xbf16> to vector<32x3xbf16>
    %cst_97 = arith.constant dense<0.000000e+00> : vector<288x3xf32>
    %96 = tpu.matmul %93, %95, %cst_97 {dimension_numbers = #tpu.dot_dimension_numbers<[1], [0], [0], [1], [0, 0, 1, 1], [], []>} : vector<288x32xbf16>, vector<32x3xbf16>, vector<288x3xf32> -> vector<288x3xf32>
    %97 = arith.addf %90, %96 : vector<288x3xf32>
    %c0_98 = arith.constant 0 : index
    %c37 = arith.constant 37 : index
    %c0_99 = arith.constant 0 : index
    %98 = vector.load %arg1[%c0_98, %c37, %c0_99] : memref<1x328x32xf32, #tpu.memory_space<vmem>>, vector<1x288x32xf32>
    %99 = vector.shape_cast %98 : vector<1x288x32xf32> to vector<288x32xf32>
    %100 = arith.truncf %99 : vector<288x32xf32> to vector<288x32xbf16>
    %c2_100 = arith.constant 2 : index
    %c3_101 = arith.constant 3 : index
    %c0_102 = arith.constant 0 : index
    %c0_103 = arith.constant 0 : index
    %101 = vector.load %arg2[%c2_100, %c3_101, %c0_102, %c0_103] : memref<4x4x32x3xbf16, #tpu.memory_space<vmem>>, vector<1x1x32x3xbf16>
    %102 = vector.shape_cast %101 : vector<1x1x32x3xbf16> to vector<32x3xbf16>
    %cst_104 = arith.constant dense<0.000000e+00> : vector<288x3xf32>
    %103 = tpu.matmul %100, %102, %cst_104 {dimension_numbers = #tpu.dot_dimension_numbers<[1], [0], [0], [1], [0, 0, 1, 1], [], []>} : vector<288x32xbf16>, vector<32x3xbf16>, vector<288x3xf32> -> vector<288x3xf32>
    %104 = arith.addf %97, %103 : vector<288x3xf32>
    %c0_105 = arith.constant 0 : index
    %c0_106 = arith.constant 0 : index
    %105 = vector.load %arg3[%c0_105, %c0_106] : memref<1x3xf32, #tpu.memory_space<vmem>>, vector<1x3xf32>
    %106 = vector.broadcast %105 : vector<1x3xf32> to vector<288x3xf32>
    %107 = arith.mulf %104, %106 : vector<288x3xf32>
    %c0_107 = arith.constant 0 : index
    %c0_108 = arith.constant 0 : index
    %108 = vector.load %arg4[%c0_107, %c0_108] : memref<1x3xf32, #tpu.memory_space<vmem>>, vector<1x3xf32>
    %109 = vector.broadcast %108 : vector<1x3xf32> to vector<288x3xf32>
    %110 = arith.addf %107, %109 : vector<288x3xf32>
    %c0_109 = arith.constant 0 : index
    %c2_110 = arith.constant 2 : index
    %c0_111 = arith.constant 0 : index
    %c0_112 = arith.constant 0 : index
    %111 = vector.load %arg5[%c0_109, %c2_110, %c0_111, %c0_112] : memref<1x4x288x3xf32, #tpu.memory_space<vmem>>, vector<1x1x288x3xf32>
    %112 = vector.shape_cast %111 : vector<1x1x288x3xf32> to vector<288x3xf32>
    %113 = vector.shape_cast %110 : vector<288x3xf32> to vector<1x1x288x3xf32>
    tpu.vector_store %arg5[%c0_109, %c2_110, %c0_111, %c0_112], %113 {strides = array<i32>} : memref<1x4x288x3xf32, #tpu.memory_space<vmem>>, vector<1x1x288x3xf32>,
    %cst_113 = arith.constant 0.000000e+00 : f32
    %114 = vector.broadcast %cst_113 : f32 to vector<288x3xf32>
    %c0_114 = arith.constant 0 : index
    %c19_115 = arith.constant 19 : index
    %c0_116 = arith.constant 0 : index
    %115 = vector.load %arg1[%c0_114, %c19_115, %c0_116] : memref<1x328x32xf32, #tpu.memory_space<vmem>>, vector<1x288x32xf32>
    %116 = vector.shape_cast %115 : vector<1x288x32xf32> to vector<288x32xf32>
    %117 = arith.truncf %116 : vector<288x32xf32> to vector<288x32xbf16>
    %c3_117 = arith.constant 3 : index
    %c0_118 = arith.constant 0 : index
    %c0_119 = arith.constant 0 : index
    %c0_120 = arith.constant 0 : index
    %118 = vector.load %arg2[%c3_117, %c0_118, %c0_119, %c0_120] : memref<4x4x32x3xbf16, #tpu.memory_space<vmem>>, vector<1x1x32x3xbf16>
    %119 = vector.shape_cast %118 : vector<1x1x32x3xbf16> to vector<32x3xbf16>
    %cst_121 = arith.constant dense<0.000000e+00> : vector<288x3xf32>
    %120 = tpu.matmul %117, %119, %cst_121 {dimension_numbers = #tpu.dot_dimension_numbers<[1], [0], [0], [1], [0, 0, 1, 1], [], []>} : vector<288x32xbf16>, vector<32x3xbf16>, vector<288x3xf32> -> vector<288x3xf32>
    %121 = arith.addf %114, %120 : vector<288x3xf32>
    %c0_122 = arith.constant 0 : index
    %c20_123 = arith.constant 20 : index
    %c0_124 = arith.constant 0 : index
    %122 = vector.load %arg1[%c0_122, %c20_123, %c0_124] : memref<1x328x32xf32, #tpu.memory_space<vmem>>, vector<1x288x32xf32>
    %123 = vector.shape_cast %122 : vector<1x288x32xf32> to vector<288x32xf32>
    %124 = arith.truncf %123 : vector<288x32xf32> to vector<288x32xbf16>
    %c3_125 = arith.constant 3 : index
    %c1_126 = arith.constant 1 : index
    %c0_127 = arith.constant 0 : index
    %c0_128 = arith.constant 0 : index
    %125 = vector.load %arg2[%c3_125, %c1_126, %c0_127, %c0_128] : memref<4x4x32x3xbf16, #tpu.memory_space<vmem>>, vector<1x1x32x3xbf16>
    %126 = vector.shape_cast %125 : vector<1x1x32x3xbf16> to vector<32x3xbf16>
    %cst_129 = arith.constant dense<0.000000e+00> : vector<288x3xf32>
    %127 = tpu.matmul %124, %126, %cst_129 {dimension_numbers = #tpu.dot_dimension_numbers<[1], [0], [0], [1], [0, 0, 1, 1], [], []>} : vector<288x32xbf16>, vector<32x3xbf16>, vector<288x3xf32> -> vector<288x3xf32>
    %128 = arith.addf %121, %127 : vector<288x3xf32>
    %c0_130 = arith.constant 0 : index
    %c37_131 = arith.constant 37 : index
    %c0_132 = arith.constant 0 : index
    %129 = vector.load %arg1[%c0_130, %c37_131, %c0_132] : memref<1x328x32xf32, #tpu.memory_space<vmem>>, vector<1x288x32xf32>
    %130 = vector.shape_cast %129 : vector<1x288x32xf32> to vector<288x32xf32>
    %131 = arith.truncf %130 : vector<288x32xf32> to vector<288x32xbf16>
    %c3_133 = arith.constant 3 : index
    %c2_134 = arith.constant 2 : index
    %c0_135 = arith.constant 0 : index
    %c0_136 = arith.constant 0 : index
    %132 = vector.load %arg2[%c3_133, %c2_134, %c0_135, %c0_136] : memref<4x4x32x3xbf16, #tpu.memory_space<vmem>>, vector<1x1x32x3xbf16>
    %133 = vector.shape_cast %132 : vector<1x1x32x3xbf16> to vector<32x3xbf16>
    %cst_137 = arith.constant dense<0.000000e+00> : vector<288x3xf32>
    %134 = tpu.matmul %131, %133, %cst_137 {dimension_numbers = #tpu.dot_dimension_numbers<[1], [0], [0], [1], [0, 0, 1, 1], [], []>} : vector<288x32xbf16>, vector<32x3xbf16>, vector<288x3xf32> -> vector<288x3xf32>
    %135 = arith.addf %128, %134 : vector<288x3xf32>
    %c0_138 = arith.constant 0 : index
    %c38 = arith.constant 38 : index
    %c0_139 = arith.constant 0 : index
    %136 = vector.load %arg1[%c0_138, %c38, %c0_139] : memref<1x328x32xf32, #tpu.memory_space<vmem>>, vector<1x288x32xf32>
    %137 = vector.shape_cast %136 : vector<1x288x32xf32> to vector<288x32xf32>
    %138 = arith.truncf %137 : vector<288x32xf32> to vector<288x32xbf16>
    %c3_140 = arith.constant 3 : index
    %c3_141 = arith.constant 3 : index
    %c0_142 = arith.constant 0 : index
    %c0_143 = arith.constant 0 : index
    %139 = vector.load %arg2[%c3_140, %c3_141, %c0_142, %c0_143] : memref<4x4x32x3xbf16, #tpu.memory_space<vmem>>, vector<1x1x32x3xbf16>
    %140 = vector.shape_cast %139 : vector<1x1x32x3xbf16> to vector<32x3xbf16>
    %cst_144 = arith.constant dense<0.000000e+00> : vector<288x3xf32>
    %141 = tpu.matmul %138, %140, %cst_144 {dimension_numbers = #tpu.dot_dimension_numbers<[1], [0], [0], [1], [0, 0, 1, 1], [], []>} : vector<288x32xbf16>, vector<32x3xbf16>, vector<288x3xf32> -> vector<288x3xf32>
    %142 = arith.addf %135, %141 : vector<288x3xf32>
    %c0_145 = arith.constant 0 : index
    %c0_146 = arith.constant 0 : index
    %143 = vector.load %arg3[%c0_145, %c0_146] : memref<1x3xf32, #tpu.memory_space<vmem>>, vector<1x3xf32>
    %144 = vector.broadcast %143 : vector<1x3xf32> to vector<288x3xf32>
    %145 = arith.mulf %142, %144 : vector<288x3xf32>
    %c0_147 = arith.constant 0 : index
    %c0_148 = arith.constant 0 : index
    %146 = vector.load %arg4[%c0_147, %c0_148] : memref<1x3xf32, #tpu.memory_space<vmem>>, vector<1x3xf32>
    %147 = vector.broadcast %146 : vector<1x3xf32> to vector<288x3xf32>
    %148 = arith.addf %145, %147 : vector<288x3xf32>
    %c0_149 = arith.constant 0 : index
    %c3_150 = arith.constant 3 : index
    %c0_151 = arith.constant 0 : index
    %c0_152 = arith.constant 0 : index
    %149 = vector.load %arg5[%c0_149, %c3_150, %c0_151, %c0_152] : memref<1x4x288x3xf32, #tpu.memory_space<vmem>>, vector<1x1x288x3xf32>
    %150 = vector.shape_cast %149 : vector<1x1x288x3xf32> to vector<288x3xf32>
    %151 = vector.shape_cast %148 : vector<288x3xf32> to vector<1x1x288x3xf32>
    tpu.vector_store %arg5[%c0_149, %c3_150, %c0_151, %c0_152], %151 {strides = array<i32>} : memref<1x4x288x3xf32, #tpu.memory_space<vmem>>, vector<1x1x288x3xf32>,
    return
  }
  func.func @transform_0(%arg0: i32) -> (i32, i32, i32) {
    %c0_i32 = arith.constant 0 : i32
    %c0_i32_0 = arith.constant 0 : i32
    %c0_i32_1 = arith.constant 0 : i32
    return %arg0, %c0_i32, %c0_i32_0 : i32, i32, i32
  }
  func.func @transform_1(%arg0: i32) -> (i32, i32, i32, i32) {
    %c0_i32 = arith.constant 0 : i32
    %c0_i32_0 = arith.constant 0 : i32
    %c0_i32_1 = arith.constant 0 : i32
    %c0_i32_2 = arith.constant 0 : i32
    %c0_i32_3 = arith.constant 0 : i32
    return %c0_i32, %c0_i32_0, %c0_i32_1, %c0_i32_2 : i32, i32, i32, i32
  }
  func.func @transform_2(%arg0: i32) -> (i32, i32) {
    %c0_i32 = arith.constant 0 : i32
    %c0_i32_0 = arith.constant 0 : i32
    %c0_i32_1 = arith.constant 0 : i32
    return %c0_i32, %c0_i32_0 : i32, i32
  }
  func.func @transform_3(%arg0: i32) -> (i32, i32) {
    %c0_i32 = arith.constant 0 : i32
    %c0_i32_0 = arith.constant 0 : i32
    %c0_i32_1 = arith.constant 0 : i32
    return %c0_i32, %c0_i32_0 : i32, i32
  }
  func.func @transform_4(%arg0: i32) -> (i32, i32, i32, i32) {
    %c0_i32 = arith.constant 0 : i32
    %c0_i32_0 = arith.constant 0 : i32
    %c0_i32_1 = arith.constant 0 : i32
    %c0_i32_2 = arith.constant 0 : i32
    return %arg0, %c0_i32, %c0_i32_0, %c0_i32_1 : i32, i32, i32, i32
  }
}

</mosaic_0001>

<bundles_post_ra>
// kernel: conv_decoder_forward.5
= control target key start
LH: loop header
LB: loop body
LE: loop exit
PB: predicated region body
PF: predicated region fallthrough
CT: control target
= control target key end

     0   :  { %9 = vsyncpa [#allocation3], 0  ;;  %s2174_s0 = inlined_call_operand.vmem [shape: f32[2,40,64], index: 0, kind: input, shape index: {}]   ;;  %s2175_s1 = inlined_call_operand.hbm [shape: bf16[4,4,64,64], index: 1, kind: input, shape index: {}]   ;;  %s2176_s2 = inlined_call_operand.hbm [shape: f32[1,64], index: 2, kind: input, shape index: {}]   ;;  %s2177_s3 = inlined_call_operand.hbm [shape: f32[1,64], index: 3, kind: input, shape index: {}]   ;;  %s2178_s4 = inlined_call_operand.vmem [shape: f32[2,4,24,64], index: 4, kind: output, shape index: {}]  }
   0x1   :  { %10 = vsyncpa [#allocation5], 0  ;;  %s1993_s15 = smov 0  }
   0x2 LB: > { %s162_s18 = sshll.u32 %s2176_s2, 4  ;;  %s2002_s19 = sadd.s32 4294967295, %s1961_s15   ;;  %s1961_s15 = sphi %s1993_s15, %s16_s15   ;;  %s163_s18 = int_to_ptr.hbm [resolvable:$true] %s162_s18 }
   0x3   : > { %p1432_p0 = scmp.ge.s32.totalorder %s1961_s15, 1  ;;  %p136_p1 = scmp.lt.s32.totalorder %s1961_s15, 3 }
   0x4   : > { %p1830_p2 = scmp.eq.s32.totalorder %s2002_s19, 0  ;;  %s1963_s21 = smov [#allocation4]  }
   0x5   : > { %p2007_p3 = pnand %p1432_p0, %p136_p1  ;;  %s164_s22 = sshll.u32 %s1963_s21, 4  ;;  %s165_s22 = int_to_ptr.vmem [resolvable:$true] %s164_s22 }
   0x6   : > { %s147_s25 = sshll.u32 %s2175_s1, 4  ;;  %s1964_s26 = smov [#allocation2]   ;;  %s148_s25 = int_to_ptr.hbm [resolvable:$true] %s147_s25 }
   0x7   : > { %p1820_p4 = pneg %p2007_p3  ;;  %s149_s27 = sshll.u32 %s1964_s26, 4  ;;  %s150_s27 = int_to_ptr.vmem [resolvable:$true] %s149_s27 }
   0x8   : > { %s174_s30 = sshll.u32 %s2177_s3, 4  ;;  %s1965_s5 = smov 64   ;;  %s175_s30 = int_to_ptr.hbm [resolvable:$true] %s174_s30 }
   0x9   : > { %p1821_p5 = pnand %p1830_p2, %p1820_p4  ;;  %s1966_s6 = smov 4  }
   0xa   : > { %s1967_s7 = smov [#allocation6]   ;;  %197 = sbr.rel (%p2007_p3) target bundleno = 291 (0x123), region = 36 }
   0xb   : > { %1826 = dma.hbm_to_vmem [thread:$0]  (!%p1821_p5), %s163_s18, 16, %s165_s22, [#allocation5]  }
   0xc   : > { %1823 = dma.hbm_to_vmem [thread:$0]  (!%p1821_p5), %s148_s25, 8192, %s150_s27, [#allocation3], %s1965_s5, %s1965_s5, %s1966_s6  }
   0xd   : > { %s176_s8 = sshll.u32 %s1967_s7, 4  ;;  %s177_s8 = int_to_ptr.vmem [resolvable:$true] %s176_s8 }
   0xe   : > { %1829 = dma.hbm_to_vmem [thread:$0]  (!%p1821_p5), %s175_s30, 16, %s177_s8, [#allocation5]  }
   0xf   : > { %1952 = dma.done.wait (%p1830_p2), [#allocation3], 8192  }
  0x10   : > { %1954 = vsyncadd (%p1830_p2), [#allocation3], 4294959104 }
  0x11   : > { %1956 = dma.done.wait (%p1830_p2), [#allocation5], 32  }
  0x12   : > { %1958 = vsyncadd (%p1830_p2), [#allocation5], 4294967264  ;;  %p234_p6 = scmp.lt.s32.totalorder %s2002_s19, 1  ;;  %v1749_v0 = vld [vmem:[#allocation2 + $0x38] sm:$0xff]  ;;  %v1748_v4 = vld [vmem:[#allocation2 + $0x30] sm:$0xff]  ;;  %vm296_vm0 = vcmask 523264  }
  0x13   : > { %v1745_v1 = vld [vmem:[#allocation2 + $0x18] sm:$0xff]  ;;  %307 = vmatpush.bf16.msra.mxu0 %v1749_v0  ;;  %v1744_v5 = vld [vmem:[#allocation2 + $0x10] sm:$0xff]  ;;  %v1747_v8 = vld [vmem:[#allocation2 + $0x28] sm:$0xff] }
  0x14   : > { %s2181_s19 = smov (!%p234_p6, %s2002_s19), 1  ;;  %v1753_v2 = vld [vmem:[#allocation2 + $0x58] sm:$0xff]  ;;  %355 = vmatpush.bf16.msra.mxu1 %v1745_v1  ;;  %v1752_v6 = vld [vmem:[#allocation2 + $0x50] sm:$0xff]  ;;  %v1743_v9 = vld [vmem:[#allocation2 + $0x8] sm:$0xff] }
  0x15   : > { %v1757_v3 = vld [vmem:[#allocation2 + $0x78] sm:$0xff]  ;;  %s1806_s9 = smul.u32 40, %s2181_s19  ;;  %417 = vmatpush.bf16.msra.mxu2 %v1753_v2  ;;  %v1756_v7 = vld [vmem:[#allocation2 + $0x70] sm:$0xff]  ;;  %v1751_v10 = vld [vmem:[#allocation2 + $0x48] sm:$0xff] }
  0x16   : > { %482 = vmatpush.bf16.msra.mxu3 %v1757_v3  ;;  %v1755_v11 = vld [vmem:[#allocation2 + $0x68] sm:$0xff]  ;;  %v1746_v12 = vld [vmem:[#allocation2 + $0x20] sm:$0xff]  ;;  %v1769_v24 = vld [vmem:[#allocation2 + $0xd8] sm:$0xff]  ;;  %s1807_s13 = smul.u32 96, %s2181_s19 }
  0x17   : > { %308 = vmatpush.bf16.msra.mxu0 %v1748_v4  ;;  %s2039_s12 = scalar_lea.vmem %s2174_s0, %s1806_s9  ;;  %v1742_v13 = vld [vmem:[#allocation2] sm:$0xff]  ;;  %v1773_v25 = vld [vmem:[#allocation2 + $0xf8] sm:$0xff]  ;;  %v1768_v32 = vld [vmem:[#allocation2 + $0xd0] sm:$0xff] }
  0x18   : > { %356 = vmatpush.bf16.msra.mxu1 %v1744_v5  ;;  %v1750_v14 = vld [vmem:[#allocation2 + $0x40] sm:$0xff]  ;;  %v259_v17 = vld [vmem:[%s2039_s12 + $0x9] sm:$0xff]  ;;  %v1765_v30 = vld [vmem:[#allocation2 + $0xb8] sm:$0xff]  ;;  %s2145_s17 = scalar_lea.vmem %s2178_s4, %s1807_s13 }
  0x19   : > { %418 = vmatpush.bf16.msra.mxu2 %v1752_v6  ;;  %v1754_v15 = vld [vmem:[#allocation2 + $0x60] sm:$0xff]  ;;  %v2045_v19 = vld [vmem:[%s2039_s12 + $0x8] sm:$0xff]  ;;  %v1761_v31 = vld [vmem:[#allocation2 + $0x98] sm:$0xff] }
  0x1a   : > { %483 = vmatpush.bf16.msra.mxu3 %v1756_v7  ;;  %v258_v16 = vld [vmem:[%s2039_s12 + $0x1] sm:$0xff]  ;;  %v2049_v21 = vld [vmem:[%s2039_s12 + $0xe] sm:$0xff]  ;;  %v1785_v42 = vld [vmem:[#allocation2 + $0x158] sm:$0xff] }
  0x1b   : > { %309 = vmatpush.bf16.msra.mxu0 %v1747_v8  ;;  %v245_v18 = vld [vmem:[%s2039_s12] sm:$0xff]  ;;  %v435_v23 = vld [vmem:[%s2039_s12 + $0xf] sm:$0xff]  ;;  %v2053_v26 = vpack.c.bf16 %v259_v17, %v258_v16  ;;  %v1789_v43 = vld [vmem:[#allocation2 + $0x178] sm:$0xff] }
  0x1c   : > { %357 = vmatpush.bf16.msra.mxu1 %v1743_v9  ;;  %v369_v20 = vld [vmem:[%s2039_s12 + $0x6] sm:$0xff]  ;;  %v248_v27 = vpack.c.bf16 %v2045_v19, %v245_v18  ;;  %v1772_v33 = vld [vmem:[#allocation2 + $0xf0] sm:$0xff]  ;;  %v1781_v50 = vld [vmem:[#allocation2 + $0x138] sm:$0xff] }
  0x1d   : > { %419 = vmatpush.bf16.msra.mxu2 %v1751_v10  ;;  %v434_v22 = vld [vmem:[%s2039_s12 + $0x7] sm:$0xff]  ;;  %v2057_v28 = vpack.c.bf16 %v2049_v21, %v369_v20  ;;  %v1764_v34 = vld [vmem:[#allocation2 + $0xb0] sm:$0xff]  ;;  %v1777_v51 = vld [vmem:[#allocation2 + $0x118] sm:$0xff] }
  0x1e   : > { %484 = vmatpush.bf16.msra.mxu3 %v1755_v11  ;;  %v2059_v29 = vpack.c.bf16 %v435_v23, %v434_v22  ;;  %v1760_v35 = vld [vmem:[#allocation2 + $0x90] sm:$0xff]  ;;  %v1767_v36 = vld [vmem:[#allocation2 + $0xc8] sm:$0xff]  ;;  %v1766_v40 = vld [vmem:[#allocation2 + $0xc0] sm:$0xff] }
  0x1f   : > { %310 = vmatpush.bf16.msra.mxu0 %v1746_v12  ;;  %v1771_v37 = vld [vmem:[#allocation2 + $0xe8] sm:$0xff]  ;;  %v1770_v41 = vld [vmem:[#allocation2 + $0xe0] sm:$0xff]  ;;  %v260_v44 = vld [vmem:[%s2039_s12 + $0x11] sm:$0xff] }
  0x20   : > { %358 = vmatpush.bf16.msra.mxu1 %v1742_v13  ;;  %v1763_v38 = vld [vmem:[#allocation2 + $0xa8] sm:$0xff]  ;;  %v247_v45 = vld [vmem:[%s2039_s12 + $0x10] sm:$0xff]  ;;  %v1762_v48 = vld [vmem:[#allocation2 + $0xa0] sm:$0xff]  ;;  %v2074_v52 = vpack.c.bf16 %v260_v44, %v260_v44 }
  0x21   : > { %420 = vmatpush.bf16.msra.mxu2 %v1750_v14  ;;  %v1759_v39 = vld [vmem:[#allocation2 + $0x88] sm:$0xff]  ;;  %v2071_v46 = vld [vmem:[%s2039_s12 + $0x16] sm:$0xff]  ;;  %v1758_v49 = vld [vmem:[#allocation2 + $0x80] sm:$0xff]  ;;  %v249_v53 = vpack.c.bf16 %v247_v45, %v247_v45  ;;  %v2092_v7 = vpack.c.bf16 %v247_v45, %v2045_v19 }
  0x22   : > { %485 = vmatpush.bf16.msra.mxu3 %v1754_v15  ;;  %1459 = vmatmul.msk.bf16.vlgmr.msra.gmra.mxu0 %vm296_vm0, %v2053_v26  ;;  %v436_v47 = vld [vmem:[%s2039_s12 + $0x17] sm:$0xff]  ;;  %v2078_v54 = vpack.c.bf16 %v2071_v46, %v2071_v46  ;;  %v1783_v60 = vld [vmem:[#allocation2 + $0x148] sm:$0xff]  ;;  %v1782_v0 = vld [vmem:[#allocation2 + $0x140] sm:$0xff] }
  0x23   : > { %1477 = vmatmul.msk.bf16.vlgmr.msra.gmra.mxu1 %vm296_vm0, %v248_v27  ;;  %581 = vmatpush.bf16.msrb.mxu0 %v1765_v30  ;;  %v2080_v55 = vpack.c.bf16 %v436_v47, %v436_v47  ;;  %v1784_v56 = vld [vmem:[#allocation2 + $0x150] sm:$0xff]  ;;  %v1787_v61 = vld [vmem:[#allocation2 + $0x168] sm:$0xff]  ;;  %v1786_v1 = vld [vmem:[#allocation2 + $0x160] sm:$0xff] }
  0x24   : > { %1495 = vmatmul.msk.bf16.vlgmr.msra.gmra.mxu2 %vm296_vm0, %v2057_v28  ;;  %629 = vmatpush.bf16.msrb.mxu1 %v1761_v31  ;;  %v1788_v57 = vld [vmem:[#allocation2 + $0x170] sm:$0xff]  ;;  %v1779_v62 = vld [vmem:[#allocation2 + $0x128] sm:$0xff]  ;;  %v1778_v2 = vld [vmem:[#allocation2 + $0x120] sm:$0xff] }
  0x25   : > { %691 = vmatpush.bf16.msrb.mxu2 %v1769_v24  ;;  %1513 = vmatmul.msk.bf16.vlgmr.msra.gmra.mxu3 %vm296_vm0, %v2059_v29  ;;  %v1780_v58 = vld [vmem:[#allocation2 + $0x130] sm:$0xff]  ;;  %v1775_v63 = vld [vmem:[#allocation2 + $0x108] sm:$0xff]  ;;  %v1774_v3 = vld [vmem:[#allocation2 + $0x100] sm:$0xff] }
  0x26   : > { %756 = vmatpush.bf16.msrb.mxu3 %v1773_v25  ;;  %v1776_v59 = vld [vmem:[#allocation2 + $0x110] sm:$0xff]  ;;  %v533_v4 = vld [vmem:[%s2039_s12 + $0x2] sm:$0xff]  ;;  %v1801_v8 = vld [vmem:[#allocation2 + $0x1d8] sm:$0xff] }
  0x27   : > { %582 = vmatpush.bf16.msrb.mxu0 %v1764_v34  ;;  %v534_v5 = vld [vmem:[%s2039_s12 + $0xa] sm:$0xff]  ;;  %v1805_v9 = vld [vmem:[#allocation2 + $0x1f8] sm:$0xff]  ;;  %v1798_v25 = vld [vmem:[#allocation2 + $0x1c0] sm:$0xff] }
  0x28   : > { %630 = vmatpush.bf16.msrb.mxu1 %v1760_v35  ;;  %v536_v6 = vpack.c.bf16 %v534_v5, %v533_v4  ;;  %v1797_v10 = vld [vmem:[#allocation2 + $0x1b8] sm:$0xff]  ;;  %v1800_v12 = vld [vmem:[#allocation2 + $0x1d0] sm:$0xff]  ;;  %v1799_v20 = vld [vmem:[#allocation2 + $0x1c8] sm:$0xff] }
  0x29   : > { %692 = vmatpush.bf16.msrb.mxu2 %v1768_v32  ;;  %v1793_v11 = vld [vmem:[#allocation2 + $0x198] sm:$0xff]  ;;  %v1804_v13 = vld [vmem:[#allocation2 + $0x1f0] sm:$0xff]  ;;  %v1803_v22 = vld [vmem:[#allocation2 + $0x1e8] sm:$0xff] }
  0x2a   : > { %757 = vmatpush.bf16.msrb.mxu3 %v1772_v33  ;;  %v1796_v14 = vld [vmem:[#allocation2 + $0x1b0] sm:$0xff]  ;;  %v710_v17 = vld [vmem:[%s2039_s12 + $0x18] sm:$0xff]  ;;  %v1795_v23 = vld [vmem:[#allocation2 + $0x1a8] sm:$0xff] }
  0x2b   : > { %583 = vmatpush.bf16.msrb.mxu0 %v1763_v38  ;;  %v1792_v15 = vld [vmem:[#allocation2 + $0x190] sm:$0xff]  ;;  %v712_v19 = vpack.c.bf16 %v710_v17, %v710_v17  ;;  %v1791_v24 = vld [vmem:[#allocation2 + $0x188] sm:$0xff]  ;;  %v1794_v27 = vld [vmem:[#allocation2 + $0x1a0] sm:$0xff] }
  0x2c   : > { %631 = vmatpush.bf16.msrb.mxu1 %v1759_v39  ;;  %v535_v16 = vld [vmem:[%s2039_s12 + $0x12] sm:$0xff]  ;;  %v1790_v30 = vld [vmem:[#allocation2 + $0x180] sm:$0xff] }
  0x2d   : > { %693 = vmatpush.bf16.msrb.mxu2 %v1767_v36  ;;  %v537_v18 = vpack.c.bf16 %v535_v16, %v535_v16  ;;  %v918_v31 = vld [vmem:[%s2039_s12 + $0xc] sm:$0xff]  ;;  %v919_v32 = vld [vmem:[%s2039_s12 + $0x14] sm:$0xff]  ;;  %v985_v38 = vld [vmem:[%s2039_s12 + $0x1d] sm:$0xff] }
  0x2e   : > { %758 = vmatpush.bf16.msrb.mxu3 %v1771_v37  ;;  %v983_v33 = vld [vmem:[%s2039_s12 + $0xd] sm:$0xff]  ;;  %v984_v34 = vld [vmem:[%s2039_s12 + $0x15] sm:$0xff]  ;;  %v921_v35 = vpack.c.bf16 %v919_v32, %v918_v31  ;;  %v1849_v47 = vld [vmem:[#allocation4] ss:$0 sm:$0xff] }
  0x2f   : > { %584 = vmatpush.bf16.msrb.mxu0 %v1762_v48  ;;  %v986_v36 = vpack.c.bf16 %v984_v34, %v983_v33  ;;  %v920_v37 = vld [vmem:[%s2039_s12 + $0x1c] sm:$0xff] }
  0x30   : > { %632 = vmatpush.bf16.msrb.mxu1 %v1758_v49  ;;  %v922_v39 = vpack.c.bf16 %v920_v37, %v920_v37 }
  0x31   : > { %694 = vmatpush.bf16.msrb.mxu2 %v1766_v40  ;;  %v987_v40 = vpack.c.bf16 %v985_v38, %v985_v38 }
  0x32   : > { %759 = vmatpush.bf16.msrb.mxu3 %v1770_v41  ;;  %1460 = vmatmul.msk.bf16.gmra.mxu0 %vm296_vm0, %v2074_v52  ;;  %v1260_v41 = vld [vmem:[%s2039_s12 + $0x1e] sm:$0xff] }
  0x33   : > { %856 = vmatpush.bf16.msra.mxu0 %v1781_v50  ;;  %1478 = vmatmul.msk.bf16.gmra.mxu1 %vm296_vm0, %v249_v53 }
  0x34   : > { %904 = vmatpush.bf16.msra.mxu1 %v1777_v51  ;;  %1496 = vmatmul.msk.bf16.gmra.mxu2 %vm296_vm0, %v2078_v54  ;;  %v1850_v51 = vld [vmem:[#allocation6] ss:$0 sm:$0xff] }
  0x35   : > { %966 = vmatpush.bf16.msra.mxu2 %v1785_v42  ;;  %1514 = vmatmul.msk.bf16.gmra.mxu3 %vm296_vm0, %v2080_v55  ;;  %v1262_v42 = vpack.c.bf16 %v1260_v41, %v1260_v41 }
  0x36   : > { %1031 = vmatpush.bf16.msra.mxu3 %v1789_v43 }
  0x37   : > { %857 = vmatpush.bf16.msra.mxu0 %v1780_v58 }
  0x38   : > { %905 = vmatpush.bf16.msra.mxu1 %v1776_v59 }
  0x39   : > { %967 = vmatpush.bf16.msra.mxu2 %v1784_v56 }
  0x3a   : > { %1032 = vmatpush.bf16.msra.mxu3 %v1788_v57 }
  0x3b   : > { %858 = vmatpush.bf16.msra.mxu0 %v1779_v62 }
  0x3c   : > { %906 = vmatpush.bf16.msra.mxu1 %v1775_v63 }
  0x3d   : > { %968 = vmatpush.bf16.msra.mxu2 %v1783_v60 }
  0x3e   : > { %1033 = vmatpush.bf16.msra.mxu3 %v1787_v61 }
  0x3f   : > { %859 = vmatpush.bf16.msra.mxu0 %v1778_v2 }
  0x40   : > { %907 = vmatpush.bf16.msra.mxu1 %v1774_v3 }
  0x41   : > { %969 = vmatpush.bf16.msra.mxu2 %v1782_v0 }
  0x42   : > { %1034 = vmatpush.bf16.msra.mxu3 %v1786_v1  ;;  %1531 = vmatmul.msk.bf16.vlgmr.msrb.gmra.mxu0 %vm296_vm0, %v536_v6 }
  0x43   : > { %1549 = vmatmul.msk.bf16.vlgmr.msrb.gmra.mxu1 %vm296_vm0, %v2053_v26  ;;  %1131 = vmatpush.bf16.msrb.mxu0 %v1797_v10  ;;  %v1802_v26 = vld [vmem:[#allocation2 + $0x1e0] sm:$0xff] }
  0x44   : > { %1567 = vmatmul.msk.bf16.vlgmr.msrb.gmra.mxu2 %vm296_vm0, %v2059_v29  ;;  %1179 = vmatpush.bf16.msrb.mxu1 %v1793_v11 }
  0x45   : > { %1585 = vmatmul.msk.bf16.vlgmr.msrb.gmra.mxu3 %vm296_vm0, %v2092_v7  ;;  %1241 = vmatpush.bf16.msrb.mxu2 %v1801_v8 }
  0x46   : > { %1306 = vmatpush.bf16.msrb.mxu3 %v1805_v9 }
  0x47   : > { %1132 = vmatpush.bf16.msrb.mxu0 %v1796_v14 }
  0x48   : > { %1180 = vmatpush.bf16.msrb.mxu1 %v1792_v15 }
  0x49   : > { %1242 = vmatpush.bf16.msrb.mxu2 %v1800_v12 }
  0x4a   : > { %1307 = vmatpush.bf16.msrb.mxu3 %v1804_v13 }
  0x4b   : > { %1133 = vmatpush.bf16.msrb.mxu0 %v1795_v23 }
  0x4c   : > { %1181 = vmatpush.bf16.msrb.mxu1 %v1791_v24  ;;  %v1852_v24 = vld [vmem:[#allocation6] ss:$0 sm:$0xff] }
  0x4d   : > { %1243 = vmatpush.bf16.msrb.mxu2 %v1799_v20 }
  0x4e   : > { %1308 = vmatpush.bf16.msrb.mxu3 %v1803_v22 }
  0x4f   : > { %1134 = vmatpush.bf16.msrb.mxu0 %v1794_v27 }
  0x50   : > { %1182 = vmatpush.bf16.msrb.mxu1 %v1790_v30 }
  0x51   : > { %1244 = vmatpush.bf16.msrb.mxu2 %v1798_v25 }
  0x52   : > { %1532 = vmatmul.msk.bf16.gmra.mxu0 %vm296_vm0, %v537_v18  ;;  %1309 = vmatpush.bf16.msrb.mxu3 %v1802_v26 }
  0x53   : > { %1550 = vmatmul.msk.bf16.gmra.mxu1 %vm296_vm0, %v2074_v52 }
  0x54   : > { %1568 = vmatmul.msk.bf16.gmra.mxu2 %vm296_vm0, %v2080_v55 }
  0x55   : > { %1586 = vmatmul.msk.bf16.gmra.mxu3 %vm296_vm0, %v712_v19 }
  0x62   : > { %1606 = vmatmul.msk.bf16.vlgmr.msra.gmra.mxu0 %vm296_vm0, %v2059_v29 }
  0x63   : > { %1624 = vmatmul.msk.bf16.vlgmr.msra.gmra.mxu1 %vm296_vm0, %v2057_v28  ;;  %v1261_v28 = vpack.c.bf16 %v2071_v46, %v2049_v21 }
  0x64   : > { %1642 = vmatmul.msk.bf16.vlgmr.msra.gmra.mxu2 %vm296_vm0, %v921_v35 }
  0x65   : > { %1660 = vmatmul.msk.bf16.vlgmr.msra.gmra.mxu3 %vm296_vm0, %v986_v36 }
  0x72   : > { %1607 = vmatmul.msk.bf16.gmra.mxu0 %vm296_vm0, %v2080_v55 }
  0x73   : > { %1625 = vmatmul.msk.bf16.gmra.mxu1 %vm296_vm0, %v2078_v54 }
  0x74   : > { %1643 = vmatmul.msk.bf16.gmra.mxu2 %vm296_vm0, %v922_v39 }
  0x75   : > { %1661 = vmatmul.msk.bf16.gmra.mxu3 %vm296_vm0, %v987_v40 }
  0x82   : > { %1681 = vmatmul.msk.bf16.vlgmr.msrb.gmra.mxu0 %vm296_vm0, %v2092_v7 }
  0x83   : > { %1699 = vmatmul.msk.bf16.vlgmr.msrb.gmra.mxu1 %vm296_vm0, %v2059_v29 }
  0x84   : > { %1717 = vmatmul.msk.bf16.vlgmr.msrb.gmra.mxu2 %vm296_vm0, %v986_v36 }
  0x85   : > { %1735 = vmatmul.msk.bf16.vlgmr.msrb.gmra.mxu3 %vm296_vm0, %v1261_v28 }
  0x92   : > { %1682 = vmatmul.msk.bf16.gmra.mxu0 %vm296_vm0, %v712_v19  ;;  %v1851_v19 = vld [vmem:[#allocation4] ss:$0 sm:$0xff] }
  0x93   : > { %1700 = vmatmul.msk.bf16.gmra.mxu1 %vm296_vm0, %v2080_v55 }
  0x94   : > { %1718 = vmatmul.msk.bf16.gmra.mxu2 %vm296_vm0, %v987_v40 }
  0x95   : > { %1736 = vmatmul.msk.bf16.gmra.mxu3 %vm296_vm0, %v1262_v42 }
  0x9f   : > { %v312_v21 = vpop.f32.mrf.mxu0 }
  0xa0   : > { %v360_v43 = vpop.f32.mrf.mxu1 }
  0xa1   : > { %v361_v44 = vadd.f32 %v360_v43, %v312_v21 }
  0xa7   : > { %v422_v29 = vpop.f32.mrf.mxu2  ;;  %v314_v48 = vpop.f32.mrf.mxu0 }
  0xa8   : > { %v487_v45 = vpop.f32.mrf.mxu3  ;;  %v431_v46 = vadd.f32 %v422_v29, %v361_v44  ;;  %v362_v49 = vpop.f32.mrf.mxu1 }
  0xa9   : > { %v363_v54 = vadd.f32 %v362_v49, %v314_v48 }
  0xaa   : > { %v496_v50 = vadd.f32 %v487_v45, %v431_v46 }
  0xac   : > { %v503_v52 = vmul.f32 %v1849_v47, %v496_v50 }
  0xae   : > { %v510_v53 = vadd.f32 %v1850_v51, %v503_v52 }
  0xaf   : > { %v424_v55 = vpop.f32.mrf.mxu2  ;;  %v317_v59 = vpop.f32.mrf.mxu0 }
  0xb0   : > { %v489_v56 = vpop.f32.mrf.mxu3  ;;  %v513_v57 = vmax.f32 %v510_v53, 0.0  ;;  %v432_v58 = vadd.f32 %v424_v55, %v363_v54  ;;  %v365_v60 = vpop.f32.mrf.mxu1  ;;  %v1853_v55 = vld [vmem:[#allocation4] ss:$0 sm:$0xff] }
  0xb1   : > { %v366_v63 = vadd.f32 %v365_v60, %v317_v59  ;;  %v1854_v59 = vld [vmem:[#allocation6] ss:$0 sm:$0xff] }
  0xb2   : > { %516 = vst.msk [vmem:[%s2145_s17] sm:$0xff] %vm296_vm0, %v513_v57  ;;  %v497_v61 = vadd.f32 %v489_v56, %v432_v58 }
  0xb4   : > { %v504_v62 = vmul.f32 %v1849_v47, %v497_v61 }
  0xb6   : > { %v511_v0 = vadd.f32 %v1850_v51, %v504_v62 }
  0xb7   : > { %v427_v1 = vpop.f32.mrf.mxu2  ;;  %v319_v5 = vpop.f32.mrf.mxu0 }
  0xb8   : > { %v492_v2 = vpop.f32.mrf.mxu3  ;;  %v514_v3 = vmax.f32 %v511_v0, 0.0  ;;  %v433_v4 = vadd.f32 %v427_v1, %v366_v63  ;;  %v367_v6 = vpop.f32.mrf.mxu1 }
  0xba   : > { %517 = vst.msk [vmem:[%s2145_s17 + $0x8] sm:$0xff] %vm296_vm0, %v514_v3  ;;  %v498_v7 = vadd.f32 %v492_v2, %v433_v4 }
  0xbc   : > { %v505_v8 = vmul.f32 %v1849_v47, %v498_v7 }
  0xbe   : > { %v512_v9 = vadd.f32 %v1850_v51, %v505_v8 }
  0xbf   : > { %v429_v10 = vpop.f32.mrf.mxu2  ;;  %v586_v13 = vpop.f32.mrf.mxu0 }
  0xc0   : > { %v494_v11 = vpop.f32.mrf.mxu3  ;;  %v515_v12 = vmax.f32 %v512_v9, 0.0  ;;  %v634_v14 = vpop.f32.mrf.mxu1 }
  0xc1   : > { %v635_v15 = vadd.f32 %v634_v14, %v586_v13 }
  0xc2   : > { %518 = vst.msk [vmem:[%s2145_s17 + $0x10] sm:$0xff] %vm296_vm0, %v515_v12 }
  0xc7   : > { %v696_v16 = vpop.f32.mrf.mxu2  ;;  %v588_v20 = vpop.f32.mrf.mxu0 }
  0xc8   : > { %v761_v17 = vpop.f32.mrf.mxu3  ;;  %v705_v18 = vadd.f32 %v696_v16, %v635_v15  ;;  %v636_v22 = vpop.f32.mrf.mxu1 }
  0xc9   : > { %v637_v27 = vadd.f32 %v636_v22, %v588_v20 }
  0xca   : > { %v770_v23 = vadd.f32 %v761_v17, %v705_v18 }
  0xcc   : > { %v777_v25 = vmul.f32 %v1851_v19, %v770_v23 }
  0xce   : > { %v784_v26 = vadd.f32 %v1852_v24, %v777_v25 }
  0xcf   : > { %v698_v30 = vpop.f32.mrf.mxu2  ;;  %v591_v34 = vpop.f32.mrf.mxu0 }
  0xd0   : > { %v763_v31 = vpop.f32.mrf.mxu3  ;;  %v787_v32 = vmax.f32 %v784_v26, 0.0  ;;  %v706_v33 = vadd.f32 %v698_v30, %v637_v27  ;;  %v639_v35 = vpop.f32.mrf.mxu1  ;;  %v1855_v30 = vld [vmem:[#allocation4] ss:$0 sm:$0xff] }
  0xd1   : > { %v640_v38 = vadd.f32 %v639_v35, %v591_v34  ;;  %v1856_v34 = vld [vmem:[#allocation6] ss:$0 sm:$0xff] }
  0xd2   : > { %1587 = vst.msk [vmem:[%s2145_s17 + $0x18] sm:$0xff] %vm296_vm0, %v787_v32  ;;  %v771_v36 = vadd.f32 %v763_v31, %v706_v33 }
  0xd4   : > { %v778_v37 = vmul.f32 %v1851_v19, %v771_v36 }
  0xd6   : > { %v785_v39 = vadd.f32 %v1852_v24, %v778_v37 }
  0xd7   : > { %v701_v40 = vpop.f32.mrf.mxu2  ;;  %v593_v21 = vpop.f32.mrf.mxu0 }
  0xd8   : > { %v766_v28 = vpop.f32.mrf.mxu3  ;;  %v788_v41 = vmax.f32 %v785_v39, 0.0  ;;  %v707_v42 = vadd.f32 %v701_v40, %v640_v38  ;;  %v641_v43 = vpop.f32.mrf.mxu1 }
  0xda   : > { %1588 = vst.msk [vmem:[%s2145_s17 + $0x20] sm:$0xff] %vm296_vm0, %v788_v41  ;;  %v772_v44 = vadd.f32 %v766_v28, %v707_v42 }
  0xdc   : > { %v779_v29 = vmul.f32 %v1851_v19, %v772_v44 }
  0xde   : > { %v786_v45 = vadd.f32 %v1852_v24, %v779_v29 }
  0xdf   : > { %v703_v46 = vpop.f32.mrf.mxu2  ;;  %v861_v49 = vpop.f32.mrf.mxu0 }
  0xe0   : > { %v768_v47 = vpop.f32.mrf.mxu3  ;;  %v789_v48 = vmax.f32 %v786_v45, 0.0  ;;  %v909_v50 = vpop.f32.mrf.mxu1 }
  0xe1   : > { %v910_v51 = vadd.f32 %v909_v50, %v861_v49 }
  0xe2   : > { %1589 = vst.msk [vmem:[%s2145_s17 + $0x28] sm:$0xff] %vm296_vm0, %v789_v48 }
  0xe7   : > { %v971_v52 = vpop.f32.mrf.mxu2  ;;  %v863_v56 = vpop.f32.mrf.mxu0 }
  0xe8   : > { %v1036_v53 = vpop.f32.mrf.mxu3  ;;  %v980_v54 = vadd.f32 %v971_v52, %v910_v51  ;;  %v911_v57 = vpop.f32.mrf.mxu1 }
  0xe9   : > { %v912_v62 = vadd.f32 %v911_v57, %v863_v56 }
  0xea   : > { %v1045_v58 = vadd.f32 %v1036_v53, %v980_v54 }
  0xec   : > { %v1052_v60 = vmul.f32 %v1853_v55, %v1045_v58 }
  0xee   : > { %v1059_v61 = vadd.f32 %v1854_v59, %v1052_v60 }
  0xef   : > { %v973_v63 = vpop.f32.mrf.mxu2  ;;  %v866_v3 = vpop.f32.mrf.mxu0 }
  0xf0   : > { %v1038_v0 = vpop.f32.mrf.mxu3  ;;  %v1062_v1 = vmax.f32 %v1059_v61, 0.0  ;;  %v981_v2 = vadd.f32 %v973_v63, %v912_v62  ;;  %v914_v4 = vpop.f32.mrf.mxu1 }
  0xf1   : > { %v915_v7 = vadd.f32 %v914_v4, %v866_v3 }
  0xf2   : > { %1662 = vst.msk [vmem:[%s2145_s17 + $0x30] sm:$0xff] %vm296_vm0, %v1062_v1  ;;  %v1046_v5 = vadd.f32 %v1038_v0, %v981_v2 }
  0xf4   : > { %v1053_v6 = vmul.f32 %v1853_v55, %v1046_v5 }
  0xf6   : > { %v1060_v8 = vadd.f32 %v1854_v59, %v1053_v6 }
  0xf7   : > { %v976_v9 = vpop.f32.mrf.mxu2  ;;  %v868_v13 = vpop.f32.mrf.mxu0 }
  0xf8   : > { %v1041_v10 = vpop.f32.mrf.mxu3  ;;  %v1063_v11 = vmax.f32 %v1060_v8, 0.0  ;;  %v982_v12 = vadd.f32 %v976_v9, %v915_v7  ;;  %v916_v14 = vpop.f32.mrf.mxu1 }
  0xfa   : > { %1663 = vst.msk [vmem:[%s2145_s17 + $0x38] sm:$0xff] %vm296_vm0, %v1063_v11  ;;  %v1047_v15 = vadd.f32 %v1041_v10, %v982_v12 }
  0xfc   : > { %v1054_v16 = vmul.f32 %v1853_v55, %v1047_v15 }
  0xfe   : > { %v1061_v17 = vadd.f32 %v1854_v59, %v1054_v16 }
  0xff   : > { %v978_v18 = vpop.f32.mrf.mxu2  ;;  %v1136_v22 = vpop.f32.mrf.mxu0 }
 0x100   : > { %v1043_v19 = vpop.f32.mrf.mxu3  ;;  %v1064_v20 = vmax.f32 %v1061_v17, 0.0  ;;  %v1184_v23 = vpop.f32.mrf.mxu1 }
 0x101   : > { %v1185_v24 = vadd.f32 %v1184_v23, %v1136_v22 }
 0x102   : > { %1664 = vst.msk [vmem:[%s2145_s17 + $0x40] sm:$0xff] %vm296_vm0, %v1064_v20 }
 0x107   : > { %v1246_v25 = vpop.f32.mrf.mxu2  ;;  %v1138_v31 = vpop.f32.mrf.mxu0 }
 0x108   : > { %v1311_v26 = vpop.f32.mrf.mxu3  ;;  %v1255_v27 = vadd.f32 %v1246_v25, %v1185_v24  ;;  %v1186_v32 = vpop.f32.mrf.mxu1 }
 0x109   : > { %v1187_v37 = vadd.f32 %v1186_v32, %v1138_v31 }
 0x10a   : > { %v1320_v33 = vadd.f32 %v1311_v26, %v1255_v27 }
 0x10c   : > { %v1327_v35 = vmul.f32 %v1855_v30, %v1320_v33 }
 0x10e   : > { %v1334_v36 = vadd.f32 %v1856_v34, %v1327_v35 }
 0x10f   : > { %v1248_v38 = vpop.f32.mrf.mxu2  ;;  %v1141_v41 = vpop.f32.mrf.mxu0 }
 0x110   : > { %v1313_v39 = vpop.f32.mrf.mxu3  ;;  %v1337_v40 = vmax.f32 %v1334_v36, 0.0  ;;  %v1256_v28 = vadd.f32 %v1248_v38, %v1187_v37  ;;  %v1189_v42 = vpop.f32.mrf.mxu1 }
 0x111   : > { %v1190_v44 = vadd.f32 %v1189_v42, %v1141_v41 }
 0x112   : > { %1737 = vst.msk [vmem:[%s2145_s17 + $0x48] sm:$0xff] %vm296_vm0, %v1337_v40  ;;  %v1321_v21 = vadd.f32 %v1313_v39, %v1256_v28 }
 0x114   : > { %v1328_v43 = vmul.f32 %v1855_v30, %v1321_v21 }
 0x116   : > { %v1335_v29 = vadd.f32 %v1856_v34, %v1328_v43 }
 0x117   : > { %v1251_v45 = vpop.f32.mrf.mxu2  ;;  %v1143_v49 = vpop.f32.mrf.mxu0 }
 0x118   : > { %v1316_v46 = vpop.f32.mrf.mxu3  ;;  %v1338_v47 = vmax.f32 %v1335_v29, 0.0  ;;  %v1257_v48 = vadd.f32 %v1251_v45, %v1190_v44  ;;  %v1191_v50 = vpop.f32.mrf.mxu1 }
 0x11a   : > { %1738 = vst.msk [vmem:[%s2145_s17 + $0x50] sm:$0xff] %vm296_vm0, %v1338_v47  ;;  %v1322_v51 = vadd.f32 %v1316_v46, %v1257_v48 }
 0x11c   : > { %v1329_v52 = vmul.f32 %v1855_v30, %v1322_v51 }
 0x11e   : > { %v1336_v53 = vadd.f32 %v1856_v34, %v1329_v52 }
 0x11f   : > { %v1253_v54 = vpop.f32.mrf.mxu2 }
 0x120   : > { %v1318_v55 = vpop.f32.mrf.mxu3  ;;  %v1339_v56 = vmax.f32 %v1336_v53, 0.0 }
 0x122   : > { %1739 = vst.msk [vmem:[%s2145_s17 + $0x58] sm:$0xff] %vm296_vm0, %v1339_v56 }
 0x123 PF: > { %s16_s15 = sadd.s32 1, %s1961_s15  }
 0x124   : > { %p13_p7 = scmp.ge.s32.totalorder %s16_s15, 4  }
 0x126   :  { %15 = sbr.rel (!%p13_p7) target bundleno = 2 (0x2), region = 97 }
 0x12b   :  { %1365 = vsyncpa [#allocation3], 1 }
 0x12c   :  { %1367 = vsyncpa [#allocation3 + $0x1], 1 }
 0x12d   :  { %1368 = vsyncpa [#allocation5], 1 }

// kernel: conv_decoder_forward.4
= control target key start
LH: loop header
LB: loop body
LE: loop exit
PB: predicated region body
PF: predicated region fallthrough
CT: control target
= control target key end

     0   :  { %12 = vsyncpa [#allocation3], 0  ;;  %s3929_s0 = inlined_call_operand.hbm [shape: f32[2,8], index: 0, kind: input, shape index: {}]   ;;  %s3930_s1 = inlined_call_operand.hbm [shape: bf16[8,512], index: 1, kind: input, shape index: {}]   ;;  %s3931_s2 = inlined_call_operand.hbm [shape: f32[1,512], index: 2, kind: input, shape index: {}]   ;;  %s3932_s3 = inlined_call_operand.hbm [shape: f32[1,512], index: 3, kind: input, shape index: {}]   ;;  %s3933_s4 = inlined_call_operand.hbm [shape: bf16[512,1024], index: 4, kind: input, shape index: {}]   ;;  %s3934_s5 = inlined_call_operand.hbm [shape: f32[1,1024], index: 5, kind: input, shape index: {}]   ;;  %s3935_s6 = inlined_call_operand.hbm [shape: f32[1,1024], index: 6, kind: input, shape index: {}]   ;;  %s3936_s7 = inlined_call_operand.vmem [shape: f32[2,1024], index: 7, kind: output, shape index: {}]  }
   0x1   :  { %13 = vsyncpa [#allocation5], 0 }
   0x2   :  { %14 = vsyncpa [#allocation8], 0  ;;  %s32_s26 = sshll.u32 %s3930_s1, 4  ;;  %s33_s26 = int_to_ptr.hbm [resolvable:$true] %s32_s26 }
   0x3   :  { %15 = vsyncpa [#allocation11], 0  ;;  %s3758_s27 = smov [#allocation4]   ;;  %s54_s8 = sshll.u32 %s3932_s3, 4  ;;  %s55_s8 = int_to_ptr.hbm [resolvable:$true] %s54_s8 }
   0x4   :  { %s34_s28 = sshll.u32 %s3758_s27, 4  ;;  %s3759_s9 = smov [#allocation7]   ;;  %s35_s28 = int_to_ptr.vmem [resolvable:$true] %s34_s28 }
   0x5   :  { %37 = dma.hbm_to_vmem [thread:$0]  %s33_s26, 256, %s35_s28, [#allocation5]  }
   0x6   :  { %s56_s10 = sshll.u32 %s3759_s9, 4  ;;  %s78_s13 = sshll.u32 %s3934_s5, 4  ;;  %s57_s10 = int_to_ptr.vmem [resolvable:$true] %s56_s10  ;;  %s79_s13 = int_to_ptr.hbm [resolvable:$true] %s78_s13 }
   0x7   :  { %59 = dma.hbm_to_vmem [thread:$0]  %s55_s8, 64, %s57_s10, [#allocation8]  }
   0x8   :  { %s21_s15 = sshll.u32 %s3929_s0, 4  ;;  %s3760_s16 = smov [#allocation10]   ;;  %s22_s15 = int_to_ptr.hbm [resolvable:$true] %s21_s15 }
   0x9   :  { %s80_s17 = sshll.u32 %s3760_s16, 4  ;;  %s3761_s3 = smov [#allocation2]   ;;  %s81_s17 = int_to_ptr.vmem [resolvable:$true] %s80_s17 }
   0xa   :  { %83 = dma.hbm_to_vmem [thread:$0]  %s79_s13, 128, %s81_s17, [#allocation11]  }
   0xb   :  { %s23_s18 = sshll.u32 %s3761_s3, 4  ;;  %s43_s21 = sshll.u32 %s3931_s2, 4  ;;  %s24_s18 = int_to_ptr.vmem [resolvable:$true] %s23_s18  ;;  %s44_s21 = int_to_ptr.hbm [resolvable:$true] %s43_s21 }
   0xc   :  { %26 = dma.hbm_to_vmem [thread:$0]  %s22_s15, 32, %s24_s18, [#allocation3]  }
   0xd   :  { %s64_s23 = sshll.u32 %s3933_s4, 4  ;;  %s3762_s24 = smov [#allocation6]   ;;  %s65_s23 = int_to_ptr.hbm [resolvable:$true] %s64_s23 }
   0xe   :  { %s45_s0 = sshll.u32 %s3762_s24, 4  ;;  %s3763_s25 = smov [#allocation9]   ;;  %s46_s0 = int_to_ptr.vmem [resolvable:$true] %s45_s0 }
   0xf   :  { %48 = dma.hbm_to_vmem [thread:$0]  %s44_s21, 64, %s46_s0, [#allocation5]  }
  0x10   :  { %s66_s26 = sshll.u32 %s3763_s25, 4  ;;  %s3764_s27 = smov 512   ;;  %s67_s26 = int_to_ptr.vmem [resolvable:$true] %s66_s26 }
  0x11   :  { %s3765_s28 = smov 32   ;;  %s89_s30 = sshll.u32 %s3935_s6, 4  ;;  %s90_s30 = int_to_ptr.hbm [resolvable:$true] %s89_s30 }
  0x12   :  { %72 = dma.hbm_to_vmem [thread:$0]  %s65_s23, 32768, %s67_s26, [#allocation8], %s3764_s27, %s3764_s27, %s3765_s28  }
  0x13   :  { %s3766_s8 = smov [#allocation12]  }
  0x14   :  { %s91_s9 = sshll.u32 %s3766_s8, 4  ;;  %s92_s9 = int_to_ptr.vmem [resolvable:$true] %s91_s9 }
  0x15   :  { %94 = dma.hbm_to_vmem [thread:$0]  %s90_s30, 128, %s92_s9, [#allocation11]  }
  0x16   :  { %3750 = dma.done.wait [#allocation3], 32  }
  0x17   :  { %3751 = vsyncadd [#allocation3], 4294967264 }
  0x18   :  { %3752 = dma.done.wait [#allocation5], 320  }
  0x19   :  { %3753 = vsyncadd [#allocation5], 4294966976 }
  0x1a   :  { %3754 = dma.done.wait [#allocation8], 32832  }
  0x1b   :  { %3755 = vsyncadd [#allocation8], 4294934464 }
  0x1c   :  { %3756 = dma.done.wait [#allocation11], 256  }
  0x1d   :  { %3757 = vsyncadd [#allocation11], 4294967040  ;;  %v126_v0 = vld [vmem:[#allocation4] sm:$0xff]  ;;  %v127_v1 = vld [vmem:[#allocation4 + $0x8] sm:$0xff]  ;;  %vm142_vm0 = vcmask 1043456   ;;  %vm138_vm1 = vcmask 64512  }
  0x1e   :  { %v124_v2 = vld [vmem:[#allocation2] sm:$0x3]  ;;  %v130_v3 = vunpack.c.l.b16 %v126_v0  ;;  %v131_v4 = vunpack.c.h.b16 %v126_v0  ;;  %v132_v5 = vunpack.c.l.b16 %v127_v1  ;;  %v133_v6 = vunpack.c.h.b16 %v127_v1  ;;  %v2519_v7 = vld [vmem:[#allocation9 + $0x1c0] sm:$0xf] }
  0x1f   :  { %v3377_v8 = vld [vmem:[#allocation9 + $0x1dc] sm:$0xf0]  ;;  %v125_v19 = vpack.c.bf16 %v124_v2, %v124_v2  ;;  %vm2269_vm2 = vcmask 1041408   ;;  %vm2271_vm3 = vcmask 1045508  }
  0x20   :  { %v2775_v9 = vld [vmem:[#allocation9 + $0x3c0] sm:$0xf]  ;;  %v134_v11 = vpack.c.b16 %v130_v3, %v130_v3  ;;  %v135_v12 = vpack.c.b16 %v131_v4, %v131_v4  ;;  %v136_v13 = vpack.c.b16 %v132_v5, %v132_v5  ;;  %v137_v14 = vpack.c.b16 %v133_v6, %v133_v6 }
  0x21   :  { %v3441_v10 = vld [vmem:[#allocation9 + $0x3dc] sm:$0xf0]  ;;  %v2520_v20 = vor.u32 %v3377_v8, %v2519_v7 }
  0x22   :  { %v2487_v15 = vld [vmem:[#allocation9 + $0x180] sm:$0xf]  ;;  %v2776_v21 = vor.u32 %v3441_v10, %v2775_v9  ;;  %v144_v25 = vsel %vm142_vm0, %v134_v11, 0  ;;  %v147_v26 = vsel %vm142_vm0, %v135_v12, 0  ;;  %v150_v27 = vsel %vm142_vm0, %v136_v13, 0 }
  0x23   :  { %v3369_v16 = vld [vmem:[#allocation9 + $0x19c] sm:$0xf0]  ;;  %v153_v28 = vsel %vm142_vm0, %v137_v14, 0  ;;  %162 = vmatpush.bf16.msra.mxu0 %v144_v25  ;;  %175 = vmatpush.bf16.msra.mxu1 %v147_v26 }
  0x24   :  { %v2743_v17 = vld [vmem:[#allocation9 + $0x380] sm:$0xf]  ;;  %188 = vmatpush.bf16.msra.mxu2 %v150_v27  ;;  %201 = vmatpush.bf16.msra.mxu3 %v153_v28  ;;  %v2488_v34 = vor.u32 %v3369_v16, %v2487_v15 }
  0x25   :  { %v3031_v18 = vld [vmem:[#allocation9 + $0x5c0] sm:$0xf] }
  0x26   :  { %v3505_v22 = vld [vmem:[#allocation9 + $0x5dc] sm:$0xf0]  ;;  %2289 = vmatmul.msk.bf16.vlgmr.msra.gmra.mxu0 %vm138_vm1, %v125_v19  ;;  %2290 = vmatmul.msk.bf16.vlgmr.msra.gmra.mxu1 %vm138_vm1, %v125_v19 }
  0x27   :  { %v3287_v23 = vld [vmem:[#allocation9 + $0x7c0] sm:$0xf]  ;;  %v3032_v30 = vor.u32 %v3505_v22, %v3031_v18  ;;  %1779 = vmatpush.bf16.msrb.mxu0 %v2520_v20  ;;  %1792 = vmatpush.bf16.msrb.mxu1 %v2776_v21 }
  0x28   :  { %v3569_v24 = vld [vmem:[#allocation9 + $0x7dc] sm:$0xf0]  ;;  %2291 = vmatmul.msk.bf16.vlgmr.msra.gmra.mxu2 %vm138_vm1, %v125_v19  ;;  %2292 = vmatmul.msk.bf16.vlgmr.msra.gmra.mxu3 %vm138_vm1, %v125_v19 }
  0x29   :  { %v3433_v29 = vld [vmem:[#allocation9 + $0x39c] sm:$0xf0]  ;;  %v3288_v31 = vor.u32 %v3569_v24, %v3287_v23  ;;  %1805 = vmatpush.bf16.msrb.mxu2 %v3032_v30 }
  0x2a   :  { %v2455_v32 = vld [vmem:[#allocation9 + $0x140] sm:$0xf]  ;;  %v2744_v35 = vor.u32 %v3433_v29, %v2743_v17 }
  0x2b   :  { %v2999_v33 = vld [vmem:[#allocation9 + $0x580] sm:$0xf]  ;;  %1818 = vmatpush.bf16.msrb.mxu3 %v3288_v31  ;;  %1780 = vmatpush.bf16.msrb.mxu0 %v2488_v34 }
  0x2c   :  { %v3497_v36 = vld [vmem:[#allocation9 + $0x59c] sm:$0xf0]  ;;  %1793 = vmatpush.bf16.msrb.mxu1 %v2744_v35 }
  0x2d   :  { %v3255_v37 = vld [vmem:[#allocation9 + $0x780] sm:$0xf]  ;;  %v3000_v42 = vor.u32 %v3497_v36, %v2999_v33 }
  0x2e   :  { %v3561_v38 = vld [vmem:[#allocation9 + $0x79c] sm:$0xf0] }
  0x2f   :  { %v3361_v39 = vld [vmem:[#allocation9 + $0x15c] sm:$0xf0]  ;;  %v3256_v43 = vor.u32 %v3561_v38, %v3255_v37  ;;  %1806 = vmatpush.bf16.msrb.mxu2 %v3000_v42  ;;  %v3373_v38 = vld [vmem:[#allocation9 + $0x1c4] sm:$0xf] }
  0x30   :  { %v2711_v40 = vld [vmem:[#allocation9 + $0x340] sm:$0xf]  ;;  %v2456_v46 = vor.u32 %v3361_v39, %v2455_v32  ;;  %v2521_v39 = vld [vmem:[#allocation9 + $0x1e0] sm:$0xf0] }
  0x31   :  { %v3425_v41 = vld [vmem:[#allocation9 + $0x35c] sm:$0xf0]  ;;  %1819 = vmatpush.bf16.msrb.mxu3 %v3256_v43 }
  0x32   :  { %v2423_v44 = vld [vmem:[#allocation9 + $0x100] sm:$0xf]  ;;  %v2712_v47 = vor.u32 %v3425_v41, %v2711_v40  ;;  %1781 = vmatpush.bf16.msrb.mxu0 %v2456_v46  ;;  %v3437_v40 = vld [vmem:[#allocation9 + $0x3c4] sm:$0xf] }
  0x33   :  { %v2967_v45 = vld [vmem:[#allocation9 + $0x540] sm:$0xf]  ;;  %v2777_v41 = vld [vmem:[#allocation9 + $0x3e0] sm:$0xf0] }
  0x34   :  { %v3489_v48 = vld [vmem:[#allocation9 + $0x55c] sm:$0xf0]  ;;  %1794 = vmatpush.bf16.msrb.mxu1 %v2712_v47 }
  0x35   :  { %v3223_v49 = vld [vmem:[#allocation9 + $0x740] sm:$0xf]  ;;  %v2968_v54 = vor.u32 %v3489_v48, %v2967_v45  ;;  %v3365_v48 = vld [vmem:[#allocation9 + $0x184] sm:$0xf] }
  0x36   :  { %v3553_v50 = vld [vmem:[#allocation9 + $0x75c] sm:$0xf0] }
  0x37   :  { %v3353_v51 = vld [vmem:[#allocation9 + $0x11c] sm:$0xf0]  ;;  %v3224_v55 = vor.u32 %v3553_v50, %v3223_v49  ;;  %1807 = vmatpush.bf16.msrb.mxu2 %v2968_v54  ;;  %v3033_v54 = vld [vmem:[#allocation9 + $0x5e0] sm:$0xf0] }
  0x38   :  { %v2679_v52 = vld [vmem:[#allocation9 + $0x300] sm:$0xf]  ;;  %v2424_v58 = vor.u32 %v3353_v51, %v2423_v44  ;;  %v3501_v51 = vld [vmem:[#allocation9 + $0x5c4] sm:$0xf] }
  0x39   :  { %v3417_v53 = vld [vmem:[#allocation9 + $0x31c] sm:$0xf0]  ;;  %1820 = vmatpush.bf16.msrb.mxu3 %v3224_v55  ;;  %v3565_v55 = vld [vmem:[#allocation9 + $0x7c4] sm:$0xf] }
  0x3a   :  { %v2391_v56 = vld [vmem:[#allocation9 + $0xc0] sm:$0xf]  ;;  %v2680_v59 = vor.u32 %v3417_v53, %v2679_v52  ;;  %1782 = vmatpush.bf16.msrb.mxu0 %v2424_v58  ;;  %v2524_v52 = vor.u32 %v3373_v38, %v2521_v39  ;;  %v2780_v53 = vor.u32 %v3437_v40, %v2777_v41  ;;  %v3429_v58 = vld [vmem:[#allocation9 + $0x384] sm:$0xf] }
  0x3b   :  { %v2935_v57 = vld [vmem:[#allocation9 + $0x500] sm:$0xf]  ;;  %v3333_v38 = vld [vmem:[#allocation9 + $0x84] sm:$0xf] }
  0x3c   :  { %v3481_v60 = vld [vmem:[#allocation9 + $0x51c] sm:$0xf0]  ;;  %1795 = vmatpush.bf16.msrb.mxu1 %v2680_v59  ;;  %v2745_v59 = vld [vmem:[#allocation9 + $0x3a0] sm:$0xf0] }
  0x3d   :  { %v3191_v61 = vld [vmem:[#allocation9 + $0x700] sm:$0xf]  ;;  %v2936_v2 = vor.u32 %v3481_v60, %v2935_v57  ;;  %v2489_v57 = vld [vmem:[#allocation9 + $0x1a0] sm:$0xf0] }
  0x3e   :  { %v3545_v62 = vld [vmem:[#allocation9 + $0x71c] sm:$0xf0]  ;;  %v2361_v39 = vld [vmem:[#allocation9 + $0xa0] sm:$0xf0] }
  0x3f   :  { %v3345_v63 = vld [vmem:[#allocation9 + $0xdc] sm:$0xf0]  ;;  %v3192_v3 = vor.u32 %v3545_v62, %v3191_v61  ;;  %1808 = vmatpush.bf16.msrb.mxu2 %v2936_v2  ;;  %v3036_v62 = vor.u32 %v3501_v51, %v3033_v54  ;;  %v2492_v2 = vor.u32 %v3365_v48, %v2489_v57  ;;  %v3397_v40 = vld [vmem:[#allocation9 + $0x284] sm:$0xf]  ;;  %v2364_v41 = vor.u32 %v3333_v38, %v2361_v39 }
  0x40   :  { %v2647_v0 = vld [vmem:[#allocation9 + $0x2c0] sm:$0xf]  ;;  %v2392_v6 = vor.u32 %v3345_v63, %v2391_v56  ;;  %v3289_v56 = vld [vmem:[#allocation9 + $0x7e0] sm:$0xf0] }
  0x41   :  { %v3409_v1 = vld [vmem:[#allocation9 + $0x2dc] sm:$0xf0]  ;;  %1821 = vmatpush.bf16.msrb.mxu3 %v3192_v3  ;;  %v3292_v63 = vor.u32 %v3565_v55, %v3289_v56  ;;  %v2748_v3 = vor.u32 %v3429_v58, %v2745_v59  ;;  %v3161_v48 = vld [vmem:[#allocation9 + $0x6e0] sm:$0xf0] }
  0x42   :  { %v2359_v4 = vld [vmem:[#allocation9 + $0x80] sm:$0xf]  ;;  %v2648_v7 = vor.u32 %v3409_v1, %v2647_v0  ;;  %1783 = vmatpush.bf16.msrb.mxu0 %v2392_v6  ;;  %v3357_v0 = vld [vmem:[#allocation9 + $0x144] sm:$0xf] }
  0x43   :  { %v2903_v5 = vld [vmem:[#allocation9 + $0x4c0] sm:$0xf]  ;;  %v3493_v1 = vld [vmem:[#allocation9 + $0x584] sm:$0xf] }
  0x44   :  { %v3473_v8 = vld [vmem:[#allocation9 + $0x4dc] sm:$0xf0]  ;;  %1796 = vmatpush.bf16.msrb.mxu1 %v2648_v7  ;;  %v3257_v6 = vld [vmem:[#allocation9 + $0x7a0] sm:$0xf0] }
  0x45   :  { %v3159_v9 = vld [vmem:[#allocation9 + $0x6c0] sm:$0xf]  ;;  %v2904_v14 = vor.u32 %v3473_v8, %v2903_v5  ;;  %v3557_v5 = vld [vmem:[#allocation9 + $0x784] sm:$0xf] }
  0x46   :  { %v3537_v10 = vld [vmem:[#allocation9 + $0x6dc] sm:$0xf0]  ;;  %v2457_v7 = vld [vmem:[#allocation9 + $0x160] sm:$0xf0] }
  0x47   :  { %v3337_v11 = vld [vmem:[#allocation9 + $0x9c] sm:$0xf0]  ;;  %v3160_v15 = vor.u32 %v3537_v10, %v3159_v9  ;;  %1809 = vmatpush.bf16.msrb.mxu2 %v2904_v14  ;;  %v3421_v8 = vld [vmem:[#allocation9 + $0x344] sm:$0xf]  ;;  %v2460_v14 = vor.u32 %v3357_v0, %v2457_v7 }
  0x48   :  { %v2615_v12 = vld [vmem:[#allocation9 + $0x280] sm:$0xf]  ;;  %v2360_v18 = vor.u32 %v3337_v11, %v2359_v4  ;;  %v3001_v4 = vld [vmem:[#allocation9 + $0x5a0] sm:$0xf0]  ;;  %v3260_v11 = vor.u32 %v3557_v5, %v3257_v6 }
  0x49   :  { %v3401_v13 = vld [vmem:[#allocation9 + $0x29c] sm:$0xf0]  ;;  %1822 = vmatpush.bf16.msrb.mxu3 %v3160_v15  ;;  %v2713_v9 = vld [vmem:[#allocation9 + $0x360] sm:$0xf0]  ;;  %v3004_v10 = vor.u32 %v3493_v1, %v3001_v4 }
  0x4a   :  { %v2327_v16 = vld [vmem:[#allocation9 + $0x40] sm:$0xf]  ;;  %v2616_v19 = vor.u32 %v3401_v13, %v2615_v12  ;;  %1784 = vmatpush.bf16.msrb.mxu0 %v2360_v18  ;;  %v3349_v12 = vld [vmem:[#allocation9 + $0x104] sm:$0xf]  ;;  %v2716_v15 = vor.u32 %v3421_v8, %v2713_v9 }
  0x4b   :  { %v2871_v17 = vld [vmem:[#allocation9 + $0x480] sm:$0xf]  ;;  %v3485_v13 = vld [vmem:[#allocation9 + $0x544] sm:$0xf] }
  0x4c   :  { %v3465_v20 = vld [vmem:[#allocation9 + $0x49c] sm:$0xf0]  ;;  %1797 = vmatpush.bf16.msrb.mxu1 %v2616_v19  ;;  %v3225_v18 = vld [vmem:[#allocation9 + $0x760] sm:$0xf0] }
  0x4d   :  { %v3127_v21 = vld [vmem:[#allocation9 + $0x680] sm:$0xf]  ;;  %v2872_v26 = vor.u32 %v3465_v20, %v2871_v17  ;;  %v3549_v17 = vld [vmem:[#allocation9 + $0x744] sm:$0xf] }
  0x4e   :  { %v3529_v22 = vld [vmem:[#allocation9 + $0x69c] sm:$0xf0]  ;;  %v2425_v19 = vld [vmem:[#allocation9 + $0x120] sm:$0xf0] }
  0x4f   :  { %v3329_v23 = vld [vmem:[#allocation9 + $0x5c] sm:$0xf0]  ;;  %v3128_v27 = vor.u32 %v3529_v22, %v3127_v21  ;;  %1810 = vmatpush.bf16.msrb.mxu2 %v2872_v26  ;;  %v3413_v20 = vld [vmem:[#allocation9 + $0x304] sm:$0xf]  ;;  %v2428_v26 = vor.u32 %v3349_v12, %v2425_v19 }
  0x50   :  { %v2583_v24 = vld [vmem:[#allocation9 + $0x240] sm:$0xf]  ;;  %v2328_v31 = vor.u32 %v3329_v23, %v2327_v16  ;;  %v2969_v16 = vld [vmem:[#allocation9 + $0x560] sm:$0xf0]  ;;  %v3228_v23 = vor.u32 %v3549_v17, %v3225_v18  ;;  %v221_v17 = vld [vmem:[#allocation7] sm:$0xf] }
  0x51   :  { %v3393_v25 = vld [vmem:[#allocation9 + $0x25c] sm:$0xf0]  ;;  %1823 = vmatpush.bf16.msrb.mxu3 %v3128_v27  ;;  %v2681_v21 = vld [vmem:[#allocation9 + $0x320] sm:$0xf0]  ;;  %v2972_v22 = vor.u32 %v3485_v13, %v2969_v16  ;;  %v207_v16 = vld [vmem:[#allocation6] sm:$0xf] }
  0x52   :  { %v2295_v28 = vld [vmem:[#allocation9] sm:$0xf]  ;;  %v2584_v32 = vor.u32 %v3393_v25, %v2583_v24  ;;  %1785 = vmatpush.bf16.msrb.mxu0 %v2328_v31  ;;  %v3341_v24 = vld [vmem:[#allocation9 + $0xc4] sm:$0xf]  ;;  %v2684_v27 = vor.u32 %v3413_v20, %v2681_v21  ;;  %v209_v18 = vperm.slane %v207_v16, 0  ;;  %v210_v19 = vperm.slane %v207_v16, 1 }
  0x53   :  { %v3321_v29 = vld [vmem:[#allocation9 + $0x1c] sm:$0xf0]  ;;  %v3477_v25 = vld [vmem:[#allocation9 + $0x504] sm:$0xf]  ;;  %v223_v20 = vperm.slane %v221_v17, 0  ;;  %v224_v21 = vperm.slane %v221_v17, 1 }
  0x54   :  { %v2839_v30 = vld [vmem:[#allocation9 + $0x440] sm:$0xf]  ;;  %1798 = vmatpush.bf16.msrb.mxu1 %v2584_v32  ;;  %v2296_v46 = vor.u32 %v3321_v29, %v2295_v28  ;;  %v2937_v28 = vld [vmem:[#allocation9 + $0x520] sm:$0xf0] }
  0x55   :  { %v3457_v33 = vld [vmem:[#allocation9 + $0x45c] sm:$0xf0]  ;;  %v3541_v29 = vld [vmem:[#allocation9 + $0x704] sm:$0xf] }
  0x56   :  { %v3095_v34 = vld [vmem:[#allocation9 + $0x640] sm:$0xf]  ;;  %v2840_v42 = vor.u32 %v3457_v33, %v2839_v30  ;;  %1786 = vmatpush.bf16.msrb.mxu0 %v2296_v46  ;;  %v3193_v30 = vld [vmem:[#allocation9 + $0x720] sm:$0xf0] }
  0x57   :  { %v3521_v35 = vld [vmem:[#allocation9 + $0x65c] sm:$0xf0]  ;;  %v2393_v31 = vld [vmem:[#allocation9 + $0xe0] sm:$0xf0] }
  0x58   :  { %v2551_v36 = vld [vmem:[#allocation9 + $0x200] sm:$0xf]  ;;  %v3096_v43 = vor.u32 %v3521_v35, %v3095_v34  ;;  %1811 = vmatpush.bf16.msrb.mxu2 %v2840_v42  ;;  %v3405_v32 = vld [vmem:[#allocation9 + $0x2c4] sm:$0xf]  ;;  %v2940_v34 = vor.u32 %v3477_v25, %v2937_v28  ;;  %v3196_v35 = vor.u32 %v3541_v29, %v3193_v30  ;;  %v3378_v29 = vld [vmem:[#allocation9 + $0x1e4] sm:$0xf0] }
  0x59   :  { %v3385_v37 = vld [vmem:[#allocation9 + $0x21c] sm:$0xf0]  ;;  %v2649_v33 = vld [vmem:[#allocation9 + $0x2e0] sm:$0xf0]  ;;  %v2783_v30 = vld [vmem:[#allocation9 + $0x3c8] sm:$0xf] }
  0x5a   :  { %v2807_v44 = vld [vmem:[#allocation9 + $0x400] sm:$0xf]  ;;  %v2552_v47 = vor.u32 %v3385_v37, %v2551_v36  ;;  %1824 = vmatpush.bf16.msrb.mxu3 %v3096_v43  ;;  %1831 = vmatpush.bf16.msra.mxu0 %v2524_v52  ;;  %v2396_v36 = vor.u32 %v3341_v24, %v2393_v31  ;;  %v2652_v37 = vor.u32 %v3405_v32, %v2649_v33  ;;  %v2617_v42 = vld [vmem:[#allocation9 + $0x2a0] sm:$0xf0]  ;;  %v3442_v31 = vld [vmem:[#allocation9 + $0x3e4] sm:$0xf0] }
  0x5b   :  { %v3449_v45 = vld [vmem:[#allocation9 + $0x41c] sm:$0xf0]  ;;  %v2620_v43 = vor.u32 %v3397_v40, %v2617_v42  ;;  %v2329_v51 = vld [vmem:[#allocation9 + $0x60] sm:$0xf0]  ;;  %v211_v32 = vperm.slane %v207_v16, 2  ;;  %v212_v33 = vperm.slane %v207_v16, 3  ;;  %v2784_v39 = vor.u32 %v3442_v31, %v2783_v30 }
  0x5c   :  { %v3063_v49 = vld [vmem:[#allocation9 + $0x600] sm:$0xf]  ;;  %v2808_v60 = vor.u32 %v3449_v45, %v2807_v44  ;;  %1799 = vmatpush.bf16.msrb.mxu1 %v2552_v47  ;;  %v3469_v44 = vld [vmem:[#allocation9 + $0x4c4] sm:$0xf]  ;;  %v2495_v40 = vld [vmem:[#allocation9 + $0x188] sm:$0xf] }
  0x5d   :  { %v3513_v50 = vld [vmem:[#allocation9 + $0x61c] sm:$0xf0]  ;;  %v2905_v45 = vld [vmem:[#allocation9 + $0x4e0] sm:$0xf0]  ;;  %v2687_v16 = vld [vmem:[#allocation9 + $0x308] sm:$0xf] }
  0x5e   :  { %v3064_v61 = vor.u32 %v3513_v50, %v3063_v49  ;;  %1812 = vmatpush.bf16.msrb.mxu2 %v2808_v60  ;;  %1832 = vmatpush.bf16.msra.mxu0 %v2492_v2  ;;  %v2908_v46 = vor.u32 %v3469_v44, %v2905_v45  ;;  %v3533_v47 = vld [vmem:[#allocation9 + $0x6c4] sm:$0xf] }
  0x5f   :  { %v3164_v49 = vor.u32 %v3533_v47, %v3161_v48  ;;  %v3325_v50 = vld [vmem:[#allocation9 + $0x44] sm:$0xf]  ;;  %v3434_v47 = vld [vmem:[#allocation9 + $0x3a4] sm:$0xf0] }
  0x60   :  { %1844 = vmatpush.bf16.msra.mxu1 %v2780_v53  ;;  %1825 = vmatpush.bf16.msrb.mxu3 %v3064_v61  ;;  %v2332_v52 = vor.u32 %v3325_v50, %v2329_v51  ;;  %v3389_v53 = vld [vmem:[#allocation9 + $0x244] sm:$0xf] }
  0x61   :  { %v2585_v54 = vld [vmem:[#allocation9 + $0x260] sm:$0xf0] }
  0x62   :  { %1857 = vmatpush.bf16.msra.mxu2 %v3036_v62  ;;  %1833 = vmatpush.bf16.msra.mxu0 %v2460_v14  ;;  %v2588_v55 = vor.u32 %v3389_v53, %v2585_v54  ;;  %v3461_v56 = vld [vmem:[#allocation9 + $0x484] sm:$0xf]  ;;  %v3039_v53 = vld [vmem:[#allocation9 + $0x5c8] sm:$0xf] }
  0x63   :  { %v2873_v57 = vld [vmem:[#allocation9 + $0x4a0] sm:$0xf0]  ;;  %v3506_v54 = vld [vmem:[#allocation9 + $0x5e4] sm:$0xf0] }
  0x64   :  { %1870 = vmatpush.bf16.msra.mxu3 %v3292_v63  ;;  %1845 = vmatpush.bf16.msra.mxu1 %v2748_v3  ;;  %v3525_v58 = vld [vmem:[#allocation9 + $0x684] sm:$0xf]  ;;  %v2876_v59 = vor.u32 %v3461_v56, %v2873_v57 }
  0x65   :  { %v3129_v60 = vld [vmem:[#allocation9 + $0x6a0] sm:$0xf0] }
  0x66   :  { %1858 = vmatpush.bf16.msra.mxu2 %v3004_v10  ;;  %1834 = vmatpush.bf16.msra.mxu0 %v2428_v26  ;;  %v3132_v61 = vor.u32 %v3525_v58, %v3129_v60  ;;  %v3317_v62 = vld [vmem:[#allocation9 + $0x4] sm:$0xf]  ;;  %v2527_v26 = vld [vmem:[#allocation9 + $0x1c8] sm:$0xf] }
  0x67   :  { %v2297_v63 = vld [vmem:[#allocation9 + $0x20] sm:$0xf0]  ;;  %v2528_v38 = vor.u32 %v3378_v29, %v2527_v26  ;;  %v2463_v60 = vld [vmem:[#allocation9 + $0x148] sm:$0xf] }
  0x68   :  { %1871 = vmatpush.bf16.msra.mxu3 %v3260_v11  ;;  %1846 = vmatpush.bf16.msra.mxu1 %v2716_v15  ;;  %v2300_v0 = vor.u32 %v3317_v62, %v2297_v63  ;;  %v3381_v1 = vld [vmem:[#allocation9 + $0x204] sm:$0xf]  ;;  %v2719_v62 = vld [vmem:[#allocation9 + $0x348] sm:$0xf] }
  0x69   :  { %v2553_v2 = vld [vmem:[#allocation9 + $0x220] sm:$0xf0]  ;;  %v3426_v63 = vld [vmem:[#allocation9 + $0x364] sm:$0xf0] }
  0x6a   :  { %1859 = vmatpush.bf16.msra.mxu2 %v2972_v22  ;;  %1835 = vmatpush.bf16.msra.mxu0 %v2396_v36  ;;  %v2556_v3 = vor.u32 %v3381_v1, %v2553_v2  ;;  %v3453_v4 = vld [vmem:[#allocation9 + $0x444] sm:$0xf]  ;;  %v225_v36 = vperm.slane %v221_v17, 2  ;;  %v3040_v2 = vor.u32 %v3506_v54, %v3039_v53  ;;  %v2399_v26 = vld [vmem:[#allocation9 + $0xc8] sm:$0xf] }
  0x6b   :  { %v2841_v5 = vld [vmem:[#allocation9 + $0x460] sm:$0xf0]  ;;  %v3410_v29 = vld [vmem:[#allocation9 + $0x2e4] sm:$0xf0] }
  0x6c   :  { %1872 = vmatpush.bf16.msra.mxu3 %v3228_v23  ;;  %1847 = vmatpush.bf16.msra.mxu1 %v2684_v27  ;;  %v2844_v6 = vor.u32 %v3453_v4, %v2841_v5  ;;  %v3517_v7 = vld [vmem:[#allocation9 + $0x644] sm:$0xf]  ;;  %v3007_v5 = vld [vmem:[#allocation9 + $0x588] sm:$0xf] }
  0x6d   :  { %v3097_v8 = vld [vmem:[#allocation9 + $0x660] sm:$0xf0]  ;;  %v3330_v53 = vld [vmem:[#allocation9 + $0x64] sm:$0xf0] }
  0x6e   :  { %1860 = vmatpush.bf16.msra.mxu2 %v2940_v34  ;;  %1836 = vmatpush.bf16.msra.mxu0 %v2364_v41  ;;  %v3100_v9 = vor.u32 %v3517_v7, %v3097_v8  ;;  %v3445_v10 = vld [vmem:[#allocation9 + $0x404] sm:$0xf]  ;;  %v3370_v41 = vld [vmem:[#allocation9 + $0x1a4] sm:$0xf0] }
  0x6f   :  { %v2809_v11 = vld [vmem:[#allocation9 + $0x420] sm:$0xf0]  ;;  %v2591_v54 = vld [vmem:[#allocation9 + $0x248] sm:$0xf] }
  0x70   :  { %1873 = vmatpush.bf16.msra.mxu3 %v3196_v35  ;;  %1848 = vmatpush.bf16.msra.mxu1 %v2652_v37  ;;  %v2812_v12 = vor.u32 %v3445_v10, %v2809_v11  ;;  %v3509_v13 = vld [vmem:[#allocation9 + $0x604] sm:$0xf]  ;;  %v226_v37 = vperm.slane %v221_v17, 3  ;;  %v3263_v10 = vld [vmem:[#allocation9 + $0x788] sm:$0xf] }
  0x71   :  { %v3065_v14 = vld [vmem:[#allocation9 + $0x620] sm:$0xf0]  ;;  %v3562_v11 = vld [vmem:[#allocation9 + $0x7a4] sm:$0xf0] }
  0x72   :  { %1861 = vmatpush.bf16.msra.mxu2 %v2908_v46  ;;  %1837 = vmatpush.bf16.msra.mxu0 %v2332_v52  ;;  %v3068_v15 = vor.u32 %v3509_v13, %v3065_v14  ;;  %v2751_v46 = vld [vmem:[#allocation9 + $0x388] sm:$0xf]  ;;  %v2496_v52 = vor.u32 %v3370_v41, %v2495_v40 }
  0x73   :  { %v2752_v58 = vor.u32 %v3434_v47, %v2751_v46  ;;  %v3418_v17 = vld [vmem:[#allocation9 + $0x324] sm:$0xf0] }
  0x74   :  { %1849 = vmatpush.bf16.msra.mxu1 %v2620_v43  ;;  %1874 = vmatpush.bf16.msra.mxu3 %v3164_v49  ;;  %v2623_v40 = vld [vmem:[#allocation9 + $0x288] sm:$0xf] }
  0x75   :  { %v3402_v41 = vld [vmem:[#allocation9 + $0x2a4] sm:$0xf0] }
  0x76   :  { %1862 = vmatpush.bf16.msra.mxu2 %v2876_v59  ;;  %1838 = vmatpush.bf16.msra.mxu0 %v2300_v0  ;;  %v3570_v59 = vld [vmem:[#allocation9 + $0x7e4] sm:$0xf0] }
  0x77   :  { %v2911_v46 = vld [vmem:[#allocation9 + $0x4c8] sm:$0xf] }
  0x78   :  { %1850 = vmatpush.bf16.msra.mxu1 %v2588_v55  ;;  %1875 = vmatpush.bf16.msra.mxu3 %v3132_v61  ;;  %v3295_v55 = vld [vmem:[#allocation9 + $0x7c8] sm:$0xf] }
  0x79   :  { %v3362_v61 = vld [vmem:[#allocation9 + $0x164] sm:$0xf0] }
  0x7a   :  { %1863 = vmatpush.bf16.msra.mxu2 %v2844_v6  ;;  %v2464_v4 = vor.u32 %v3362_v61, %v2463_v60  ;;  %v3498_v6 = vld [vmem:[#allocation9 + $0x5a4] sm:$0xf0] }
  0x7b   :  { %v3474_v47 = vld [vmem:[#allocation9 + $0x4e4] sm:$0xf0] }
  0x7c   :  { %1851 = vmatpush.bf16.msra.mxu1 %v2556_v3  ;;  %1876 = vmatpush.bf16.msra.mxu3 %v3100_v9  ;;  %v3296_v3 = vor.u32 %v3570_v59, %v3295_v55  ;;  %v2720_v9 = vor.u32 %v3426_v63, %v2719_v62  ;;  %v3394_v55 = vld [vmem:[#allocation9 + $0x264] sm:$0xf0] }
  0x7d   :  { %v3466_v59 = vld [vmem:[#allocation9 + $0x4a4] sm:$0xf0]  ;;  %v2592_v63 = vor.u32 %v3394_v55, %v2591_v54  ;;  %v3414_v54 = vld [vmem:[#allocation9 + $0x30c] sm:$0xf] }
  0x7e   :  { %1864 = vmatpush.bf16.msra.mxu2 %v2812_v12  ;;  %v2431_v12 = vld [vmem:[#allocation9 + $0x108] sm:$0xf]  ;;  %v2689_v55 = vld [vmem:[#allocation9 + $0x328] sm:$0xf0] }
  0x7f   :  { %v3135_v60 = vld [vmem:[#allocation9 + $0x688] sm:$0xf] }
  0x80   :  { %1877 = vmatpush.bf16.msra.mxu3 %v3068_v15  ;;  %v3354_v15 = vld [vmem:[#allocation9 + $0x124] sm:$0xf0] }
  0x81   :  { %v3530_v61 = vld [vmem:[#allocation9 + $0x6a4] sm:$0xf0] }
  0xa3   :  { %v164_v22 = vpop.f32.mrf.mxu0  ;;  %v177_v23 = vpop.f32.mrf.mxu1 }
  0xa4   :  { %v217_v24 = vmul.f32 %v209_v18, %v164_v22  ;;  %v218_v25 = vmul.f32 %v210_v19, %v177_v23  ;;  %v3008_v18 = vor.u32 %v3498_v6, %v3007_v5  ;;  %v3264_v19 = vor.u32 %v3562_v11, %v3263_v10  ;;  %v3490_v23 = vld [vmem:[#allocation9 + $0x564] sm:$0xf0]  ;;  %v2529_v5 = vld [vmem:[#allocation9 + $0x1e8] sm:$0xf0] }
  0xa5   :  { %v2688_v22 = vor.u32 %v3418_v17, %v2687_v16  ;;  %v3438_v10 = vld [vmem:[#allocation9 + $0x3cc] sm:$0xf] }
  0xa6   :  { %v231_v27 = vadd.f32 %v223_v20, %v217_v24  ;;  %v232_v28 = vadd.f32 %v224_v21, %v218_v25  ;;  %v2975_v20 = vld [vmem:[#allocation9 + $0x548] sm:$0xf]  ;;  %v2432_v21 = vor.u32 %v3354_v15, %v2431_v12  ;;  %v2785_v11 = vld [vmem:[#allocation9 + $0x3e8] sm:$0xf0] }
  0xa7   :  { %v3231_v24 = vld [vmem:[#allocation9 + $0x748] sm:$0xf]  ;;  %v2976_v30 = vor.u32 %v3490_v23, %v2975_v20  ;;  %v3366_v20 = vld [vmem:[#allocation9 + $0x18c] sm:$0xf] }
  0xa8   :  { %v235_v34 = vmax.f32 %v231_v27, 0.0  ;;  %v236_v35 = vmax.f32 %v232_v28, 0.0  ;;  %v3554_v25 = vld [vmem:[#allocation9 + $0x764] sm:$0xf0] }
  0xa9   :  { %v3346_v27 = vld [vmem:[#allocation9 + $0xe4] sm:$0xf0]  ;;  %v3232_v31 = vor.u32 %v3554_v25, %v3231_v24  ;;  %v2753_v25 = vld [vmem:[#allocation9 + $0x3a8] sm:$0xf0] }
  0xaa   :  { %v3836_v42 = vpack.c.bf16 %v235_v34, %v235_v34  ;;  %v3838_v43 = vpack.c.bf16 %v236_v35, %v236_v35  ;;  %v2655_v28 = vld [vmem:[#allocation9 + $0x2c8] sm:$0xf] }
  0xab   :  { %v190_v44 = vpop.f32.mrf.mxu2  ;;  %v203_v45 = vpop.f32.mrf.mxu3  ;;  %v3199_v34 = vld [vmem:[#allocation9 + $0x708] sm:$0xf] }
  0xac   :  { %v219_v48 = vmul.f32 %v211_v32, %v190_v44  ;;  %v220_v49 = vmul.f32 %v212_v33, %v203_v45  ;;  %v166_v50 = vpop.f32.mrf.mxu0  ;;  %v179_v51 = vpop.f32.mrf.mxu1  ;;  %1787 = vmatmul.bf16.vlgmr.msrb.gmra.mxu0 %v3836_v42  ;;  %1800 = vmatmul.bf16.vlgmr.msrb.gmra.mxu1 %v3838_v43  ;;  %v2943_v32 = vld [vmem:[#allocation9 + $0x508] sm:$0xf] }
  0xad   :  { %1883 = vmatpush.bf16.msrb.mxu0 %v2528_v38  ;;  %1896 = vmatpush.bf16.msrb.mxu1 %v2784_v39  ;;  %v3482_v33 = vld [vmem:[#allocation9 + $0x524] sm:$0xf0]  ;;  %v2624_v51 = vor.u32 %v3402_v41, %v2623_v40  ;;  %v3422_v40 = vld [vmem:[#allocation9 + $0x34c] sm:$0xf] }
  0xae   :  { %v233_v56 = vadd.f32 %v225_v36, %v219_v48  ;;  %v234_v57 = vadd.f32 %v226_v37, %v220_v49  ;;  %v3546_v35 = vld [vmem:[#allocation9 + $0x724] sm:$0xf0]  ;;  %v2400_v36 = vor.u32 %v3346_v27, %v2399_v26  ;;  %v2656_v37 = vor.u32 %v3410_v29, %v2655_v28  ;;  %v2721_v41 = vld [vmem:[#allocation9 + $0x368] sm:$0xf0] }
  0xaf   :  { %v2367_v38 = vld [vmem:[#allocation9 + $0x88] sm:$0xf]  ;;  %v2944_v44 = vor.u32 %v3482_v33, %v2943_v32  ;;  %v3200_v45 = vor.u32 %v3546_v35, %v3199_v34  ;;  %v3566_v32 = vld [vmem:[#allocation9 + $0x7cc] sm:$0xf] }
  0xb0   :  { %v237_v0 = vmax.f32 %v233_v56, 0.0  ;;  %v238_v1 = vmax.f32 %v234_v57, 0.0  ;;  %v3338_v39 = vld [vmem:[#allocation9 + $0xa4] sm:$0xf0]  ;;  %v2912_v56 = vor.u32 %v3474_v47, %v2911_v46  ;;  %v3297_v33 = vld [vmem:[#allocation9 + $0x7e8] sm:$0xf0] }
  0xb1   :  { %1884 = vmatpush.bf16.msrb.mxu0 %v2496_v52  ;;  %1897 = vmatpush.bf16.msrb.mxu1 %v2752_v58  ;;  %v3167_v48 = vld [vmem:[#allocation9 + $0x6c8] sm:$0xf]  ;;  %v2368_v50 = vor.u32 %v3338_v39, %v2367_v38  ;;  %v2465_v39 = vld [vmem:[#allocation9 + $0x168] sm:$0xf0] }
  0xb2   :  { %v3842_v7 = vpack.c.bf16 %v237_v0, %v237_v0  ;;  %v3844_v8 = vpack.c.bf16 %v238_v1, %v238_v1  ;;  %v3538_v49 = vld [vmem:[#allocation9 + $0x6e4] sm:$0xf0]  ;;  %v3494_v46 = vld [vmem:[#allocation9 + $0x58c] sm:$0xf] }
  0xb3   :  { %v192_v13 = vpop.f32.mrf.mxu2  ;;  %v205_v14 = vpop.f32.mrf.mxu3  ;;  %v2335_v52 = vld [vmem:[#allocation9 + $0x48] sm:$0xf]  ;;  %v3168_v57 = vor.u32 %v3538_v49, %v3167_v48  ;;  %v3009_v47 = vld [vmem:[#allocation9 + $0x5a8] sm:$0xf0] }
  0xb4   :  { %1813 = vmatmul.bf16.vlgmr.msrb.gmra.mxu2 %v3842_v7  ;;  %1826 = vmatmul.bf16.vlgmr.msrb.gmra.mxu3 %v3844_v8  ;;  %v2879_v58 = vld [vmem:[#allocation9 + $0x488] sm:$0xf]  ;;  %v2336_v62 = vor.u32 %v3330_v53, %v2335_v52  ;;  %v3558_v48 = vld [vmem:[#allocation9 + $0x78c] sm:$0xf] }
  0xb5   :  { %1909 = vmatpush.bf16.msrb.mxu2 %v3040_v2  ;;  %1922 = vmatpush.bf16.msrb.mxu3 %v3296_v3  ;;  %v2303_v0 = vld [vmem:[#allocation9 + $0x8] sm:$0xf]  ;;  %v2880_v6 = vor.u32 %v3466_v59, %v2879_v58  ;;  %v3265_v49 = vld [vmem:[#allocation9 + $0x7a8] sm:$0xf0] }
  0xb6   :  { %1885 = vmatpush.bf16.msrb.mxu0 %v2464_v4  ;;  %1898 = vmatpush.bf16.msrb.mxu1 %v2720_v9  ;;  %v3322_v1 = vld [vmem:[#allocation9 + $0x24] sm:$0xf0]  ;;  %v3374_v4 = vld [vmem:[#allocation9 + $0x1cc] sm:$0xf]  ;;  %v3136_v9 = vor.u32 %v3530_v61, %v3135_v60 }
  0xb7   :  { %v2559_v2 = vld [vmem:[#allocation9 + $0x208] sm:$0xf]  ;;  %v2304_v16 = vor.u32 %v3322_v1, %v2303_v0  ;;  %v3350_v52 = vld [vmem:[#allocation9 + $0x10c] sm:$0xf] }
  0xb8   :  { %v3386_v3 = vld [vmem:[#allocation9 + $0x224] sm:$0xf0]  ;;  %v2433_v53 = vld [vmem:[#allocation9 + $0x128] sm:$0xf0] }
  0xb9   :  { %1910 = vmatpush.bf16.msrb.mxu2 %v3008_v18  ;;  %1923 = vmatpush.bf16.msrb.mxu3 %v3264_v19  ;;  %v2847_v12 = vld [vmem:[#allocation9 + $0x448] sm:$0xf]  ;;  %v2560_v17 = vor.u32 %v3386_v3, %v2559_v2  ;;  %v2532_v18 = vor.u32 %v3374_v4, %v2529_v5  ;;  %v2788_v19 = vor.u32 %v3438_v10, %v2785_v11  ;;  %v3486_v58 = vld [vmem:[#allocation9 + $0x54c] sm:$0xf] }
  0xba   :  { %1886 = vmatpush.bf16.msrb.mxu0 %v2432_v21  ;;  %1899 = vmatpush.bf16.msrb.mxu1 %v2688_v22  ;;  %v3458_v13 = vld [vmem:[#allocation9 + $0x464] sm:$0xf0]  ;;  %v2497_v21 = vld [vmem:[#allocation9 + $0x1a8] sm:$0xf0] }
  0xbb   :  { %v3103_v14 = vld [vmem:[#allocation9 + $0x648] sm:$0xf]  ;;  %v3430_v22 = vld [vmem:[#allocation9 + $0x38c] sm:$0xf]  ;;  %v2848_v23 = vor.u32 %v3458_v13, %v2847_v12  ;;  %v2500_v34 = vor.u32 %v3366_v20, %v2497_v21 }
  0xbc   :  { %1839 = vmatmul.bf16.vlgmr.msra.gmra.mxu0 %v3836_v42  ;;  %1852 = vmatmul.bf16.vlgmr.msra.gmra.mxu1 %v3838_v43  ;;  %v3522_v15 = vld [vmem:[#allocation9 + $0x664] sm:$0xf0]  ;;  %v2756_v35 = vor.u32 %v3430_v22, %v2753_v25  ;;  %v2977_v59 = vld [vmem:[#allocation9 + $0x568] sm:$0xf0] }
  0xbd   :  { %1911 = vmatpush.bf16.msrb.mxu2 %v2976_v30  ;;  %1924 = vmatpush.bf16.msrb.mxu3 %v3232_v31  ;;  %v3104_v24 = vor.u32 %v3522_v15, %v3103_v14  ;;  %v2815_v26 = vld [vmem:[#allocation9 + $0x408] sm:$0xf]  ;;  %v3502_v30 = vld [vmem:[#allocation9 + $0x5cc] sm:$0xf]  ;;  %v2980_v4 = vor.u32 %v3486_v58, %v2977_v59  ;;  %v2503_v58 = vld [vmem:[#allocation9 + $0x190] sm:$0xf] }
  0xbe   :  { %1887 = vmatpush.bf16.msrb.mxu0 %v2400_v36  ;;  %1900 = vmatpush.bf16.msrb.mxu1 %v2656_v37  ;;  %v3450_v27 = vld [vmem:[#allocation9 + $0x424] sm:$0xf0]  ;;  %v3041_v31 = vld [vmem:[#allocation9 + $0x5e8] sm:$0xf0]  ;;  %v3371_v59 = vld [vmem:[#allocation9 + $0x1ac] sm:$0xf0] }
  0xbf   :  { %v3071_v28 = vld [vmem:[#allocation9 + $0x608] sm:$0xf]  ;;  %v3358_v36 = vld [vmem:[#allocation9 + $0x14c] sm:$0xf]  ;;  %v2816_v37 = vor.u32 %v3450_v27, %v2815_v26 }
  0xc0   :  { %v3514_v29 = vld [vmem:[#allocation9 + $0x624] sm:$0xf0]  ;;  %v3550_v60 = vld [vmem:[#allocation9 + $0x74c] sm:$0xf] }
  0xc1   :  { %1912 = vmatpush.bf16.msrb.mxu2 %v2944_v44  ;;  %1925 = vmatpush.bf16.msrb.mxu3 %v3200_v45  ;;  %v3072_v38 = vor.u32 %v3514_v29, %v3071_v28  ;;  %v3044_v44 = vor.u32 %v3502_v30, %v3041_v31  ;;  %v3300_v45 = vor.u32 %v3566_v32, %v3297_v33  ;;  %v3233_v61 = vld [vmem:[#allocation9 + $0x768] sm:$0xf0] }
  0xc2   :  { %1888 = vmatpush.bf16.msrb.mxu0 %v2368_v50  ;;  %1901 = vmatpush.bf16.msrb.mxu1 %v2624_v51  ;;  %v2468_v50 = vor.u32 %v3358_v36, %v2465_v39  ;;  %v2724_v51 = vor.u32 %v3422_v40, %v2721_v41  ;;  %v3342_v0 = vld [vmem:[#allocation9 + $0xcc] sm:$0xf]  ;;  %v3236_v5 = vor.u32 %v3550_v60, %v3233_v61  ;;  %v2759_v60 = vld [vmem:[#allocation9 + $0x390] sm:$0xf] }
  0xc3   :  { %v2401_v1 = vld [vmem:[#allocation9 + $0xe8] sm:$0xf0] }
  0xc4   :  { %1865 = vmatmul.bf16.vlgmr.msra.gmra.mxu2 %v3842_v7  ;;  %1878 = vmatmul.bf16.vlgmr.msra.gmra.mxu3 %v3844_v8  ;;  %v3406_v2 = vld [vmem:[#allocation9 + $0x2cc] sm:$0xf]  ;;  %v2404_v12 = vor.u32 %v3342_v0, %v2401_v1 }
  0xc5   :  { %1913 = vmatpush.bf16.msrb.mxu2 %v2912_v56  ;;  %1926 = vmatpush.bf16.msrb.mxu3 %v3168_v57  ;;  %v3012_v56 = vor.u32 %v3494_v46, %v3009_v47  ;;  %v3268_v57 = vor.u32 %v3558_v48, %v3265_v49  ;;  %v2657_v3 = vld [vmem:[#allocation9 + $0x2e8] sm:$0xf0]  ;;  %v2791_v48 = vld [vmem:[#allocation9 + $0x3d0] sm:$0xf] }
  0xc6   :  { %1889 = vmatpush.bf16.msrb.mxu0 %v2336_v62  ;;  %1902 = vmatpush.bf16.msrb.mxu1 %v2592_v63  ;;  %v2436_v62 = vor.u32 %v3350_v52, %v2433_v53  ;;  %v2692_v63 = vor.u32 %v3414_v54, %v2689_v55  ;;  %v3542_v10 = vld [vmem:[#allocation9 + $0x70c] sm:$0xf]  ;;  %v2660_v13 = vor.u32 %v3406_v2, %v2657_v3  ;;  %v3443_v49 = vld [vmem:[#allocation9 + $0x3ec] sm:$0xf0] }
  0xc7   :  { %v3201_v11 = vld [vmem:[#allocation9 + $0x728] sm:$0xf0] }
  0xc8   :  { %v3334_v14 = vld [vmem:[#allocation9 + $0x8c] sm:$0xf] }
  0xc9   :  { %1914 = vmatpush.bf16.msrb.mxu2 %v2880_v6  ;;  %1927 = vmatpush.bf16.msrb.mxu3 %v3136_v9  ;;  %v3478_v6 = vld [vmem:[#allocation9 + $0x50c] sm:$0xf] }
  0xca   :  { %1890 = vmatpush.bf16.msrb.mxu0 %v2304_v16  ;;  %1903 = vmatpush.bf16.msrb.mxu1 %v2560_v17  ;;  %v2945_v9 = vld [vmem:[#allocation9 + $0x528] sm:$0xf0] }
  0xcb   :  { %v2369_v15 = vld [vmem:[#allocation9 + $0xa8] sm:$0xf0] }
  0xcc   :  { %v3398_v16 = vld [vmem:[#allocation9 + $0x28c] sm:$0xf] }
  0xcd   :  { %1915 = vmatpush.bf16.msrb.mxu2 %v2848_v23  ;;  %1928 = vmatpush.bf16.msrb.mxu3 %v3104_v24  ;;  %v2625_v17 = vld [vmem:[#allocation9 + $0x2a8] sm:$0xf0]  ;;  %v2372_v24 = vor.u32 %v3334_v14, %v2369_v15  ;;  %v2471_v14 = vld [vmem:[#allocation9 + $0x150] sm:$0xf] }
  0xce   :  { %1935 = vmatpush.bf16.msra.mxu0 %v2532_v18  ;;  %1948 = vmatpush.bf16.msra.mxu1 %v2788_v19  ;;  %v2948_v18 = vor.u32 %v3478_v6, %v2945_v9  ;;  %v3204_v19 = vor.u32 %v3542_v10, %v3201_v11  ;;  %v3470_v20 = vld [vmem:[#allocation9 + $0x4cc] sm:$0xf]  ;;  %v2628_v25 = vor.u32 %v3398_v16, %v2625_v17  ;;  %v3303_v6 = vld [vmem:[#allocation9 + $0x7d0] sm:$0xf] }
  0xcf   :  { %1891 = vmatmul.bf16.vlgmr.msrb.gmra.mxu0 %v3836_v42  ;;  %1904 = vmatmul.bf16.vlgmr.msrb.gmra.mxu1 %v3838_v43  ;;  %v2913_v21 = vld [vmem:[#allocation9 + $0x4e8] sm:$0xf0]  ;;  %v3571_v9 = vld [vmem:[#allocation9 + $0x7ec] sm:$0xf0]  ;;  %v2504_v10 = vor.u32 %v3371_v59, %v2503_v58 }
  0xd0   :  { %v3534_v22 = vld [vmem:[#allocation9 + $0x6cc] sm:$0xf]  ;;  %v2916_v30 = vor.u32 %v3470_v20, %v2913_v21  ;;  %v3363_v15 = vld [vmem:[#allocation9 + $0x16c] sm:$0xf0]  ;;  %v3304_v17 = vor.u32 %v3571_v9, %v3303_v6 }
  0xd1   :  { %1916 = vmatpush.bf16.msrb.mxu2 %v2816_v37  ;;  %1929 = vmatpush.bf16.msrb.mxu3 %v3072_v38  ;;  %v3169_v23 = vld [vmem:[#allocation9 + $0x6e8] sm:$0xf0]  ;;  %v3015_v20 = vld [vmem:[#allocation9 + $0x590] sm:$0xf] }
  0xd2   :  { %1936 = vmatpush.bf16.msra.mxu0 %v2500_v34  ;;  %1949 = vmatpush.bf16.msra.mxu1 %v2756_v35  ;;  %v3326_v26 = vld [vmem:[#allocation9 + $0x4c] sm:$0xf]  ;;  %v3172_v31 = vor.u32 %v3534_v22, %v3169_v23  ;;  %v3499_v21 = vld [vmem:[#allocation9 + $0x5ac] sm:$0xf0] }
  0xd3   :  { %v2337_v27 = vld [vmem:[#allocation9 + $0x68] sm:$0xf0]  ;;  %v3271_v22 = vld [vmem:[#allocation9 + $0x790] sm:$0xf] }
  0xd4   :  { %1917 = vmatmul.bf16.vlgmr.msrb.gmra.mxu2 %v3842_v7  ;;  %1930 = vmatmul.bf16.vlgmr.msrb.gmra.mxu3 %v3844_v8  ;;  %v3390_v28 = vld [vmem:[#allocation9 + $0x24c] sm:$0xf]  ;;  %v2340_v36 = vor.u32 %v3326_v26, %v2337_v27  ;;  %v3563_v23 = vld [vmem:[#allocation9 + $0x7ac] sm:$0xf0] }
  0xd5   :  { %1961 = vmatpush.bf16.msra.mxu2 %v3044_v44  ;;  %1974 = vmatpush.bf16.msra.mxu3 %v3300_v45  ;;  %v2593_v29 = vld [vmem:[#allocation9 + $0x268] sm:$0xf0]  ;;  %v2535_v44 = vld [vmem:[#allocation9 + $0x1d0] sm:$0xf] }
  0xd6   :  { %1937 = vmatpush.bf16.msra.mxu0 %v2468_v50  ;;  %1950 = vmatpush.bf16.msra.mxu1 %v2724_v51  ;;  %v3462_v32 = vld [vmem:[#allocation9 + $0x48c] sm:$0xf]  ;;  %v2596_v37 = vor.u32 %v3390_v28, %v2593_v29  ;;  %v3379_v45 = vld [vmem:[#allocation9 + $0x1ec] sm:$0xf0]  ;;  %v3016_v28 = vor.u32 %v3499_v21, %v3015_v20  ;;  %v3272_v29 = vor.u32 %v3563_v23, %v3271_v22  ;;  %v3375_v20 = vld [vmem:[#allocation9 + $0x1d4] sm:$0xf] }
  0xd7   :  { %v2881_v33 = vld [vmem:[#allocation9 + $0x4a8] sm:$0xf0]  ;;  %v2439_v26 = vld [vmem:[#allocation9 + $0x110] sm:$0xf]  ;;  %v2537_v21 = vld [vmem:[#allocation9 + $0x1f0] sm:$0xf0] }
  0xd8   :  { %v3526_v34 = vld [vmem:[#allocation9 + $0x68c] sm:$0xf]  ;;  %v2884_v46 = vor.u32 %v3462_v32, %v2881_v33  ;;  %v3355_v27 = vld [vmem:[#allocation9 + $0x12c] sm:$0xf0]  ;;  %v3439_v22 = vld [vmem:[#allocation9 + $0x3d4] sm:$0xf] }
  0xd9   :  { %1962 = vmatpush.bf16.msra.mxu2 %v3012_v56  ;;  %1975 = vmatpush.bf16.msra.mxu3 %v3268_v57  ;;  %v3137_v35 = vld [vmem:[#allocation9 + $0x6a8] sm:$0xf0]  ;;  %v2536_v56 = vor.u32 %v3379_v45, %v2535_v44  ;;  %v2792_v57 = vor.u32 %v3443_v49, %v2791_v48  ;;  %v2983_v32 = vld [vmem:[#allocation9 + $0x550] sm:$0xf]  ;;  %v2793_v23 = vld [vmem:[#allocation9 + $0x3f0] sm:$0xf0] }
  0xda   :  { %1938 = vmatpush.bf16.msra.mxu0 %v2436_v62  ;;  %1951 = vmatpush.bf16.msra.mxu1 %v2692_v63  ;;  %v3318_v38 = vld [vmem:[#allocation9 + $0xc] sm:$0xf]  ;;  %v3140_v47 = vor.u32 %v3526_v34, %v3137_v35  ;;  %v3435_v63 = vld [vmem:[#allocation9 + $0x3ac] sm:$0xf0] }
  0xdb   :  { %v2305_v39 = vld [vmem:[#allocation9 + $0x28] sm:$0xf0]  ;;  %v2760_v11 = vor.u32 %v3435_v63, %v2759_v60  ;;  %v3491_v33 = vld [vmem:[#allocation9 + $0x56c] sm:$0xf0] }
  0xdc   :  { %v3382_v40 = vld [vmem:[#allocation9 + $0x20c] sm:$0xf]  ;;  %v2308_v54 = vor.u32 %v3318_v38, %v2305_v39  ;;  %v3239_v34 = vld [vmem:[#allocation9 + $0x750] sm:$0xf] }
  0xdd   :  { %1963 = vmatpush.bf16.msra.mxu2 %v2980_v4  ;;  %1976 = vmatpush.bf16.msra.mxu3 %v3236_v5  ;;  %v2561_v41 = vld [vmem:[#allocation9 + $0x228] sm:$0xf0]  ;;  %v3047_v4 = vld [vmem:[#allocation9 + $0x5d0] sm:$0xf] }
  0xde   :  { %1939 = vmatpush.bf16.msra.mxu0 %v2404_v12  ;;  %1952 = vmatpush.bf16.msra.mxu1 %v2660_v13  ;;  %v3454_v50 = vld [vmem:[#allocation9 + $0x44c] sm:$0xf]  ;;  %v2564_v55 = vor.u32 %v3382_v40, %v2561_v41  ;;  %v3507_v5 = vld [vmem:[#allocation9 + $0x5ec] sm:$0xf0]  ;;  %v2984_v40 = vor.u32 %v3491_v33, %v2983_v32  ;;  %v3367_v32 = vld [vmem:[#allocation9 + $0x194] sm:$0xf] }
  0xdf   :  { %v2849_v51 = vld [vmem:[#allocation9 + $0x468] sm:$0xf0]  ;;  %v3048_v16 = vor.u32 %v3507_v5, %v3047_v4  ;;  %v3555_v35 = vld [vmem:[#allocation9 + $0x76c] sm:$0xf0]  ;;  %v2505_v33 = vld [vmem:[#allocation9 + $0x1b0] sm:$0xf0] }
  0xe0   :  { %v3518_v52 = vld [vmem:[#allocation9 + $0x64c] sm:$0xf]  ;;  %v2852_v61 = vor.u32 %v3454_v50, %v2849_v51  ;;  %v2407_v38 = vld [vmem:[#allocation9 + $0xd0] sm:$0xf]  ;;  %v3240_v41 = vor.u32 %v3555_v35, %v3239_v34  ;;  %v3431_v34 = vld [vmem:[#allocation9 + $0x394] sm:$0xf] }
  0xe1   :  { %1964 = vmatpush.bf16.msra.mxu2 %v2948_v18  ;;  %1977 = vmatpush.bf16.msra.mxu3 %v3204_v19  ;;  %v3105_v53 = vld [vmem:[#allocation9 + $0x668] sm:$0xf0]  ;;  %v2727_v18 = vld [vmem:[#allocation9 + $0x350] sm:$0xf] }
  0xe2   :  { %1940 = vmatpush.bf16.msra.mxu0 %v2372_v24  ;;  %1953 = vmatpush.bf16.msra.mxu1 %v2628_v25  ;;  %v3108_v62 = vor.u32 %v3518_v52, %v3105_v53  ;;  %v3446_v0 = vld [vmem:[#allocation9 + $0x40c] sm:$0xf]  ;;  %v3427_v19 = vld [vmem:[#allocation9 + $0x36c] sm:$0xf0]  ;;  %v2472_v24 = vor.u32 %v3363_v15, %v2471_v14 }
  0xe3   :  { %v2817_v1 = vld [vmem:[#allocation9 + $0x428] sm:$0xf0]  ;;  %v2728_v25 = vor.u32 %v3427_v19, %v2727_v18  ;;  %v3347_v39 = vld [vmem:[#allocation9 + $0xec] sm:$0xf0] }
  0xe4   :  { %v3510_v2 = vld [vmem:[#allocation9 + $0x60c] sm:$0xf]  ;;  %v2820_v12 = vor.u32 %v3446_v0, %v2817_v1  ;;  %v2663_v44 = vld [vmem:[#allocation9 + $0x2d0] sm:$0xf]  ;;  %v2408_v50 = vor.u32 %v3347_v39, %v2407_v38 }
  0xe5   :  { %1965 = vmatpush.bf16.msra.mxu2 %v2916_v30  ;;  %1978 = vmatpush.bf16.msra.mxu3 %v3172_v31  ;;  %v3073_v3 = vld [vmem:[#allocation9 + $0x628] sm:$0xf0]  ;;  %v2695_v30 = vld [vmem:[#allocation9 + $0x310] sm:$0xf] }
  0xe6   :  { %1941 = vmatpush.bf16.msra.mxu0 %v2340_v36  ;;  %1954 = vmatpush.bf16.msra.mxu1 %v2596_v37  ;;  %v3076_v13 = vor.u32 %v3510_v2, %v3073_v3  ;;  %v3419_v31 = vld [vmem:[#allocation9 + $0x32c] sm:$0xf0]  ;;  %v2440_v36 = vor.u32 %v3355_v27, %v2439_v26 }
  0xe7   :  { %v2696_v37 = vor.u32 %v3419_v31, %v2695_v30  ;;  %v3411_v45 = vld [vmem:[#allocation9 + $0x2ec] sm:$0xf0]  ;;  %v2540_v30 = vor.u32 %v3375_v20, %v2537_v21  ;;  %v2796_v31 = vor.u32 %v3439_v22, %v2793_v23  ;;  %v3479_v20 = vld [vmem:[#allocation9 + $0x514] sm:$0xf] }
  0xe8   :  { %v3207_v48 = vld [vmem:[#allocation9 + $0x710] sm:$0xf]  ;;  %v2664_v51 = vor.u32 %v3411_v45, %v2663_v44  ;;  %v3503_v44 = vld [vmem:[#allocation9 + $0x5d4] sm:$0xf] }
  0xe9   :  { %1966 = vmatpush.bf16.msra.mxu2 %v2884_v46  ;;  %1979 = vmatpush.bf16.msra.mxu3 %v3140_v47  ;;  %v2951_v46 = vld [vmem:[#allocation9 + $0x510] sm:$0xf]  ;;  %v3049_v45 = vld [vmem:[#allocation9 + $0x5f0] sm:$0xf0] }
  0xea   :  { %1942 = vmatpush.bf16.msra.mxu0 %v2308_v54  ;;  %1955 = vmatpush.bf16.msra.mxu1 %v2564_v55  ;;  %v3483_v47 = vld [vmem:[#allocation9 + $0x52c] sm:$0xf0]  ;;  %v2953_v21 = vld [vmem:[#allocation9 + $0x530] sm:$0xf0] }
  0xeb   :  { %v3547_v49 = vld [vmem:[#allocation9 + $0x72c] sm:$0xf0]  ;;  %v2952_v54 = vor.u32 %v3483_v47, %v2951_v46  ;;  %v3567_v46 = vld [vmem:[#allocation9 + $0x7d4] sm:$0xf] }
  0xec   :  { %v2375_v52 = vld [vmem:[#allocation9 + $0x90] sm:$0xf]  ;;  %v3208_v55 = vor.u32 %v3547_v49, %v3207_v48  ;;  %v3305_v47 = vld [vmem:[#allocation9 + $0x7f0] sm:$0xf0]  ;;  %v2508_v48 = vor.u32 %v3367_v32, %v2505_v33 }
  0xed   :  { %1967 = vmatpush.bf16.msra.mxu2 %v2852_v61  ;;  %1980 = vmatpush.bf16.msra.mxu3 %v3108_v62  ;;  %v3339_v53 = vld [vmem:[#allocation9 + $0xac] sm:$0xf0]  ;;  %v3543_v22 = vld [vmem:[#allocation9 + $0x714] sm:$0xf] }
  0xee   :  { %1987 = vmatpush.bf16.msrb.mxu0 %v2536_v56  ;;  %2000 = vmatpush.bf16.msrb.mxu1 %v2792_v57  ;;  %v2631_v56 = vld [vmem:[#allocation9 + $0x290] sm:$0xf]  ;;  %v2376_v62 = vor.u32 %v3339_v53, %v2375_v52  ;;  %v3359_v52 = vld [vmem:[#allocation9 + $0x154] sm:$0xf] }
  0xef   :  { %1943 = vmatmul.bf16.vlgmr.msra.gmra.mxu0 %v3836_v42  ;;  %1956 = vmatmul.bf16.vlgmr.msra.gmra.mxu1 %v3838_v43  ;;  %v3403_v57 = vld [vmem:[#allocation9 + $0x2ac] sm:$0xf0]  ;;  %v2473_v53 = vld [vmem:[#allocation9 + $0x170] sm:$0xf0] }
  0xf0   :  { %v2919_v58 = vld [vmem:[#allocation9 + $0x4d0] sm:$0xf]  ;;  %v2632_v63 = vor.u32 %v3403_v57, %v2631_v56  ;;  %v3423_v56 = vld [vmem:[#allocation9 + $0x354] sm:$0xf] }
  0xf1   :  { %1968 = vmatpush.bf16.msra.mxu2 %v2820_v12  ;;  %1981 = vmatpush.bf16.msra.mxu3 %v3076_v13  ;;  %v3475_v59 = vld [vmem:[#allocation9 + $0x4ec] sm:$0xf0]  ;;  %v2729_v57 = vld [vmem:[#allocation9 + $0x370] sm:$0xf0] }
  0xf2   :  { %1988 = vmatpush.bf16.msrb.mxu0 %v2504_v10  ;;  %2001 = vmatpush.bf16.msrb.mxu1 %v2760_v11  ;;  %v3175_v60 = vld [vmem:[#allocation9 + $0x6d0] sm:$0xf]  ;;  %v2920_v2 = vor.u32 %v3475_v59, %v2919_v58  ;;  %v3495_v58 = vld [vmem:[#allocation9 + $0x594] sm:$0xf] }
  0xf3   :  { %v3539_v61 = vld [vmem:[#allocation9 + $0x6ec] sm:$0xf0]  ;;  %v3017_v59 = vld [vmem:[#allocation9 + $0x5b0] sm:$0xf0] }
  0xf4   :  { %1969 = vmatmul.bf16.vlgmr.msra.gmra.mxu2 %v3842_v7  ;;  %1982 = vmatmul.bf16.vlgmr.msra.gmra.mxu3 %v3844_v8  ;;  %v2343_v0 = vld [vmem:[#allocation9 + $0x50] sm:$0xf]  ;;  %v3176_v3 = vor.u32 %v3539_v61, %v3175_v60  ;;  %v3559_v60 = vld [vmem:[#allocation9 + $0x794] sm:$0xf] }
  0xf5   :  { %2013 = vmatpush.bf16.msrb.mxu2 %v3048_v16  ;;  %2026 = vmatpush.bf16.msrb.mxu3 %v3304_v17  ;;  %v3331_v1 = vld [vmem:[#allocation9 + $0x6c] sm:$0xf0]  ;;  %v3273_v61 = vld [vmem:[#allocation9 + $0x7b0] sm:$0xf0] }
  0xf6   :  { %1989 = vmatpush.bf16.msrb.mxu0 %v2472_v24  ;;  %2002 = vmatpush.bf16.msrb.mxu1 %v2728_v25  ;;  %v2599_v4 = vld [vmem:[#allocation9 + $0x250] sm:$0xf]  ;;  %v2344_v12 = vor.u32 %v3331_v1, %v2343_v0  ;;  %v3351_v0 = vld [vmem:[#allocation9 + $0x114] sm:$0xf] }
  0xf7   :  { %v3395_v5 = vld [vmem:[#allocation9 + $0x26c] sm:$0xf0]  ;;  %v2441_v1 = vld [vmem:[#allocation9 + $0x130] sm:$0xf0] }
  0xf8   :  { %v2887_v6 = vld [vmem:[#allocation9 + $0x490] sm:$0xf]  ;;  %v2600_v13 = vor.u32 %v3395_v5, %v2599_v4  ;;  %v3415_v4 = vld [vmem:[#allocation9 + $0x314] sm:$0xf] }
  0xf9   :  { %2014 = vmatpush.bf16.msrb.mxu2 %v3016_v28  ;;  %2027 = vmatpush.bf16.msrb.mxu3 %v3272_v29  ;;  %v3467_v9 = vld [vmem:[#allocation9 + $0x4ac] sm:$0xf0]  ;;  %v2697_v5 = vld [vmem:[#allocation9 + $0x330] sm:$0xf0] }
  0xfa   :  { %1990 = vmatpush.bf16.msrb.mxu0 %v2440_v36  ;;  %2003 = vmatpush.bf16.msrb.mxu1 %v2696_v37  ;;  %v3143_v10 = vld [vmem:[#allocation9 + $0x690] sm:$0xf]  ;;  %v2888_v17 = vor.u32 %v3467_v9, %v2887_v6  ;;  %v2761_v37 = vld [vmem:[#allocation9 + $0x3b0] sm:$0xf0] }
  0xfb   :  { %v3531_v11 = vld [vmem:[#allocation9 + $0x6ac] sm:$0xf0]  ;;  %v2764_v49 = vor.u32 %v3431_v34, %v2761_v37  ;;  %v3487_v6 = vld [vmem:[#allocation9 + $0x554] sm:$0xf] }
  0xfc   :  { %v2311_v14 = vld [vmem:[#allocation9 + $0x10] sm:$0xf]  ;;  %v3144_v18 = vor.u32 %v3531_v11, %v3143_v10  ;;  %v2985_v9 = vld [vmem:[#allocation9 + $0x570] sm:$0xf0] }
  0xfd   :  { %2015 = vmatpush.bf16.msrb.mxu2 %v2984_v40  ;;  %2028 = vmatpush.bf16.msrb.mxu3 %v3240_v41  ;;  %v3323_v15 = vld [vmem:[#allocation9 + $0x2c] sm:$0xf0]  ;;  %v3551_v10 = vld [vmem:[#allocation9 + $0x754] sm:$0xf] }
  0xfe   :  { %1991 = vmatpush.bf16.msrb.mxu0 %v2408_v50  ;;  %2004 = vmatpush.bf16.msrb.mxu1 %v2664_v51  ;;  %v2567_v16 = vld [vmem:[#allocation9 + $0x210] sm:$0xf]  ;;  %v2312_v28 = vor.u32 %v3323_v15, %v2311_v14  ;;  %v3241_v11 = vld [vmem:[#allocation9 + $0x770] sm:$0xf0] }
  0xff   :  { %v3387_v19 = vld [vmem:[#allocation9 + $0x22c] sm:$0xf0]  ;;  %v3343_v14 = vld [vmem:[#allocation9 + $0xd4] sm:$0xf] }
 0x100   :  { %v2855_v24 = vld [vmem:[#allocation9 + $0x450] sm:$0xf]  ;;  %v2568_v29 = vor.u32 %v3387_v19, %v2567_v16  ;;  %v2409_v15 = vld [vmem:[#allocation9 + $0xf0] sm:$0xf0]  ;;  %v2988_v16 = vor.u32 %v3487_v6, %v2985_v9  ;;  %v2511_v6 = vld [vmem:[#allocation9 + $0x198] sm:$0xf] }
 0x101   :  { %2016 = vmatpush.bf16.msrb.mxu2 %v2952_v54  ;;  %2029 = vmatpush.bf16.msrb.mxu3 %v3208_v55  ;;  %v3459_v25 = vld [vmem:[#allocation9 + $0x46c] sm:$0xf0]  ;;  %v3052_v54 = vor.u32 %v3503_v44, %v3049_v45  ;;  %v3308_v55 = vor.u32 %v3567_v46, %v3305_v47  ;;  %v2665_v19 = vld [vmem:[#allocation9 + $0x2f0] sm:$0xf0]  ;;  %v3372_v9 = vld [vmem:[#allocation9 + $0x1b4] sm:$0xf0] }
 0x102   :  { %1992 = vmatpush.bf16.msrb.mxu0 %v2376_v62  ;;  %2005 = vmatpush.bf16.msrb.mxu1 %v2632_v63  ;;  %v3111_v26 = vld [vmem:[#allocation9 + $0x650] sm:$0xf]  ;;  %v2856_v35 = vor.u32 %v3459_v25, %v2855_v24  ;;  %v2476_v62 = vor.u32 %v3359_v52, %v2473_v53  ;;  %v2732_v63 = vor.u32 %v3423_v56, %v2729_v57  ;;  %v3209_v23 = vld [vmem:[#allocation9 + $0x730] sm:$0xf0] }
 0x103   :  { %v3523_v27 = vld [vmem:[#allocation9 + $0x66c] sm:$0xf0]  ;;  %v2412_v24 = vor.u32 %v3343_v14, %v2409_v15  ;;  %v3471_v32 = vld [vmem:[#allocation9 + $0x4d4] sm:$0xf] }
 0x104   :  { %v3112_v36 = vor.u32 %v3523_v27, %v3111_v26  ;;  %v2823_v38 = vld [vmem:[#allocation9 + $0x410] sm:$0xf]  ;;  %v3335_v26 = vld [vmem:[#allocation9 + $0x94] sm:$0xf] }
 0x105   :  { %2017 = vmatpush.bf16.msrb.mxu2 %v2920_v2  ;;  %2030 = vmatpush.bf16.msrb.mxu3 %v3176_v3  ;;  %v3451_v39 = vld [vmem:[#allocation9 + $0x42c] sm:$0xf0]  ;;  %v3020_v2 = vor.u32 %v3495_v58, %v3017_v59  ;;  %v3276_v3 = vor.u32 %v3559_v60, %v3273_v61  ;;  %v2377_v27 = vld [vmem:[#allocation9 + $0xb0] sm:$0xf0]  ;;  %v2543_v58 = vld [vmem:[#allocation9 + $0x1d8] sm:$0xf] }
 0x106   :  { %1993 = vmatpush.bf16.msrb.mxu0 %v2344_v12  ;;  %2006 = vmatpush.bf16.msrb.mxu1 %v2600_v13  ;;  %v3079_v40 = vld [vmem:[#allocation9 + $0x610] sm:$0xf]  ;;  %v2824_v50 = vor.u32 %v3451_v39, %v2823_v38  ;;  %v2444_v12 = vor.u32 %v3351_v0, %v2441_v1  ;;  %v2700_v13 = vor.u32 %v3415_v4, %v2697_v5  ;;  %v2921_v33 = vld [vmem:[#allocation9 + $0x4f0] sm:$0xf0]  ;;  %v3380_v59 = vld [vmem:[#allocation9 + $0x1f4] sm:$0xf0] }
 0x107   :  { %v3515_v41 = vld [vmem:[#allocation9 + $0x62c] sm:$0xf0]  ;;  %v3535_v34 = vld [vmem:[#allocation9 + $0x6d4] sm:$0xf]  ;;  %v2799_v60 = vld [vmem:[#allocation9 + $0x3d8] sm:$0xf]  ;;  %v2544_v4 = vor.u32 %v3380_v59, %v2543_v58 }
 0x108   :  { %v3080_v51 = vor.u32 %v3515_v41, %v3079_v40  ;;  %v3327_v38 = vld [vmem:[#allocation9 + $0x54] sm:$0xf]  ;;  %v2924_v40 = vor.u32 %v3471_v32, %v2921_v33  ;;  %v3444_v61 = vld [vmem:[#allocation9 + $0x3f4] sm:$0xf0] }
 0x109   :  { %2018 = vmatpush.bf16.msrb.mxu2 %v2888_v17  ;;  %2031 = vmatpush.bf16.msrb.mxu3 %v3144_v18  ;;  %v3244_v17 = vor.u32 %v3551_v10, %v3241_v11  ;;  %v3407_v18 = vld [vmem:[#allocation9 + $0x2d4] sm:$0xf]  ;;  %v2800_v5 = vor.u32 %v3444_v61, %v2799_v60  ;;  %v2767_v10 = vld [vmem:[#allocation9 + $0x398] sm:$0xf] }
 0x10a   :  { %1994 = vmatpush.bf16.msrb.mxu0 %v2312_v28  ;;  %2007 = vmatpush.bf16.msrb.mxu1 %v2568_v29  ;;  %v2668_v25 = vor.u32 %v3407_v18, %v2665_v19  ;;  %v2956_v28 = vor.u32 %v3479_v20, %v2953_v21  ;;  %v3212_v29 = vor.u32 %v3543_v22, %v3209_v23  ;;  %v2345_v39 = vld [vmem:[#allocation9 + $0x70] sm:$0xf0]  ;;  %v3055_v18 = vld [vmem:[#allocation9 + $0x5d8] sm:$0xf] }
 0x10b   :  { %v3391_v44 = vld [vmem:[#allocation9 + $0x254] sm:$0xf]  ;;  %v3508_v19 = vld [vmem:[#allocation9 + $0x5f4] sm:$0xf0]  ;;  %v2512_v22 = vor.u32 %v3372_v9, %v2511_v6 }
 0x10c   :  { %v2601_v45 = vld [vmem:[#allocation9 + $0x270] sm:$0xf0]  ;;  %v3311_v20 = vld [vmem:[#allocation9 + $0x7d8] sm:$0xf] }
 0x10d   :  { %2019 = vmatpush.bf16.msrb.mxu2 %v2856_v35  ;;  %2032 = vmatpush.bf16.msrb.mxu3 %v3112_v36  ;;  %v3177_v35 = vld [vmem:[#allocation9 + $0x6f0] sm:$0xf0]  ;;  %v2380_v36 = vor.u32 %v3335_v26, %v2377_v27  ;;  %v3572_v21 = vld [vmem:[#allocation9 + $0x7f4] sm:$0xf0] }
 0x10e   :  { %2039 = vmatpush.bf16.msra.mxu0 %v2540_v30  ;;  %2052 = vmatpush.bf16.msra.mxu1 %v2796_v31  ;;  %v3399_v30 = vld [vmem:[#allocation9 + $0x294] sm:$0xf]  ;;  %v3180_v41 = vor.u32 %v3535_v34, %v3177_v35  ;;  %v2479_v26 = vld [vmem:[#allocation9 + $0x158] sm:$0xf] }
 0x10f   :  { %1995 = vmatmul.bf16.vlgmr.msrb.gmra.mxu0 %v3836_v42  ;;  %2008 = vmatmul.bf16.vlgmr.msrb.gmra.mxu1 %v3838_v43  ;;  %v2633_v31 = vld [vmem:[#allocation9 + $0x2b0] sm:$0xf0]  ;;  %v3364_v27 = vld [vmem:[#allocation9 + $0x174] sm:$0xf0] }
 0x110   :  { %v2636_v37 = vor.u32 %v3399_v30, %v2633_v31  ;;  %v3463_v46 = vld [vmem:[#allocation9 + $0x494] sm:$0xf]  ;;  %v2735_v30 = vld [vmem:[#allocation9 + $0x358] sm:$0xf] }
 0x111   :  { %2020 = vmatpush.bf16.msrb.mxu2 %v2824_v50  ;;  %2033 = vmatpush.bf16.msrb.mxu3 %v3080_v51  ;;  %v2889_v47 = vld [vmem:[#allocation9 + $0x4b0] sm:$0xf0]  ;;  %v2348_v50 = vor.u32 %v3327_v38, %v2345_v39  ;;  %v2604_v51 = vor.u32 %v3391_v44, %v2601_v45  ;;  %v3428_v31 = vld [vmem:[#allocation9 + $0x374] sm:$0xf0] }
 0x112   :  { %2040 = vmatpush.bf16.msra.mxu0 %v2508_v48  ;;  %2053 = vmatpush.bf16.msra.mxu1 %v2764_v49  ;;  %v3527_v48 = vld [vmem:[#allocation9 + $0x694] sm:$0xf]  ;;  %v3023_v32 = vld [vmem:[#allocation9 + $0x598] sm:$0xf] }
 0x113   :  { %v3145_v49 = vld [vmem:[#allocation9 + $0x6b0] sm:$0xf0]  ;;  %v3500_v33 = vld [vmem:[#allocation9 + $0x5b4] sm:$0xf0] }
 0x114   :  { %2021 = vmatmul.bf16.vlgmr.msrb.gmra.mxu2 %v3842_v7  ;;  %2034 = vmatmul.bf16.vlgmr.msrb.gmra.mxu3 %v3844_v8  ;;  %v3319_v52 = vld [vmem:[#allocation9 + $0x14] sm:$0xf]  ;;  %v3148_v56 = vor.u32 %v3527_v48, %v3145_v49  ;;  %v3279_v34 = vld [vmem:[#allocation9 + $0x798] sm:$0xf]  ;;  %v3024_v45 = vor.u32 %v3500_v33, %v3023_v32 }
 0x115   :  { %2065 = vmatpush.bf16.msra.mxu2 %v3052_v54  ;;  %2078 = vmatpush.bf16.msra.mxu3 %v3308_v55  ;;  %v2313_v53 = vld [vmem:[#allocation9 + $0x30] sm:$0xf0]  ;;  %v2892_v55 = vor.u32 %v3463_v46, %v2889_v47  ;;  %v3564_v35 = vld [vmem:[#allocation9 + $0x7b4] sm:$0xf0] }
 0x116   :  { %2041 = vmatpush.bf16.msra.mxu0 %v2476_v62  ;;  %2054 = vmatpush.bf16.msra.mxu1 %v2732_v63  ;;  %v3383_v54 = vld [vmem:[#allocation9 + $0x214] sm:$0xf]  ;;  %v3280_v46 = vor.u32 %v3564_v35, %v3279_v34  ;;  %v2703_v47 = vld [vmem:[#allocation9 + $0x318] sm:$0xf] }
 0x117   :  { %v2569_v57 = vld [vmem:[#allocation9 + $0x230] sm:$0xf0]  ;;  %v3420_v48 = vld [vmem:[#allocation9 + $0x334] sm:$0xf0] }
 0x118   :  { %v3455_v62 = vld [vmem:[#allocation9 + $0x454] sm:$0xf]  ;;  %v2991_v49 = vld [vmem:[#allocation9 + $0x558] sm:$0xf] }
 0x119   :  { %2066 = vmatpush.bf16.msra.mxu2 %v3020_v2  ;;  %2079 = vmatpush.bf16.msra.mxu3 %v3276_v3  ;;  %v2857_v63 = vld [vmem:[#allocation9 + $0x470] sm:$0xf0]  ;;  %v2316_v2 = vor.u32 %v3319_v52, %v2313_v53  ;;  %v2572_v3 = vor.u32 %v3383_v54, %v2569_v57  ;;  %v3556_v52 = vld [vmem:[#allocation9 + $0x774] sm:$0xf0]  ;;  %v2704_v54 = vor.u32 %v3420_v48, %v2703_v47  ;;  %v3440_v47 = vld [vmem:[#allocation9 + $0x3dc] sm:$0xf] }
 0x11a   :  { %2042 = vmatpush.bf16.msra.mxu0 %v2444_v12  ;;  %2055 = vmatpush.bf16.msra.mxu1 %v2700_v13  ;;  %v3519_v0 = vld [vmem:[#allocation9 + $0x654] sm:$0xf]  ;;  %v2860_v11 = vor.u32 %v3455_v62, %v2857_v63  ;;  %v3436_v13 = vld [vmem:[#allocation9 + $0x3b4] sm:$0xf0]  ;;  %v2801_v48 = vld [vmem:[#allocation9 + $0x3f8] sm:$0xf0] }
 0x11b   :  { %v3113_v1 = vld [vmem:[#allocation9 + $0x670] sm:$0xf0]  ;;  %v2768_v23 = vor.u32 %v3436_v13, %v2767_v10  ;;  %v2671_v59 = vld [vmem:[#allocation9 + $0x2d8] sm:$0xf] }
 0x11c   :  { %v3116_v12 = vor.u32 %v3519_v0, %v3113_v1  ;;  %v3447_v14 = vld [vmem:[#allocation9 + $0x414] sm:$0xf]  ;;  %v3412_v60 = vld [vmem:[#allocation9 + $0x2f4] sm:$0xf0] }
 0x11d   :  { %2067 = vmatpush.bf16.msra.mxu2 %v2988_v16  ;;  %2080 = vmatpush.bf16.msra.mxu3 %v3244_v17  ;;  %v2825_v15 = vld [vmem:[#allocation9 + $0x430] sm:$0xf0]  ;;  %v2959_v61 = vld [vmem:[#allocation9 + $0x518] sm:$0xf] }
 0x11e   :  { %2043 = vmatpush.bf16.msra.mxu0 %v2412_v24  ;;  %2056 = vmatpush.bf16.msra.mxu1 %v2668_v25  ;;  %v3511_v16 = vld [vmem:[#allocation9 + $0x614] sm:$0xf]  ;;  %v2828_v24 = vor.u32 %v3447_v14, %v2825_v15  ;;  %v3484_v62 = vld [vmem:[#allocation9 + $0x534] sm:$0xf0] }
 0x11f   :  { %v3081_v17 = vld [vmem:[#allocation9 + $0x630] sm:$0xf0]  ;;  %v3215_v63 = vld [vmem:[#allocation9 + $0x718] sm:$0xf]  ;;  %v2960_v9 = vor.u32 %v3484_v62, %v2959_v61  ;;  %v3432_v61 = vld [vmem:[#allocation9 + $0x39c] sm:$0xf] }
 0x120   :  { %v3084_v25 = vor.u32 %v3511_v16, %v3081_v17  ;;  %v3548_v0 = vld [vmem:[#allocation9 + $0x734] sm:$0xf0] }
 0x121   :  { %2068 = vmatpush.bf16.msra.mxu2 %v2956_v28  ;;  %2081 = vmatpush.bf16.msra.mxu3 %v3212_v29  ;;  %v3056_v28 = vor.u32 %v3508_v19, %v3055_v18  ;;  %v3312_v29 = vor.u32 %v3572_v21, %v3311_v20  ;;  %v3340_v6 = vld [vmem:[#allocation9 + $0xb4] sm:$0xf0]  ;;  %v3216_v10 = vor.u32 %v3548_v0, %v3215_v63  ;;  %v2769_v0 = vld [vmem:[#allocation9 + $0x3b8] sm:$0xf0] }
 0x122   :  { %2044 = vmatpush.bf16.msra.mxu0 %v2380_v36  ;;  %2057 = vmatpush.bf16.msra.mxu1 %v2636_v37  ;;  %v2480_v36 = vor.u32 %v3364_v27, %v2479_v26  ;;  %v2736_v37 = vor.u32 %v3428_v31, %v2735_v30  ;;  %v2927_v13 = vld [vmem:[#allocation9 + $0x4d8] sm:$0xf] }
 0x123   :  { %v3476_v14 = vld [vmem:[#allocation9 + $0x4f4] sm:$0xf0] }
 0x124   :  { %v3183_v15 = vld [vmem:[#allocation9 + $0x6d8] sm:$0xf] }
 0x125   :  { %2069 = vmatpush.bf16.msra.mxu2 %v2924_v40  ;;  %2082 = vmatpush.bf16.msra.mxu3 %v3180_v41  ;;  %v2447_v40 = vld [vmem:[#allocation9 + $0x118] sm:$0xf] }
 0x126   :  { %2045 = vmatpush.bf16.msra.mxu0 %v2348_v50  ;;  %2058 = vmatpush.bf16.msra.mxu1 %v2604_v51  ;;  %v3356_v41 = vld [vmem:[#allocation9 + $0x134] sm:$0xf0] }
 0x127   :  { %v3492_v50 = vld [vmem:[#allocation9 + $0x574] sm:$0xf0]  ;;  %v2448_v53 = vor.u32 %v3356_v41, %v2447_v40 }
 0x128   :  { %v3247_v51 = vld [vmem:[#allocation9 + $0x758] sm:$0xf]  ;;  %v2992_v57 = vor.u32 %v3492_v50, %v2991_v49 }
 0x129   :  { %2070 = vmatpush.bf16.msra.mxu2 %v2892_v55  ;;  %2083 = vmatpush.bf16.msra.mxu3 %v3148_v56  ;;  %v1788_v38 = vpop.f32.mrf.mxu0  ;;  %v1801_v39 = vpop.f32.mrf.mxu1  ;;  %v2415_v55 = vld [vmem:[#allocation9 + $0xd8] sm:$0xf]  ;;  %v3248_v58 = vor.u32 %v3556_v52, %v3247_v51 }
 0x12a   :  { %2046 = vmatpush.bf16.msra.mxu0 %v2316_v2  ;;  %2059 = vmatpush.bf16.msra.mxu1 %v2572_v3  ;;  %v1802_v44 = vadd.f32 %v1801_v39, %v1788_v38  ;;  %v3348_v56 = vld [vmem:[#allocation9 + $0xf4] sm:$0xf0]  ;;  %v2672_v2 = vor.u32 %v3412_v60, %v2671_v59  ;;  %v3368_v59 = vld [vmem:[#allocation9 + $0x19c] sm:$0xf] }
 0x12b   :  { %v2416_v1 = vor.u32 %v3348_v56, %v2415_v55  ;;  %v3540_v16 = vld [vmem:[#allocation9 + $0x6f4] sm:$0xf0]  ;;  %v2513_v60 = vld [vmem:[#allocation9 + $0x1b8] sm:$0xf0] }
 0x12c   :  { %v2351_v19 = vld [vmem:[#allocation9 + $0x58] sm:$0xf] }
 0x12d   :  { %2071 = vmatpush.bf16.msra.mxu2 %v2860_v11  ;;  %2084 = vmatpush.bf16.msra.mxu3 %v3116_v12  ;;  %v2639_v11 = vld [vmem:[#allocation9 + $0x298] sm:$0xf] }
 0x12e   :  { %2091 = vmatpush.bf16.msrb.mxu0 %v2544_v4  ;;  %2104 = vmatpush.bf16.msrb.mxu1 %v2800_v5  ;;  %v2383_v5 = vld [vmem:[#allocation9 + $0x98] sm:$0xf] }
 0x12f   :  { %2047 = vmatmul.bf16.vlgmr.msra.gmra.mxu0 %v3836_v42  ;;  %2060 = vmatmul.bf16.vlgmr.msra.gmra.mxu1 %v3838_v43  ;;  %v3404_v12 = vld [vmem:[#allocation9 + $0x2b4] sm:$0xf0]  ;;  %v2384_v17 = vor.u32 %v3340_v6, %v2383_v5  ;;  %v3504_v5 = vld [vmem:[#allocation9 + $0x5dc] sm:$0xf] }
 0x130   :  { %v2640_v18 = vor.u32 %v3404_v12, %v2639_v11  ;;  %v3332_v20 = vld [vmem:[#allocation9 + $0x74] sm:$0xf0]  ;;  %v3057_v6 = vld [vmem:[#allocation9 + $0x5f8] sm:$0xf0] }
 0x131   :  { %2072 = vmatpush.bf16.msra.mxu2 %v2828_v24  ;;  %2085 = vmatpush.bf16.msra.mxu3 %v3084_v25  ;;  %v1790_v3 = vpop.f32.mrf.mxu0  ;;  %v1803_v4 = vpop.f32.mrf.mxu1  ;;  %v3184_v24 = vor.u32 %v3540_v16, %v3183_v15  ;;  %v2607_v25 = vld [vmem:[#allocation9 + $0x258] sm:$0xf]  ;;  %v2352_v33 = vor.u32 %v3332_v20, %v2351_v19  ;;  %v3060_v19 = vor.u32 %v3504_v5, %v3057_v6  ;;  %v2641_v5 = vld [vmem:[#allocation9 + $0x2b8] sm:$0xf0] }
 0x132   :  { %2092 = vmatpush.bf16.msrb.mxu0 %v2512_v22  ;;  %2105 = vmatpush.bf16.msrb.mxu1 %v2768_v23  ;;  %v2928_v23 = vor.u32 %v3476_v14, %v2927_v13  ;;  %v3396_v26 = vld [vmem:[#allocation9 + $0x274] sm:$0xf0]  ;;  %v2516_v13 = vor.u32 %v3368_v59, %v2513_v60  ;;  %v2772_v14 = vor.u32 %v3432_v61, %v2769_v0  ;;  %v3217_v59 = vld [vmem:[#allocation9 + $0x738] sm:$0xf0] }
 0x133   :  { %v2895_v27 = vld [vmem:[#allocation9 + $0x498] sm:$0xf]  ;;  %v2608_v34 = vor.u32 %v3396_v26, %v2607_v25  ;;  %v3560_v25 = vld [vmem:[#allocation9 + $0x79c] sm:$0xf] }
 0x134   :  { %2073 = vmatmul.bf16.vlgmr.msra.gmra.mxu2 %v3842_v7  ;;  %2086 = vmatmul.bf16.vlgmr.msra.gmra.mxu3 %v3844_v8  ;;  %v3151_v30 = vld [vmem:[#allocation9 + $0x698] sm:$0xf]  ;;  %v3281_v26 = vld [vmem:[#allocation9 + $0x7b8] sm:$0xf0] }
 0x135   :  { %2117 = vmatpush.bf16.msrb.mxu2 %v3056_v28  ;;  %2130 = vmatpush.bf16.msrb.mxu3 %v3312_v29  ;;  %v3468_v29 = vld [vmem:[#allocation9 + $0x4b4] sm:$0xf0]  ;;  %v3336_v0 = vld [vmem:[#allocation9 + $0x9c] sm:$0xf] }
 0x136   :  { %2093 = vmatpush.bf16.msrb.mxu0 %v2480_v36  ;;  %2106 = vmatpush.bf16.msrb.mxu1 %v2736_v37  ;;  %v3532_v31 = vld [vmem:[#allocation9 + $0x6b4] sm:$0xf0]  ;;  %v2896_v40 = vor.u32 %v3468_v29, %v2895_v27  ;;  %v3472_v6 = vld [vmem:[#allocation9 + $0x4dc] sm:$0xf] }
 0x137   :  { %v1814_v21 = vpop.f32.mrf.mxu2  ;;  %v1827_v22 = vpop.f32.mrf.mxu3  ;;  %v2319_v35 = vld [vmem:[#allocation9 + $0x18] sm:$0xf]  ;;  %v3152_v41 = vor.u32 %v3532_v31, %v3151_v30  ;;  %v3352_v31 = vld [vmem:[#allocation9 + $0x11c] sm:$0xf] }
 0x138   :  { %v1815_v28 = vadd.f32 %v1814_v21, %v1802_v44  ;;  %v3324_v36 = vld [vmem:[#allocation9 + $0x34] sm:$0xf0]  ;;  %v3424_v21 = vld [vmem:[#allocation9 + $0x35c] sm:$0xf] }
 0x139   :  { %2118 = vmatpush.bf16.msrb.mxu2 %v3024_v45  ;;  %2131 = vmatpush.bf16.msrb.mxu3 %v3280_v46  ;;  %v2575_v37 = vld [vmem:[#allocation9 + $0x218] sm:$0xf]  ;;  %v3870_v38 = vpop.f32.mrf.mxu0  ;;  %v3872_v39 = vpop.f32.mrf.mxu1  ;;  %v3376_v45 = vld [vmem:[#allocation9 + $0x1dc] sm:$0xf] }
 0x13a   :  { %2094 = vmatpush.bf16.msrb.mxu0 %v2448_v53  ;;  %2107 = vmatpush.bf16.msrb.mxu1 %v2704_v54  ;;  %v3868_v32 = vadd.f32 %v1827_v22, %v1815_v28  ;;  %v3388_v44 = vld [vmem:[#allocation9 + $0x234] sm:$0xf0]  ;;  %v2545_v46 = vld [vmem:[#allocation9 + $0x1f8] sm:$0xf0]  ;;  %v2320_v53 = vor.u32 %v3324_v36, %v2319_v35  ;;  %v3284_v35 = vor.u32 %v3560_v25, %v3281_v26 }
 0x13b   :  { %v2863_v49 = vld [vmem:[#allocation9 + $0x458] sm:$0xf]  ;;  %v2576_v54 = vor.u32 %v3388_v44, %v2575_v37  ;;  %v2737_v22 = vld [vmem:[#allocation9 + $0x378] sm:$0xf0] }
 0x13c   :  { %v3460_v50 = vld [vmem:[#allocation9 + $0x474] sm:$0xf0]  ;;  %v2740_v30 = vor.u32 %v3424_v21, %v2737_v22  ;;  %v3416_v36 = vld [vmem:[#allocation9 + $0x31c] sm:$0xf] }
 0x13d   :  { %2119 = vmatpush.bf16.msrb.mxu2 %v2992_v57  ;;  %2132 = vmatpush.bf16.msrb.mxu3 %v3248_v58  ;;  %v3119_v51 = vld [vmem:[#allocation9 + $0x658] sm:$0xf]  ;;  %v2548_v57 = vor.u32 %v3376_v45, %v2545_v46  ;;  %v2804_v58 = vor.u32 %v3440_v47, %v2801_v48  ;;  %v2864_v62 = vor.u32 %v3460_v50, %v2863_v49  ;;  %v2705_v37 = vld [vmem:[#allocation9 + $0x338] sm:$0xf0] }
 0x13e   :  { %2095 = vmatpush.bf16.msrb.mxu0 %v2416_v1  ;;  %2108 = vmatpush.bf16.msrb.mxu1 %v2672_v2  ;;  %v3524_v52 = vld [vmem:[#allocation9 + $0x674] sm:$0xf0]  ;;  %v3552_v44 = vld [vmem:[#allocation9 + $0x75c] sm:$0xf]  ;;  %v2708_v49 = vor.u32 %v3416_v36, %v2705_v37 }
 0x13f   :  { %v1816_v55 = vpop.f32.mrf.mxu2  ;;  %v1829_v56 = vpop.f32.mrf.mxu3  ;;  %v3120_v63 = vor.u32 %v3524_v52, %v3119_v51  ;;  %v2831_v1 = vld [vmem:[#allocation9 + $0x418] sm:$0xf]  ;;  %v3249_v45 = vld [vmem:[#allocation9 + $0x778] sm:$0xf0] }
 0x140   :  { %v3452_v2 = vld [vmem:[#allocation9 + $0x434] sm:$0xf0]  ;;  %v3344_v50 = vld [vmem:[#allocation9 + $0xdc] sm:$0xf] }
 0x141   :  { %2120 = vmatpush.bf16.msrb.mxu2 %v2960_v9  ;;  %2133 = vmatpush.bf16.msrb.mxu3 %v3216_v10  ;;  %v3087_v3 = vld [vmem:[#allocation9 + $0x618] sm:$0xf]  ;;  %v3568_v9 = vld [vmem:[#allocation9 + $0x7dc] sm:$0xf]  ;;  %v1842_v11 = vpop.f32.mrf.mxu0  ;;  %v1855_v12 = vpop.f32.mrf.mxu1  ;;  %v2832_v15 = vor.u32 %v3452_v2, %v2831_v1 }
 0x142   :  { %2096 = vmatpush.bf16.msrb.mxu0 %v2384_v17  ;;  %2109 = vmatpush.bf16.msrb.mxu1 %v2640_v18  ;;  %v3516_v4 = vld [vmem:[#allocation9 + $0x634] sm:$0xf0]  ;;  %v3313_v10 = vld [vmem:[#allocation9 + $0x7f8] sm:$0xf0] }
 0x143   :  { %v3088_v16 = vor.u32 %v3516_v4, %v3087_v3  ;;  %v3360_v17 = vld [vmem:[#allocation9 + $0x15c] sm:$0xf]  ;;  %v3316_v20 = vor.u32 %v3568_v9, %v3313_v10 }
 0x144   :  { %v2481_v18 = vld [vmem:[#allocation9 + $0x178] sm:$0xf0] }
 0x145   :  { %2121 = vmatpush.bf16.msrb.mxu2 %v2928_v23  ;;  %2134 = vmatpush.bf16.msrb.mxu3 %v3184_v24  ;;  %v3496_v23 = vld [vmem:[#allocation9 + $0x59c] sm:$0xf]  ;;  %v2484_v29 = vor.u32 %v3360_v17, %v2481_v18 }
 0x146   :  { %2097 = vmatpush.bf16.msrb.mxu0 %v2352_v33  ;;  %2110 = vmatpush.bf16.msrb.mxu1 %v2608_v34  ;;  %v3025_v24 = vld [vmem:[#allocation9 + $0x5b8] sm:$0xf0] }
 0x147   :  { %v3876_v27 = vpop.f32.mrf.mxu2  ;;  %v3878_v28 = vpop.f32.mrf.mxu3  ;;  %v2449_v33 = vld [vmem:[#allocation9 + $0x138] sm:$0xf0]  ;;  %v3028_v34 = vor.u32 %v3496_v23, %v3025_v24 }
 0x148   :  { %v2452_v48 = vor.u32 %v3352_v31, %v2449_v33  ;;  %v2417_v51 = vld [vmem:[#allocation9 + $0xf8] sm:$0xf0] }
 0x149   :  { %2122 = vmatpush.bf16.msrb.mxu2 %v2896_v40  ;;  %2135 = vmatpush.bf16.msrb.mxu3 %v3152_v41  ;;  %v3488_v40 = vld [vmem:[#allocation9 + $0x55c] sm:$0xf] }
 0x14a   :  { %2098 = vmatpush.bf16.msrb.mxu0 %v2320_v53  ;;  %2111 = vmatpush.bf16.msrb.mxu1 %v2576_v54  ;;  %v2993_v41 = vld [vmem:[#allocation9 + $0x578] sm:$0xf0]  ;;  %v3252_v53 = vor.u32 %v3552_v44, %v3249_v45 }
 0x14b   :  { %v2996_v52 = vor.u32 %v3488_v40, %v2993_v41  ;;  %v3408_v54 = vld [vmem:[#allocation9 + $0x2dc] sm:$0xf] }
 0x14c   :  { %v3882_v46 = vpop.f32.mrf.mxu0  ;;  %v3884_v47 = vpop.f32.mrf.mxu1  ;;  %v2673_v55 = vld [vmem:[#allocation9 + $0x2f8] sm:$0xf0] }
 0x14d   :  { %2123 = vmatpush.bf16.msrb.mxu2 %v2864_v62  ;;  %2136 = vmatpush.bf16.msrb.mxu3 %v3120_v63  ;;  %v3480_v56 = vld [vmem:[#allocation9 + $0x51c] sm:$0xf]  ;;  %v2420_v62 = vor.u32 %v3344_v50, %v2417_v51  ;;  %v2676_v63 = vor.u32 %v3408_v54, %v2673_v55 }
 0x14e   :  { %2143 = vmatpush.bf16.msra.mxu0 %v2548_v57  ;;  %2156 = vmatpush.bf16.msra.mxu1 %v2804_v58  ;;  %v2961_v57 = vld [vmem:[#allocation9 + $0x538] sm:$0xf0] }
 0x14f   :  { %2099 = vmatmul.bf16.vlgmr.msrb.gmra.mxu0 %v3836_v42  ;;  %2112 = vmatmul.bf16.vlgmr.msrb.gmra.mxu1 %v3838_v43  ;;  %v3544_v58 = vld [vmem:[#allocation9 + $0x71c] sm:$0xf]  ;;  %v1868_v60 = vpop.f32.mrf.mxu2  ;;  %v1881_v61 = vpop.f32.mrf.mxu3  ;;  %v2964_v2 = vor.u32 %v3480_v56, %v2961_v57 }
 0x150   :  { %v2385_v1 = vld [vmem:[#allocation9 + $0xb8] sm:$0xf0]  ;;  %v3220_v3 = vor.u32 %v3544_v58, %v3217_v59  ;;  %v1854_v61 = vadd.f32 %v3872_v39, %v3870_v38 }
 0x151   :  { %2124 = vmatpush.bf16.msrb.mxu2 %v2832_v15  ;;  %2137 = vmatpush.bf16.msrb.mxu3 %v3088_v16  ;;  %v3400_v4 = vld [vmem:[#allocation9 + $0x29c] sm:$0xf] }
 0x152   :  { %2144 = vmatpush.bf16.msra.mxu0 %v2516_v13  ;;  %2157 = vmatpush.bf16.msra.mxu1 %v2772_v14  ;;  %v2929_v9 = vld [vmem:[#allocation9 + $0x4f8] sm:$0xf0]  ;;  %v2388_v14 = vor.u32 %v3336_v0, %v2385_v1  ;;  %v2644_v15 = vor.u32 %v3400_v4, %v2641_v5  ;;  %v1867_v0 = vadd.f32 %v3876_v27, %v1854_v61 }
 0x153   :  { %v3536_v10 = vld [vmem:[#allocation9 + $0x6dc] sm:$0xf]  ;;  %v2932_v18 = vor.u32 %v3472_v6, %v2929_v9  ;;  %v1906_v1 = vadd.f32 %v3884_v47, %v3882_v46 }
 0x154   :  { %2125 = vmatmul.bf16.vlgmr.msrb.gmra.mxu2 %v3842_v7  ;;  %2138 = vmatmul.bf16.vlgmr.msrb.gmra.mxu3 %v3844_v8  ;;  %v3185_v11 = vld [vmem:[#allocation9 + $0x6f8] sm:$0xf0]  ;;  %v1894_v12 = vpop.f32.mrf.mxu0  ;;  %v1907_v13 = vpop.f32.mrf.mxu1 }
 0x155   :  { %2169 = vmatpush.bf16.msra.mxu2 %v3060_v19  ;;  %2182 = vmatpush.bf16.msra.mxu3 %v3316_v20  ;;  %v3328_v16 = vld [vmem:[#allocation9 + $0x5c] sm:$0xf]  ;;  %v3188_v19 = vor.u32 %v3536_v10, %v3185_v11 }
 0x156   :  { %2145 = vmatpush.bf16.msra.mxu0 %v2484_v29  ;;  %2158 = vmatpush.bf16.msra.mxu1 %v2740_v30  ;;  %v2353_v17 = vld [vmem:[#allocation9 + $0x78] sm:$0xf0] }
 0x157   :  { %v3392_v20 = vld [vmem:[#allocation9 + $0x25c] sm:$0xf]  ;;  %v1918_v26 = vpop.f32.mrf.mxu2  ;;  %v1931_v29 = vpop.f32.mrf.mxu3  ;;  %v2356_v30 = vor.u32 %v3328_v16, %v2353_v17 }
 0x158   :  { %v2609_v21 = vld [vmem:[#allocation9 + $0x278] sm:$0xf0] }
 0x159   :  { %2170 = vmatpush.bf16.msra.mxu2 %v3028_v34  ;;  %2183 = vmatpush.bf16.msra.mxu3 %v3284_v35  ;;  %v3464_v22 = vld [vmem:[#allocation9 + $0x49c] sm:$0xf]  ;;  %v2612_v31 = vor.u32 %v3392_v20, %v2609_v21 }
 0x15a   :  { %2146 = vmatpush.bf16.msra.mxu0 %v2452_v48  ;;  %2159 = vmatpush.bf16.msra.mxu1 %v2708_v49  ;;  %v2897_v23 = vld [vmem:[#allocation9 + $0x4b8] sm:$0xf0] }
 0x15b   :  { %v3528_v24 = vld [vmem:[#allocation9 + $0x69c] sm:$0xf]  ;;  %v2900_v35 = vor.u32 %v3464_v22, %v2897_v23 }
 0x15c   :  { %v3153_v25 = vld [vmem:[#allocation9 + $0x6b8] sm:$0xf0] }
 0x15d   :  { %2171 = vmatpush.bf16.msra.mxu2 %v2996_v52  ;;  %2184 = vmatpush.bf16.msra.mxu3 %v3252_v53  ;;  %v3320_v33 = vld [vmem:[#allocation9 + $0x1c] sm:$0xf]  ;;  %v3156_v36 = vor.u32 %v3528_v24, %v3153_v25 }
 0x15e   :  { %2147 = vmatpush.bf16.msra.mxu0 %v2420_v62  ;;  %2160 = vmatpush.bf16.msra.mxu1 %v2676_v63  ;;  %v2321_v34 = vld [vmem:[#allocation9 + $0x38] sm:$0xf0] }
 0x15f   :  { %v3384_v37 = vld [vmem:[#allocation9 + $0x21c] sm:$0xf]  ;;  %v2324_v49 = vor.u32 %v3320_v33, %v2321_v34  ;;  %v1920_v57 = vpop.f32.mrf.mxu2  ;;  %v1933_v58 = vpop.f32.mrf.mxu3 }
 0x160   :  { %v2577_v40 = vld [vmem:[#allocation9 + $0x238] sm:$0xf0] }
 0x161   :  { %2172 = vmatpush.bf16.msra.mxu2 %v2964_v2  ;;  %2185 = vmatpush.bf16.msra.mxu3 %v3220_v3  ;;  %v3456_v41 = vld [vmem:[#allocation9 + $0x45c] sm:$0xf]  ;;  %v2580_v50 = vor.u32 %v3384_v37, %v2577_v40  ;;  %v1919_v2 = vadd.f32 %v1918_v26, %v1906_v1 }
 0x162   :  { %2148 = vmatpush.bf16.msra.mxu0 %v2388_v14  ;;  %2161 = vmatpush.bf16.msra.mxu1 %v2644_v15  ;;  %v2865_v44 = vld [vmem:[#allocation9 + $0x478] sm:$0xf0] }
 0x163   :  { %v3520_v45 = vld [vmem:[#allocation9 + $0x65c] sm:$0xf]  ;;  %v2868_v51 = vor.u32 %v3456_v41, %v2865_v44  ;;  %v1932_v4 = vadd.f32 %v1931_v29, %v1919_v2 }
 0x164   :  { %v3121_v48 = vld [vmem:[#allocation9 + $0x678] sm:$0xf0] }
 0x165   :  { %2173 = vmatpush.bf16.msra.mxu2 %v2932_v18  ;;  %2186 = vmatpush.bf16.msra.mxu3 %v3188_v19  ;;  %v3124_v52 = vor.u32 %v3520_v45, %v3121_v48  ;;  %v3448_v53 = vld [vmem:[#allocation9 + $0x41c] sm:$0xf] }
 0x166   :  { %2149 = vmatpush.bf16.msra.mxu0 %v2356_v30  ;;  %2162 = vmatpush.bf16.msra.mxu1 %v2612_v31  ;;  %v2833_v54 = vld [vmem:[#allocation9 + $0x438] sm:$0xf0] }
 0x167   :  { %v3512_v55 = vld [vmem:[#allocation9 + $0x61c] sm:$0xf]  ;;  %v2836_v59 = vor.u32 %v3448_v53, %v2833_v54 }
 0x168   :  { %v3089_v56 = vld [vmem:[#allocation9 + $0x638] sm:$0xf0] }
 0x169   :  { %2174 = vmatpush.bf16.msra.mxu2 %v2900_v35  ;;  %2187 = vmatpush.bf16.msra.mxu3 %v3156_v36  ;;  %v3092_v60 = vor.u32 %v3512_v55, %v3089_v56 }
 0x16a   :  { %2150 = vmatpush.bf16.msra.mxu0 %v2324_v49  ;;  %2163 = vmatpush.bf16.msra.mxu1 %v2580_v50 }
 0x16c   :  { %v1944_v62 = vpop.f32.mrf.mxu0  ;;  %v1957_v63 = vpop.f32.mrf.mxu1 }
 0x16d   :  { %2175 = vmatpush.bf16.msra.mxu2 %v2868_v51  ;;  %2188 = vmatpush.bf16.msra.mxu3 %v3124_v52  ;;  %v1958_v9 = vadd.f32 %v1957_v63, %v1944_v62 }
 0x16e   :  { %2151 = vmatmul.bf16.vlgmr.msra.gmra.mxu0 %v3836_v42  ;;  %2164 = vmatmul.bf16.vlgmr.msra.gmra.mxu1 %v3838_v43  ;;  %v3895_v42 = vld [vmem:[#allocation10] sm:$0xff]  ;;  %v1880_v43 = vadd.f32 %v3878_v28, %v1867_v0 }
 0x16f   :  { %v2198_v3 = vperm.slane %v3895_v42, 1  ;;  %v2199_v38 = vperm.slane %v3895_v42, 2  ;;  %v2197_v6 = vperm.slane %v3895_v42, 0  ;;  %v2200_v13 = vperm.slane %v3895_v42, 3 }
 0x170   :  { %v2201_v58 = vperm.slane %v3895_v42, 4  ;;  %v2202_v62 = vperm.slane %v3895_v42, 5 }
 0x171   :  { %2176 = vmatpush.bf16.msra.mxu2 %v2836_v59  ;;  %2189 = vmatpush.bf16.msra.mxu3 %v3092_v60  ;;  %v2214_v5 = vmul.f32 %v2198_v3, %v1880_v43  ;;  %v2215_v46 = vmul.f32 %v2199_v38, %v1932_v4  ;;  %v2213_v15 = vmul.f32 %v2197_v6, %v3868_v32 }
 0x174   :  { %2177 = vmatmul.bf16.vlgmr.msra.gmra.mxu2 %v3842_v7  ;;  %2190 = vmatmul.bf16.vlgmr.msra.gmra.mxu3 %v3844_v8  ;;  %v3900_v7 = vld [vmem:[#allocation12] sm:$0xff]  ;;  %v1946_v8 = vpop.f32.mrf.mxu0  ;;  %v1959_v39 = vpop.f32.mrf.mxu1 }
 0x175   :  { %v2224_v27 = vperm.slane %v3900_v7, 1  ;;  %v2225_v47 = vperm.slane %v3900_v7, 2  ;;  %v2223_v14 = vperm.slane %v3900_v7, 0  ;;  %v2226_v18 = vperm.slane %v3900_v7, 3 }
 0x176   :  { %v2227_v0 = vperm.slane %v3900_v7, 4  ;;  %v2228_v2 = vperm.slane %v3900_v7, 5 }
 0x177   :  { %v1970_v10 = vpop.f32.mrf.mxu2  ;;  %v1983_v28 = vpop.f32.mrf.mxu3  ;;  %v2240_v11 = vadd.f32 %v2224_v27, %v2214_v5  ;;  %v2241_v16 = vadd.f32 %v2225_v47, %v2215_v46  ;;  %v2239_v21 = vadd.f32 %v2223_v14, %v2213_v15 }
 0x178   :  { %v1971_v12 = vadd.f32 %v1970_v10, %v1958_v9 }
 0x179   :  { %v2248_v19 = vmax.f32 %v2240_v11, 0.0  ;;  %v2249_v22 = vmax.f32 %v2241_v16, 0.0  ;;  %v2247_v30 = vmax.f32 %v2239_v21, 0.0 }
 0x17a   :  { %v1984_v17 = vadd.f32 %v1983_v28, %v1971_v12 }
 0x17b   :  { %v2263_v26 = vrot.slane %v2248_v19, 6  ;;  %v2264_v31 = vrot.slane %v2249_v22, 4  ;;  %v2203_v19 = vperm.slane %v3895_v42, 6 }
 0x17c   :  { %v2216_v20 = vmul.f32 %v2200_v13, %v1984_v17 }
 0x17d   :  { %v2270_v32 = vsel %vm2269_vm2, %v2247_v30, %v2263_v26  ;;  %v2204_v30 = vperm.slane %v3895_v42, 7 }
 0x17e   :  { %v2242_v23 = vadd.f32 %v2226_v18, %v2216_v20 }
 0x17f   :  { %v1972_v24 = vpop.f32.mrf.mxu2  ;;  %v1985_v25 = vpop.f32.mrf.mxu3 }
 0x180   :  { %v2250_v29 = vmax.f32 %v2242_v23, 0.0  ;;  %v2229_v23 = vperm.slane %v3900_v7, 6 }
 0x182   :  { %v2265_v33 = vrot.slane %v2250_v29, 2 }
 0x184   :  { %v2272_v34 = vsel %vm2271_vm3, %v2264_v31, %v2265_v33 }
 0x185   :  { %v2273_v35 = vsel %vm142_vm0, %v2270_v32, %v2272_v34  ;;  %v2230_v32 = vperm.slane %v3900_v7, 7 }
 0x186   :  { %2279 = vst [vmem:[%s3936_s7] sm:$0xff] %v2273_v35 }
 0x18c   :  { %v1996_v36 = vpop.f32.mrf.mxu0  ;;  %v2009_v37 = vpop.f32.mrf.mxu1 }
 0x18d   :  { %v2010_v40 = vadd.f32 %v2009_v37, %v1996_v36 }
 0x194   :  { %v1998_v41 = vpop.f32.mrf.mxu0  ;;  %v2011_v44 = vpop.f32.mrf.mxu1 }
 0x197   :  { %v2022_v45 = vpop.f32.mrf.mxu2  ;;  %v2035_v48 = vpop.f32.mrf.mxu3 }
 0x198   :  { %v2023_v49 = vadd.f32 %v2022_v45, %v2010_v40 }
 0x19a   :  { %v2036_v50 = vadd.f32 %v2035_v48, %v2023_v49 }
 0x19c   :  { %v2217_v63 = vmul.f32 %v2201_v58, %v2036_v50 }
 0x19e   :  { %v2243_v3 = vadd.f32 %v2227_v0, %v2217_v63 }
 0x19f   :  { %v2024_v51 = vpop.f32.mrf.mxu2  ;;  %v2037_v52 = vpop.f32.mrf.mxu3 }
 0x1a0   :  { %v2251_v5 = vmax.f32 %v2243_v3, 0.0 }
 0x1ac   :  { %v2048_v53 = vpop.f32.mrf.mxu0  ;;  %v2061_v54 = vpop.f32.mrf.mxu1 }
 0x1ad   :  { %v2062_v55 = vadd.f32 %v2061_v54, %v2048_v53 }
 0x1b4   :  { %v2050_v56 = vpop.f32.mrf.mxu0  ;;  %v2063_v57 = vpop.f32.mrf.mxu1 }
 0x1b7   :  { %v2074_v59 = vpop.f32.mrf.mxu2  ;;  %v2087_v60 = vpop.f32.mrf.mxu3 }
 0x1b8   :  { %v2075_v61 = vadd.f32 %v2074_v59, %v2062_v55 }
 0x1ba   :  { %v2088_v1 = vadd.f32 %v2087_v60, %v2075_v61 }
 0x1bc   :  { %v2218_v43 = vmul.f32 %v2202_v62, %v2088_v1 }
 0x1be   :  { %v2244_v4 = vadd.f32 %v2228_v2, %v2218_v43 }
 0x1bf   :  { %v2076_v38 = vpop.f32.mrf.mxu2  ;;  %v2089_v8 = vpop.f32.mrf.mxu3 }
 0x1c0   :  { %v2252_v39 = vmax.f32 %v2244_v4, 0.0 }
 0x1c2   :  { %v2266_v27 = vrot.slane %v2252_v39, 6 }
 0x1c4   :  { %v2274_v6 = vsel %vm2269_vm2, %v2251_v5, %v2266_v27 }
 0x1cc   :  { %v2100_v46 = vpop.f32.mrf.mxu0  ;;  %v2113_v47 = vpop.f32.mrf.mxu1 }
 0x1cd   :  { %v2114_v14 = vadd.f32 %v2113_v47, %v2100_v46 }
 0x1d4   :  { %v2102_v9 = vpop.f32.mrf.mxu0  ;;  %v2115_v10 = vpop.f32.mrf.mxu1 }
 0x1d7   :  { %v2126_v28 = vpop.f32.mrf.mxu2  ;;  %v2139_v11 = vpop.f32.mrf.mxu3 }
 0x1d8   :  { %v2127_v17 = vadd.f32 %v2126_v28, %v2114_v14 }
 0x1da   :  { %v2140_v18 = vadd.f32 %v2139_v11, %v2127_v17 }
 0x1dc   :  { %v2219_v22 = vmul.f32 %v2203_v19, %v2140_v18 }
 0x1de   :  { %v2245_v31 = vadd.f32 %v2229_v23, %v2219_v22 }
 0x1df   :  { %v2128_v12 = vpop.f32.mrf.mxu2  ;;  %v2141_v13 = vpop.f32.mrf.mxu3 }
 0x1e0   :  { %v2253_v35 = vmax.f32 %v2245_v31, 0.0 }
 0x1e2   :  { %v2267_v44 = vrot.slane %v2253_v35, 4 }
 0x1eb   :  { %v2152_v15 = vpop.f32.mrf.mxu0  ;;  %v2165_v16 = vpop.f32.mrf.mxu1 }
 0x1ec   :  { %v2166_v24 = vadd.f32 %v2165_v16, %v2152_v15 }
 0x1f3   :  { %v2154_v20 = vpop.f32.mrf.mxu0  ;;  %v2167_v21 = vpop.f32.mrf.mxu1 }
 0x1f7   :  { %v2178_v25 = vpop.f32.mrf.mxu2  ;;  %v2191_v26 = vpop.f32.mrf.mxu3 }
 0x1f8   :  { %v2179_v29 = vadd.f32 %v2178_v25, %v2166_v24 }
 0x1fa   :  { %v2192_v33 = vadd.f32 %v2191_v26, %v2179_v29 }
 0x1fc   :  { %v2220_v34 = vmul.f32 %v2204_v30, %v2192_v33 }
 0x1fe   :  { %v2246_v36 = vadd.f32 %v2230_v32, %v2220_v34 }
 0x1ff   :  { %v2180_v37 = vpop.f32.mrf.mxu2  ;;  %v2193_v40 = vpop.f32.mrf.mxu3 }
 0x200   :  { %v2254_v41 = vmax.f32 %v2246_v36, 0.0 }
 0x202   :  { %v2268_v45 = vrot.slane %v2254_v41, 2 }
 0x204   :  { %v2275_v48 = vsel %vm2271_vm3, %v2267_v44, %v2268_v45 }
 0x205   :  { %v2276_v49 = vsel %vm142_vm0, %v2274_v6, %v2275_v48 }
 0x206   :  { %2280 = vst [vmem:[%s3936_s7 + $0x8] sm:$0xff] %v2276_v49 }
 0x207   :  { %2285 = vsyncpa [#allocation3], 1 }
 0x208   :  { %2286 = vsyncpa [#allocation5], 1 }
 0x209   :  { %2287 = vsyncpa [#allocation8], 1 }
 0x20a   :  { %2288 = vsyncpa [#allocation11], 1 }

// kernel: conv_decoder_forward.6
= control target key start
LH: loop header
LB: loop body
LE: loop exit
PB: predicated region body
PF: predicated region fallthrough
CT: control target
= control target key end

     0   :  { %s2692_s15 = smov 0   ;;  %s3448_s0 = inlined_call_operand.vmem [shape: f32[2,104,64], index: 0, kind: input, shape index: {}]   ;;  %s3449_s1 = inlined_call_operand.vmem [shape: bf16[4,4,64,32], index: 1, kind: input, shape index: {}]   ;;  %s3450_s2 = inlined_call_operand.vmem [shape: f32[1,32], index: 2, kind: input, shape index: {}]   ;;  %s3451_s3 = inlined_call_operand.vmem [shape: f32[1,32], index: 3, kind: input, shape index: {}]   ;;  %s3452_s4 = inlined_call_operand.vmem [shape: f32[2,4,80,32], index: 4, kind: output, shape index: {}]  }
   0x1 LB: > { %s2082_s16 = sadd.s32 4294967295, %s2665_s15   ;;  %p2086_p0 = scmp.ge.s32.totalorder %s2665_s15, 1  ;;  %s2665_s15 = sphi %s2692_s15, %s14_s15  }
   0x2   : > { %p162_p1 = scmp.lt.s32.totalorder %s2665_s15, 3 }
   0x4   : > { %p163_p2 = pnand %p2086_p0, %p162_p1 }
   0x5   : > { %p188_p3 = scmp.lt.s32.totalorder (!%p163_p2), %s2082_s16, 1 }
   0x6   : > { %166 = sbr.rel (%p163_p2) target bundleno = 484 (0x1e4), region = 36 }
   0xb   : > { %v2584_v0 = vld [vmem:[%s3449_s1 + $0x38] sm:$0xff]  ;;  %v2583_v4 = vld [vmem:[%s3449_s1 + $0x30] sm:$0xff]  ;;  %s3454_s16 = smov (!%p188_p3, %s2082_s16), 1  ;;  %v2582_v8 = vld [vmem:[%s3449_s1 + $0x28] sm:$0xff]  ;;  %vm270_vm0 = vcmask 523264   ;;  %vm645_vm1 = vcmask 261120  }
   0xc   : > { %v2580_v1 = vld [vmem:[%s3449_s1 + $0x18] sm:$0xff]  ;;  %290 = vmatpush.bf16.msra.mxu0 %v2584_v0  ;;  %v2579_v5 = vld [vmem:[%s3449_s1 + $0x10] sm:$0xff]  ;;  %s2641_s7 = smul.u32 104, %s3454_s16  ;;  %v2578_v9 = vld [vmem:[%s3449_s1 + $0x8] sm:$0xff] }
   0xd   : > { %v2588_v2 = vld [vmem:[%s3449_s1 + $0x58] sm:$0xff]  ;;  %363 = vmatpush.bf16.msra.mxu1 %v2580_v1  ;;  %v2587_v6 = vld [vmem:[%s3449_s1 + $0x50] sm:$0xff]  ;;  %v2586_v10 = vld [vmem:[%s3449_s1 + $0x48] sm:$0xff]  ;;  %s2642_s6 = smul.u32 320, %s3454_s16 }
   0xe   : > { %v2592_v3 = vld [vmem:[%s3449_s1 + $0x78] sm:$0xff]  ;;  %460 = vmatpush.bf16.msra.mxu2 %v2588_v2  ;;  %v2591_v7 = vld [vmem:[%s3449_s1 + $0x70] sm:$0xff]  ;;  %s2736_s14 = scalar_lea.vmem %s3448_s0, %s2641_s7  ;;  %v2590_v11 = vld [vmem:[%s3449_s1 + $0x68] sm:$0xff] }
   0xf   : > { %567 = vmatpush.bf16.msra.mxu3 %v2592_v3  ;;  %v2581_v12 = vld [vmem:[%s3449_s1 + $0x20] sm:$0xff]  ;;  %v223_v17 = vld [vmem:[%s2736_s14 + $0x9] sm:$0xff]  ;;  %v2764_v21 = vld [vmem:[%s2736_s14 + $0x12] sm:$0xff]  ;;  %s3085_s9 = scalar_lea.vmem %s3452_s4, %s2642_s6 }
  0x10   : > { %291 = vmatpush.bf16.msra.mxu0 %v2583_v4  ;;  %v2577_v13 = vld [vmem:[%s3449_s1] sm:$0xff]  ;;  %v200_v19 = vld [vmem:[%s2736_s14 + $0x8] sm:$0xff]  ;;  %v501_v23 = vld [vmem:[%s2736_s14 + $0x13] sm:$0xff] }
  0x11   : > { %364 = vmatpush.bf16.msra.mxu1 %v2579_v5  ;;  %v2585_v14 = vld [vmem:[%s3449_s1 + $0x40] sm:$0xff]  ;;  %v2761_v20 = vld [vmem:[%s2736_s14 + $0xa] sm:$0xff]  ;;  %v2604_v24 = vld [vmem:[%s3449_s1 + $0xd8] sm:$0xff] }
  0x12   : > { %461 = vmatpush.bf16.msra.mxu2 %v2587_v6  ;;  %v2589_v15 = vld [vmem:[%s3449_s1 + $0x60] sm:$0xff]  ;;  %v500_v22 = vld [vmem:[%s2736_s14 + $0xb] sm:$0xff]  ;;  %v2608_v25 = vld [vmem:[%s3449_s1 + $0xf8] sm:$0xff]  ;;  %v2778_v28 = vpack.c.bf16 %v2764_v21, %v2761_v20 }
  0x13   : > { %568 = vmatpush.bf16.msra.mxu3 %v2591_v7  ;;  %v222_v16 = vld [vmem:[%s2736_s14 + $0x1] sm:$0xff]  ;;  %v2780_v29 = vpack.c.bf16 %v501_v23, %v500_v22  ;;  %v2600_v30 = vld [vmem:[%s3449_s1 + $0xb8] sm:$0xff]  ;;  %v2603_v32 = vld [vmem:[%s3449_s1 + $0xd0] sm:$0xff] }
  0x14   : > { %292 = vmatpush.bf16.msra.mxu0 %v2582_v8  ;;  %v199_v18 = vld [vmem:[%s2736_s14] sm:$0xff]  ;;  %v2774_v26 = vpack.c.bf16 %v223_v17, %v222_v16  ;;  %v2596_v31 = vld [vmem:[%s3449_s1 + $0x98] sm:$0xff]  ;;  %v2607_v33 = vld [vmem:[%s3449_s1 + $0xf0] sm:$0xff] }
  0x15   : > { %365 = vmatpush.bf16.msra.mxu1 %v2578_v9  ;;  %v209_v27 = vpack.c.bf16 %v200_v19, %v199_v18  ;;  %v2599_v34 = vld [vmem:[%s3449_s1 + $0xb0] sm:$0xff]  ;;  %v2602_v36 = vld [vmem:[%s3449_s1 + $0xc8] sm:$0xff]  ;;  %v225_v41 = vld [vmem:[%s2736_s14 + $0x19] sm:$0xff] }
  0x16   : > { %462 = vmatpush.bf16.msra.mxu2 %v2586_v10  ;;  %v2595_v35 = vld [vmem:[%s3449_s1 + $0x90] sm:$0xff]  ;;  %v2606_v37 = vld [vmem:[%s3449_s1 + $0xe8] sm:$0xff]  ;;  %v202_v43 = vld [vmem:[%s2736_s14 + $0x18] sm:$0xff] }
  0x17   : > { %569 = vmatpush.bf16.msra.mxu3 %v2590_v11  ;;  %v2598_v38 = vld [vmem:[%s3449_s1 + $0xa8] sm:$0xff]  ;;  %v224_v40 = vld [vmem:[%s2736_s14 + $0x11] sm:$0xff]  ;;  %v2824_v44 = vld [vmem:[%s2736_s14 + $0x1a] sm:$0xff] }
  0x18   : > { %293 = vmatpush.bf16.msra.mxu0 %v2581_v12  ;;  %v2594_v39 = vld [vmem:[%s3449_s1 + $0x88] sm:$0xff]  ;;  %v201_v42 = vld [vmem:[%s2736_s14 + $0x10] sm:$0xff]  ;;  %v502_v46 = vld [vmem:[%s2736_s14 + $0x1b] sm:$0xff]  ;;  %v2831_v48 = vpack.c.bf16 %v225_v41, %v224_v40  ;;  %v691_v19 = vpack.c.bf16 %v2824_v44, %v2764_v21 }
  0x19   : > { %366 = vmatpush.bf16.msra.mxu1 %v2577_v13  ;;  %v2827_v45 = vld [vmem:[%s2736_s14 + $0x22] sm:$0xff]  ;;  %v210_v49 = vpack.c.bf16 %v202_v43, %v201_v42  ;;  %v2857_v58 = vld [vmem:[%s2736_s14 + $0x2a] sm:$0xff]  ;;  %v2860_v59 = vld [vmem:[%s2736_s14 + $0x32] sm:$0xff] }
  0x1a   : > { %463 = vmatpush.bf16.msra.mxu2 %v2585_v14  ;;  %v503_v47 = vld [vmem:[%s2736_s14 + $0x23] sm:$0xff]  ;;  %v2835_v50 = vpack.c.bf16 %v2827_v45, %v2824_v44  ;;  %v504_v60 = vld [vmem:[%s2736_s14 + $0x2b] sm:$0xff]  ;;  %v505_v61 = vld [vmem:[%s2736_s14 + $0x33] sm:$0xff]  ;;  %v2868_v0 = vpack.c.bf16 %v2860_v59, %v2857_v58 }
  0x1b   : > { %570 = vmatpush.bf16.msra.mxu3 %v2589_v15  ;;  %2113 = vmatmul.msk.bf16.vlgmr.msra.gmra.mxu0 %vm270_vm0, %v2774_v26  ;;  %v2837_v51 = vpack.c.bf16 %v503_v47, %v502_v46  ;;  %v2601_v52 = vld [vmem:[%s3449_s1 + $0xc0] sm:$0xff]  ;;  %v227_v55 = vld [vmem:[%s2736_s14 + $0x29] sm:$0xff]  ;;  %v2870_v1 = vpack.c.bf16 %v505_v61, %v504_v60  ;;  %v228_v4 = vld [vmem:[%s2736_s14 + $0x31] sm:$0xff] }
  0x1c   : > { %2134 = vmatmul.msk.bf16.vlgmr.msra.gmra.mxu1 %vm270_vm0, %v209_v27  ;;  %747 = vmatpush.bf16.msrb.mxu0 %v2600_v30  ;;  %v2605_v53 = vld [vmem:[%s3449_s1 + $0xe0] sm:$0xff]  ;;  %v204_v57 = vld [vmem:[%s2736_s14 + $0x28] sm:$0xff]  ;;  %v205_v6 = vld [vmem:[%s2736_s14 + $0x30] sm:$0xff] }
  0x1d   : > { %2163 = vmatmul.msk.bf16.vlgmr.msra.gmra.mxu2 %vm270_vm0, %v2778_v28  ;;  %820 = vmatpush.bf16.msrb.mxu1 %v2596_v31  ;;  %v226_v54 = vld [vmem:[%s2736_s14 + $0x21] sm:$0xff]  ;;  %v229_v5 = vld [vmem:[%s2736_s14 + $0x39] sm:$0xff]  ;;  %v2931_v30 = vld [vmem:[%s2736_s14 + $0x4a] sm:$0xff] }
  0x1e   : > { %917 = vmatpush.bf16.msrb.mxu2 %v2604_v24  ;;  %2192 = vmatmul.msk.bf16.vlgmr.msra.gmra.mxu3 %vm270_vm0, %v2780_v29  ;;  %v203_v56 = vld [vmem:[%s2736_s14 + $0x20] sm:$0xff]  ;;  %v2864_v62 = vpack.c.bf16 %v227_v55, %v226_v54  ;;  %v206_v7 = vld [vmem:[%s2736_s14 + $0x38] sm:$0xff]  ;;  %v2897_v12 = vpack.c.bf16 %v229_v5, %v228_v4  ;;  %v231_v24 = vld [vmem:[%s2736_s14 + $0x49] sm:$0xff] }
  0x1f   : > { %1024 = vmatpush.bf16.msrb.mxu3 %v2608_v25  ;;  %v211_v63 = vpack.c.bf16 %v204_v57, %v203_v56  ;;  %v2597_v2 = vld [vmem:[%s3449_s1 + $0xa0] sm:$0xff]  ;;  %v212_v13 = vpack.c.bf16 %v206_v7, %v205_v6  ;;  %v2620_v16 = vld [vmem:[%s3449_s1 + $0x158] sm:$0xff]  ;;  %v208_v27 = vld [vmem:[%s2736_s14 + $0x48] sm:$0xff]  ;;  %v692_v57 = vpack.c.bf16 %v2857_v58, %v2827_v45 }
  0x20   : > { %748 = vmatpush.bf16.msrb.mxu0 %v2599_v34  ;;  %v2593_v3 = vld [vmem:[%s3449_s1 + $0x80] sm:$0xff]  ;;  %v2624_v17 = vld [vmem:[%s3449_s1 + $0x178] sm:$0xff]  ;;  %v2611_v40 = vld [vmem:[%s3449_s1 + $0x110] sm:$0xff] }
  0x21   : > { %821 = vmatpush.bf16.msrb.mxu1 %v2595_v35  ;;  %v2890_v8 = vld [vmem:[%s2736_s14 + $0x3a] sm:$0xff]  ;;  %v2893_v9 = vld [vmem:[%s2736_s14 + $0x42] sm:$0xff]  ;;  %v402_v31 = vld [vmem:[%s2736_s14 + $0x52] sm:$0xff] }
  0x22   : > { %918 = vmatpush.bf16.msrb.mxu2 %v2603_v32  ;;  %v506_v10 = vld [vmem:[%s2736_s14 + $0x3b] sm:$0xff]  ;;  %v507_v11 = vld [vmem:[%s2736_s14 + $0x43] sm:$0xff]  ;;  %v2901_v14 = vpack.c.bf16 %v2893_v9, %v2890_v8  ;;  %v508_v32 = vld [vmem:[%s2736_s14 + $0x4b] sm:$0xff]  ;;  %v2939_v35 = vpack.c.bf16 %v402_v31, %v2931_v30 }
  0x23   : > { %1025 = vmatpush.bf16.msrb.mxu3 %v2607_v33  ;;  %v2903_v15 = vpack.c.bf16 %v507_v11, %v506_v10  ;;  %v2616_v18 = vld [vmem:[%s3449_s1 + $0x138] sm:$0xff]  ;;  %v230_v23 = vld [vmem:[%s2736_s14 + $0x41] sm:$0xff]  ;;  %v957_v42 = vld [vmem:[%s2736_s14 + $0xc] sm:$0xff] }
  0x24   : > { %749 = vmatpush.bf16.msrb.mxu0 %v2598_v38  ;;  %v2612_v22 = vld [vmem:[%s3449_s1 + $0x118] sm:$0xff]  ;;  %v207_v25 = vld [vmem:[%s2736_s14 + $0x40] sm:$0xff]  ;;  %v2936_v34 = vpack.c.bf16 %v231_v24, %v230_v23  ;;  %v2623_v38 = vld [vmem:[%s3449_s1 + $0x170] sm:$0xff] }
  0x25   : > { %822 = vmatpush.bf16.msrb.mxu1 %v2594_v39  ;;  %v509_v33 = vld [vmem:[%s2736_s14 + $0x53] sm:$0xff]  ;;  %v213_v21 = vpack.c.bf16 %v208_v27, %v207_v25  ;;  %v680_v41 = vld [vmem:[%s2736_s14 + $0x2] sm:$0xff]  ;;  %v3060_v10 = vld [vmem:[%s3450_s2] ss:$0 sm:$0xff] }
  0x26   : > { %919 = vmatpush.bf16.msrb.mxu2 %v2602_v36  ;;  %v2941_v36 = vpack.c.bf16 %v509_v33, %v508_v32  ;;  %v2615_v39 = vld [vmem:[%s3449_s1 + $0x130] sm:$0xff]  ;;  %v690_v44 = vpack.c.bf16 %v2761_v20, %v680_v41  ;;  %v2618_v47 = vld [vmem:[%s3449_s1 + $0x148] sm:$0xff]  ;;  %v2621_v45 = vld [vmem:[%s3449_s1 + $0x160] sm:$0xff]  ;;  %v694_v32 = vpack.c.bf16 %v2931_v30, %v2893_v9 }
  0x27   : > { %1026 = vmatpush.bf16.msrb.mxu3 %v2606_v37  ;;  %v2619_v37 = vld [vmem:[%s3449_s1 + $0x150] sm:$0xff]  ;;  %v2622_v20 = vld [vmem:[%s3449_s1 + $0x168] sm:$0xff]  ;;  %v2613_v58 = vld [vmem:[%s3449_s1 + $0x120] sm:$0xff] }
  0x28   : > { %750 = vmatpush.bf16.msrb.mxu0 %v2597_v2  ;;  %v2965_v43 = vld [vmem:[%s2736_s14 + $0x14] sm:$0xff]  ;;  %v3008_v55 = vld [vmem:[%s2736_s14 + $0x2c] sm:$0xff]  ;;  %v2609_v61 = vld [vmem:[%s3449_s1 + $0x100] sm:$0xff]  ;;  %v693_v2 = vpack.c.bf16 %v2890_v8, %v2860_v59 }
  0x29   : > { %823 = vmatpush.bf16.msrb.mxu1 %v2593_v3  ;;  %v2969_v46 = vpack.c.bf16 %v2965_v43, %v957_v42  ;;  %v3011_v56 = vld [vmem:[%s2736_s14 + $0x34] sm:$0xff] }
  0x2a   : > { %920 = vmatpush.bf16.msrb.mxu2 %v2601_v52  ;;  %v2991_v52 = vld [vmem:[%s2736_s14 + $0x1c] sm:$0xff]  ;;  %v3017_v60 = vpack.c.bf16 %v3011_v56, %v3008_v55  ;;  %v3079_v23 = vld [vmem:[%s2736_s14 + $0x54] sm:$0xff] }
  0x2b   : > { %2114 = vmatmul.msk.bf16.gmra.mxu0 %vm270_vm0, %v2831_v48  ;;  %1027 = vmatpush.bf16.msrb.mxu3 %v2605_v53  ;;  %v2994_v53 = vld [vmem:[%s2736_s14 + $0x24] sm:$0xff]  ;;  %v2632_v41 = vld [vmem:[%s3449_s1 + $0x1b8] sm:$0xff] }
  0x2c   : > { %2135 = vmatmul.msk.bf16.gmra.mxu1 %vm270_vm0, %v210_v49  ;;  %1204 = vmatpush.bf16.msra.mxu0 %v2616_v18  ;;  %v2610_v49 = vld [vmem:[%s3449_s1 + $0x108] sm:$0xff]  ;;  %v2998_v54 = vpack.c.bf16 %v2994_v53, %v2991_v52  ;;  %v2640_v18 = vld [vmem:[%s3449_s1 + $0x1f8] sm:$0xff] }
  0x2d   : > { %2164 = vmatmul.msk.bf16.gmra.mxu2 %vm270_vm0, %v2835_v50  ;;  %1277 = vmatpush.bf16.msra.mxu1 %v2612_v22  ;;  %v3076_v22 = vld [vmem:[%s2736_s14 + $0x4c] sm:$0xff]  ;;  %v2628_v42 = vld [vmem:[%s3449_s1 + $0x198] sm:$0xff] }
  0x2e   : > { %2193 = vmatmul.msk.bf16.gmra.mxu3 %vm270_vm0, %v2837_v51  ;;  %1374 = vmatpush.bf16.msra.mxu2 %v2620_v16  ;;  %v3065_v16 = vld [vmem:[%s3451_s3] ss:$0 sm:$0xff] }
  0x2f   : > { %1481 = vmatpush.bf16.msra.mxu3 %v2624_v17  ;;  %v2636_v17 = vld [vmem:[%s3449_s1 + $0x1d8] sm:$0xff] }
  0x30   : > { %1205 = vmatpush.bf16.msra.mxu0 %v2615_v39  ;;  %v3091_v39 = vpack.c.bf16 %v3079_v23, %v3076_v22 }
  0x31   : > { %1278 = vmatpush.bf16.msra.mxu1 %v2611_v40 }
  0x32   : > { %1375 = vmatpush.bf16.msra.mxu2 %v2619_v37 }
  0x33   : > { %1482 = vmatpush.bf16.msra.mxu3 %v2623_v38 }
  0x35   : > { %1279 = vmatpush.bf16.msra.mxu1 %v2610_v49 }
  0x36   : > { %1376 = vmatpush.bf16.msra.mxu2 %v2618_v47 }
  0x37   : > { %1483 = vmatpush.bf16.msra.mxu3 %v2622_v20 }
  0x39   : > { %1280 = vmatpush.bf16.msra.mxu1 %v2609_v61  ;;  %v1415_v61 = vld [vmem:[%s2736_s14 + $0x1d] sm:$0xff] }
  0x3b   : > { %2115 = vmatmul.msk.bf16.gmra.mxu0 %vm270_vm0, %v2864_v62  ;;  %1484 = vmatpush.bf16.msra.mxu3 %v2621_v45 }
  0x3c   : > { %2136 = vmatmul.msk.bf16.gmra.mxu1 %vm270_vm0, %v211_v63  ;;  %v3042_v63 = vld [vmem:[%s2736_s14 + $0x44] sm:$0xff] }
  0x3d   : > { %2165 = vmatmul.msk.bf16.gmra.mxu2 %vm270_vm0, %v2868_v0 }
  0x3e   : > { %2194 = vmatmul.msk.bf16.gmra.mxu3 %vm270_vm0, %v2870_v1 }
  0x4b   : > { %2116 = vmatmul.msk.bf16.gmra.mxu0 %vm270_vm0, %v2897_v12 }
  0x4c   : > { %2137 = vmatmul.msk.bf16.gmra.mxu1 %vm270_vm0, %v212_v13 }
  0x4d   : > { %2166 = vmatmul.msk.bf16.gmra.mxu2 %vm270_vm0, %v2901_v14 }
  0x4e   : > { %2195 = vmatmul.msk.bf16.gmra.mxu3 %vm270_vm0, %v2903_v15 }
  0x5b   : > { %2117 = vmatmul.msk.bf16.gmra.mxu0 %vm270_vm0, %v2936_v34 }
  0x5c   : > { %2138 = vmatmul.msk.bf16.gmra.mxu1 %vm270_vm0, %v213_v21 }
  0x5d   : > { %2167 = vmatmul.msk.bf16.gmra.mxu2 %vm270_vm0, %v2939_v35 }
  0x5e   : > { %2196 = vmatmul.msk.bf16.gmra.mxu3 %vm270_vm0, %v2941_v36 }
  0x6b   : > { %2229 = vmatmul.msk.bf16.vlgmr.msrb.gmra.mxu0 %vm270_vm0, %v690_v44 }
  0x6c   : > { %2250 = vmatmul.msk.bf16.vlgmr.msrb.gmra.mxu1 %vm270_vm0, %v2774_v26  ;;  %v2614_v26 = vld [vmem:[%s3449_s1 + $0x128] sm:$0xff] }
  0x6d   : > { %2279 = vmatmul.msk.bf16.vlgmr.msrb.gmra.mxu2 %vm270_vm0, %v2780_v29  ;;  %1206 = vmatpush.bf16.msra.mxu0 %v2614_v26 }
  0x6e   : > { %2308 = vmatmul.msk.bf16.vlgmr.msrb.gmra.mxu3 %vm270_vm0, %v2969_v46  ;;  %1734 = vmatpush.bf16.msrb.mxu1 %v2628_v42 }
  0x6f   : > { %1938 = vmatpush.bf16.msrb.mxu3 %v2640_v18  ;;  %v2635_v18 = vld [vmem:[%s3449_s1 + $0x1d0] sm:$0xff] }
  0x71   : > { %1207 = vmatpush.bf16.msra.mxu0 %v2613_v58  ;;  %v1414_v58 = vld [vmem:[%s2736_s14 + $0x15] sm:$0xff] }
  0x75   : > { %1661 = vmatpush.bf16.msrb.mxu0 %v2632_v41  ;;  %v1417_v41 = vld [vmem:[%s2736_s14 + $0x2d] sm:$0xff] }
  0x7b   : > { %2230 = vmatmul.msk.bf16.gmra.mxu0 %vm270_vm0, %v691_v19 }
  0x7c   : > { %2251 = vmatmul.msk.bf16.gmra.mxu1 %vm270_vm0, %v2831_v48  ;;  %v2617_v48 = vld [vmem:[%s3449_s1 + $0x140] sm:$0xff] }
  0x7d   : > { %2280 = vmatmul.msk.bf16.gmra.mxu2 %vm270_vm0, %v2837_v51 }
  0x7e   : > { %2309 = vmatmul.msk.bf16.gmra.mxu3 %vm270_vm0, %v2998_v54  ;;  %1377 = vmatpush.bf16.msra.mxu2 %v2617_v48 }
  0x82   : > { %1831 = vmatpush.bf16.msrb.mxu2 %v2636_v17 }
  0x86   : > { %1832 = vmatpush.bf16.msrb.mxu2 %v2635_v18 }
  0x8b   : > { %2231 = vmatmul.msk.bf16.gmra.mxu0 %vm270_vm0, %v692_v57 }
  0x8c   : > { %2252 = vmatmul.msk.bf16.gmra.mxu1 %vm270_vm0, %v2864_v62  ;;  %v3039_v62 = vld [vmem:[%s2736_s14 + $0x3c] sm:$0xff] }
  0x8d   : > { %2281 = vmatmul.msk.bf16.gmra.mxu2 %vm270_vm0, %v2870_v1  ;;  %v3048_v5 = vpack.c.bf16 %v3042_v63, %v3039_v62 }
  0x8e   : > { %2310 = vmatmul.msk.bf16.gmra.mxu3 %vm270_vm0, %v3017_v60 }
  0x98   : > { %v295_v3 = vpop.f32.mrf.mxu0 }
  0x99   : > { %v368_v4 = vpop.f32.mrf.mxu1 }
  0x9a   : > { %v369_v6 = vadd.f32 %v368_v4, %v295_v3 }
  0x9b   : > { %2232 = vmatmul.msk.bf16.gmra.mxu0 %vm270_vm0, %v693_v2 }
  0x9c   : > { %2253 = vmatmul.msk.bf16.gmra.mxu1 %vm270_vm0, %v2897_v12 }
  0x9d   : > { %2282 = vmatmul.msk.bf16.gmra.mxu2 %vm270_vm0, %v2903_v15 }
  0x9e   : > { %2311 = vmatmul.msk.bf16.gmra.mxu3 %vm270_vm0, %v3048_v5 }
  0xa0   : > { %v465_v59 = vpop.f32.mrf.mxu2  ;;  %v297_v11 = vpop.f32.mrf.mxu0 }
  0xa1   : > { %v572_v7 = vpop.f32.mrf.mxu3  ;;  %v490_v8 = vadd.f32 %v465_v59, %v369_v6  ;;  %v370_v13 = vpop.f32.mrf.mxu1 }
  0xa2   : > { %v371_v25 = vadd.f32 %v370_v13, %v297_v11  ;;  %v1317_v13 = vpack.c.bf16 %v2991_v52, %v2965_v43  ;;  %v2627_v43 = vld [vmem:[%s3449_s1 + $0x190] sm:$0xff] }
  0xa3   : > { %v597_v12 = vadd.f32 %v572_v7, %v490_v8  ;;  %1735 = vmatpush.bf16.msrb.mxu1 %v2627_v43 }
  0xa5   : > { %v611_v19 = vmul.f32 %v3060_v10, %v597_v12  ;;  %v3118_v12 = vpack.c.bf16 %v1415_v61, %v1414_v58  ;;  %v2638_v58 = vld [vmem:[%s3449_s1 + $0x1e8] sm:$0xff] }
  0xa7   : > { %v625_v24 = vadd.f32 %v3065_v16, %v611_v19  ;;  %v2639_v19 = vld [vmem:[%s3449_s1 + $0x1f0] sm:$0xff] }
  0xa8   : > { %v467_v27 = vpop.f32.mrf.mxu2  ;;  %v300_v37 = vpop.f32.mrf.mxu0  ;;  %1939 = vmatpush.bf16.msrb.mxu3 %v2639_v19 }
  0xa9   : > { %v574_v31 = vpop.f32.mrf.mxu3  ;;  %v635_v33 = vmax.f32 %v625_v24, 0.0  ;;  %v491_v21 = vadd.f32 %v467_v27, %v371_v25  ;;  %v373_v38 = vpop.f32.mrf.mxu1  ;;  %v2631_v24 = vld [vmem:[%s3449_s1 + $0x1b0] sm:$0xff] }
  0xaa   : > { %v374_v30 = vadd.f32 %v373_v38, %v300_v37  ;;  %1662 = vmatpush.bf16.msrb.mxu0 %v2631_v24 }
  0xab   : > { %646 = vst.msk [vmem:[%s3085_s9] sm:$0xff] %vm645_vm1, %v635_v33  ;;  %v598_v40 = vadd.f32 %v574_v31, %v491_v21  ;;  %2233 = vmatmul.msk.bf16.gmra.mxu0 %vm270_vm0, %v694_v32 }
  0xac   : > { %2254 = vmatmul.msk.bf16.gmra.mxu1 %vm270_vm0, %v2936_v34  ;;  %1940 = vmatpush.bf16.msrb.mxu3 %v2638_v58 }
  0xad   : > { %v612_v9 = vmul.f32 %v3060_v10, %v598_v40  ;;  %2283 = vmatmul.msk.bf16.gmra.mxu2 %vm270_vm0, %v2941_v36  ;;  %v1416_v40 = vld [vmem:[%s2736_s14 + $0x25] sm:$0xff] }
  0xae   : > { %2312 = vmatmul.msk.bf16.gmra.mxu3 %vm270_vm0, %v3091_v39 }
  0xaf   : > { %v626_v44 = vadd.f32 %v3065_v16, %v612_v9 }
  0xb0   : > { %v470_v47 = vpop.f32.mrf.mxu2  ;;  %v302_v34 = vpop.f32.mrf.mxu0 }
  0xb1   : > { %v577_v20 = vpop.f32.mrf.mxu3  ;;  %v636_v26 = vmax.f32 %v626_v44, 0.0  ;;  %v492_v49 = vadd.f32 %v470_v47, %v374_v30  ;;  %v375_v57 = vpop.f32.mrf.mxu1 }
  0xb2   : > { %v376_v3 = vadd.f32 %v375_v57, %v302_v34  ;;  %v1318_v34 = vpack.c.bf16 %v3008_v55, %v2994_v53  ;;  %v3151_v57 = vpack.c.bf16 %v1417_v41, %v1416_v40 }
  0xb3   : > { %647 = vst.msk [vmem:[%s3085_s9 + $0x8] sm:$0xff] %vm645_vm1, %v636_v26  ;;  %v599_v48 = vadd.f32 %v577_v20, %v492_v49 }
  0xb5   : > { %v613_v45 = vmul.f32 %v3060_v10, %v599_v48 }
  0xb7   : > { %v627_v2 = vadd.f32 %v3065_v16, %v613_v45  ;;  %v2634_v45 = vld [vmem:[%s3449_s1 + $0x1c8] sm:$0xff] }
  0xb8   : > { %v472_v4 = vpop.f32.mrf.mxu2  ;;  %v305_v8 = vpop.f32.mrf.mxu0  ;;  %1833 = vmatpush.bf16.msrb.mxu2 %v2634_v45 }
  0xb9   : > { %v579_v6 = vpop.f32.mrf.mxu3  ;;  %v637_v59 = vmax.f32 %v627_v2, 0.0  ;;  %v493_v7 = vadd.f32 %v472_v4, %v376_v3  ;;  %v378_v11 = vpop.f32.mrf.mxu1 }
  0xba   : > { %v379_v25 = vadd.f32 %v378_v11, %v305_v8  ;;  %v2626_v8 = vld [vmem:[%s3449_s1 + $0x188] sm:$0xff] }
  0xbb   : > { %648 = vst.msk [vmem:[%s3085_s9 + $0x10] sm:$0xff] %vm645_vm1, %v637_v59  ;;  %v600_v17 = vadd.f32 %v579_v6, %v493_v7  ;;  %2355 = vmatmul.msk.bf16.vlgmr.msra.gmra.mxu0 %vm270_vm0, %v2780_v29  ;;  %v2630_v7 = vld [vmem:[%s3449_s1 + $0x1a8] sm:$0xff]  ;;  %1736 = vmatpush.bf16.msrb.mxu1 %v2626_v8 }
  0xbc   : > { %2376 = vmatmul.msk.bf16.vlgmr.msra.gmra.mxu1 %vm270_vm0, %v2778_v28  ;;  %1663 = vmatpush.bf16.msrb.mxu0 %v2630_v7 }
  0xbd   : > { %v614_v52 = vmul.f32 %v3060_v10, %v600_v17  ;;  %2405 = vmatmul.msk.bf16.vlgmr.msra.gmra.mxu2 %vm270_vm0, %v1317_v13  ;;  %v1418_v13 = vld [vmem:[%s2736_s14 + $0x35] sm:$0xff]  ;;  %v1419_v17 = vld [vmem:[%s2736_s14 + $0x3d] sm:$0xff] }
  0xbe   : > { %2434 = vmatmul.msk.bf16.vlgmr.msra.gmra.mxu3 %vm270_vm0, %v3118_v12 }
  0xbf   : > { %v628_v29 = vadd.f32 %v3065_v16, %v614_v52 }
  0xc0   : > { %v475_v28 = vpop.f32.mrf.mxu2  ;;  %v307_v33 = vpop.f32.mrf.mxu0 }
  0xc1   : > { %v582_v27 = vpop.f32.mrf.mxu3  ;;  %v638_v31 = vmax.f32 %v628_v29, 0.0  ;;  %v494_v32 = vadd.f32 %v475_v28, %v379_v25  ;;  %v380_v21 = vpop.f32.mrf.mxu1 }
  0xc2   : > { %v381_v9 = vadd.f32 %v380_v21, %v307_v33 }
  0xc3   : > { %649 = vst.msk [vmem:[%s3085_s9 + $0x18] sm:$0xff] %vm645_vm1, %v638_v31  ;;  %v601_v37 = vadd.f32 %v582_v27, %v494_v32  ;;  %v1319_v27 = vpack.c.bf16 %v3039_v62, %v3011_v56  ;;  %v3184_v31 = vpack.c.bf16 %v1419_v17, %v1418_v13  ;;  %v1316_v13 = vld [vmem:[%s2736_s14 + $0x5c] sm:$0xff] }
  0xc4   : > { %v1422_v17 = vld [vmem:[%s2736_s14 + $0x55] sm:$0xff] }
  0xc5   : > { %v615_v38 = vmul.f32 %v3060_v10, %v601_v37 }
  0xc7   : > { %v629_v42 = vadd.f32 %v3065_v16, %v615_v38 }
  0xc8   : > { %v477_v30 = vpop.f32.mrf.mxu2  ;;  %v310_v26 = vpop.f32.mrf.mxu0 }
  0xc9   : > { %v584_v44 = vpop.f32.mrf.mxu3  ;;  %v639_v47 = vmax.f32 %v629_v42, 0.0  ;;  %v495_v20 = vadd.f32 %v477_v30, %v381_v9  ;;  %v383_v49 = vpop.f32.mrf.mxu1  ;;  %v2633_v42 = vld [vmem:[%s3449_s1 + $0x1c0] sm:$0xff] }
  0xca   : > { %v384_v55 = vadd.f32 %v383_v49, %v310_v26  ;;  %v2637_v9 = vld [vmem:[%s3449_s1 + $0x1e0] sm:$0xff]  ;;  %1834 = vmatpush.bf16.msrb.mxu2 %v2633_v42  ;;  %v1421_v26 = vld [vmem:[%s2736_s14 + $0x4d] sm:$0xff] }
  0xcb   : > { %650 = vst.msk [vmem:[%s3085_s9 + $0x20] sm:$0xff] %vm645_vm1, %v639_v47  ;;  %v602_v48 = vadd.f32 %v584_v44, %v495_v20  ;;  %2356 = vmatmul.msk.bf16.gmra.mxu0 %vm270_vm0, %v2837_v51  ;;  %v2629_v30 = vld [vmem:[%s3449_s1 + $0x1a0] sm:$0xff]  ;;  %1941 = vmatpush.bf16.msrb.mxu3 %v2637_v9  ;;  %v1570_v42 = vld [vmem:[%s2736_s14 + $0xb] sm:$0xff]  ;;  %v1571_v9 = vld [vmem:[%s2736_s14 + $0x13] sm:$0xff] }
  0xcc   : > { %2377 = vmatmul.msk.bf16.gmra.mxu1 %vm270_vm0, %v2835_v50  ;;  %v2625_v44 = vld [vmem:[%s3449_s1 + $0x180] sm:$0xff]  ;;  %1664 = vmatpush.bf16.msrb.mxu0 %v2629_v30  ;;  %v1871_v30 = vld [vmem:[%s2736_s14 + $0x16] sm:$0xff] }
  0xcd   : > { %v616_v53 = vmul.f32 %v3060_v10, %v602_v48  ;;  %2406 = vmatmul.msk.bf16.gmra.mxu2 %vm270_vm0, %v1318_v34  ;;  %v1420_v20 = vld [vmem:[%s2736_s14 + $0x45] sm:$0xff]  ;;  %1737 = vmatpush.bf16.msrb.mxu1 %v2625_v44 }
  0xce   : > { %2435 = vmatmul.msk.bf16.gmra.mxu3 %vm270_vm0, %v3151_v57  ;;  %v1872_v44 = vld [vmem:[%s2736_s14 + $0x1e] sm:$0xff] }
  0xcf   : > { %v630_v61 = vadd.f32 %v3065_v16, %v616_v53 }
  0xd0   : > { %v480_v2 = vpop.f32.mrf.mxu2  ;;  %v312_v6 = vpop.f32.mrf.mxu0 }
  0xd1   : > { %v587_v3 = vpop.f32.mrf.mxu3  ;;  %v640_v51 = vmax.f32 %v630_v61, 0.0  ;;  %v496_v4 = vadd.f32 %v480_v2, %v384_v55  ;;  %v385_v50 = vpop.f32.mrf.mxu1  ;;  %v1320_v2 = vpack.c.bf16 %v3076_v22, %v3042_v63 }
  0xd2   : > { %v386_v19 = vadd.f32 %v385_v50, %v312_v6 }
  0xd3   : > { %651 = vst.msk [vmem:[%s3085_s9 + $0x28] sm:$0xff] %vm645_vm1, %v640_v51  ;;  %v603_v59 = vadd.f32 %v587_v3, %v496_v4  ;;  %v3217_v3 = vpack.c.bf16 %v1421_v26, %v1420_v20 }
  0xd5   : > { %v617_v11 = vmul.f32 %v3060_v10, %v603_v59 }
  0xd7   : > { %v631_v18 = vadd.f32 %v3065_v16, %v617_v11  ;;  %v3240_v11 = vld [vmem:[%s3451_s3] ss:$0 sm:$0xff] }
  0xd8   : > { %v482_v24 = vpop.f32.mrf.mxu2  ;;  %v315_v29 = vpop.f32.mrf.mxu0 }
  0xd9   : > { %v589_v43 = vpop.f32.mrf.mxu3  ;;  %v641_v52 = vmax.f32 %v631_v18, 0.0  ;;  %v497_v25 = vadd.f32 %v482_v24, %v386_v19  ;;  %v388_v28 = vpop.f32.mrf.mxu1  ;;  %v1423_v18 = vld [vmem:[%s2736_s14 + $0x5d] sm:$0xff] }
  0xda   : > { %v389_v21 = vadd.f32 %v388_v28, %v315_v29 }
  0xdb   : > { %652 = vst.msk [vmem:[%s3085_s9 + $0x30] sm:$0xff] %vm645_vm1, %v641_v52  ;;  %v604_v32 = vadd.f32 %v589_v43, %v497_v25  ;;  %2357 = vmatmul.msk.bf16.gmra.mxu0 %vm270_vm0, %v2870_v1 }
  0xdc   : > { %2378 = vmatmul.msk.bf16.gmra.mxu1 %vm270_vm0, %v2868_v0 }
  0xdd   : > { %v618_v33 = vmul.f32 %v3060_v10, %v604_v32  ;;  %2407 = vmatmul.msk.bf16.gmra.mxu2 %vm270_vm0, %v1319_v27  ;;  %v1321_v32 = vpack.c.bf16 %v1316_v13, %v3079_v23 }
  0xde   : > { %2436 = vmatmul.msk.bf16.gmra.mxu3 %vm270_vm0, %v3184_v31 }
  0xdf   : > { %v632_v56 = vadd.f32 %v3065_v16, %v618_v33  ;;  %v3248_v33 = vpack.c.bf16 %v1423_v18, %v1422_v17 }
  0xe0   : > { %v485_v62 = vpop.f32.mrf.mxu2  ;;  %v317_v1 = vpop.f32.mrf.mxu0 }
  0xe1   : > { %v592_v37 = vpop.f32.mrf.mxu3  ;;  %v642_v38 = vmax.f32 %v632_v56, 0.0  ;;  %v498_v40 = vadd.f32 %v485_v62, %v389_v21  ;;  %v390_v41 = vpop.f32.mrf.mxu1 }
  0xe2   : > { %v391_v34 = vadd.f32 %v390_v41, %v317_v1 }
  0xe3   : > { %653 = vst.msk [vmem:[%s3085_s9 + $0x38] sm:$0xff] %vm645_vm1, %v642_v38  ;;  %v605_v0 = vadd.f32 %v592_v37, %v498_v40 }
  0xe5   : > { %v619_v47 = vmul.f32 %v3060_v10, %v605_v0 }
  0xe7   : > { %v633_v49 = vadd.f32 %v3065_v16, %v619_v47 }
  0xe8   : > { %v487_v48 = vpop.f32.mrf.mxu2  ;;  %v752_v55 = vpop.f32.mrf.mxu0 }
  0xe9   : > { %v594_v45 = vpop.f32.mrf.mxu3  ;;  %v643_v58 = vmax.f32 %v633_v49, 0.0  ;;  %v499_v53 = vadd.f32 %v487_v48, %v391_v34  ;;  %v825_v61 = vpop.f32.mrf.mxu1  ;;  %v1580_v34 = vpack.c.bf16 %v1571_v9, %v1570_v42 }
  0xea   : > { %v826_v6 = vadd.f32 %v825_v61, %v752_v55  ;;  %v1881_v55 = vpack.c.bf16 %v1872_v44, %v1871_v30 }
  0xeb   : > { %654 = vst.msk [vmem:[%s3085_s9 + $0x40] sm:$0xff] %vm645_vm1, %v643_v58  ;;  %v606_v51 = vadd.f32 %v594_v45, %v499_v53  ;;  %2358 = vmatmul.msk.bf16.gmra.mxu0 %vm270_vm0, %v2903_v15 }
  0xec   : > { %2379 = vmatmul.msk.bf16.gmra.mxu1 %vm270_vm0, %v2901_v14  ;;  %v3233_v14 = vld [vmem:[%s3450_s2] ss:$0 sm:$0xff] }
  0xed   : > { %v620_v4 = vmul.f32 %v3060_v10, %v606_v51  ;;  %2408 = vmatmul.msk.bf16.gmra.mxu2 %vm270_vm0, %v1320_v2 }
  0xee   : > { %2437 = vmatmul.msk.bf16.gmra.mxu3 %vm270_vm0, %v3217_v3 }
  0xef   : > { %v634_v63 = vadd.f32 %v3065_v16, %v620_v4 }
  0xf0   : > { %v922_v22 = vpop.f32.mrf.mxu2  ;;  %v754_v10 = vpop.f32.mrf.mxu0 }
  0xf1   : > { %v1029_v50 = vpop.f32.mrf.mxu3  ;;  %v644_v59 = vmax.f32 %v634_v63, 0.0  ;;  %v947_v15 = vadd.f32 %v922_v22, %v826_v6  ;;  %v827_v7 = vpop.f32.mrf.mxu1 }
  0xf2   : > { %v828_v24 = vadd.f32 %v827_v7, %v754_v10  ;;  %v1572_v7 = vld [vmem:[%s2736_s14 + $0x1b] sm:$0xff] }
  0xf3   : > { %655 = vst.msk [vmem:[%s3085_s9 + $0x48] sm:$0xff] %vm645_vm1, %v644_v59  ;;  %v1054_v8 = vadd.f32 %v1029_v50, %v947_v15 }
  0xf5   : > { %v1068_v16 = vmul.f32 %v3233_v14, %v1054_v8  ;;  %v1573_v8 = vld [vmem:[%s2736_s14 + $0x23] sm:$0xff] }
  0xf7   : > { %v1082_v19 = vadd.f32 %v3240_v11, %v1068_v16  ;;  %v1873_v16 = vld [vmem:[%s2736_s14 + $0x26] sm:$0xff] }
  0xf8   : > { %v924_v43 = vpop.f32.mrf.mxu2  ;;  %v757_v28 = vpop.f32.mrf.mxu0 }
  0xf9   : > { %v1031_v52 = vpop.f32.mrf.mxu3  ;;  %v1092_v25 = vmax.f32 %v1082_v19, 0.0  ;;  %v948_v29 = vadd.f32 %v924_v43, %v828_v24  ;;  %v830_v27 = vpop.f32.mrf.mxu1  ;;  %v1581_v24 = vpack.c.bf16 %v1573_v8, %v1572_v7 }
  0xfa   : > { %v831_v62 = vadd.f32 %v830_v27, %v757_v28 }
  0xfb   : > { %2313 = vst.msk [vmem:[%s3085_s9 + $0x50] sm:$0xff] %vm645_vm1, %v1092_v25  ;;  %v1055_v21 = vadd.f32 %v1031_v52, %v948_v29  ;;  %2359 = vmatmul.msk.bf16.gmra.mxu0 %vm270_vm0, %v2941_v36 }
  0xfc   : > { %2380 = vmatmul.msk.bf16.gmra.mxu1 %vm270_vm0, %v2939_v35 }
  0xfd   : > { %v1069_v56 = vmul.f32 %v3233_v14, %v1055_v21  ;;  %2409 = vmatmul.msk.bf16.gmra.mxu2 %vm270_vm0, %v1321_v32 }
  0xfe   : > { %2438 = vmatmul.msk.bf16.gmra.mxu3 %vm270_vm0, %v3248_v33 }
  0xff   : > { %v1083_v23 = vadd.f32 %v3240_v11, %v1069_v56 }
 0x100   : > { %v927_v37 = vpop.f32.mrf.mxu2  ;;  %v759_v1 = vpop.f32.mrf.mxu0 }
 0x101   : > { %v1034_v38 = vpop.f32.mrf.mxu3  ;;  %v1093_v36 = vmax.f32 %v1083_v23, 0.0  ;;  %v949_v40 = vadd.f32 %v927_v37, %v831_v62  ;;  %v832_v41 = vpop.f32.mrf.mxu1 }
 0x102   : > { %v833_v20 = vadd.f32 %v832_v41, %v759_v1  ;;  %v1574_v41 = vld [vmem:[%s2736_s14 + $0x2b] sm:$0xff] }
 0x103   : > { %2314 = vst.msk [vmem:[%s3085_s9 + $0x58] sm:$0xff] %vm645_vm1, %v1093_v36  ;;  %v1056_v35 = vadd.f32 %v1034_v38, %v949_v40 }
 0x105   : > { %v1070_v0 = vmul.f32 %v3233_v14, %v1056_v35  ;;  %v1575_v35 = vld [vmem:[%s2736_s14 + $0x33] sm:$0xff] }
 0x107   : > { %v1084_v47 = vadd.f32 %v3240_v11, %v1070_v0  ;;  %v1875_v0 = vld [vmem:[%s2736_s14 + $0x36] sm:$0xff] }
 0x108   : > { %v929_v26 = vpop.f32.mrf.mxu2  ;;  %v762_v58 = vpop.f32.mrf.mxu0 }
 0x109   : > { %v1036_v49 = vpop.f32.mrf.mxu3  ;;  %v1094_v48 = vmax.f32 %v1084_v47, 0.0  ;;  %v950_v45 = vadd.f32 %v929_v26, %v833_v20  ;;  %v835_v53 = vpop.f32.mrf.mxu1  ;;  %v1582_v47 = vpack.c.bf16 %v1575_v35, %v1574_v41 }
 0x10a   : > { %v836_v51 = vadd.f32 %v835_v53, %v762_v58 }
 0x10b   : > { %2315 = vst.msk [vmem:[%s3085_s9 + $0x60] sm:$0xff] %vm645_vm1, %v1094_v48  ;;  %v1057_v61 = vadd.f32 %v1036_v49, %v950_v45  ;;  %2481 = vmatmul.msk.bf16.vlgmr.msrb.gmra.mxu0 %vm270_vm0, %v2969_v46 }
 0x10c   : > { %2502 = vmatmul.msk.bf16.vlgmr.msrb.gmra.mxu1 %vm270_vm0, %v1580_v34 }
 0x10d   : > { %v1071_v2 = vmul.f32 %v3233_v14, %v1057_v61  ;;  %2531 = vmatmul.msk.bf16.vlgmr.msrb.gmra.mxu2 %vm270_vm0, %v3118_v12  ;;  %v1874_v12 = vld [vmem:[%s2736_s14 + $0x2e] sm:$0xff] }
 0x10e   : > { %2560 = vmatmul.msk.bf16.vlgmr.msrb.gmra.mxu3 %vm270_vm0, %v1881_v55  ;;  %v1882_v28 = vpack.c.bf16 %v1874_v12, %v1873_v16 }
 0x10f   : > { %v1085_v4 = vadd.f32 %v3240_v11, %v1071_v2 }
 0x110   : > { %v932_v6 = vpop.f32.mrf.mxu2  ;;  %v764_v50 = vpop.f32.mrf.mxu0 }
 0x111   : > { %v1039_v63 = vpop.f32.mrf.mxu3  ;;  %v1095_v22 = vmax.f32 %v1085_v4, 0.0  ;;  %v951_v46 = vadd.f32 %v932_v6, %v836_v51  ;;  %v837_v59 = vpop.f32.mrf.mxu1 }
 0x112   : > { %v838_v17 = vadd.f32 %v837_v59, %v764_v50  ;;  %v1577_v50 = vld [vmem:[%s2736_s14 + $0x43] sm:$0xff] }
 0x113   : > { %2316 = vst.msk [vmem:[%s3085_s9 + $0x68] sm:$0xff] %vm645_vm1, %v1095_v22  ;;  %v1058_v15 = vadd.f32 %v1039_v63, %v951_v46  ;;  %v1576_v46 = vld [vmem:[%s2736_s14 + $0x3b] sm:$0xff]  ;;  %v1877_v59 = vld [vmem:[%s2736_s14 + $0x46] sm:$0xff] }
 0x114   : > { %v1583_v16 = vpack.c.bf16 %v1577_v50, %v1576_v46 }
 0x115   : > { %v1072_v10 = vmul.f32 %v3233_v14, %v1058_v15 }
 0x117   : > { %v1086_v13 = vadd.f32 %v3240_v11, %v1072_v10 }
 0x118   : > { %v934_v18 = vpop.f32.mrf.mxu2  ;;  %v767_v25 = vpop.f32.mrf.mxu0 }
 0x119   : > { %v1041_v19 = vpop.f32.mrf.mxu3  ;;  %v1096_v43 = vmax.f32 %v1086_v13, 0.0  ;;  %v952_v52 = vadd.f32 %v934_v18, %v838_v17  ;;  %v840_v29 = vpop.f32.mrf.mxu1 }
 0x11a   : > { %v841_v21 = vadd.f32 %v840_v29, %v767_v25 }
 0x11b   : > { %2317 = vst.msk [vmem:[%s3085_s9 + $0x70] sm:$0xff] %vm645_vm1, %v1096_v43  ;;  %v1059_v27 = vadd.f32 %v1041_v19, %v952_v52  ;;  %2482 = vmatmul.msk.bf16.gmra.mxu0 %vm270_vm0, %v2998_v54 }
 0x11c   : > { %2503 = vmatmul.msk.bf16.gmra.mxu1 %vm270_vm0, %v1581_v24 }
 0x11d   : > { %v1073_v32 = vmul.f32 %v3233_v14, %v1059_v27  ;;  %2532 = vmatmul.msk.bf16.gmra.mxu2 %vm270_vm0, %v3151_v57  ;;  %v1876_v57 = vld [vmem:[%s2736_s14 + $0x3e] sm:$0xff] }
 0x11e   : > { %2561 = vmatmul.msk.bf16.gmra.mxu3 %vm270_vm0, %v1882_v28  ;;  %v1883_v48 = vpack.c.bf16 %v1876_v57, %v1875_v0 }
 0x11f   : > { %v1087_v56 = vadd.f32 %v3240_v11, %v1073_v32 }
 0x120   : > { %v937_v62 = vpop.f32.mrf.mxu2  ;;  %v769_v38 = vpop.f32.mrf.mxu0 }
 0x121   : > { %v1044_v23 = vpop.f32.mrf.mxu3  ;;  %v1097_v37 = vmax.f32 %v1087_v56, 0.0  ;;  %v953_v54 = vadd.f32 %v937_v62, %v841_v21  ;;  %v842_v36 = vpop.f32.mrf.mxu1  ;;  %v3343_v56 = vld [vmem:[%s3451_s3] ss:$0 sm:$0xff]  ;;  %v1578_v62 = vld [vmem:[%s2736_s14 + $0x4b] sm:$0xff] }
 0x122   : > { %v843_v9 = vadd.f32 %v842_v36, %v769_v38 }
 0x123   : > { %2318 = vst.msk [vmem:[%s3085_s9 + $0x78] sm:$0xff] %vm645_vm1, %v1097_v37  ;;  %v1060_v40 = vadd.f32 %v1044_v23, %v953_v54  ;;  %v1579_v23 = vld [vmem:[%s2736_s14 + $0x53] sm:$0xff]  ;;  %v1880_v54 = vld [vmem:[%s2736_s14 + $0x5e] sm:$0xff] }
 0x124   : > { %v1879_v37 = vld [vmem:[%s2736_s14 + $0x56] sm:$0xff]  ;;  %v1584_v41 = vpack.c.bf16 %v1579_v23, %v1578_v62 }
 0x125   : > { %v1074_v1 = vmul.f32 %v3233_v14, %v1060_v40 }
 0x127   : > { %v1088_v42 = vadd.f32 %v3240_v11, %v1074_v1 }
 0x128   : > { %v939_v30 = vpop.f32.mrf.mxu2  ;;  %v772_v49 = vpop.f32.mrf.mxu0 }
 0x129   : > { %v1046_v44 = vpop.f32.mrf.mxu3  ;;  %v1098_v20 = vmax.f32 %v1088_v42, 0.0  ;;  %v954_v26 = vadd.f32 %v939_v30, %v843_v9  ;;  %v845_v34 = vpop.f32.mrf.mxu1  ;;  %v1885_v9 = vpack.c.bf16 %v1880_v54, %v1879_v37 }
 0x12a   : > { %v846_v53 = vadd.f32 %v845_v34, %v772_v49 }
 0x12b   : > { %2319 = vst.msk [vmem:[%s3085_s9 + $0x80] sm:$0xff] %vm645_vm1, %v1098_v20  ;;  %v1061_v45 = vadd.f32 %v1046_v44, %v954_v26  ;;  %2483 = vmatmul.msk.bf16.gmra.mxu0 %vm270_vm0, %v3017_v60 }
 0x12c   : > { %2504 = vmatmul.msk.bf16.gmra.mxu1 %vm270_vm0, %v1582_v47 }
 0x12d   : > { %v1075_v58 = vmul.f32 %v3233_v14, %v1061_v45  ;;  %2533 = vmatmul.msk.bf16.gmra.mxu2 %vm270_vm0, %v3184_v31  ;;  %v1878_v31 = vld [vmem:[%s2736_s14 + $0x4e] sm:$0xff] }
 0x12e   : > { %2562 = vmatmul.msk.bf16.gmra.mxu3 %vm270_vm0, %v1883_v48  ;;  %v1884_v19 = vpack.c.bf16 %v1878_v31, %v1877_v59 }
 0x12f   : > { %v1089_v55 = vadd.f32 %v3240_v11, %v1075_v58 }
 0x130   : > { %v942_v61 = vpop.f32.mrf.mxu2  ;;  %v774_v4 = vpop.f32.mrf.mxu0 }
 0x131   : > { %v1049_v2 = vpop.f32.mrf.mxu3  ;;  %v1099_v51 = vmax.f32 %v1089_v55, 0.0  ;;  %v955_v60 = vadd.f32 %v942_v61, %v846_v53  ;;  %v847_v6 = vpop.f32.mrf.mxu1 }
 0x132   : > { %v848_v10 = vadd.f32 %v847_v6, %v774_v4 }
 0x133   : > { %2320 = vst.msk [vmem:[%s3085_s9 + $0x88] sm:$0xff] %vm645_vm1, %v1099_v51  ;;  %v1062_v63 = vadd.f32 %v1049_v2, %v955_v60 }
 0x135   : > { %v1076_v22 = vmul.f32 %v3233_v14, %v1062_v63 }
 0x137   : > { %v1090_v15 = vadd.f32 %v3240_v11, %v1076_v22 }
 0x138   : > { %v944_v7 = vpop.f32.mrf.mxu2  ;;  %v1209_v17 = vpop.f32.mrf.mxu0 }
 0x139   : > { %v1051_v8 = vpop.f32.mrf.mxu3  ;;  %v1100_v12 = vmax.f32 %v1090_v15, 0.0  ;;  %v956_v13 = vadd.f32 %v944_v7, %v848_v10  ;;  %v1282_v18 = vpop.f32.mrf.mxu1 }
 0x13a   : > { %v1283_v52 = vadd.f32 %v1282_v18, %v1209_v17 }
 0x13b   : > { %2321 = vst.msk [vmem:[%s3085_s9 + $0x90] sm:$0xff] %vm645_vm1, %v1100_v12  ;;  %v1063_v24 = vadd.f32 %v1051_v8, %v956_v13  ;;  %2484 = vmatmul.msk.bf16.gmra.mxu0 %vm270_vm0, %v3048_v5 }
 0x13c   : > { %2505 = vmatmul.msk.bf16.gmra.mxu1 %vm270_vm0, %v1583_v16 }
 0x13d   : > { %v1077_v43 = vmul.f32 %v3233_v14, %v1063_v24  ;;  %2534 = vmatmul.msk.bf16.gmra.mxu2 %vm270_vm0, %v3217_v3  ;;  %v3336_v14 = vld [vmem:[%s3450_s2] ss:$0 sm:$0xff] }
 0x13e   : > { %2563 = vmatmul.msk.bf16.gmra.mxu3 %vm270_vm0, %v1884_v19 }
 0x13f   : > { %v1091_v25 = vadd.f32 %v3240_v11, %v1077_v43 }
 0x140   : > { %v1379_v29 = vpop.f32.mrf.mxu2  ;;  %v1211_v32 = vpop.f32.mrf.mxu0 }
 0x141   : > { %v1486_v28 = vpop.f32.mrf.mxu3  ;;  %v1101_v27 = vmax.f32 %v1091_v25, 0.0  ;;  %v1404_v5 = vadd.f32 %v1379_v29, %v1283_v52  ;;  %v1284_v21 = vpop.f32.mrf.mxu1 }
 0x142   : > { %v1285_v36 = vadd.f32 %v1284_v21, %v1211_v32 }
 0x143   : > { %2322 = vst.msk [vmem:[%s3085_s9 + $0x98] sm:$0xff] %vm645_vm1, %v1101_v27  ;;  %v1511_v3 = vadd.f32 %v1486_v28, %v1404_v5 }
 0x145   : > { %v1525_v11 = vmul.f32 %v3336_v14, %v1511_v3 }
 0x147   : > { %v1539_v38 = vadd.f32 %v3343_v56, %v1525_v11 }
 0x148   : > { %v1381_v40 = vpop.f32.mrf.mxu2  ;;  %v1214_v57 = vpop.f32.mrf.mxu0 }
 0x149   : > { %v1488_v1 = vpop.f32.mrf.mxu3  ;;  %v1549_v35 = vmax.f32 %v1539_v38, 0.0  ;;  %v1405_v0 = vadd.f32 %v1381_v40, %v1285_v36  ;;  %v1287_v42 = vpop.f32.mrf.mxu1 }
 0x14a   : > { %v1288_v47 = vadd.f32 %v1287_v42, %v1214_v57 }
 0x14b   : > { %2439 = vst.msk [vmem:[%s3085_s9 + $0xa0] sm:$0xff] %vm645_vm1, %v1549_v35  ;;  %v1512_v30 = vadd.f32 %v1488_v1, %v1405_v0  ;;  %2485 = vmatmul.msk.bf16.gmra.mxu0 %vm270_vm0, %v3091_v39 }
 0x14c   : > { %2506 = vmatmul.msk.bf16.gmra.mxu1 %vm270_vm0, %v1584_v41 }
 0x14d   : > { %v1526_v44 = vmul.f32 %v3336_v14, %v1512_v30  ;;  %2535 = vmatmul.msk.bf16.gmra.mxu2 %vm270_vm0, %v3248_v33 }
 0x14e   : > { %2564 = vmatmul.msk.bf16.gmra.mxu3 %vm270_vm0, %v1885_v9 }
 0x14f   : > { %v1540_v20 = vadd.f32 %v3343_v56, %v1526_v44 }
 0x150   : > { %v1384_v26 = vpop.f32.mrf.mxu2  ;;  %v1216_v45 = vpop.f32.mrf.mxu0 }
 0x151   : > { %v1491_v49 = vpop.f32.mrf.mxu3  ;;  %v1550_v34 = vmax.f32 %v1540_v20, 0.0  ;;  %v1406_v48 = vadd.f32 %v1384_v26, %v1288_v47  ;;  %v1289_v58 = vpop.f32.mrf.mxu1 }
 0x152   : > { %v1290_v61 = vadd.f32 %v1289_v58, %v1216_v45 }
 0x153   : > { %2440 = vst.msk [vmem:[%s3085_s9 + $0xa8] sm:$0xff] %vm645_vm1, %v1550_v34  ;;  %v1513_v39 = vadd.f32 %v1491_v49, %v1406_v48 }
 0x155   : > { %v1527_v53 = vmul.f32 %v3336_v14, %v1513_v39 }
 0x157   : > { %v1541_v55 = vadd.f32 %v3343_v56, %v1527_v53 }
 0x158   : > { %v1386_v33 = vpop.f32.mrf.mxu2  ;;  %v1219_v4 = vpop.f32.mrf.mxu0 }
 0x159   : > { %v1493_v2 = vpop.f32.mrf.mxu3  ;;  %v1551_v51 = vmax.f32 %v1541_v55, 0.0  ;;  %v1407_v60 = vadd.f32 %v1386_v33, %v1290_v61  ;;  %v1292_v6 = vpop.f32.mrf.mxu1 }
 0x15a   : > { %v1293_v46 = vadd.f32 %v1292_v6, %v1219_v4 }
 0x15b   : > { %2441 = vst.msk [vmem:[%s3085_s9 + $0xb0] sm:$0xff] %vm645_vm1, %v1551_v51  ;;  %v1514_v63 = vadd.f32 %v1493_v2, %v1407_v60 }
 0x15d   : > { %v1528_v22 = vmul.f32 %v3336_v14, %v1514_v63 }
 0x15f   : > { %v1542_v50 = vadd.f32 %v3343_v56, %v1528_v22 }
 0x160   : > { %v1389_v59 = vpop.f32.mrf.mxu2  ;;  %v1221_v7 = vpop.f32.mrf.mxu0 }
 0x161   : > { %v1496_v31 = vpop.f32.mrf.mxu3  ;;  %v1552_v15 = vmax.f32 %v1542_v50, 0.0  ;;  %v1408_v10 = vadd.f32 %v1389_v59, %v1293_v46  ;;  %v1294_v8 = vpop.f32.mrf.mxu1 }
 0x162   : > { %v1295_v17 = vadd.f32 %v1294_v8, %v1221_v7 }
 0x163   : > { %2442 = vst.msk [vmem:[%s3085_s9 + $0xb8] sm:$0xff] %vm645_vm1, %v1552_v15  ;;  %v1515_v16 = vadd.f32 %v1496_v31, %v1408_v10  ;;  %v3396_v15 = vld [vmem:[%s3450_s2] ss:$0 sm:$0xff] }
 0x165   : > { %v1529_v12 = vmul.f32 %v3336_v14, %v1515_v16 }
 0x167   : > { %v1543_v13 = vadd.f32 %v3343_v56, %v1529_v12 }
 0x168   : > { %v1391_v18 = vpop.f32.mrf.mxu2  ;;  %v1224_v52 = vpop.f32.mrf.mxu0 }
 0x169   : > { %v1498_v19 = vpop.f32.mrf.mxu3  ;;  %v1553_v24 = vmax.f32 %v1543_v13, 0.0  ;;  %v1409_v43 = vadd.f32 %v1391_v18, %v1295_v17  ;;  %v1297_v25 = vpop.f32.mrf.mxu1 }
 0x16a   : > { %v1298_v27 = vadd.f32 %v1297_v25, %v1224_v52 }
 0x16b   : > { %2443 = vst.msk [vmem:[%s3085_s9 + $0xc0] sm:$0xff] %vm645_vm1, %v1553_v24  ;;  %v1516_v29 = vadd.f32 %v1498_v19, %v1409_v43 }
 0x16d   : > { %v1530_v28 = vmul.f32 %v3336_v14, %v1516_v29 }
 0x16f   : > { %v1544_v5 = vadd.f32 %v3343_v56, %v1530_v28 }
 0x170   : > { %v1394_v32 = vpop.f32.mrf.mxu2  ;;  %v1226_v62 = vpop.f32.mrf.mxu0 }
 0x171   : > { %v1501_v21 = vpop.f32.mrf.mxu3  ;;  %v1554_v3 = vmax.f32 %v1544_v5, 0.0  ;;  %v1410_v11 = vadd.f32 %v1394_v32, %v1298_v27  ;;  %v1299_v23 = vpop.f32.mrf.mxu1 }
 0x172   : > { %v1300_v36 = vadd.f32 %v1299_v23, %v1226_v62 }
 0x173   : > { %2444 = vst.msk [vmem:[%s3085_s9 + $0xc8] sm:$0xff] %vm645_vm1, %v1554_v3  ;;  %v1517_v37 = vadd.f32 %v1501_v21, %v1410_v11 }
 0x175   : > { %v1531_v54 = vmul.f32 %v3336_v14, %v1517_v37 }
 0x177   : > { %v1545_v38 = vadd.f32 %v3343_v56, %v1531_v54 }
 0x178   : > { %v1396_v40 = vpop.f32.mrf.mxu2  ;;  %v1229_v0 = vpop.f32.mrf.mxu0 }
 0x179   : > { %v1503_v1 = vpop.f32.mrf.mxu3  ;;  %v1555_v41 = vmax.f32 %v1545_v38, 0.0  ;;  %v1411_v35 = vadd.f32 %v1396_v40, %v1300_v36  ;;  %v1302_v57 = vpop.f32.mrf.mxu1 }
 0x17a   : > { %v1303_v30 = vadd.f32 %v1302_v57, %v1229_v0 }
 0x17b   : > { %2445 = vst.msk [vmem:[%s3085_s9 + $0xd0] sm:$0xff] %vm645_vm1, %v1555_v41  ;;  %v1518_v42 = vadd.f32 %v1503_v1, %v1411_v35 }
 0x17d   : > { %v1532_v9 = vmul.f32 %v3336_v14, %v1518_v42 }
 0x17f   : > { %v1546_v44 = vadd.f32 %v3343_v56, %v1532_v9 }
 0x180   : > { %v1399_v47 = vpop.f32.mrf.mxu2  ;;  %v1231_v34 = vpop.f32.mrf.mxu0 }
 0x181   : > { %v1506_v20 = vpop.f32.mrf.mxu3  ;;  %v1556_v26 = vmax.f32 %v1546_v44, 0.0  ;;  %v1412_v49 = vadd.f32 %v1399_v47, %v1303_v30  ;;  %v1304_v48 = vpop.f32.mrf.mxu1 }
 0x182   : > { %v1305_v53 = vadd.f32 %v1304_v48, %v1231_v34 }
 0x183   : > { %2446 = vst.msk [vmem:[%s3085_s9 + $0xd8] sm:$0xff] %vm645_vm1, %v1556_v26  ;;  %v1519_v45 = vadd.f32 %v1506_v20, %v1412_v49 }
 0x185   : > { %v1533_v58 = vmul.f32 %v3336_v14, %v1519_v45 }
 0x187   : > { %v1547_v39 = vadd.f32 %v3343_v56, %v1533_v58 }
 0x188   : > { %v1401_v55 = vpop.f32.mrf.mxu2  ;;  %v1666_v51 = vpop.f32.mrf.mxu0 }
 0x189   : > { %v1508_v61 = vpop.f32.mrf.mxu3  ;;  %v1557_v33 = vmax.f32 %v1547_v39, 0.0  ;;  %v1413_v2 = vadd.f32 %v1401_v55, %v1305_v53  ;;  %v1739_v60 = vpop.f32.mrf.mxu1 }
 0x18a   : > { %v1740_v63 = vadd.f32 %v1739_v60, %v1666_v51 }
 0x18b   : > { %2447 = vst.msk [vmem:[%s3085_s9 + $0xe0] sm:$0xff] %vm645_vm1, %v1557_v33  ;;  %v1520_v4 = vadd.f32 %v1508_v61, %v1413_v2 }
 0x18d   : > { %v1534_v6 = vmul.f32 %v3336_v14, %v1520_v4  ;;  %v3403_v14 = vld [vmem:[%s3451_s3] ss:$0 sm:$0xff] }
 0x18f   : > { %v1548_v22 = vadd.f32 %v3343_v56, %v1534_v6 }
 0x190   : > { %v1836_v46 = vpop.f32.mrf.mxu2  ;;  %v1668_v10 = vpop.f32.mrf.mxu0 }
 0x191   : > { %v1943_v50 = vpop.f32.mrf.mxu3  ;;  %v1558_v59 = vmax.f32 %v1548_v22, 0.0  ;;  %v1861_v31 = vadd.f32 %v1836_v46, %v1740_v63  ;;  %v1741_v7 = vpop.f32.mrf.mxu1 }
 0x192   : > { %v1742_v12 = vadd.f32 %v1741_v7, %v1668_v10 }
 0x193   : > { %2448 = vst.msk [vmem:[%s3085_s9 + $0xe8] sm:$0xff] %vm645_vm1, %v1558_v59  ;;  %v1968_v8 = vadd.f32 %v1943_v50, %v1861_v31 }
 0x195   : > { %v1982_v56 = vmul.f32 %v3396_v15, %v1968_v8 }
 0x197   : > { %v1996_v16 = vadd.f32 %v3403_v14, %v1982_v56 }
 0x198   : > { %v1838_v13 = vpop.f32.mrf.mxu2  ;;  %v1671_v24 = vpop.f32.mrf.mxu0 }
 0x199   : > { %v1945_v17 = vpop.f32.mrf.mxu3  ;;  %v2006_v18 = vmax.f32 %v1996_v16, 0.0  ;;  %v1862_v19 = vadd.f32 %v1838_v13, %v1742_v12  ;;  %v1744_v43 = vpop.f32.mrf.mxu1 }
 0x19a   : > { %v1745_v29 = vadd.f32 %v1744_v43, %v1671_v24 }
 0x19b   : > { %2565 = vst.msk [vmem:[%s3085_s9 + $0xf0] sm:$0xff] %vm645_vm1, %v2006_v18  ;;  %v1969_v52 = vadd.f32 %v1945_v17, %v1862_v19 }
 0x19d   : > { %v1983_v25 = vmul.f32 %v3396_v15, %v1969_v52 }
 0x19f   : > { %v1997_v28 = vadd.f32 %v3403_v14, %v1983_v25 }
 0x1a0   : > { %v1841_v27 = vpop.f32.mrf.mxu2  ;;  %v1673_v3 = vpop.f32.mrf.mxu0 }
 0x1a1   : > { %v1948_v5 = vpop.f32.mrf.mxu3  ;;  %v2007_v32 = vmax.f32 %v1997_v28, 0.0  ;;  %v1863_v21 = vadd.f32 %v1841_v27, %v1745_v29  ;;  %v1746_v11 = vpop.f32.mrf.mxu1 }
 0x1a2   : > { %v1747_v54 = vadd.f32 %v1746_v11, %v1673_v3 }
 0x1a3   : > { %2566 = vst.msk [vmem:[%s3085_s9 + $0xf8] sm:$0xff] %vm645_vm1, %v2007_v32  ;;  %v1970_v62 = vadd.f32 %v1948_v5, %v1863_v21 }
 0x1a5   : > { %v1984_v23 = vmul.f32 %v3396_v15, %v1970_v62 }
 0x1a7   : > { %v1998_v37 = vadd.f32 %v3403_v14, %v1984_v23 }
 0x1a8   : > { %v1843_v38 = vpop.f32.mrf.mxu2  ;;  %v1676_v41 = vpop.f32.mrf.mxu0 }
 0x1a9   : > { %v1950_v36 = vpop.f32.mrf.mxu3  ;;  %v2008_v40 = vmax.f32 %v1998_v37, 0.0  ;;  %v1864_v1 = vadd.f32 %v1843_v38, %v1747_v54  ;;  %v1749_v35 = vpop.f32.mrf.mxu1 }
 0x1aa   : > { %v1750_v42 = vadd.f32 %v1749_v35, %v1676_v41 }
 0x1ab   : > { %2567 = vst.msk [vmem:[%s3085_s9 + $0x100] sm:$0xff] %vm645_vm1, %v2008_v40  ;;  %v1971_v0 = vadd.f32 %v1950_v36, %v1864_v1 }
 0x1ad   : > { %v1985_v57 = vmul.f32 %v3396_v15, %v1971_v0 }
 0x1af   : > { %v1999_v9 = vadd.f32 %v3403_v14, %v1985_v57 }
 0x1b0   : > { %v1846_v30 = vpop.f32.mrf.mxu2  ;;  %v1678_v26 = vpop.f32.mrf.mxu0 }
 0x1b1   : > { %v1953_v44 = vpop.f32.mrf.mxu3  ;;  %v2009_v47 = vmax.f32 %v1999_v9, 0.0  ;;  %v1865_v20 = vadd.f32 %v1846_v30, %v1750_v42  ;;  %v1751_v49 = vpop.f32.mrf.mxu1 }
 0x1b2   : > { %v1752_v58 = vadd.f32 %v1751_v49, %v1678_v26 }
 0x1b3   : > { %2568 = vst.msk [vmem:[%s3085_s9 + $0x108] sm:$0xff] %vm645_vm1, %v2009_v47  ;;  %v1972_v34 = vadd.f32 %v1953_v44, %v1865_v20 }
 0x1b5   : > { %v1986_v48 = vmul.f32 %v3396_v15, %v1972_v34 }
 0x1b7   : > { %v2000_v45 = vadd.f32 %v3403_v14, %v1986_v48 }
 0x1b8   : > { %v1848_v39 = vpop.f32.mrf.mxu2  ;;  %v1681_v33 = vpop.f32.mrf.mxu0 }
 0x1b9   : > { %v1955_v53 = vpop.f32.mrf.mxu3  ;;  %v2010_v55 = vmax.f32 %v2000_v45, 0.0  ;;  %v1866_v61 = vadd.f32 %v1848_v39, %v1752_v58  ;;  %v1754_v2 = vpop.f32.mrf.mxu1 }
 0x1ba   : > { %v1755_v4 = vadd.f32 %v1754_v2, %v1681_v33 }
 0x1bb   : > { %2569 = vst.msk [vmem:[%s3085_s9 + $0x110] sm:$0xff] %vm645_vm1, %v2010_v55  ;;  %v1973_v51 = vadd.f32 %v1955_v53, %v1866_v61 }
 0x1bd   : > { %v1987_v60 = vmul.f32 %v3396_v15, %v1973_v51 }
 0x1bf   : > { %v2001_v6 = vadd.f32 %v3403_v14, %v1987_v60 }
 0x1c0   : > { %v1851_v63 = vpop.f32.mrf.mxu2  ;;  %v1683_v59 = vpop.f32.mrf.mxu0 }
 0x1c1   : > { %v1958_v22 = vpop.f32.mrf.mxu3  ;;  %v2011_v46 = vmax.f32 %v2001_v6, 0.0  ;;  %v1867_v50 = vadd.f32 %v1851_v63, %v1755_v4  ;;  %v1756_v31 = vpop.f32.mrf.mxu1 }
 0x1c2   : > { %v1757_v56 = vadd.f32 %v1756_v31, %v1683_v59 }
 0x1c3   : > { %2570 = vst.msk [vmem:[%s3085_s9 + $0x118] sm:$0xff] %vm645_vm1, %v2011_v46  ;;  %v1974_v10 = vadd.f32 %v1958_v22, %v1867_v50 }
 0x1c5   : > { %v1988_v7 = vmul.f32 %v3396_v15, %v1974_v10 }
 0x1c7   : > { %v2002_v8 = vadd.f32 %v3403_v14, %v1988_v7 }
 0x1c8   : > { %v1853_v16 = vpop.f32.mrf.mxu2  ;;  %v1686_v18 = vpop.f32.mrf.mxu0 }
 0x1c9   : > { %v1960_v12 = vpop.f32.mrf.mxu3  ;;  %v2012_v13 = vmax.f32 %v2002_v8, 0.0  ;;  %v1868_v17 = vadd.f32 %v1853_v16, %v1757_v56  ;;  %v1759_v19 = vpop.f32.mrf.mxu1 }
 0x1ca   : > { %v1760_v52 = vadd.f32 %v1759_v19, %v1686_v18 }
 0x1cb   : > { %2571 = vst.msk [vmem:[%s3085_s9 + $0x120] sm:$0xff] %vm645_vm1, %v2012_v13  ;;  %v1975_v24 = vadd.f32 %v1960_v12, %v1868_v17 }
 0x1cd   : > { %v1989_v43 = vmul.f32 %v3396_v15, %v1975_v24 }
 0x1cf   : > { %v2003_v25 = vadd.f32 %v3403_v14, %v1989_v43 }
 0x1d0   : > { %v1856_v29 = vpop.f32.mrf.mxu2  ;;  %v1688_v21 = vpop.f32.mrf.mxu0 }
 0x1d1   : > { %v1963_v28 = vpop.f32.mrf.mxu3  ;;  %v2013_v27 = vmax.f32 %v2003_v25, 0.0  ;;  %v1869_v5 = vadd.f32 %v1856_v29, %v1760_v52  ;;  %v1761_v3 = vpop.f32.mrf.mxu1 }
 0x1d2   : > { %v1762_v23 = vadd.f32 %v1761_v3, %v1688_v21 }
 0x1d3   : > { %2572 = vst.msk [vmem:[%s3085_s9 + $0x128] sm:$0xff] %vm645_vm1, %v2013_v27  ;;  %v1976_v32 = vadd.f32 %v1963_v28, %v1869_v5 }
 0x1d5   : > { %v1990_v11 = vmul.f32 %v3396_v15, %v1976_v32 }
 0x1d7   : > { %v2004_v62 = vadd.f32 %v3403_v14, %v1990_v11 }
 0x1d8   : > { %v1858_v37 = vpop.f32.mrf.mxu2 }
 0x1d9   : > { %v2014_v54 = vmax.f32 %v2004_v62, 0.0  ;;  %v1870_v38 = vadd.f32 %v1858_v37, %v1762_v23  ;;  %v1965_v36 = vpop.f32.mrf.mxu3 }
 0x1db   : > { %2573 = vst.msk [vmem:[%s3085_s9 + $0x130] sm:$0xff] %vm645_vm1, %v2014_v54  ;;  %v1977_v40 = vadd.f32 %v1965_v36, %v1870_v38 }
 0x1dd   : > { %v1991_v1 = vmul.f32 %v3396_v15, %v1977_v40 }
 0x1df   : > { %v2005_v41 = vadd.f32 %v3403_v14, %v1991_v1 }
 0x1e1   : > { %v2015_v35 = vmax.f32 %v2005_v41, 0.0 }
 0x1e3   : > { %2574 = vst.msk [vmem:[%s3085_s9 + $0x138] sm:$0xff] %vm645_vm1, %v2015_v35 }
 0x1e4 PF: > { %s14_s15 = sadd.s32 1, %s2665_s15  }
 0x1e5   : > { %p11_p4 = scmp.ge.s32.totalorder %s14_s15, 4  }
 0x1e7   :  { %13 = sbr.rel (!%p11_p4) target bundleno = 1 (0x1), region = 84 }

// kernel: conv_decoder_forward.7
= control target key start
LH: loop header
LB: loop body
LE: loop exit
PB: predicated region body
PF: predicated region fallthrough
CT: control target
= control target key end

     0   :  { %s5276_s15 = smov 0   ;;  %s6907_s0 = inlined_call_operand.vmem [shape: f32[2,328,32], index: 0, kind: input, shape index: {}]   ;;  %s6908_s1 = inlined_call_operand.vmem [shape: bf16[4,4,32,3], index: 1, kind: input, shape index: {}]   ;;  %s6909_s2 = inlined_call_operand.vmem [shape: f32[1,3], index: 2, kind: input, shape index: {}]   ;;  %s6910_s3 = inlined_call_operand.vmem [shape: f32[1,3], index: 3, kind: input, shape index: {}]   ;;  %s6911_s4 = inlined_call_operand.vmem [shape: f32[2,4,288,3], index: 4, kind: output, shape index: {}]  }
   0x1 LB: > { %s4594_s16 = sadd.s32 4294967295, %s5249_s15   ;;  %p4598_p0 = scmp.ge.s32.totalorder %s5249_s15, 1  ;;  %s5249_s15 = sphi %s5276_s15, %s14_s15  }
   0x2   : > { %p162_p1 = scmp.lt.s32.totalorder %s5249_s15, 3 }
   0x4   : > { %p163_p2 = pnand %p4598_p0, %p162_p1 }
   0x5   : > { %p188_p3 = scmp.lt.s32.totalorder (!%p163_p2), %s4594_s16, 1 }
   0x6   : > { %166 = sbr.rel (%p163_p2) target bundleno = 1307 (0x51b), region = 36 }
   0xb   : > { %v5190_v0 = vld [vmem:[%s6908_s1 + $0x18] sm:$0xff]  ;;  %v5188_v1 = vld [vmem:[%s6908_s1 + $0x8] sm:$0xff]  ;;  %v5189_v4 = vld [vmem:[%s6908_s1 + $0x10] sm:$0xff]  ;;  %s6913_s16 = smov (!%p188_p3, %s4594_s16), 1  ;;  %vm328_vm0 = vcmask 261120   ;;  %vm1247_vm1 = vcmask 23552  }
   0xc   : > { %v5192_v2 = vld [vmem:[%s6908_s1 + $0x28] sm:$0xff]  ;;  %v5194_v3 = vld [vmem:[%s6908_s1 + $0x38] sm:$0xff]  ;;  %389 = vmatpush.bf16.msra.mxu0 %v5190_v0  ;;  %554 = vmatpush.bf16.msra.mxu1 %v5188_v1  ;;  %v5187_v5 = vld [vmem:[%s6908_s1] sm:$0xff]  ;;  %s5219_s13 = smul.u32 328, %s6913_s16 }
   0xd   : > { %v5191_v6 = vld [vmem:[%s6908_s1 + $0x20] sm:$0xff]  ;;  %v5193_v7 = vld [vmem:[%s6908_s1 + $0x30] sm:$0xff]  ;;  %778 = vmatpush.bf16.msra.mxu2 %v5192_v2  ;;  %1038 = vmatpush.bf16.msra.mxu3 %v5194_v3  ;;  %v5200_v8 = vld [vmem:[%s6908_s1 + $0x68] sm:$0xff]  ;;  %s5220_s5 = smul.u32 1152, %s6913_s16 }
   0xe   : > { %v5202_v9 = vld [vmem:[%s6908_s1 + $0x78] sm:$0xff]  ;;  %v5196_v11 = vld [vmem:[%s6908_s1 + $0x48] sm:$0xff]  ;;  %s5326_s20 = scalar_lea.vmem %s6907_s0, %s5219_s13 }
   0xf   : > { %v5198_v10 = vld [vmem:[%s6908_s1 + $0x58] sm:$0xff]  ;;  %v257_v12 = vld [vmem:[%s5326_s20 + $0x1] sm:$0xff]  ;;  %v258_v13 = vld [vmem:[%s5326_s20 + $0x9] sm:$0xff]  ;;  %s5466_s10 = scalar_lea.vmem %s6911_s4, %s5220_s5 }
  0x10   : > { %390 = vmatpush.bf16.msra.mxu0 %v5189_v4  ;;  %555 = vmatpush.bf16.msra.mxu1 %v5187_v5  ;;  %v199_v14 = vld [vmem:[%s5326_s20] sm:$0xff]  ;;  %v293_v15 = vpack.c.bf16 %v258_v13, %v257_v12  ;;  %v200_v16 = vld [vmem:[%s5326_s20 + $0x8] sm:$0xff]  ;;  %v647_v17 = vld [vmem:[%s5326_s20 + $0x12] sm:$0xff] }
  0x11   : > { %779 = vmatpush.bf16.msra.mxu2 %v5191_v6  ;;  %1039 = vmatpush.bf16.msra.mxu3 %v5193_v7  ;;  %v648_v18 = vld [vmem:[%s5326_s20 + $0x1a] sm:$0xff]  ;;  %v235_v19 = vpack.c.bf16 %v200_v16, %v199_v14  ;;  %v259_v24 = vld [vmem:[%s5326_s20 + $0x11] sm:$0xff]  ;;  %v649_v28 = vld [vmem:[%s5326_s20 + $0x22] sm:$0xff] }
  0x12   : > { %v683_v20 = vpack.c.bf16 %v648_v18, %v647_v17  ;;  %v907_v21 = vld [vmem:[%s5326_s20 + $0x13] sm:$0xff]  ;;  %v908_v22 = vld [vmem:[%s5326_s20 + $0x1b] sm:$0xff]  ;;  %v650_v29 = vld [vmem:[%s5326_s20 + $0x2a] sm:$0xff] }
  0x13   : > { %4613 = vmatmul.msk.bf16.vlgmr.msra.gmra.mxu0 %vm328_vm0, %v293_v15  ;;  %v943_v23 = vpack.c.bf16 %v908_v22, %v907_v21  ;;  %4639 = vmatmul.msk.bf16.vlgmr.msra.gmra.mxu1 %vm328_vm0, %v235_v19  ;;  %v260_v25 = vld [vmem:[%s5326_s20 + $0x19] sm:$0xff]  ;;  %v201_v26 = vld [vmem:[%s5326_s20 + $0x10] sm:$0xff]  ;;  %v909_v30 = vld [vmem:[%s5326_s20 + $0x23] sm:$0xff]  ;;  %v684_v34 = vpack.c.bf16 %v650_v29, %v649_v28 }
  0x14   : > { %1474 = vmatpush.bf16.msrb.mxu0 %v5198_v10  ;;  %1639 = vmatpush.bf16.msrb.mxu1 %v5196_v11  ;;  %v202_v27 = vld [vmem:[%s5326_s20 + $0x18] sm:$0xff]  ;;  %v910_v31 = vld [vmem:[%s5326_s20 + $0x2b] sm:$0xff]  ;;  %v294_v32 = vpack.c.bf16 %v260_v25, %v259_v24  ;;  %v261_v36 = vld [vmem:[%s5326_s20 + $0x21] sm:$0xff] }
  0x15   : > { %1863 = vmatpush.bf16.msrb.mxu2 %v5200_v8  ;;  %2123 = vmatpush.bf16.msrb.mxu3 %v5202_v9  ;;  %v236_v33 = vpack.c.bf16 %v202_v27, %v201_v26  ;;  %v944_v35 = vpack.c.bf16 %v910_v31, %v909_v30  ;;  %v262_v37 = vld [vmem:[%s5326_s20 + $0x29] sm:$0xff]  ;;  %v203_v38 = vld [vmem:[%s5326_s20 + $0x20] sm:$0xff]  ;;  %v651_v40 = vld [vmem:[%s5326_s20 + $0x32] sm:$0xff] }
  0x16   : > { %4669 = vmatmul.msk.bf16.vlgmr.msra.gmra.mxu2 %vm328_vm0, %v683_v20  ;;  %4699 = vmatmul.msk.bf16.vlgmr.msra.gmra.mxu3 %vm328_vm0, %v943_v23  ;;  %v204_v39 = vld [vmem:[%s5326_s20 + $0x28] sm:$0xff]  ;;  %v652_v41 = vld [vmem:[%s5326_s20 + $0x3a] sm:$0xff]  ;;  %v295_v44 = vpack.c.bf16 %v262_v37, %v261_v36  ;;  %v263_v48 = vld [vmem:[%s5326_s20 + $0x31] sm:$0xff] }
  0x17   : > { %v911_v42 = vld [vmem:[%s5326_s20 + $0x33] sm:$0xff]  ;;  %v912_v43 = vld [vmem:[%s5326_s20 + $0x3b] sm:$0xff]  ;;  %v237_v45 = vpack.c.bf16 %v204_v39, %v203_v38  ;;  %v685_v46 = vpack.c.bf16 %v652_v41, %v651_v40  ;;  %v654_v53 = vld [vmem:[%s5326_s20 + $0x4a] sm:$0xff] }
  0x18   : > { %v945_v47 = vpack.c.bf16 %v912_v43, %v911_v42  ;;  %v264_v49 = vld [vmem:[%s5326_s20 + $0x39] sm:$0xff]  ;;  %v205_v50 = vld [vmem:[%s5326_s20 + $0x30] sm:$0xff]  ;;  %v653_v52 = vld [vmem:[%s5326_s20 + $0x42] sm:$0xff] }
  0x19   : > { %v206_v51 = vld [vmem:[%s5326_s20 + $0x38] sm:$0xff]  ;;  %v913_v54 = vld [vmem:[%s5326_s20 + $0x43] sm:$0xff]  ;;  %v914_v55 = vld [vmem:[%s5326_s20 + $0x4b] sm:$0xff]  ;;  %v296_v56 = vpack.c.bf16 %v264_v49, %v263_v48  ;;  %v686_v58 = vpack.c.bf16 %v654_v53, %v653_v52 }
  0x1a   : > { %v238_v57 = vpack.c.bf16 %v206_v51, %v205_v50  ;;  %v946_v59 = vpack.c.bf16 %v914_v55, %v913_v54  ;;  %v265_v60 = vld [vmem:[%s5326_s20 + $0x41] sm:$0xff]  ;;  %v266_v61 = vld [vmem:[%s5326_s20 + $0x49] sm:$0xff]  ;;  %v655_v0 = vld [vmem:[%s5326_s20 + $0x52] sm:$0xff] }
  0x1b   : > { %v207_v62 = vld [vmem:[%s5326_s20 + $0x40] sm:$0xff]  ;;  %v208_v63 = vld [vmem:[%s5326_s20 + $0x48] sm:$0xff]  ;;  %v915_v2 = vld [vmem:[%s5326_s20 + $0x53] sm:$0xff]  ;;  %v297_v4 = vpack.c.bf16 %v266_v61, %v265_v60 }
  0x1c   : > { %v656_v1 = vld [vmem:[%s5326_s20 + $0x5a] sm:$0xff]  ;;  %v239_v5 = vpack.c.bf16 %v208_v63, %v207_v62  ;;  %v267_v8 = vld [vmem:[%s5326_s20 + $0x51] sm:$0xff]  ;;  %v657_v12 = vld [vmem:[%s5326_s20 + $0x62] sm:$0xff] }
  0x1d   : > { %v916_v3 = vld [vmem:[%s5326_s20 + $0x5b] sm:$0xff]  ;;  %v687_v6 = vpack.c.bf16 %v656_v1, %v655_v0  ;;  %v209_v10 = vld [vmem:[%s5326_s20 + $0x50] sm:$0xff]  ;;  %v917_v14 = vld [vmem:[%s5326_s20 + $0x63] sm:$0xff] }
  0x1e   : > { %v947_v7 = vpack.c.bf16 %v916_v3, %v915_v2  ;;  %v268_v9 = vld [vmem:[%s5326_s20 + $0x59] sm:$0xff]  ;;  %v658_v13 = vld [vmem:[%s5326_s20 + $0x6a] sm:$0xff]  ;;  %v269_v20 = vld [vmem:[%s5326_s20 + $0x61] sm:$0xff] }
  0x1f   : > { %v210_v11 = vld [vmem:[%s5326_s20 + $0x58] sm:$0xff]  ;;  %v918_v15 = vld [vmem:[%s5326_s20 + $0x6b] sm:$0xff]  ;;  %v298_v16 = vpack.c.bf16 %v268_v9, %v267_v8  ;;  %v688_v18 = vpack.c.bf16 %v658_v13, %v657_v12  ;;  %v211_v22 = vld [vmem:[%s5326_s20 + $0x60] sm:$0xff] }
  0x20   : > { %v240_v17 = vpack.c.bf16 %v210_v11, %v209_v10  ;;  %v948_v19 = vpack.c.bf16 %v918_v15, %v917_v14  ;;  %v270_v21 = vld [vmem:[%s5326_s20 + $0x69] sm:$0xff]  ;;  %v659_v24 = vld [vmem:[%s5326_s20 + $0x72] sm:$0xff]  ;;  %v660_v25 = vld [vmem:[%s5326_s20 + $0x7a] sm:$0xff] }
  0x21   : > { %v212_v23 = vld [vmem:[%s5326_s20 + $0x68] sm:$0xff]  ;;  %v919_v26 = vld [vmem:[%s5326_s20 + $0x73] sm:$0xff]  ;;  %v920_v27 = vld [vmem:[%s5326_s20 + $0x7b] sm:$0xff]  ;;  %v299_v28 = vpack.c.bf16 %v270_v21, %v269_v20  ;;  %v689_v30 = vpack.c.bf16 %v660_v25, %v659_v24 }
  0x22   : > { %v241_v29 = vpack.c.bf16 %v212_v23, %v211_v22  ;;  %v949_v31 = vpack.c.bf16 %v920_v27, %v919_v26  ;;  %v661_v36 = vld [vmem:[%s5326_s20 + $0x82] sm:$0xff]  ;;  %v662_v37 = vld [vmem:[%s5326_s20 + $0x8a] sm:$0xff]  ;;  %v663_v50 = vld [vmem:[%s5326_s20 + $0x92] sm:$0xff] }
  0x23   : > { %4614 = vmatmul.msk.bf16.gmra.mxu0 %vm328_vm0, %v294_v32  ;;  %4640 = vmatmul.msk.bf16.gmra.mxu1 %vm328_vm0, %v236_v33  ;;  %v271_v32 = vld [vmem:[%s5326_s20 + $0x71] sm:$0xff]  ;;  %v272_v33 = vld [vmem:[%s5326_s20 + $0x79] sm:$0xff]  ;;  %v921_v38 = vld [vmem:[%s5326_s20 + $0x83] sm:$0xff]  ;;  %v690_v42 = vpack.c.bf16 %v662_v37, %v661_v36 }
  0x24   : > { %v922_v39 = vld [vmem:[%s5326_s20 + $0x8b] sm:$0xff]  ;;  %v300_v40 = vpack.c.bf16 %v272_v33, %v271_v32  ;;  %v215_v48 = vld [vmem:[%s5326_s20 + $0x80] sm:$0xff]  ;;  %v923_v52 = vld [vmem:[%s5326_s20 + $0x93] sm:$0xff] }
  0x25   : > { %v950_v43 = vpack.c.bf16 %v922_v39, %v921_v38  ;;  %v216_v49 = vld [vmem:[%s5326_s20 + $0x88] sm:$0xff]  ;;  %v664_v51 = vld [vmem:[%s5326_s20 + $0x9a] sm:$0xff]  ;;  %v275_v8 = vld [vmem:[%s5326_s20 + $0x91] sm:$0xff] }
  0x26   : > { %4670 = vmatmul.msk.bf16.gmra.mxu2 %vm328_vm0, %v684_v34  ;;  %4700 = vmatmul.msk.bf16.gmra.mxu3 %vm328_vm0, %v944_v35  ;;  %v213_v34 = vld [vmem:[%s5326_s20 + $0x70] sm:$0xff]  ;;  %v214_v35 = vld [vmem:[%s5326_s20 + $0x78] sm:$0xff]  ;;  %v5451_v2 = vld [vmem:[%s6909_s2] ss:$0 sm:$0xff] }
  0x27   : > { %v242_v41 = vpack.c.bf16 %v214_v35, %v213_v34  ;;  %v924_v53 = vld [vmem:[%s5326_s20 + $0x9b] sm:$0xff]  ;;  %v217_v10 = vld [vmem:[%s5326_s20 + $0x90] sm:$0xff] }
  0x28   : > { %v951_v61 = vpack.c.bf16 %v924_v53, %v923_v52  ;;  %v276_v9 = vld [vmem:[%s5326_s20 + $0x99] sm:$0xff]  ;;  %v665_v12 = vld [vmem:[%s5326_s20 + $0xa2] sm:$0xff]  ;;  %v666_v13 = vld [vmem:[%s5326_s20 + $0xaa] sm:$0xff] }
  0x29   : > { %v218_v11 = vld [vmem:[%s5326_s20 + $0x98] sm:$0xff]  ;;  %v692_v24 = vpack.c.bf16 %v666_v13, %v665_v12  ;;  %v277_v38 = vld [vmem:[%s5326_s20 + $0xa1] sm:$0xff]  ;;  %v278_v39 = vld [vmem:[%s5326_s20 + $0xa9] sm:$0xff] }
  0x2a   : > { %v244_v23 = vpack.c.bf16 %v218_v11, %v217_v10  ;;  %v669_v10 = vld [vmem:[%s5326_s20 + $0xc2] sm:$0xff]  ;;  %v670_v11 = vld [vmem:[%s5326_s20 + $0xca] sm:$0xff] }
  0x33   : > { %4615 = vmatmul.msk.bf16.gmra.mxu0 %vm328_vm0, %v295_v44  ;;  %4641 = vmatmul.msk.bf16.gmra.mxu1 %vm328_vm0, %v237_v45  ;;  %v5199_v44 = vld [vmem:[%s6908_s1 + $0x60] sm:$0xff]  ;;  %v5201_v45 = vld [vmem:[%s6908_s1 + $0x70] sm:$0xff] }
  0x34   : > { %1864 = vmatpush.bf16.msrb.mxu2 %v5199_v44  ;;  %2124 = vmatpush.bf16.msrb.mxu3 %v5201_v45 }
  0x36   : > { %4671 = vmatmul.msk.bf16.gmra.mxu2 %vm328_vm0, %v685_v46  ;;  %4701 = vmatmul.msk.bf16.gmra.mxu3 %vm328_vm0, %v945_v47  ;;  %v273_v46 = vld [vmem:[%s5326_s20 + $0x81] sm:$0xff]  ;;  %v274_v47 = vld [vmem:[%s5326_s20 + $0x89] sm:$0xff] }
  0x37   : > { %v301_v54 = vpack.c.bf16 %v274_v47, %v273_v46  ;;  %v927_v46 = vld [vmem:[%s5326_s20 + $0xb3] sm:$0xff]  ;;  %v928_v47 = vld [vmem:[%s5326_s20 + $0xbb] sm:$0xff] }
  0x43   : > { %4616 = vmatmul.msk.bf16.gmra.mxu0 %vm328_vm0, %v296_v56  ;;  %4642 = vmatmul.msk.bf16.gmra.mxu1 %vm328_vm0, %v238_v57  ;;  %v243_v56 = vpack.c.bf16 %v216_v49, %v215_v48  ;;  %v691_v57 = vpack.c.bf16 %v664_v51, %v663_v50  ;;  %v303_v49 = vpack.c.bf16 %v278_v39, %v277_v38  ;;  %v223_v38 = vld [vmem:[%s5326_s20 + $0xc0] sm:$0xff]  ;;  %v224_v39 = vld [vmem:[%s5326_s20 + $0xc8] sm:$0xff] }
  0x46   : > { %4672 = vmatmul.msk.bf16.gmra.mxu2 %vm328_vm0, %v686_v58  ;;  %4702 = vmatmul.msk.bf16.gmra.mxu3 %vm328_vm0, %v946_v59  ;;  %v5197_v58 = vld [vmem:[%s6908_s1 + $0x50] sm:$0xff]  ;;  %v5195_v59 = vld [vmem:[%s6908_s1 + $0x40] sm:$0xff] }
  0x47   : > { %1475 = vmatpush.bf16.msrb.mxu0 %v5197_v58  ;;  %1640 = vmatpush.bf16.msrb.mxu1 %v5195_v59 }
  0x53   : > { %4617 = vmatmul.msk.bf16.gmra.mxu0 %vm328_vm0, %v297_v4  ;;  %4643 = vmatmul.msk.bf16.gmra.mxu1 %vm328_vm0, %v239_v5 }
  0x56   : > { %4673 = vmatmul.msk.bf16.gmra.mxu2 %vm328_vm0, %v687_v6  ;;  %4703 = vmatmul.msk.bf16.gmra.mxu3 %vm328_vm0, %v947_v7  ;;  %v5457_v6 = vld [vmem:[%s6910_s3] ss:$0 sm:$0xff] }
  0x63   : > { %4618 = vmatmul.msk.bf16.gmra.mxu0 %vm328_vm0, %v298_v16  ;;  %4644 = vmatmul.msk.bf16.gmra.mxu1 %vm328_vm0, %v240_v17  ;;  %v925_v16 = vld [vmem:[%s5326_s20 + $0xa3] sm:$0xff]  ;;  %v926_v17 = vld [vmem:[%s5326_s20 + $0xab] sm:$0xff] }
  0x64   : > { %v952_v26 = vpack.c.bf16 %v926_v17, %v925_v16 }
  0x66   : > { %4674 = vmatmul.msk.bf16.gmra.mxu2 %vm328_vm0, %v688_v18  ;;  %4704 = vmatmul.msk.bf16.gmra.mxu3 %vm328_vm0, %v948_v19  ;;  %v302_v19 = vpack.c.bf16 %v276_v9, %v275_v8  ;;  %v221_v8 = vld [vmem:[%s5326_s20 + $0xb0] sm:$0xff]  ;;  %v222_v9 = vld [vmem:[%s5326_s20 + $0xb8] sm:$0xff] }
  0x73   : > { %4619 = vmatmul.msk.bf16.gmra.mxu0 %vm328_vm0, %v299_v28  ;;  %4645 = vmatmul.msk.bf16.gmra.mxu1 %vm328_vm0, %v241_v29 }
  0x76   : > { %4675 = vmatmul.msk.bf16.gmra.mxu2 %vm328_vm0, %v689_v30  ;;  %4705 = vmatmul.msk.bf16.gmra.mxu3 %vm328_vm0, %v949_v31 }
  0x83   : > { %4620 = vmatmul.msk.bf16.gmra.mxu0 %vm328_vm0, %v300_v40  ;;  %4646 = vmatmul.msk.bf16.gmra.mxu1 %vm328_vm0, %v242_v41  ;;  %v219_v40 = vld [vmem:[%s5326_s20 + $0xa0] sm:$0xff]  ;;  %v220_v41 = vld [vmem:[%s5326_s20 + $0xa8] sm:$0xff] }
  0x84   : > { %v245_v53 = vpack.c.bf16 %v220_v41, %v219_v40  ;;  %v671_v40 = vld [vmem:[%s5326_s20 + $0xd2] sm:$0xff]  ;;  %v672_v41 = vld [vmem:[%s5326_s20 + $0xda] sm:$0xff] }
  0x86   : > { %4676 = vmatmul.msk.bf16.gmra.mxu2 %vm328_vm0, %v690_v42  ;;  %4706 = vmatmul.msk.bf16.gmra.mxu3 %vm328_vm0, %v950_v43  ;;  %v667_v42 = vld [vmem:[%s5326_s20 + $0xb2] sm:$0xff]  ;;  %v668_v43 = vld [vmem:[%s5326_s20 + $0xba] sm:$0xff] }
  0x90   : > { %v392_v55 = vpop.f32.mrf.mxu0  ;;  %v557_v60 = vpop.f32.mrf.mxu1 }
  0x91   : > { %v558_v62 = vadd.f32 %v557_v60, %v392_v55 }
  0x93   : > { %4621 = vmatmul.msk.bf16.gmra.mxu0 %vm328_vm0, %v301_v54  ;;  %4647 = vmatmul.msk.bf16.gmra.mxu1 %vm328_vm0, %v243_v56  ;;  %v693_v54 = vpack.c.bf16 %v668_v43, %v667_v42  ;;  %v953_v56 = vpack.c.bf16 %v928_v47, %v927_v46 }
  0x96   : > { %4677 = vmatmul.msk.bf16.gmra.mxu2 %vm328_vm0, %v691_v57  ;;  %4707 = vmatmul.msk.bf16.gmra.mxu3 %vm328_vm0, %v951_v61 }
  0x98   : > { %v394_v3 = vpop.f32.mrf.mxu0  ;;  %v559_v4 = vpop.f32.mrf.mxu1 }
  0x99   : > { %v781_v63 = vpop.f32.mrf.mxu2  ;;  %v1041_v1 = vpop.f32.mrf.mxu3  ;;  %v560_v15 = vadd.f32 %v559_v4, %v394_v3 }
  0x9a   : > { %v871_v0 = vadd.f32 %v781_v63, %v558_v62 }
  0x9c   : > { %v1131_v5 = vadd.f32 %v1041_v1, %v871_v0 }
  0x9e   : > { %v1171_v7 = vmul.f32 %v5451_v2, %v1131_v5  ;;  %v279_v5 = vld [vmem:[%s5326_s20 + $0xb1] sm:$0xff] }
  0xa0   : > { %v1211_v14 = vadd.f32 %v5457_v6, %v1171_v7  ;;  %v397_v22 = vpop.f32.mrf.mxu0  ;;  %v562_v25 = vpop.f32.mrf.mxu1  ;;  %v280_v7 = vld [vmem:[%s5326_s20 + $0xb9] sm:$0xff] }
  0xa1   : > { %v783_v18 = vpop.f32.mrf.mxu2  ;;  %v1043_v21 = vpop.f32.mrf.mxu3  ;;  %v563_v29 = vadd.f32 %v562_v25, %v397_v22  ;;  %v304_v17 = vpack.c.bf16 %v280_v7, %v279_v5  ;;  %v694_v22 = vpack.c.bf16 %v670_v11, %v669_v10  ;;  %v225_v5 = vld [vmem:[%s5326_s20 + $0xd0] sm:$0xff]  ;;  %v226_v7 = vld [vmem:[%s5326_s20 + $0xd8] sm:$0xff] }
  0xa2   : > { %1248 = vst.msk [vmem:[%s5466_s10] sm:$0xff] %vm1247_vm1, %v1211_v14  ;;  %v872_v20 = vadd.f32 %v783_v18, %v560_v15  ;;  %v929_v14 = vld [vmem:[%s5326_s20 + $0xc3] sm:$0xff]  ;;  %v930_v15 = vld [vmem:[%s5326_s20 + $0xcb] sm:$0xff] }
  0xa3   : > { %4622 = vmatmul.msk.bf16.gmra.mxu0 %vm328_vm0, %v302_v19  ;;  %4648 = vmatmul.msk.bf16.gmra.mxu1 %vm328_vm0, %v244_v23 }
  0xa4   : > { %v1132_v27 = vadd.f32 %v1043_v21, %v872_v20  ;;  %v246_v21 = vpack.c.bf16 %v222_v9, %v221_v8  ;;  %v673_v8 = vld [vmem:[%s5326_s20 + $0xe2] sm:$0xff]  ;;  %v674_v9 = vld [vmem:[%s5326_s20 + $0xea] sm:$0xff] }
  0xa6   : > { %v1172_v28 = vmul.f32 %v5451_v2, %v1132_v27  ;;  %4678 = vmatmul.msk.bf16.gmra.mxu2 %vm328_vm0, %v692_v24  ;;  %4708 = vmatmul.msk.bf16.gmra.mxu3 %vm328_vm0, %v952_v26  ;;  %v954_v24 = vpack.c.bf16 %v930_v15, %v929_v14 }
  0xa8   : > { %v1212_v30 = vadd.f32 %v5457_v6, %v1172_v28  ;;  %v399_v34 = vpop.f32.mrf.mxu0  ;;  %v564_v35 = vpop.f32.mrf.mxu1 }
  0xa9   : > { %v786_v31 = vpop.f32.mrf.mxu2  ;;  %v1046_v33 = vpop.f32.mrf.mxu3  ;;  %v565_v45 = vadd.f32 %v564_v35, %v399_v34 }
  0xaa   : > { %1249 = vst.msk [vmem:[%s5466_s10 + $0x8] sm:$0xff] %vm1247_vm1, %v1212_v30  ;;  %v873_v32 = vadd.f32 %v786_v31, %v563_v29 }
  0xac   : > { %v1133_v36 = vadd.f32 %v1046_v33, %v873_v32 }
  0xae   : > { %v1173_v37 = vmul.f32 %v5451_v2, %v1133_v36  ;;  %v281_v36 = vld [vmem:[%s5326_s20 + $0xc1] sm:$0xff] }
  0xb0   : > { %v1213_v44 = vadd.f32 %v5457_v6, %v1173_v37  ;;  %v402_v52 = vpop.f32.mrf.mxu0  ;;  %v567_v55 = vpop.f32.mrf.mxu1  ;;  %v282_v37 = vld [vmem:[%s5326_s20 + $0xc9] sm:$0xff] }
  0xb1   : > { %v788_v48 = vpop.f32.mrf.mxu2  ;;  %v1048_v51 = vpop.f32.mrf.mxu3  ;;  %v568_v59 = vadd.f32 %v567_v55, %v402_v52  ;;  %v305_v47 = vpack.c.bf16 %v282_v37, %v281_v36  ;;  %v695_v52 = vpack.c.bf16 %v672_v41, %v671_v40  ;;  %v227_v36 = vld [vmem:[%s5326_s20 + $0xe0] sm:$0xff]  ;;  %v228_v37 = vld [vmem:[%s5326_s20 + $0xe8] sm:$0xff] }
  0xb2   : > { %1250 = vst.msk [vmem:[%s5466_s10 + $0x10] sm:$0xff] %vm1247_vm1, %v1213_v44  ;;  %v874_v50 = vadd.f32 %v788_v48, %v565_v45  ;;  %v931_v44 = vld [vmem:[%s5326_s20 + $0xd3] sm:$0xff]  ;;  %v932_v45 = vld [vmem:[%s5326_s20 + $0xdb] sm:$0xff] }
  0xb3   : > { %4623 = vmatmul.msk.bf16.gmra.mxu0 %vm328_vm0, %v303_v49  ;;  %4649 = vmatmul.msk.bf16.gmra.mxu1 %vm328_vm0, %v245_v53 }
  0xb4   : > { %v1134_v57 = vadd.f32 %v1048_v51, %v874_v50  ;;  %v247_v51 = vpack.c.bf16 %v224_v39, %v223_v38  ;;  %v675_v38 = vld [vmem:[%s5326_s20 + $0xf2] sm:$0xff]  ;;  %v676_v39 = vld [vmem:[%s5326_s20 + $0xfa] sm:$0xff] }
  0xb6   : > { %v1174_v58 = vmul.f32 %v5451_v2, %v1134_v57  ;;  %4679 = vmatmul.msk.bf16.gmra.mxu2 %vm328_vm0, %v693_v54  ;;  %4709 = vmatmul.msk.bf16.gmra.mxu3 %vm328_vm0, %v953_v56  ;;  %v955_v54 = vpack.c.bf16 %v932_v45, %v931_v44 }
  0xb8   : > { %v1214_v60 = vadd.f32 %v5457_v6, %v1174_v58  ;;  %v404_v0 = vpop.f32.mrf.mxu0  ;;  %v569_v1 = vpop.f32.mrf.mxu1 }
  0xb9   : > { %v791_v61 = vpop.f32.mrf.mxu2  ;;  %v1051_v63 = vpop.f32.mrf.mxu3  ;;  %v570_v13 = vadd.f32 %v569_v1, %v404_v0 }
  0xba   : > { %1251 = vst.msk [vmem:[%s5466_s10 + $0x18] sm:$0xff] %vm1247_vm1, %v1214_v60  ;;  %v875_v62 = vadd.f32 %v791_v61, %v568_v59 }
  0xbc   : > { %v1135_v3 = vadd.f32 %v1051_v63, %v875_v62 }
  0xbe   : > { %v1175_v4 = vmul.f32 %v5451_v2, %v1135_v3  ;;  %v283_v3 = vld [vmem:[%s5326_s20 + $0xd1] sm:$0xff] }
  0xc0   : > { %v1215_v12 = vadd.f32 %v5457_v6, %v1175_v4  ;;  %v407_v20 = vpop.f32.mrf.mxu0  ;;  %v572_v23 = vpop.f32.mrf.mxu1  ;;  %v284_v4 = vld [vmem:[%s5326_s20 + $0xd9] sm:$0xff] }
  0xc1   : > { %v793_v16 = vpop.f32.mrf.mxu2  ;;  %v1053_v19 = vpop.f32.mrf.mxu3  ;;  %v573_v27 = vadd.f32 %v572_v23, %v407_v20  ;;  %v306_v15 = vpack.c.bf16 %v284_v4, %v283_v3  ;;  %v696_v20 = vpack.c.bf16 %v674_v9, %v673_v8  ;;  %v229_v3 = vld [vmem:[%s5326_s20 + $0xf0] sm:$0xff]  ;;  %v230_v4 = vld [vmem:[%s5326_s20 + $0xf8] sm:$0xff] }
  0xc2   : > { %1252 = vst.msk [vmem:[%s5466_s10 + $0x20] sm:$0xff] %vm1247_vm1, %v1215_v12  ;;  %v876_v18 = vadd.f32 %v793_v16, %v570_v13  ;;  %v933_v12 = vld [vmem:[%s5326_s20 + $0xe3] sm:$0xff]  ;;  %v934_v13 = vld [vmem:[%s5326_s20 + $0xeb] sm:$0xff] }
  0xc3   : > { %4624 = vmatmul.msk.bf16.gmra.mxu0 %vm328_vm0, %v304_v17  ;;  %4650 = vmatmul.msk.bf16.gmra.mxu1 %vm328_vm0, %v246_v21 }
  0xc4   : > { %v1136_v25 = vadd.f32 %v1053_v19, %v876_v18  ;;  %v248_v19 = vpack.c.bf16 %v226_v7, %v225_v5  ;;  %v677_v5 = vld [vmem:[%s5326_s20 + $0x102] sm:$0xff]  ;;  %v678_v7 = vld [vmem:[%s5326_s20 + $0x10a] sm:$0xff] }
  0xc6   : > { %v1176_v26 = vmul.f32 %v5451_v2, %v1136_v25  ;;  %4680 = vmatmul.msk.bf16.gmra.mxu2 %vm328_vm0, %v694_v22  ;;  %4710 = vmatmul.msk.bf16.gmra.mxu3 %vm328_vm0, %v954_v24  ;;  %v956_v22 = vpack.c.bf16 %v934_v13, %v933_v12 }
  0xc8   : > { %v1216_v28 = vadd.f32 %v5457_v6, %v1176_v26  ;;  %v409_v32 = vpop.f32.mrf.mxu0  ;;  %v574_v33 = vpop.f32.mrf.mxu1 }
  0xc9   : > { %v796_v29 = vpop.f32.mrf.mxu2  ;;  %v1056_v31 = vpop.f32.mrf.mxu3  ;;  %v575_v43 = vadd.f32 %v574_v33, %v409_v32 }
  0xca   : > { %1253 = vst.msk [vmem:[%s5466_s10 + $0x28] sm:$0xff] %vm1247_vm1, %v1216_v28  ;;  %v877_v30 = vadd.f32 %v796_v29, %v573_v27 }
  0xcc   : > { %v1137_v34 = vadd.f32 %v1056_v31, %v877_v30 }
  0xce   : > { %v1177_v35 = vmul.f32 %v5451_v2, %v1137_v34  ;;  %v285_v34 = vld [vmem:[%s5326_s20 + $0xe1] sm:$0xff] }
  0xd0   : > { %v1217_v42 = vadd.f32 %v5457_v6, %v1177_v35  ;;  %v412_v50 = vpop.f32.mrf.mxu0  ;;  %v577_v53 = vpop.f32.mrf.mxu1  ;;  %v286_v35 = vld [vmem:[%s5326_s20 + $0xe9] sm:$0xff] }
  0xd1   : > { %v798_v46 = vpop.f32.mrf.mxu2  ;;  %v1058_v49 = vpop.f32.mrf.mxu3  ;;  %v578_v57 = vadd.f32 %v577_v53, %v412_v50  ;;  %v307_v45 = vpack.c.bf16 %v286_v35, %v285_v34  ;;  %v697_v50 = vpack.c.bf16 %v676_v39, %v675_v38  ;;  %v231_v34 = vld [vmem:[%s5326_s20 + $0x100] sm:$0xff]  ;;  %v232_v35 = vld [vmem:[%s5326_s20 + $0x108] sm:$0xff] }
  0xd2   : > { %1254 = vst.msk [vmem:[%s5466_s10 + $0x30] sm:$0xff] %vm1247_vm1, %v1217_v42  ;;  %v878_v48 = vadd.f32 %v798_v46, %v575_v43  ;;  %v935_v42 = vld [vmem:[%s5326_s20 + $0xf3] sm:$0xff]  ;;  %v936_v43 = vld [vmem:[%s5326_s20 + $0xfb] sm:$0xff] }
  0xd3   : > { %4625 = vmatmul.msk.bf16.gmra.mxu0 %vm328_vm0, %v305_v47  ;;  %4651 = vmatmul.msk.bf16.gmra.mxu1 %vm328_vm0, %v247_v51 }
  0xd4   : > { %v1138_v55 = vadd.f32 %v1058_v49, %v878_v48  ;;  %v249_v49 = vpack.c.bf16 %v228_v37, %v227_v36  ;;  %v679_v36 = vld [vmem:[%s5326_s20 + $0x112] sm:$0xff]  ;;  %v680_v37 = vld [vmem:[%s5326_s20 + $0x11a] sm:$0xff] }
  0xd6   : > { %v1178_v56 = vmul.f32 %v5451_v2, %v1138_v55  ;;  %4681 = vmatmul.msk.bf16.gmra.mxu2 %vm328_vm0, %v695_v52  ;;  %4711 = vmatmul.msk.bf16.gmra.mxu3 %vm328_vm0, %v955_v54  ;;  %v957_v52 = vpack.c.bf16 %v936_v43, %v935_v42 }
  0xd8   : > { %v1218_v58 = vadd.f32 %v5457_v6, %v1178_v56  ;;  %v414_v62 = vpop.f32.mrf.mxu0  ;;  %v579_v63 = vpop.f32.mrf.mxu1 }
  0xd9   : > { %v801_v59 = vpop.f32.mrf.mxu2  ;;  %v1061_v61 = vpop.f32.mrf.mxu3  ;;  %v580_v11 = vadd.f32 %v579_v63, %v414_v62 }
  0xda   : > { %1255 = vst.msk [vmem:[%s5466_s10 + $0x38] sm:$0xff] %vm1247_vm1, %v1218_v58  ;;  %v879_v60 = vadd.f32 %v801_v59, %v578_v57 }
  0xdc   : > { %v1139_v0 = vadd.f32 %v1061_v61, %v879_v60 }
  0xde   : > { %v1179_v1 = vmul.f32 %v5451_v2, %v1139_v0  ;;  %v287_v0 = vld [vmem:[%s5326_s20 + $0xf1] sm:$0xff] }
  0xe0   : > { %v1219_v10 = vadd.f32 %v5457_v6, %v1179_v1  ;;  %v417_v18 = vpop.f32.mrf.mxu0  ;;  %v582_v21 = vpop.f32.mrf.mxu1  ;;  %v288_v1 = vld [vmem:[%s5326_s20 + $0xf9] sm:$0xff] }
  0xe1   : > { %v803_v14 = vpop.f32.mrf.mxu2  ;;  %v1063_v17 = vpop.f32.mrf.mxu3  ;;  %v583_v25 = vadd.f32 %v582_v21, %v417_v18  ;;  %v308_v13 = vpack.c.bf16 %v288_v1, %v287_v0  ;;  %v698_v18 = vpack.c.bf16 %v678_v7, %v677_v5  ;;  %v291_v0 = vld [vmem:[%s5326_s20 + $0x111] sm:$0xff]  ;;  %v292_v1 = vld [vmem:[%s5326_s20 + $0x119] sm:$0xff]  ;;  %v681_v5 = vld [vmem:[%s5326_s20 + $0x122] sm:$0xff] }
  0xe2   : > { %1256 = vst.msk [vmem:[%s5466_s10 + $0x40] sm:$0xff] %vm1247_vm1, %v1219_v10  ;;  %v880_v16 = vadd.f32 %v803_v14, %v580_v11  ;;  %v937_v10 = vld [vmem:[%s5326_s20 + $0x103] sm:$0xff]  ;;  %v938_v11 = vld [vmem:[%s5326_s20 + $0x10b] sm:$0xff] }
  0xe3   : > { %4626 = vmatmul.msk.bf16.gmra.mxu0 %vm328_vm0, %v306_v15  ;;  %4652 = vmatmul.msk.bf16.gmra.mxu1 %vm328_vm0, %v248_v19  ;;  %v682_v7 = vld [vmem:[%s5326_s20 + $0x12a] sm:$0xff] }
  0xe4   : > { %v1140_v23 = vadd.f32 %v1063_v17, %v880_v16  ;;  %v250_v17 = vpack.c.bf16 %v230_v4, %v229_v3  ;;  %v233_v3 = vld [vmem:[%s5326_s20 + $0x110] sm:$0xff]  ;;  %v234_v4 = vld [vmem:[%s5326_s20 + $0x118] sm:$0xff] }
  0xe6   : > { %v1180_v24 = vmul.f32 %v5451_v2, %v1140_v23  ;;  %4682 = vmatmul.msk.bf16.gmra.mxu2 %vm328_vm0, %v696_v20  ;;  %4712 = vmatmul.msk.bf16.gmra.mxu3 %vm328_vm0, %v956_v22  ;;  %v958_v20 = vpack.c.bf16 %v938_v11, %v937_v10  ;;  %v941_v10 = vld [vmem:[%s5326_s20 + $0x123] sm:$0xff]  ;;  %v942_v11 = vld [vmem:[%s5326_s20 + $0x12b] sm:$0xff] }
  0xe8   : > { %v1220_v26 = vadd.f32 %v5457_v6, %v1180_v24  ;;  %v419_v30 = vpop.f32.mrf.mxu0  ;;  %v584_v31 = vpop.f32.mrf.mxu1 }
  0xe9   : > { %v806_v27 = vpop.f32.mrf.mxu2  ;;  %v1066_v29 = vpop.f32.mrf.mxu3  ;;  %v585_v41 = vadd.f32 %v584_v31, %v419_v30 }
  0xea   : > { %1257 = vst.msk [vmem:[%s5466_s10 + $0x48] sm:$0xff] %vm1247_vm1, %v1220_v26  ;;  %v881_v28 = vadd.f32 %v806_v27, %v583_v25 }
  0xec   : > { %v1141_v32 = vadd.f32 %v1066_v29, %v881_v28 }
  0xee   : > { %v1181_v33 = vmul.f32 %v5451_v2, %v1141_v32  ;;  %v289_v32 = vld [vmem:[%s5326_s20 + $0x101] sm:$0xff] }
  0xf0   : > { %v1221_v40 = vadd.f32 %v5457_v6, %v1181_v33  ;;  %v422_v48 = vpop.f32.mrf.mxu0  ;;  %v587_v51 = vpop.f32.mrf.mxu1  ;;  %v290_v33 = vld [vmem:[%s5326_s20 + $0x109] sm:$0xff] }
  0xf1   : > { %v808_v44 = vpop.f32.mrf.mxu2  ;;  %v1068_v47 = vpop.f32.mrf.mxu3  ;;  %v588_v55 = vadd.f32 %v587_v51, %v422_v48  ;;  %v309_v43 = vpack.c.bf16 %v290_v33, %v289_v32  ;;  %v699_v48 = vpack.c.bf16 %v680_v37, %v679_v36  ;;  %v1284_v36 = vld [vmem:[%s5326_s20 + $0x1] sm:$0xff]  ;;  %v1285_v37 = vld [vmem:[%s5326_s20 + $0x9] sm:$0xff] }
  0xf2   : > { %1258 = vst.msk [vmem:[%s5466_s10 + $0x50] sm:$0xff] %vm1247_vm1, %v1221_v40  ;;  %v882_v46 = vadd.f32 %v808_v44, %v585_v41  ;;  %v939_v40 = vld [vmem:[%s5326_s20 + $0x113] sm:$0xff]  ;;  %v940_v41 = vld [vmem:[%s5326_s20 + $0x11b] sm:$0xff] }
  0xf3   : > { %4627 = vmatmul.msk.bf16.gmra.mxu0 %vm328_vm0, %v307_v45  ;;  %4653 = vmatmul.msk.bf16.gmra.mxu1 %vm328_vm0, %v249_v49 }
  0xf4   : > { %v1142_v53 = vadd.f32 %v1068_v47, %v882_v46  ;;  %v251_v47 = vpack.c.bf16 %v232_v35, %v231_v34  ;;  %v1343_v34 = vld [vmem:[%s5326_s20 + $0x2] sm:$0xff]  ;;  %v1344_v35 = vld [vmem:[%s5326_s20 + $0xa] sm:$0xff] }
  0xf6   : > { %v1182_v54 = vmul.f32 %v5451_v2, %v1142_v53  ;;  %4683 = vmatmul.msk.bf16.gmra.mxu2 %vm328_vm0, %v697_v50  ;;  %4713 = vmatmul.msk.bf16.gmra.mxu3 %vm328_vm0, %v957_v52  ;;  %v959_v50 = vpack.c.bf16 %v940_v41, %v939_v40 }
  0xf8   : > { %v1222_v56 = vadd.f32 %v5457_v6, %v1182_v54  ;;  %v424_v60 = vpop.f32.mrf.mxu0  ;;  %v589_v61 = vpop.f32.mrf.mxu1 }
  0xf9   : > { %v811_v57 = vpop.f32.mrf.mxu2  ;;  %v1071_v59 = vpop.f32.mrf.mxu3  ;;  %v590_v9 = vadd.f32 %v589_v61, %v424_v60  ;;  %v5210_v60 = vld [vmem:[%s6908_s1 + $0xb8] sm:$0xff] }
  0xfa   : > { %1259 = vst.msk [vmem:[%s5466_s10 + $0x58] sm:$0xff] %vm1247_vm1, %v1222_v56  ;;  %v883_v58 = vadd.f32 %v811_v57, %v588_v55  ;;  %3208 = vmatpush.bf16.msra.mxu3 %v5210_v60 }
  0xfc   : > { %v1143_v62 = vadd.f32 %v1071_v59, %v883_v58  ;;  %v5208_v59 = vld [vmem:[%s6908_s1 + $0xa8] sm:$0xff] }
  0xfd   : > { %2948 = vmatpush.bf16.msra.mxu2 %v5208_v59 }
  0xfe   : > { %v1183_v63 = vmul.f32 %v5451_v2, %v1143_v62 }
 0x100   : > { %v1223_v8 = vadd.f32 %v5457_v6, %v1183_v63  ;;  %v427_v16 = vpop.f32.mrf.mxu0  ;;  %v592_v19 = vpop.f32.mrf.mxu1 }
 0x101   : > { %v813_v12 = vpop.f32.mrf.mxu2  ;;  %v1073_v15 = vpop.f32.mrf.mxu3  ;;  %v593_v23 = vadd.f32 %v592_v19, %v427_v16  ;;  %v5206_v19 = vld [vmem:[%s6908_s1 + $0x98] sm:$0xff] }
 0x102   : > { %1260 = vst.msk [vmem:[%s5466_s10 + $0x60] sm:$0xff] %vm1247_vm1, %v1223_v8  ;;  %v884_v14 = vadd.f32 %v813_v12, %v590_v9  ;;  %2559 = vmatpush.bf16.msra.mxu0 %v5206_v19 }
 0x103   : > { %4628 = vmatmul.msk.bf16.gmra.mxu0 %vm328_vm0, %v308_v13  ;;  %4654 = vmatmul.msk.bf16.gmra.mxu1 %vm328_vm0, %v250_v17  ;;  %v310_v13 = vpack.c.bf16 %v292_v1, %v291_v0  ;;  %v252_v17 = vpack.c.bf16 %v234_v4, %v233_v3  ;;  %v1345_v0 = vld [vmem:[%s5326_s20 + $0x12] sm:$0xff]  ;;  %v1346_v1 = vld [vmem:[%s5326_s20 + $0x1a] sm:$0xff] }
 0x104   : > { %v1144_v21 = vadd.f32 %v1073_v15, %v884_v14  ;;  %v1286_v3 = vld [vmem:[%s5326_s20 + $0x11] sm:$0xff]  ;;  %v1287_v4 = vld [vmem:[%s5326_s20 + $0x19] sm:$0xff] }
 0x106   : > { %v1184_v22 = vmul.f32 %v5451_v2, %v1144_v21  ;;  %4684 = vmatmul.msk.bf16.gmra.mxu2 %vm328_vm0, %v698_v18  ;;  %4714 = vmatmul.msk.bf16.gmra.mxu3 %vm328_vm0, %v958_v20  ;;  %v700_v18 = vpack.c.bf16 %v682_v7, %v681_v5  ;;  %v5204_v20 = vld [vmem:[%s6908_s1 + $0x88] sm:$0xff] }
 0x107   : > { %2724 = vmatpush.bf16.msra.mxu1 %v5204_v20  ;;  %v1734_v5 = vld [vmem:[%s5326_s20 + $0x23] sm:$0xff]  ;;  %v1735_v7 = vld [vmem:[%s5326_s20 + $0x2b] sm:$0xff] }
 0x108   : > { %v1224_v24 = vadd.f32 %v5457_v6, %v1184_v22  ;;  %v429_v28 = vpop.f32.mrf.mxu0  ;;  %v594_v29 = vpop.f32.mrf.mxu1  ;;  %v960_v22 = vpack.c.bf16 %v942_v11, %v941_v10  ;;  %v1994_v10 = vld [vmem:[%s5326_s20 + $0x24] sm:$0xff]  ;;  %v1995_v11 = vld [vmem:[%s5326_s20 + $0x2c] sm:$0xff] }
 0x109   : > { %v816_v25 = vpop.f32.mrf.mxu2  ;;  %v1076_v27 = vpop.f32.mrf.mxu3  ;;  %v595_v39 = vadd.f32 %v594_v29, %v429_v28  ;;  %v2029_v20 = vpack.c.bf16 %v1995_v11, %v1994_v10 }
 0x10a   : > { %1261 = vst.msk [vmem:[%s5466_s10 + $0x68] sm:$0xff] %vm1247_vm1, %v1224_v24  ;;  %v885_v26 = vadd.f32 %v816_v25, %v593_v23 }
 0x10c   : > { %v1145_v30 = vadd.f32 %v1076_v27, %v885_v26 }
 0x10e   : > { %v1185_v31 = vmul.f32 %v5451_v2, %v1145_v30 }
 0x110   : > { %v1225_v38 = vadd.f32 %v5457_v6, %v1185_v31  ;;  %v432_v46 = vpop.f32.mrf.mxu0  ;;  %v597_v49 = vpop.f32.mrf.mxu1 }
 0x111   : > { %v818_v42 = vpop.f32.mrf.mxu2  ;;  %v1078_v45 = vpop.f32.mrf.mxu3  ;;  %v598_v53 = vadd.f32 %v597_v49, %v432_v46  ;;  %v1320_v49 = vpack.c.bf16 %v1285_v37, %v1284_v36  ;;  %v1736_v36 = vld [vmem:[%s5326_s20 + $0x33] sm:$0xff]  ;;  %v1737_v37 = vld [vmem:[%s5326_s20 + $0x3b] sm:$0xff] }
 0x112   : > { %1262 = vst.msk [vmem:[%s5466_s10 + $0x70] sm:$0xff] %vm1247_vm1, %v1225_v38  ;;  %v886_v44 = vadd.f32 %v818_v42, %v595_v39  ;;  %v1732_v38 = vld [vmem:[%s5326_s20 + $0x13] sm:$0xff]  ;;  %v1733_v39 = vld [vmem:[%s5326_s20 + $0x1b] sm:$0xff] }
 0x113   : > { %4629 = vmatmul.msk.bf16.gmra.mxu0 %vm328_vm0, %v309_v43  ;;  %4655 = vmatmul.msk.bf16.gmra.mxu1 %vm328_vm0, %v251_v47  ;;  %v1992_v42 = vld [vmem:[%s5326_s20 + $0x14] sm:$0xff]  ;;  %v1993_v43 = vld [vmem:[%s5326_s20 + $0x1c] sm:$0xff] }
 0x114   : > { %v1146_v51 = vadd.f32 %v1078_v45, %v886_v44  ;;  %v1379_v45 = vpack.c.bf16 %v1344_v35, %v1343_v34  ;;  %v1288_v34 = vld [vmem:[%s5326_s20 + $0x21] sm:$0xff]  ;;  %v1289_v35 = vld [vmem:[%s5326_s20 + $0x29] sm:$0xff] }
 0x116   : > { %v1186_v52 = vmul.f32 %v5451_v2, %v1146_v51  ;;  %4685 = vmatmul.msk.bf16.gmra.mxu2 %vm328_vm0, %v699_v48  ;;  %4715 = vmatmul.msk.bf16.gmra.mxu3 %vm328_vm0, %v959_v50  ;;  %v1768_v50 = vpack.c.bf16 %v1733_v39, %v1732_v38 }
 0x118   : > { %v1226_v54 = vadd.f32 %v5457_v6, %v1186_v52  ;;  %v434_v58 = vpop.f32.mrf.mxu0  ;;  %v599_v61 = vpop.f32.mrf.mxu1  ;;  %v2028_v52 = vpack.c.bf16 %v1993_v43, %v1992_v42 }
 0x119   : > { %v821_v55 = vpop.f32.mrf.mxu2  ;;  %v1081_v57 = vpop.f32.mrf.mxu3  ;;  %v600_v9 = vadd.f32 %v599_v61, %v434_v58 }
 0x11a   : > { %1263 = vst.msk [vmem:[%s5466_s10 + $0x78] sm:$0xff] %vm1247_vm1, %v1226_v54  ;;  %v887_v56 = vadd.f32 %v821_v55, %v598_v53 }
 0x11c   : > { %v1147_v62 = vadd.f32 %v1081_v57, %v887_v56 }
 0x11e   : > { %v1187_v63 = vmul.f32 %v5451_v2, %v1147_v62 }
 0x120   : > { %v1227_v8 = vadd.f32 %v5457_v6, %v1187_v63  ;;  %v437_v16 = vpop.f32.mrf.mxu0  ;;  %v602_v21 = vpop.f32.mrf.mxu1 }
 0x121   : > { %v823_v12 = vpop.f32.mrf.mxu2  ;;  %v1083_v15 = vpop.f32.mrf.mxu3  ;;  %v603_v25 = vadd.f32 %v602_v21, %v437_v16 }
 0x122   : > { %1264 = vst.msk [vmem:[%s5466_s10 + $0x80] sm:$0xff] %vm1247_vm1, %v1227_v8  ;;  %v888_v14 = vadd.f32 %v823_v12, %v600_v9 }
 0x123   : > { %4630 = vmatmul.msk.bf16.gmra.mxu0 %vm328_vm0, %v310_v13  ;;  %4656 = vmatmul.msk.bf16.gmra.mxu1 %vm328_vm0, %v252_v17  ;;  %v1380_v13 = vpack.c.bf16 %v1346_v1, %v1345_v0  ;;  %v1321_v17 = vpack.c.bf16 %v1287_v4, %v1286_v3  ;;  %v1290_v0 = vld [vmem:[%s5326_s20 + $0x31] sm:$0xff]  ;;  %v1291_v1 = vld [vmem:[%s5326_s20 + $0x39] sm:$0xff]  ;;  %v1738_v3 = vld [vmem:[%s5326_s20 + $0x43] sm:$0xff] }
 0x124   : > { %v1148_v23 = vadd.f32 %v1083_v15, %v888_v14  ;;  %v1739_v4 = vld [vmem:[%s5326_s20 + $0x4b] sm:$0xff] }
 0x126   : > { %v1188_v24 = vmul.f32 %v5451_v2, %v1148_v23  ;;  %4686 = vmatmul.msk.bf16.gmra.mxu2 %vm328_vm0, %v700_v18  ;;  %4716 = vmatmul.msk.bf16.gmra.mxu3 %vm328_vm0, %v960_v22  ;;  %v1769_v18 = vpack.c.bf16 %v1735_v7, %v1734_v5 }
 0x128   : > { %v1228_v26 = vadd.f32 %v5457_v6, %v1188_v24  ;;  %v439_v30 = vpop.f32.mrf.mxu0  ;;  %v604_v31 = vpop.f32.mrf.mxu1 }
 0x129   : > { %v826_v27 = vpop.f32.mrf.mxu2  ;;  %v1086_v29 = vpop.f32.mrf.mxu3  ;;  %v605_v41 = vadd.f32 %v604_v31, %v439_v30 }
 0x12a   : > { %1265 = vst.msk [vmem:[%s5466_s10 + $0x88] sm:$0xff] %vm1247_vm1, %v1228_v26  ;;  %v889_v28 = vadd.f32 %v826_v27, %v603_v25 }
 0x12c   : > { %v1149_v32 = vadd.f32 %v1086_v29, %v889_v28 }
 0x12e   : > { %v1189_v33 = vmul.f32 %v5451_v2, %v1149_v32  ;;  %v1347_v32 = vld [vmem:[%s5326_s20 + $0x22] sm:$0xff] }
 0x130   : > { %v1229_v40 = vadd.f32 %v5457_v6, %v1189_v33  ;;  %v442_v48 = vpop.f32.mrf.mxu0  ;;  %v607_v51 = vpop.f32.mrf.mxu1  ;;  %v1348_v33 = vld [vmem:[%s5326_s20 + $0x2a] sm:$0xff] }
 0x131   : > { %v828_v44 = vpop.f32.mrf.mxu2  ;;  %v1088_v47 = vpop.f32.mrf.mxu3  ;;  %v608_v55 = vadd.f32 %v607_v51, %v442_v48  ;;  %v1381_v43 = vpack.c.bf16 %v1348_v33, %v1347_v32  ;;  %v1770_v48 = vpack.c.bf16 %v1737_v37, %v1736_v36  ;;  %v1292_v32 = vld [vmem:[%s5326_s20 + $0x41] sm:$0xff]  ;;  %v1293_v33 = vld [vmem:[%s5326_s20 + $0x49] sm:$0xff] }
 0x132   : > { %1266 = vst.msk [vmem:[%s5466_s10 + $0x90] sm:$0xff] %vm1247_vm1, %v1229_v40  ;;  %v890_v46 = vadd.f32 %v828_v44, %v605_v41  ;;  %v1996_v40 = vld [vmem:[%s5326_s20 + $0x34] sm:$0xff]  ;;  %v1997_v41 = vld [vmem:[%s5326_s20 + $0x3c] sm:$0xff] }
 0x133   : > { %4733 = vmatmul.msk.bf16.vlgmr.msrb.gmra.mxu0 %vm328_vm0, %v1379_v45  ;;  %4759 = vmatmul.msk.bf16.vlgmr.msrb.gmra.mxu1 %vm328_vm0, %v1320_v49 }
 0x134   : > { %v1150_v53 = vadd.f32 %v1088_v47, %v890_v46  ;;  %v1322_v47 = vpack.c.bf16 %v1289_v35, %v1288_v34  ;;  %v1740_v34 = vld [vmem:[%s5326_s20 + $0x53] sm:$0xff]  ;;  %v1741_v35 = vld [vmem:[%s5326_s20 + $0x5b] sm:$0xff] }
 0x136   : > { %v1190_v54 = vmul.f32 %v5451_v2, %v1150_v53  ;;  %4789 = vmatmul.msk.bf16.vlgmr.msrb.gmra.mxu2 %vm328_vm0, %v1768_v50  ;;  %4819 = vmatmul.msk.bf16.vlgmr.msrb.gmra.mxu3 %vm328_vm0, %v2028_v52  ;;  %v2030_v50 = vpack.c.bf16 %v1997_v41, %v1996_v40 }
 0x138   : > { %v1230_v56 = vadd.f32 %v5457_v6, %v1190_v54  ;;  %v444_v60 = vpop.f32.mrf.mxu0  ;;  %v609_v61 = vpop.f32.mrf.mxu1 }
 0x139   : > { %v831_v57 = vpop.f32.mrf.mxu2  ;;  %v1091_v59 = vpop.f32.mrf.mxu3  ;;  %v610_v9 = vadd.f32 %v609_v61, %v444_v60 }
 0x13a   : > { %1267 = vst.msk [vmem:[%s5466_s10 + $0x98] sm:$0xff] %vm1247_vm1, %v1230_v56  ;;  %v891_v58 = vadd.f32 %v831_v57, %v608_v55 }
 0x13c   : > { %v1151_v62 = vadd.f32 %v1091_v59, %v891_v58 }
 0x13e   : > { %v1191_v63 = vmul.f32 %v5451_v2, %v1151_v62  ;;  %v1349_v62 = vld [vmem:[%s5326_s20 + $0x32] sm:$0xff] }
 0x140   : > { %v1231_v8 = vadd.f32 %v5457_v6, %v1191_v63  ;;  %v447_v16 = vpop.f32.mrf.mxu0  ;;  %v612_v19 = vpop.f32.mrf.mxu1  ;;  %v1350_v63 = vld [vmem:[%s5326_s20 + $0x3a] sm:$0xff] }
 0x141   : > { %v833_v12 = vpop.f32.mrf.mxu2  ;;  %v1093_v15 = vpop.f32.mrf.mxu3  ;;  %v613_v23 = vadd.f32 %v612_v19, %v447_v16  ;;  %v1382_v11 = vpack.c.bf16 %v1350_v63, %v1349_v62  ;;  %v1771_v16 = vpack.c.bf16 %v1739_v4, %v1738_v3  ;;  %v1295_v62 = vld [vmem:[%s5326_s20 + $0x59] sm:$0xff]  ;;  %v1742_v63 = vld [vmem:[%s5326_s20 + $0x63] sm:$0xff] }
 0x142   : > { %1268 = vst.msk [vmem:[%s5466_s10 + $0xa0] sm:$0xff] %vm1247_vm1, %v1231_v8  ;;  %v892_v14 = vadd.f32 %v833_v12, %v610_v9  ;;  %v1998_v8 = vld [vmem:[%s5326_s20 + $0x44] sm:$0xff]  ;;  %v1999_v9 = vld [vmem:[%s5326_s20 + $0x4c] sm:$0xff] }
 0x143   : > { %4734 = vmatmul.msk.bf16.gmra.mxu0 %vm328_vm0, %v1380_v13  ;;  %4760 = vmatmul.msk.bf16.gmra.mxu1 %vm328_vm0, %v1321_v17 }
 0x144   : > { %v1152_v21 = vadd.f32 %v1093_v15, %v892_v14  ;;  %v1323_v15 = vpack.c.bf16 %v1291_v1, %v1290_v0  ;;  %v1743_v0 = vld [vmem:[%s5326_s20 + $0x6b] sm:$0xff]  ;;  %v5771_v1 = vld [vmem:[%s6910_s3] ss:$0 sm:$0xff] }
 0x146   : > { %v1192_v22 = vmul.f32 %v5451_v2, %v1152_v21  ;;  %4790 = vmatmul.msk.bf16.gmra.mxu2 %vm328_vm0, %v1769_v18  ;;  %4820 = vmatmul.msk.bf16.gmra.mxu3 %vm328_vm0, %v2029_v20  ;;  %v2031_v18 = vpack.c.bf16 %v1999_v9, %v1998_v8 }
 0x148   : > { %v1232_v24 = vadd.f32 %v5457_v6, %v1192_v22  ;;  %v449_v28 = vpop.f32.mrf.mxu0  ;;  %v614_v29 = vpop.f32.mrf.mxu1 }
 0x149   : > { %v836_v25 = vpop.f32.mrf.mxu2  ;;  %v1096_v27 = vpop.f32.mrf.mxu3  ;;  %v615_v39 = vadd.f32 %v614_v29, %v449_v28 }
 0x14a   : > { %1269 = vst.msk [vmem:[%s5466_s10 + $0xa8] sm:$0xff] %vm1247_vm1, %v1232_v24  ;;  %v893_v26 = vadd.f32 %v836_v25, %v613_v23 }
 0x14c   : > { %v1153_v30 = vadd.f32 %v1096_v27, %v893_v26 }
 0x14e   : > { %v1193_v31 = vmul.f32 %v5451_v2, %v1153_v30  ;;  %v1351_v30 = vld [vmem:[%s5326_s20 + $0x42] sm:$0xff] }
 0x150   : > { %v1233_v38 = vadd.f32 %v5457_v6, %v1193_v31  ;;  %v452_v46 = vpop.f32.mrf.mxu0  ;;  %v617_v49 = vpop.f32.mrf.mxu1  ;;  %v1352_v31 = vld [vmem:[%s5326_s20 + $0x4a] sm:$0xff] }
 0x151   : > { %v838_v42 = vpop.f32.mrf.mxu2  ;;  %v1098_v45 = vpop.f32.mrf.mxu3  ;;  %v618_v53 = vadd.f32 %v617_v49, %v452_v46  ;;  %v1383_v41 = vpack.c.bf16 %v1352_v31, %v1351_v30  ;;  %v1772_v46 = vpack.c.bf16 %v1741_v35, %v1740_v34  ;;  %v1296_v30 = vld [vmem:[%s5326_s20 + $0x61] sm:$0xff]  ;;  %v1297_v31 = vld [vmem:[%s5326_s20 + $0x69] sm:$0xff] }
 0x152   : > { %1270 = vst.msk [vmem:[%s5466_s10 + $0xb0] sm:$0xff] %vm1247_vm1, %v1233_v38  ;;  %v894_v44 = vadd.f32 %v838_v42, %v615_v39  ;;  %v2000_v38 = vld [vmem:[%s5326_s20 + $0x54] sm:$0xff]  ;;  %v2001_v39 = vld [vmem:[%s5326_s20 + $0x5c] sm:$0xff] }
 0x153   : > { %4735 = vmatmul.msk.bf16.gmra.mxu0 %vm328_vm0, %v1381_v43  ;;  %4761 = vmatmul.msk.bf16.gmra.mxu1 %vm328_vm0, %v1322_v47 }
 0x154   : > { %v1154_v51 = vadd.f32 %v1098_v45, %v894_v44  ;;  %v1324_v45 = vpack.c.bf16 %v1293_v33, %v1292_v32  ;;  %v1744_v32 = vld [vmem:[%s5326_s20 + $0x73] sm:$0xff]  ;;  %v1745_v33 = vld [vmem:[%s5326_s20 + $0x7b] sm:$0xff] }
 0x156   : > { %v1194_v52 = vmul.f32 %v5451_v2, %v1154_v51  ;;  %4791 = vmatmul.msk.bf16.gmra.mxu2 %vm328_vm0, %v1770_v48  ;;  %4821 = vmatmul.msk.bf16.gmra.mxu3 %vm328_vm0, %v2030_v50  ;;  %v2032_v48 = vpack.c.bf16 %v2001_v39, %v2000_v38 }
 0x158   : > { %v1234_v54 = vadd.f32 %v5457_v6, %v1194_v52  ;;  %v454_v58 = vpop.f32.mrf.mxu0  ;;  %v619_v59 = vpop.f32.mrf.mxu1 }
 0x159   : > { %v841_v55 = vpop.f32.mrf.mxu2  ;;  %v1101_v57 = vpop.f32.mrf.mxu3  ;;  %v620_v7 = vadd.f32 %v619_v59, %v454_v58  ;;  %v5759_v58 = vld [vmem:[%s6909_s2] ss:$0 sm:$0xff] }
 0x15a   : > { %1271 = vst.msk [vmem:[%s5466_s10 + $0xb8] sm:$0xff] %vm1247_vm1, %v1234_v54  ;;  %v895_v56 = vadd.f32 %v841_v55, %v618_v53 }
 0x15c   : > { %v1155_v60 = vadd.f32 %v1101_v57, %v895_v56 }
 0x15e   : > { %v1195_v61 = vmul.f32 %v5451_v2, %v1155_v60  ;;  %v1353_v60 = vld [vmem:[%s5326_s20 + $0x52] sm:$0xff] }
 0x160   : > { %v1235_v5 = vadd.f32 %v5457_v6, %v1195_v61  ;;  %v457_v14 = vpop.f32.mrf.mxu0  ;;  %v622_v17 = vpop.f32.mrf.mxu1  ;;  %v1294_v61 = vld [vmem:[%s5326_s20 + $0x51] sm:$0xff] }
 0x161   : > { %v843_v10 = vpop.f32.mrf.mxu2  ;;  %v1103_v13 = vpop.f32.mrf.mxu3  ;;  %v623_v21 = vadd.f32 %v622_v17, %v457_v14  ;;  %v1773_v14 = vpack.c.bf16 %v1743_v0, %v1742_v63 }
 0x162   : > { %1272 = vst.msk [vmem:[%s5466_s10 + $0xc0] sm:$0xff] %vm1247_vm1, %v1235_v5  ;;  %v896_v12 = vadd.f32 %v843_v10, %v620_v7  ;;  %v2002_v5 = vld [vmem:[%s5326_s20 + $0x64] sm:$0xff]  ;;  %v2003_v7 = vld [vmem:[%s5326_s20 + $0x6c] sm:$0xff] }
 0x163   : > { %4736 = vmatmul.msk.bf16.gmra.mxu0 %vm328_vm0, %v1382_v11  ;;  %4762 = vmatmul.msk.bf16.gmra.mxu1 %vm328_vm0, %v1323_v15 }
 0x164   : > { %v1156_v19 = vadd.f32 %v1103_v13, %v896_v12  ;;  %v1325_v13 = vpack.c.bf16 %v1295_v62, %v1294_v61  ;;  %v1746_v61 = vld [vmem:[%s5326_s20 + $0x83] sm:$0xff]  ;;  %v1747_v62 = vld [vmem:[%s5326_s20 + $0x8b] sm:$0xff] }
 0x166   : > { %v1196_v20 = vmul.f32 %v5451_v2, %v1156_v19  ;;  %4792 = vmatmul.msk.bf16.gmra.mxu2 %vm328_vm0, %v1771_v16  ;;  %4822 = vmatmul.msk.bf16.gmra.mxu3 %vm328_vm0, %v2031_v18  ;;  %v2033_v16 = vpack.c.bf16 %v2003_v7, %v2002_v5 }
 0x168   : > { %v1236_v22 = vadd.f32 %v5457_v6, %v1196_v20  ;;  %v459_v26 = vpop.f32.mrf.mxu0  ;;  %v624_v27 = vpop.f32.mrf.mxu1 }
 0x169   : > { %v846_v23 = vpop.f32.mrf.mxu2  ;;  %v1106_v25 = vpop.f32.mrf.mxu3  ;;  %v625_v37 = vadd.f32 %v624_v27, %v459_v26 }
 0x16a   : > { %1273 = vst.msk [vmem:[%s5466_s10 + $0xc8] sm:$0xff] %vm1247_vm1, %v1236_v22  ;;  %v897_v24 = vadd.f32 %v846_v23, %v623_v21 }
 0x16c   : > { %v1157_v28 = vadd.f32 %v1106_v25, %v897_v24 }
 0x16e   : > { %v1197_v29 = vmul.f32 %v5451_v2, %v1157_v28  ;;  %v1355_v28 = vld [vmem:[%s5326_s20 + $0x62] sm:$0xff] }
 0x170   : > { %v1237_v36 = vadd.f32 %v5457_v6, %v1197_v29  ;;  %v462_v44 = vpop.f32.mrf.mxu0  ;;  %v627_v47 = vpop.f32.mrf.mxu1  ;;  %v1356_v29 = vld [vmem:[%s5326_s20 + $0x6a] sm:$0xff] }
 0x171   : > { %v848_v40 = vpop.f32.mrf.mxu2  ;;  %v1108_v43 = vpop.f32.mrf.mxu3  ;;  %v628_v51 = vadd.f32 %v627_v47, %v462_v44  ;;  %v1385_v39 = vpack.c.bf16 %v1356_v29, %v1355_v28  ;;  %v1774_v44 = vpack.c.bf16 %v1745_v33, %v1744_v32  ;;  %v1359_v28 = vld [vmem:[%s5326_s20 + $0x82] sm:$0xff]  ;;  %v1360_v29 = vld [vmem:[%s5326_s20 + $0x8a] sm:$0xff]  ;;  %v1748_v32 = vld [vmem:[%s5326_s20 + $0x93] sm:$0xff] }
 0x172   : > { %1274 = vst.msk [vmem:[%s5466_s10 + $0xd0] sm:$0xff] %vm1247_vm1, %v1237_v36  ;;  %v898_v42 = vadd.f32 %v848_v40, %v625_v37  ;;  %v2004_v36 = vld [vmem:[%s5326_s20 + $0x74] sm:$0xff]  ;;  %v2005_v37 = vld [vmem:[%s5326_s20 + $0x7c] sm:$0xff] }
 0x173   : > { %4737 = vmatmul.msk.bf16.gmra.mxu0 %vm328_vm0, %v1383_v41  ;;  %4763 = vmatmul.msk.bf16.gmra.mxu1 %vm328_vm0, %v1324_v45  ;;  %v1749_v33 = vld [vmem:[%s5326_s20 + $0x9b] sm:$0xff] }
 0x174   : > { %v1158_v49 = vadd.f32 %v1108_v43, %v898_v42  ;;  %v1326_v43 = vpack.c.bf16 %v1297_v31, %v1296_v30  ;;  %v1300_v30 = vld [vmem:[%s5326_s20 + $0x81] sm:$0xff]  ;;  %v1301_v31 = vld [vmem:[%s5326_s20 + $0x89] sm:$0xff] }
 0x176   : > { %v1198_v50 = vmul.f32 %v5451_v2, %v1158_v49  ;;  %4793 = vmatmul.msk.bf16.gmra.mxu2 %vm328_vm0, %v1772_v46  ;;  %4823 = vmatmul.msk.bf16.gmra.mxu3 %vm328_vm0, %v2032_v48  ;;  %v2034_v46 = vpack.c.bf16 %v2005_v37, %v2004_v36  ;;  %v2008_v36 = vld [vmem:[%s5326_s20 + $0x94] sm:$0xff]  ;;  %v2009_v37 = vld [vmem:[%s5326_s20 + $0x9c] sm:$0xff] }
 0x178   : > { %v1238_v52 = vadd.f32 %v5457_v6, %v1198_v50  ;;  %v464_v55 = vpop.f32.mrf.mxu0  ;;  %v629_v56 = vpop.f32.mrf.mxu1  ;;  %v1354_v6 = vld [vmem:[%s5326_s20 + $0x5a] sm:$0xff] }
 0x179   : > { %v851_v53 = vpop.f32.mrf.mxu2  ;;  %v1111_v2 = vpop.f32.mrf.mxu3  ;;  %v630_v4 = vadd.f32 %v629_v56, %v464_v55  ;;  %v1384_v9 = vpack.c.bf16 %v1354_v6, %v1353_v60  ;;  %v1298_v60 = vld [vmem:[%s5326_s20 + $0x71] sm:$0xff]  ;;  %v1299_v6 = vld [vmem:[%s5326_s20 + $0x79] sm:$0xff] }
 0x17a   : > { %1275 = vst.msk [vmem:[%s5466_s10 + $0xd8] sm:$0xff] %vm1247_vm1, %v1238_v52  ;;  %v899_v54 = vadd.f32 %v851_v53, %v628_v51 }
 0x17c   : > { %v1159_v57 = vadd.f32 %v1111_v2, %v899_v54 }
 0x17e   : > { %v1199_v59 = vmul.f32 %v5759_v58, %v1159_v57  ;;  %v1357_v57 = vld [vmem:[%s5326_s20 + $0x72] sm:$0xff] }
 0x180   : > { %v1239_v3 = vadd.f32 %v5771_v1, %v1199_v59  ;;  %v467_v12 = vpop.f32.mrf.mxu0  ;;  %v632_v15 = vpop.f32.mrf.mxu1  ;;  %v1358_v59 = vld [vmem:[%s5326_s20 + $0x7a] sm:$0xff] }
 0x181   : > { %v853_v8 = vpop.f32.mrf.mxu2  ;;  %v1113_v11 = vpop.f32.mrf.mxu3  ;;  %v633_v19 = vadd.f32 %v632_v15, %v467_v12  ;;  %v1386_v7 = vpack.c.bf16 %v1358_v59, %v1357_v57  ;;  %v1775_v12 = vpack.c.bf16 %v1747_v62, %v1746_v61  ;;  %v1302_v61 = vld [vmem:[%s5326_s20 + $0x91] sm:$0xff]  ;;  %v1303_v62 = vld [vmem:[%s5326_s20 + $0x99] sm:$0xff] }
 0x182   : > { %1276 = vst.msk [vmem:[%s5466_s10 + $0xe0] sm:$0xff] %vm1247_vm1, %v1239_v3  ;;  %v900_v10 = vadd.f32 %v853_v8, %v630_v4  ;;  %v2006_v3 = vld [vmem:[%s5326_s20 + $0x84] sm:$0xff]  ;;  %v2007_v4 = vld [vmem:[%s5326_s20 + $0x8c] sm:$0xff] }
 0x183   : > { %4738 = vmatmul.msk.bf16.gmra.mxu0 %vm328_vm0, %v1384_v9  ;;  %4764 = vmatmul.msk.bf16.gmra.mxu1 %vm328_vm0, %v1325_v13 }
 0x184   : > { %v1160_v17 = vadd.f32 %v1113_v11, %v900_v10  ;;  %v1327_v11 = vpack.c.bf16 %v1299_v6, %v1298_v60  ;;  %v1361_v60 = vld [vmem:[%s5326_s20 + $0x92] sm:$0xff]  ;;  %v1362_v6 = vld [vmem:[%s5326_s20 + $0x9a] sm:$0xff] }
 0x186   : > { %v1200_v18 = vmul.f32 %v5759_v58, %v1160_v17  ;;  %4794 = vmatmul.msk.bf16.gmra.mxu2 %vm328_vm0, %v1773_v14  ;;  %4824 = vmatmul.msk.bf16.gmra.mxu3 %vm328_vm0, %v2033_v16  ;;  %v2035_v14 = vpack.c.bf16 %v2007_v4, %v2006_v3 }
 0x188   : > { %v1240_v20 = vadd.f32 %v5771_v1, %v1200_v18  ;;  %v469_v24 = vpop.f32.mrf.mxu0  ;;  %v634_v25 = vpop.f32.mrf.mxu1 }
 0x189   : > { %v856_v21 = vpop.f32.mrf.mxu2  ;;  %v1116_v23 = vpop.f32.mrf.mxu3  ;;  %v635_v35 = vadd.f32 %v634_v25, %v469_v24  ;;  %v5209_v24 = vld [vmem:[%s6908_s1 + $0xb0] sm:$0xff] }
 0x18a   : > { %1277 = vst.msk [vmem:[%s5466_s10 + $0xe8] sm:$0xff] %vm1247_vm1, %v1240_v20  ;;  %v901_v22 = vadd.f32 %v856_v21, %v633_v19  ;;  %3209 = vmatpush.bf16.msra.mxu3 %v5209_v24 }
 0x18c   : > { %v1161_v26 = vadd.f32 %v1116_v23, %v901_v22  ;;  %v5207_v23 = vld [vmem:[%s6908_s1 + $0xa0] sm:$0xff] }
 0x18d   : > { %2949 = vmatpush.bf16.msra.mxu2 %v5207_v23 }
 0x18e   : > { %v1201_v27 = vmul.f32 %v5759_v58, %v1161_v26 }
 0x190   : > { %v1241_v34 = vadd.f32 %v5771_v1, %v1201_v27  ;;  %v472_v42 = vpop.f32.mrf.mxu0  ;;  %v637_v45 = vpop.f32.mrf.mxu1 }
 0x191   : > { %v858_v38 = vpop.f32.mrf.mxu2  ;;  %v1118_v41 = vpop.f32.mrf.mxu3  ;;  %v638_v49 = vadd.f32 %v637_v45, %v472_v42  ;;  %v5205_v45 = vld [vmem:[%s6908_s1 + $0x90] sm:$0xff] }
 0x192   : > { %1278 = vst.msk [vmem:[%s5466_s10 + $0xf0] sm:$0xff] %vm1247_vm1, %v1241_v34  ;;  %v902_v40 = vadd.f32 %v858_v38, %v635_v35  ;;  %2560 = vmatpush.bf16.msra.mxu0 %v5205_v45 }
 0x193   : > { %4739 = vmatmul.msk.bf16.gmra.mxu0 %vm328_vm0, %v1385_v39  ;;  %4765 = vmatmul.msk.bf16.gmra.mxu1 %vm328_vm0, %v1326_v43  ;;  %v1387_v39 = vpack.c.bf16 %v1360_v29, %v1359_v28  ;;  %v1328_v43 = vpack.c.bf16 %v1301_v31, %v1300_v30  ;;  %v1363_v28 = vld [vmem:[%s5326_s20 + $0xa2] sm:$0xff]  ;;  %v1364_v29 = vld [vmem:[%s5326_s20 + $0xaa] sm:$0xff] }
 0x194   : > { %v1162_v47 = vadd.f32 %v1118_v41, %v902_v40  ;;  %v1304_v30 = vld [vmem:[%s5326_s20 + $0xa1] sm:$0xff]  ;;  %v1305_v31 = vld [vmem:[%s5326_s20 + $0xa9] sm:$0xff] }
 0x196   : > { %v1202_v48 = vmul.f32 %v5759_v58, %v1162_v47  ;;  %4795 = vmatmul.msk.bf16.gmra.mxu2 %vm328_vm0, %v1774_v44  ;;  %4825 = vmatmul.msk.bf16.gmra.mxu3 %vm328_vm0, %v2034_v46  ;;  %v1776_v44 = vpack.c.bf16 %v1749_v33, %v1748_v32  ;;  %v5203_v46 = vld [vmem:[%s6908_s1 + $0x80] sm:$0xff]  ;;  %v1752_v32 = vld [vmem:[%s5326_s20 + $0xb3] sm:$0xff] }
 0x197   : > { %2725 = vmatpush.bf16.msra.mxu1 %v5203_v46  ;;  %v1753_v33 = vld [vmem:[%s5326_s20 + $0xbb] sm:$0xff] }
 0x198   : > { %v1242_v50 = vadd.f32 %v5771_v1, %v1202_v48  ;;  %v474_v54 = vpop.f32.mrf.mxu0  ;;  %v639_v2 = vpop.f32.mrf.mxu1  ;;  %v2036_v48 = vpack.c.bf16 %v2009_v37, %v2008_v36  ;;  %v2012_v36 = vld [vmem:[%s5326_s20 + $0xb4] sm:$0xff]  ;;  %v2013_v37 = vld [vmem:[%s5326_s20 + $0xbc] sm:$0xff] }
 0x199   : > { %v861_v51 = vpop.f32.mrf.mxu2  ;;  %v1121_v53 = vpop.f32.mrf.mxu3  ;;  %v640_v0 = vadd.f32 %v639_v2, %v474_v54  ;;  %v5861_v2 = vld [vmem:[%s6909_s2] ss:$0 sm:$0xff]  ;;  %v2038_v46 = vpack.c.bf16 %v2013_v37, %v2012_v36 }
 0x19a   : > { %1279 = vst.msk [vmem:[%s5466_s10 + $0xf8] sm:$0xff] %vm1247_vm1, %v1242_v50  ;;  %v903_v52 = vadd.f32 %v861_v51, %v638_v49 }
 0x19c   : > { %v1163_v55 = vadd.f32 %v1121_v53, %v903_v52 }
 0x19e   : > { %v1203_v56 = vmul.f32 %v5759_v58, %v1163_v55 }
 0x1a0   : > { %v1243_v63 = vadd.f32 %v5771_v1, %v1203_v56  ;;  %v477_v10 = vpop.f32.mrf.mxu0  ;;  %v642_v13 = vpop.f32.mrf.mxu1 }
 0x1a1   : > { %v863_v5 = vpop.f32.mrf.mxu2  ;;  %v1123_v9 = vpop.f32.mrf.mxu3  ;;  %v643_v17 = vadd.f32 %v642_v13, %v477_v10  ;;  %v1329_v13 = vpack.c.bf16 %v1303_v62, %v1302_v61  ;;  %v1754_v61 = vld [vmem:[%s5326_s20 + $0xc3] sm:$0xff]  ;;  %v1755_v62 = vld [vmem:[%s5326_s20 + $0xcb] sm:$0xff] }
 0x1a2   : > { %1280 = vst.msk [vmem:[%s5466_s10 + $0x100] sm:$0xff] %vm1247_vm1, %v1243_v63  ;;  %v904_v8 = vadd.f32 %v863_v5, %v640_v0  ;;  %v1750_v63 = vld [vmem:[%s5326_s20 + $0xa3] sm:$0xff]  ;;  %v1751_v0 = vld [vmem:[%s5326_s20 + $0xab] sm:$0xff] }
 0x1a3   : > { %4740 = vmatmul.msk.bf16.gmra.mxu0 %vm328_vm0, %v1386_v7  ;;  %4766 = vmatmul.msk.bf16.gmra.mxu1 %vm328_vm0, %v1327_v11  ;;  %v2010_v5 = vld [vmem:[%s5326_s20 + $0xa4] sm:$0xff]  ;;  %v2011_v7 = vld [vmem:[%s5326_s20 + $0xac] sm:$0xff] }
 0x1a4   : > { %v1164_v15 = vadd.f32 %v1123_v9, %v904_v8  ;;  %v1388_v9 = vpack.c.bf16 %v1362_v6, %v1361_v60  ;;  %v1306_v60 = vld [vmem:[%s5326_s20 + $0xb1] sm:$0xff]  ;;  %v1307_v6 = vld [vmem:[%s5326_s20 + $0xb9] sm:$0xff] }
 0x1a6   : > { %v1204_v16 = vmul.f32 %v5759_v58, %v1164_v15  ;;  %4796 = vmatmul.msk.bf16.gmra.mxu2 %vm328_vm0, %v1775_v12  ;;  %4826 = vmatmul.msk.bf16.gmra.mxu3 %vm328_vm0, %v2035_v14  ;;  %v1777_v14 = vpack.c.bf16 %v1751_v0, %v1750_v63 }
 0x1a8   : > { %v1244_v18 = vadd.f32 %v5771_v1, %v1204_v16  ;;  %v479_v22 = vpop.f32.mrf.mxu0  ;;  %v644_v25 = vpop.f32.mrf.mxu1  ;;  %v2037_v16 = vpack.c.bf16 %v2011_v7, %v2010_v5 }
 0x1a9   : > { %v866_v19 = vpop.f32.mrf.mxu2  ;;  %v1126_v21 = vpop.f32.mrf.mxu3  ;;  %v645_v35 = vadd.f32 %v644_v25, %v479_v22 }
 0x1aa   : > { %1281 = vst.msk [vmem:[%s5466_s10 + $0x108] sm:$0xff] %vm1247_vm1, %v1244_v18  ;;  %v905_v20 = vadd.f32 %v866_v19, %v643_v17 }
 0x1ac   : > { %v1165_v26 = vadd.f32 %v1126_v21, %v905_v20 }
 0x1ae   : > { %v1205_v27 = vmul.f32 %v5759_v58, %v1165_v26 }
 0x1b0   : > { %v1245_v34 = vadd.f32 %v5771_v1, %v1205_v27  ;;  %v1477_v42 = vpop.f32.mrf.mxu0  ;;  %v1642_v47 = vpop.f32.mrf.mxu1 }
 0x1b1   : > { %v868_v38 = vpop.f32.mrf.mxu2  ;;  %v1128_v41 = vpop.f32.mrf.mxu3  ;;  %v1643_v51 = vadd.f32 %v1642_v47, %v1477_v42 }
 0x1b2   : > { %1282 = vst.msk [vmem:[%s5466_s10 + $0x110] sm:$0xff] %vm1247_vm1, %v1245_v34  ;;  %v906_v40 = vadd.f32 %v868_v38, %v645_v35 }
 0x1b3   : > { %4741 = vmatmul.msk.bf16.gmra.mxu0 %vm328_vm0, %v1387_v39  ;;  %4767 = vmatmul.msk.bf16.gmra.mxu1 %vm328_vm0, %v1328_v43  ;;  %v1389_v39 = vpack.c.bf16 %v1364_v29, %v1363_v28  ;;  %v1330_v43 = vpack.c.bf16 %v1305_v31, %v1304_v30  ;;  %v1308_v28 = vld [vmem:[%s5326_s20 + $0xc1] sm:$0xff]  ;;  %v1309_v29 = vld [vmem:[%s5326_s20 + $0xc9] sm:$0xff]  ;;  %v1756_v30 = vld [vmem:[%s5326_s20 + $0xd3] sm:$0xff] }
 0x1b4   : > { %v1166_v49 = vadd.f32 %v1128_v41, %v906_v40  ;;  %v1757_v31 = vld [vmem:[%s5326_s20 + $0xdb] sm:$0xff] }
 0x1b6   : > { %v1206_v50 = vmul.f32 %v5759_v58, %v1166_v49  ;;  %4797 = vmatmul.msk.bf16.gmra.mxu2 %vm328_vm0, %v1776_v44  ;;  %4827 = vmatmul.msk.bf16.gmra.mxu3 %vm328_vm0, %v2036_v48  ;;  %v1778_v44 = vpack.c.bf16 %v1753_v33, %v1752_v32 }
 0x1b8   : > { %v1246_v52 = vadd.f32 %v5771_v1, %v1206_v50  ;;  %v1479_v55 = vpop.f32.mrf.mxu0  ;;  %v1644_v56 = vpop.f32.mrf.mxu1  ;;  %v5866_v1 = vld [vmem:[%s6910_s3] ss:$0 sm:$0xff] }
 0x1b9   : > { %v1866_v53 = vpop.f32.mrf.mxu2  ;;  %v2126_v58 = vpop.f32.mrf.mxu3  ;;  %v1645_v4 = vadd.f32 %v1644_v56, %v1479_v55 }
 0x1ba   : > { %1283 = vst.msk [vmem:[%s5466_s10 + $0x118] sm:$0xff] %vm1247_vm1, %v1246_v52  ;;  %v1956_v54 = vadd.f32 %v1866_v53, %v1643_v51 }
 0x1bc   : > { %v2216_v57 = vadd.f32 %v2126_v58, %v1956_v54 }
 0x1be   : > { %v2256_v59 = vmul.f32 %v5861_v2, %v2216_v57  ;;  %v1365_v57 = vld [vmem:[%s5326_s20 + $0xb2] sm:$0xff] }
 0x1c0   : > { %v2296_v3 = vadd.f32 %v5866_v1, %v2256_v59  ;;  %v1482_v12 = vpop.f32.mrf.mxu0  ;;  %v1647_v15 = vpop.f32.mrf.mxu1  ;;  %v1366_v59 = vld [vmem:[%s5326_s20 + $0xba] sm:$0xff] }
 0x1c1   : > { %v1868_v8 = vpop.f32.mrf.mxu2  ;;  %v2128_v11 = vpop.f32.mrf.mxu3  ;;  %v1648_v19 = vadd.f32 %v1647_v15, %v1482_v12  ;;  %v1390_v7 = vpack.c.bf16 %v1366_v59, %v1365_v57  ;;  %v1779_v12 = vpack.c.bf16 %v1755_v62, %v1754_v61  ;;  %v1310_v57 = vld [vmem:[%s5326_s20 + $0xd1] sm:$0xff]  ;;  %v1311_v59 = vld [vmem:[%s5326_s20 + $0xd9] sm:$0xff] }
 0x1c2   : > { %4837 = vst.msk [vmem:[%s5466_s10 + $0x120] sm:$0xff] %vm1247_vm1, %v2296_v3  ;;  %v1957_v10 = vadd.f32 %v1868_v8, %v1645_v4  ;;  %v2014_v3 = vld [vmem:[%s5326_s20 + $0xc4] sm:$0xff]  ;;  %v2015_v4 = vld [vmem:[%s5326_s20 + $0xcc] sm:$0xff] }
 0x1c3   : > { %4742 = vmatmul.msk.bf16.gmra.mxu0 %vm328_vm0, %v1388_v9  ;;  %4768 = vmatmul.msk.bf16.gmra.mxu1 %vm328_vm0, %v1329_v13 }
 0x1c4   : > { %v2217_v17 = vadd.f32 %v2128_v11, %v1957_v10  ;;  %v1331_v11 = vpack.c.bf16 %v1307_v6, %v1306_v60  ;;  %v1758_v60 = vld [vmem:[%s5326_s20 + $0xe3] sm:$0xff]  ;;  %v1759_v6 = vld [vmem:[%s5326_s20 + $0xeb] sm:$0xff] }
 0x1c6   : > { %v2257_v18 = vmul.f32 %v5861_v2, %v2217_v17  ;;  %4798 = vmatmul.msk.bf16.gmra.mxu2 %vm328_vm0, %v1777_v14  ;;  %4828 = vmatmul.msk.bf16.gmra.mxu3 %vm328_vm0, %v2037_v16  ;;  %v2039_v14 = vpack.c.bf16 %v2015_v4, %v2014_v3 }
 0x1c8   : > { %v2297_v20 = vadd.f32 %v5866_v1, %v2257_v18  ;;  %v1484_v24 = vpop.f32.mrf.mxu0  ;;  %v1649_v25 = vpop.f32.mrf.mxu1 }
 0x1c9   : > { %v1871_v21 = vpop.f32.mrf.mxu2  ;;  %v2131_v23 = vpop.f32.mrf.mxu3  ;;  %v1650_v35 = vadd.f32 %v1649_v25, %v1484_v24 }
 0x1ca   : > { %4838 = vst.msk [vmem:[%s5466_s10 + $0x128] sm:$0xff] %vm1247_vm1, %v2297_v20  ;;  %v1958_v22 = vadd.f32 %v1871_v21, %v1648_v19 }
 0x1cc   : > { %v2218_v26 = vadd.f32 %v2131_v23, %v1958_v22 }
 0x1ce   : > { %v2258_v27 = vmul.f32 %v5861_v2, %v2218_v26  ;;  %v1367_v26 = vld [vmem:[%s5326_s20 + $0xc2] sm:$0xff] }
 0x1d0   : > { %v2298_v34 = vadd.f32 %v5866_v1, %v2258_v27  ;;  %v1487_v42 = vpop.f32.mrf.mxu0  ;;  %v1652_v45 = vpop.f32.mrf.mxu1  ;;  %v1368_v27 = vld [vmem:[%s5326_s20 + $0xca] sm:$0xff] }
 0x1d1   : > { %v1873_v38 = vpop.f32.mrf.mxu2  ;;  %v2133_v41 = vpop.f32.mrf.mxu3  ;;  %v1653_v49 = vadd.f32 %v1652_v45, %v1487_v42  ;;  %v1391_v37 = vpack.c.bf16 %v1368_v27, %v1367_v26  ;;  %v1780_v42 = vpack.c.bf16 %v1757_v31, %v1756_v30  ;;  %v1312_v26 = vld [vmem:[%s5326_s20 + $0xe1] sm:$0xff]  ;;  %v1313_v27 = vld [vmem:[%s5326_s20 + $0xe9] sm:$0xff] }
 0x1d2   : > { %4839 = vst.msk [vmem:[%s5466_s10 + $0x130] sm:$0xff] %vm1247_vm1, %v2298_v34  ;;  %v1959_v40 = vadd.f32 %v1873_v38, %v1650_v35  ;;  %v2016_v34 = vld [vmem:[%s5326_s20 + $0xd4] sm:$0xff]  ;;  %v2017_v35 = vld [vmem:[%s5326_s20 + $0xdc] sm:$0xff] }
 0x1d3   : > { %4743 = vmatmul.msk.bf16.gmra.mxu0 %vm328_vm0, %v1389_v39  ;;  %4769 = vmatmul.msk.bf16.gmra.mxu1 %vm328_vm0, %v1330_v43 }
 0x1d4   : > { %v2219_v47 = vadd.f32 %v2133_v41, %v1959_v40  ;;  %v1332_v41 = vpack.c.bf16 %v1309_v29, %v1308_v28  ;;  %v1760_v28 = vld [vmem:[%s5326_s20 + $0xf3] sm:$0xff]  ;;  %v1761_v29 = vld [vmem:[%s5326_s20 + $0xfb] sm:$0xff] }
 0x1d6   : > { %v2259_v48 = vmul.f32 %v5861_v2, %v2219_v47  ;;  %4799 = vmatmul.msk.bf16.gmra.mxu2 %vm328_vm0, %v1778_v44  ;;  %4829 = vmatmul.msk.bf16.gmra.mxu3 %vm328_vm0, %v2038_v46  ;;  %v2040_v44 = vpack.c.bf16 %v2017_v35, %v2016_v34 }
 0x1d8   : > { %v2299_v50 = vadd.f32 %v5866_v1, %v2259_v48  ;;  %v1489_v54 = vpop.f32.mrf.mxu0  ;;  %v1654_v58 = vpop.f32.mrf.mxu1 }
 0x1d9   : > { %v1876_v51 = vpop.f32.mrf.mxu2  ;;  %v2136_v53 = vpop.f32.mrf.mxu3  ;;  %v1655_v0 = vadd.f32 %v1654_v58, %v1489_v54 }
 0x1da   : > { %4840 = vst.msk [vmem:[%s5466_s10 + $0x138] sm:$0xff] %vm1247_vm1, %v2299_v50  ;;  %v1960_v52 = vadd.f32 %v1876_v51, %v1653_v49 }
 0x1dc   : > { %v2220_v55 = vadd.f32 %v2136_v53, %v1960_v52 }
 0x1de   : > { %v2260_v56 = vmul.f32 %v5861_v2, %v2220_v55  ;;  %v1369_v55 = vld [vmem:[%s5326_s20 + $0xd2] sm:$0xff] }
 0x1e0   : > { %v2300_v63 = vadd.f32 %v5866_v1, %v2260_v56  ;;  %v1492_v10 = vpop.f32.mrf.mxu0  ;;  %v1657_v13 = vpop.f32.mrf.mxu1  ;;  %v1370_v56 = vld [vmem:[%s5326_s20 + $0xda] sm:$0xff] }
 0x1e1   : > { %v1878_v5 = vpop.f32.mrf.mxu2  ;;  %v2138_v9 = vpop.f32.mrf.mxu3  ;;  %v1658_v17 = vadd.f32 %v1657_v13, %v1492_v10  ;;  %v1392_v4 = vpack.c.bf16 %v1370_v56, %v1369_v55  ;;  %v1781_v10 = vpack.c.bf16 %v1759_v6, %v1758_v60  ;;  %v1314_v55 = vld [vmem:[%s5326_s20 + $0xf1] sm:$0xff]  ;;  %v1315_v56 = vld [vmem:[%s5326_s20 + $0xf9] sm:$0xff] }
 0x1e2   : > { %4841 = vst.msk [vmem:[%s5466_s10 + $0x140] sm:$0xff] %vm1247_vm1, %v2300_v63  ;;  %v1961_v8 = vadd.f32 %v1878_v5, %v1655_v0  ;;  %v2018_v63 = vld [vmem:[%s5326_s20 + $0xe4] sm:$0xff]  ;;  %v2019_v0 = vld [vmem:[%s5326_s20 + $0xec] sm:$0xff] }
 0x1e3   : > { %4744 = vmatmul.msk.bf16.gmra.mxu0 %vm328_vm0, %v1390_v7  ;;  %4770 = vmatmul.msk.bf16.gmra.mxu1 %vm328_vm0, %v1331_v11 }
 0x1e4   : > { %v2221_v15 = vadd.f32 %v2138_v9, %v1961_v8  ;;  %v1333_v9 = vpack.c.bf16 %v1311_v59, %v1310_v57  ;;  %v1762_v57 = vld [vmem:[%s5326_s20 + $0x103] sm:$0xff]  ;;  %v1763_v59 = vld [vmem:[%s5326_s20 + $0x10b] sm:$0xff] }
 0x1e6   : > { %v2261_v16 = vmul.f32 %v5861_v2, %v2221_v15  ;;  %4800 = vmatmul.msk.bf16.gmra.mxu2 %vm328_vm0, %v1779_v12  ;;  %4830 = vmatmul.msk.bf16.gmra.mxu3 %vm328_vm0, %v2039_v14  ;;  %v2041_v12 = vpack.c.bf16 %v2019_v0, %v2018_v63 }
 0x1e8   : > { %v2301_v18 = vadd.f32 %v5866_v1, %v2261_v16  ;;  %v1494_v22 = vpop.f32.mrf.mxu0  ;;  %v1659_v23 = vpop.f32.mrf.mxu1 }
 0x1e9   : > { %v1881_v19 = vpop.f32.mrf.mxu2  ;;  %v2141_v21 = vpop.f32.mrf.mxu3  ;;  %v1660_v33 = vadd.f32 %v1659_v23, %v1494_v22 }
 0x1ea   : > { %4842 = vst.msk [vmem:[%s5466_s10 + $0x148] sm:$0xff] %vm1247_vm1, %v2301_v18  ;;  %v1962_v20 = vadd.f32 %v1881_v19, %v1658_v17 }
 0x1ec   : > { %v2222_v24 = vadd.f32 %v2141_v21, %v1962_v20 }
 0x1ee   : > { %v2262_v25 = vmul.f32 %v5861_v2, %v2222_v24  ;;  %v1371_v24 = vld [vmem:[%s5326_s20 + $0xe2] sm:$0xff] }
 0x1f0   : > { %v2302_v32 = vadd.f32 %v5866_v1, %v2262_v25  ;;  %v1497_v40 = vpop.f32.mrf.mxu0  ;;  %v1662_v43 = vpop.f32.mrf.mxu1  ;;  %v1372_v25 = vld [vmem:[%s5326_s20 + $0xea] sm:$0xff] }
 0x1f1   : > { %v1883_v36 = vpop.f32.mrf.mxu2  ;;  %v2143_v39 = vpop.f32.mrf.mxu3  ;;  %v1663_v47 = vadd.f32 %v1662_v43, %v1497_v40  ;;  %v1393_v35 = vpack.c.bf16 %v1372_v25, %v1371_v24  ;;  %v1782_v40 = vpack.c.bf16 %v1761_v29, %v1760_v28  ;;  %v1316_v24 = vld [vmem:[%s5326_s20 + $0x101] sm:$0xff]  ;;  %v1317_v25 = vld [vmem:[%s5326_s20 + $0x109] sm:$0xff] }
 0x1f2   : > { %4843 = vst.msk [vmem:[%s5466_s10 + $0x150] sm:$0xff] %vm1247_vm1, %v2302_v32  ;;  %v1963_v38 = vadd.f32 %v1883_v36, %v1660_v33  ;;  %v2020_v32 = vld [vmem:[%s5326_s20 + $0xf4] sm:$0xff]  ;;  %v2021_v33 = vld [vmem:[%s5326_s20 + $0xfc] sm:$0xff] }
 0x1f3   : > { %4745 = vmatmul.msk.bf16.gmra.mxu0 %vm328_vm0, %v1391_v37  ;;  %4771 = vmatmul.msk.bf16.gmra.mxu1 %vm328_vm0, %v1332_v41 }
 0x1f4   : > { %v2223_v45 = vadd.f32 %v2143_v39, %v1963_v38  ;;  %v1334_v39 = vpack.c.bf16 %v1313_v27, %v1312_v26  ;;  %v1764_v26 = vld [vmem:[%s5326_s20 + $0x113] sm:$0xff]  ;;  %v1765_v27 = vld [vmem:[%s5326_s20 + $0x11b] sm:$0xff] }
 0x1f6   : > { %v2263_v46 = vmul.f32 %v5861_v2, %v2223_v45  ;;  %4801 = vmatmul.msk.bf16.gmra.mxu2 %vm328_vm0, %v1780_v42  ;;  %4831 = vmatmul.msk.bf16.gmra.mxu3 %vm328_vm0, %v2040_v44  ;;  %v2042_v42 = vpack.c.bf16 %v2021_v33, %v2020_v32 }
 0x1f8   : > { %v2303_v48 = vadd.f32 %v5866_v1, %v2263_v46  ;;  %v1499_v52 = vpop.f32.mrf.mxu0  ;;  %v1664_v53 = vpop.f32.mrf.mxu1 }
 0x1f9   : > { %v1886_v49 = vpop.f32.mrf.mxu2  ;;  %v2146_v51 = vpop.f32.mrf.mxu3  ;;  %v1665_v62 = vadd.f32 %v1664_v53, %v1499_v52 }
 0x1fa   : > { %4844 = vst.msk [vmem:[%s5466_s10 + $0x158] sm:$0xff] %vm1247_vm1, %v2303_v48  ;;  %v1964_v50 = vadd.f32 %v1886_v49, %v1663_v47 }
 0x1fc   : > { %v2224_v54 = vadd.f32 %v2146_v51, %v1964_v50 }
 0x1fe   : > { %v2264_v58 = vmul.f32 %v5861_v2, %v2224_v54  ;;  %v1373_v54 = vld [vmem:[%s5326_s20 + $0xf2] sm:$0xff] }
 0x200   : > { %v2304_v61 = vadd.f32 %v5866_v1, %v2264_v58  ;;  %v1502_v8 = vpop.f32.mrf.mxu0  ;;  %v1667_v11 = vpop.f32.mrf.mxu1  ;;  %v1374_v58 = vld [vmem:[%s5326_s20 + $0xfa] sm:$0xff] }
 0x201   : > { %v1888_v3 = vpop.f32.mrf.mxu2  ;;  %v2148_v7 = vpop.f32.mrf.mxu3  ;;  %v1668_v15 = vadd.f32 %v1667_v11, %v1502_v8  ;;  %v1394_v0 = vpack.c.bf16 %v1374_v58, %v1373_v54  ;;  %v1783_v8 = vpack.c.bf16 %v1763_v59, %v1762_v57  ;;  %v1377_v54 = vld [vmem:[%s5326_s20 + $0x112] sm:$0xff]  ;;  %v1378_v58 = vld [vmem:[%s5326_s20 + $0x11a] sm:$0xff]  ;;  %v1766_v57 = vld [vmem:[%s5326_s20 + $0x123] sm:$0xff] }
 0x202   : > { %4845 = vst.msk [vmem:[%s5466_s10 + $0x160] sm:$0xff] %vm1247_vm1, %v2304_v61  ;;  %v1965_v5 = vadd.f32 %v1888_v3, %v1665_v62  ;;  %v2022_v61 = vld [vmem:[%s5326_s20 + $0x104] sm:$0xff]  ;;  %v2023_v62 = vld [vmem:[%s5326_s20 + $0x10c] sm:$0xff] }
 0x203   : > { %4746 = vmatmul.msk.bf16.gmra.mxu0 %vm328_vm0, %v1392_v4  ;;  %4772 = vmatmul.msk.bf16.gmra.mxu1 %vm328_vm0, %v1333_v9  ;;  %v1767_v59 = vld [vmem:[%s5326_s20 + $0x12b] sm:$0xff] }
 0x204   : > { %v2225_v13 = vadd.f32 %v2148_v7, %v1965_v5  ;;  %v1335_v7 = vpack.c.bf16 %v1315_v56, %v1314_v55  ;;  %v1318_v55 = vld [vmem:[%s5326_s20 + $0x111] sm:$0xff]  ;;  %v1319_v56 = vld [vmem:[%s5326_s20 + $0x119] sm:$0xff] }
 0x206   : > { %v2265_v14 = vmul.f32 %v5861_v2, %v2225_v13  ;;  %4802 = vmatmul.msk.bf16.gmra.mxu2 %vm328_vm0, %v1781_v10  ;;  %4832 = vmatmul.msk.bf16.gmra.mxu3 %vm328_vm0, %v2041_v12  ;;  %v2043_v10 = vpack.c.bf16 %v2023_v62, %v2022_v61  ;;  %v2026_v61 = vld [vmem:[%s5326_s20 + $0x124] sm:$0xff]  ;;  %v2027_v62 = vld [vmem:[%s5326_s20 + $0x12c] sm:$0xff] }
 0x208   : > { %v2305_v16 = vadd.f32 %v5866_v1, %v2265_v14  ;;  %v1504_v20 = vpop.f32.mrf.mxu0  ;;  %v1669_v21 = vpop.f32.mrf.mxu1 }
 0x209   : > { %v1891_v17 = vpop.f32.mrf.mxu2  ;;  %v2151_v19 = vpop.f32.mrf.mxu3  ;;  %v1670_v31 = vadd.f32 %v1669_v21, %v1504_v20 }
 0x20a   : > { %4846 = vst.msk [vmem:[%s5466_s10 + $0x168] sm:$0xff] %vm1247_vm1, %v2305_v16  ;;  %v1966_v18 = vadd.f32 %v1891_v17, %v1668_v15 }
 0x20c   : > { %v2226_v22 = vadd.f32 %v2151_v19, %v1966_v18 }
 0x20e   : > { %v2266_v23 = vmul.f32 %v5861_v2, %v2226_v22  ;;  %v1375_v22 = vld [vmem:[%s5326_s20 + $0x102] sm:$0xff] }
 0x210   : > { %v2306_v30 = vadd.f32 %v5866_v1, %v2266_v23  ;;  %v1507_v38 = vpop.f32.mrf.mxu0  ;;  %v1672_v41 = vpop.f32.mrf.mxu1  ;;  %v1376_v23 = vld [vmem:[%s5326_s20 + $0x10a] sm:$0xff] }
 0x211   : > { %v1893_v34 = vpop.f32.mrf.mxu2  ;;  %v2153_v37 = vpop.f32.mrf.mxu3  ;;  %v1673_v45 = vadd.f32 %v1672_v41, %v1507_v38  ;;  %v1395_v33 = vpack.c.bf16 %v1376_v23, %v1375_v22  ;;  %v1784_v38 = vpack.c.bf16 %v1765_v27, %v1764_v26  ;;  %v2369_v26 = vld [vmem:[%s5326_s20 + $0x12] sm:$0xff]  ;;  %v2370_v27 = vld [vmem:[%s5326_s20 + $0x1a] sm:$0xff] }
 0x212   : > { %4847 = vst.msk [vmem:[%s5466_s10 + $0x170] sm:$0xff] %vm1247_vm1, %v2306_v30  ;;  %v1967_v36 = vadd.f32 %v1893_v34, %v1670_v31  ;;  %v2024_v30 = vld [vmem:[%s5326_s20 + $0x114] sm:$0xff]  ;;  %v2025_v31 = vld [vmem:[%s5326_s20 + $0x11c] sm:$0xff] }
 0x213   : > { %4747 = vmatmul.msk.bf16.gmra.mxu0 %vm328_vm0, %v1393_v35  ;;  %4773 = vmatmul.msk.bf16.gmra.mxu1 %vm328_vm0, %v1334_v39 }
 0x214   : > { %v2227_v43 = vadd.f32 %v2153_v37, %v1967_v36  ;;  %v1336_v37 = vpack.c.bf16 %v1317_v25, %v1316_v24  ;;  %v2428_v24 = vld [vmem:[%s5326_s20 + $0x13] sm:$0xff]  ;;  %v2429_v25 = vld [vmem:[%s5326_s20 + $0x1b] sm:$0xff] }
 0x216   : > { %v2267_v44 = vmul.f32 %v5861_v2, %v2227_v43  ;;  %4803 = vmatmul.msk.bf16.gmra.mxu2 %vm328_vm0, %v1782_v40  ;;  %4833 = vmatmul.msk.bf16.gmra.mxu3 %vm328_vm0, %v2042_v42  ;;  %v2044_v40 = vpack.c.bf16 %v2025_v31, %v2024_v30 }
 0x218   : > { %v2307_v46 = vadd.f32 %v5866_v1, %v2267_v44  ;;  %v1509_v50 = vpop.f32.mrf.mxu0  ;;  %v1674_v51 = vpop.f32.mrf.mxu1 }
 0x219   : > { %v1896_v47 = vpop.f32.mrf.mxu2  ;;  %v2156_v49 = vpop.f32.mrf.mxu3  ;;  %v1675_v6 = vadd.f32 %v1674_v51, %v1509_v50  ;;  %v5218_v50 = vld [vmem:[%s6908_s1 + $0xf8] sm:$0xff] }
 0x21a   : > { %4848 = vst.msk [vmem:[%s5466_s10 + $0x178] sm:$0xff] %vm1247_vm1, %v2307_v46  ;;  %v1968_v48 = vadd.f32 %v1896_v47, %v1673_v45  ;;  %4293 = vmatpush.bf16.msrb.mxu3 %v5218_v50 }
 0x21c   : > { %v2228_v52 = vadd.f32 %v2156_v49, %v1968_v48  ;;  %v5216_v49 = vld [vmem:[%s6908_s1 + $0xe8] sm:$0xff] }
 0x21d   : > { %4033 = vmatpush.bf16.msrb.mxu2 %v5216_v49 }
 0x21e   : > { %v2268_v53 = vmul.f32 %v5861_v2, %v2228_v52 }
 0x220   : > { %v2308_v60 = vadd.f32 %v5866_v1, %v2268_v53  ;;  %v1512_v5 = vpop.f32.mrf.mxu0  ;;  %v1677_v9 = vpop.f32.mrf.mxu1 }
 0x221   : > { %v1898_v63 = vpop.f32.mrf.mxu2  ;;  %v2158_v4 = vpop.f32.mrf.mxu3  ;;  %v1678_v13 = vadd.f32 %v1677_v9, %v1512_v5  ;;  %v5214_v9 = vld [vmem:[%s6908_s1 + $0xd8] sm:$0xff] }
 0x222   : > { %4849 = vst.msk [vmem:[%s5466_s10 + $0x180] sm:$0xff] %vm1247_vm1, %v2308_v60  ;;  %v1969_v3 = vadd.f32 %v1898_v63, %v1675_v6  ;;  %3644 = vmatpush.bf16.msrb.mxu0 %v5214_v9 }
 0x223   : > { %4748 = vmatmul.msk.bf16.gmra.mxu0 %vm328_vm0, %v1394_v0  ;;  %4774 = vmatmul.msk.bf16.gmra.mxu1 %vm328_vm0, %v1335_v7  ;;  %v1396_v0 = vpack.c.bf16 %v1378_v58, %v1377_v54  ;;  %v1337_v7 = vpack.c.bf16 %v1319_v56, %v1318_v55  ;;  %v2430_v54 = vld [vmem:[%s5326_s20 + $0x23] sm:$0xff]  ;;  %v2431_v58 = vld [vmem:[%s5326_s20 + $0x2b] sm:$0xff] }
 0x224   : > { %v2229_v11 = vadd.f32 %v2158_v4, %v1969_v3  ;;  %v2371_v55 = vld [vmem:[%s5326_s20 + $0x22] sm:$0xff]  ;;  %v2372_v56 = vld [vmem:[%s5326_s20 + $0x2a] sm:$0xff] }
 0x226   : > { %v2269_v12 = vmul.f32 %v5861_v2, %v2229_v11  ;;  %4804 = vmatmul.msk.bf16.gmra.mxu2 %vm328_vm0, %v1783_v8  ;;  %4834 = vmatmul.msk.bf16.gmra.mxu3 %vm328_vm0, %v2043_v10  ;;  %v1785_v8 = vpack.c.bf16 %v1767_v59, %v1766_v57  ;;  %v5212_v10 = vld [vmem:[%s6908_s1 + $0xc8] sm:$0xff]  ;;  %v2819_v57 = vld [vmem:[%s5326_s20 + $0x34] sm:$0xff]  ;;  %v2820_v59 = vld [vmem:[%s5326_s20 + $0x3c] sm:$0xff] }
 0x227   : > { %3809 = vmatpush.bf16.msrb.mxu1 %v5212_v10 }
 0x228   : > { %v2309_v14 = vadd.f32 %v5866_v1, %v2269_v12  ;;  %v1514_v18 = vpop.f32.mrf.mxu0  ;;  %v1679_v19 = vpop.f32.mrf.mxu1  ;;  %v2045_v12 = vpack.c.bf16 %v2027_v62, %v2026_v61  ;;  %v3079_v61 = vld [vmem:[%s5326_s20 + $0x35] sm:$0xff]  ;;  %v3080_v62 = vld [vmem:[%s5326_s20 + $0x3d] sm:$0xff] }
 0x229   : > { %v1901_v15 = vpop.f32.mrf.mxu2  ;;  %v2161_v17 = vpop.f32.mrf.mxu3  ;;  %v1680_v29 = vadd.f32 %v1679_v19, %v1514_v18  ;;  %v3114_v10 = vpack.c.bf16 %v3080_v62, %v3079_v61 }
 0x22a   : > { %4850 = vst.msk [vmem:[%s5466_s10 + $0x188] sm:$0xff] %vm1247_vm1, %v2309_v14  ;;  %v1970_v16 = vadd.f32 %v1901_v15, %v1678_v13 }
 0x22c   : > { %v2230_v20 = vadd.f32 %v2161_v17, %v1970_v16 }
 0x22e   : > { %v2270_v21 = vmul.f32 %v5861_v2, %v2230_v20 }
 0x230   : > { %v2310_v28 = vadd.f32 %v5866_v1, %v2270_v21  ;;  %v1517_v36 = vpop.f32.mrf.mxu0  ;;  %v1682_v39 = vpop.f32.mrf.mxu1 }
 0x231   : > { %v1903_v32 = vpop.f32.mrf.mxu2  ;;  %v2163_v35 = vpop.f32.mrf.mxu3  ;;  %v1683_v43 = vadd.f32 %v1682_v39, %v1517_v36  ;;  %v2405_v39 = vpack.c.bf16 %v2370_v27, %v2369_v26  ;;  %v2821_v26 = vld [vmem:[%s5326_s20 + $0x44] sm:$0xff]  ;;  %v2822_v27 = vld [vmem:[%s5326_s20 + $0x4c] sm:$0xff] }
 0x232   : > { %4851 = vst.msk [vmem:[%s5466_s10 + $0x190] sm:$0xff] %vm1247_vm1, %v2310_v28  ;;  %v1971_v34 = vadd.f32 %v1903_v32, %v1680_v29  ;;  %v2817_v28 = vld [vmem:[%s5326_s20 + $0x24] sm:$0xff]  ;;  %v2818_v29 = vld [vmem:[%s5326_s20 + $0x2c] sm:$0xff] }
 0x233   : > { %4749 = vmatmul.msk.bf16.gmra.mxu0 %vm328_vm0, %v1395_v33  ;;  %4775 = vmatmul.msk.bf16.gmra.mxu1 %vm328_vm0, %v1336_v37  ;;  %v3077_v32 = vld [vmem:[%s5326_s20 + $0x25] sm:$0xff]  ;;  %v3078_v33 = vld [vmem:[%s5326_s20 + $0x2d] sm:$0xff] }
 0x234   : > { %v2231_v41 = vadd.f32 %v2163_v35, %v1971_v34  ;;  %v2464_v35 = vpack.c.bf16 %v2429_v25, %v2428_v24  ;;  %v2373_v24 = vld [vmem:[%s5326_s20 + $0x32] sm:$0xff]  ;;  %v2374_v25 = vld [vmem:[%s5326_s20 + $0x3a] sm:$0xff] }
 0x236   : > { %v2271_v42 = vmul.f32 %v5861_v2, %v2231_v41  ;;  %4805 = vmatmul.msk.bf16.gmra.mxu2 %vm328_vm0, %v1784_v38  ;;  %4835 = vmatmul.msk.bf16.gmra.mxu3 %vm328_vm0, %v2044_v40  ;;  %v2853_v40 = vpack.c.bf16 %v2818_v29, %v2817_v28 }
 0x238   : > { %v2311_v44 = vadd.f32 %v5866_v1, %v2271_v42  ;;  %v1519_v48 = vpop.f32.mrf.mxu0  ;;  %v1684_v51 = vpop.f32.mrf.mxu1  ;;  %v3113_v42 = vpack.c.bf16 %v3078_v33, %v3077_v32 }
 0x239   : > { %v1906_v45 = vpop.f32.mrf.mxu2  ;;  %v2166_v47 = vpop.f32.mrf.mxu3  ;;  %v1685_v6 = vadd.f32 %v1684_v51, %v1519_v48 }
 0x23a   : > { %4852 = vst.msk [vmem:[%s5466_s10 + $0x198] sm:$0xff] %vm1247_vm1, %v2311_v44  ;;  %v1972_v46 = vadd.f32 %v1906_v45, %v1683_v43 }
 0x23c   : > { %v2232_v52 = vadd.f32 %v2166_v47, %v1972_v46 }
 0x23e   : > { %v2272_v53 = vmul.f32 %v5861_v2, %v2232_v52 }
 0x240   : > { %v2312_v60 = vadd.f32 %v5866_v1, %v2272_v53  ;;  %v1522_v5 = vpop.f32.mrf.mxu0  ;;  %v1687_v11 = vpop.f32.mrf.mxu1 }
 0x241   : > { %v1908_v63 = vpop.f32.mrf.mxu2  ;;  %v2168_v4 = vpop.f32.mrf.mxu3  ;;  %v1688_v15 = vadd.f32 %v1687_v11, %v1522_v5 }
 0x242   : > { %4853 = vst.msk [vmem:[%s5466_s10 + $0x1a0] sm:$0xff] %vm1247_vm1, %v2312_v60  ;;  %v1973_v3 = vadd.f32 %v1908_v63, %v1685_v6 }
 0x243   : > { %4750 = vmatmul.msk.bf16.gmra.mxu0 %vm328_vm0, %v1396_v0  ;;  %4776 = vmatmul.msk.bf16.gmra.mxu1 %vm328_vm0, %v1337_v7  ;;  %v2465_v0 = vpack.c.bf16 %v2431_v58, %v2430_v54  ;;  %v2406_v7 = vpack.c.bf16 %v2372_v56, %v2371_v55  ;;  %v2375_v54 = vld [vmem:[%s5326_s20 + $0x42] sm:$0xff]  ;;  %v2376_v58 = vld [vmem:[%s5326_s20 + $0x4a] sm:$0xff]  ;;  %v2823_v55 = vld [vmem:[%s5326_s20 + $0x54] sm:$0xff] }
 0x244   : > { %v2233_v13 = vadd.f32 %v2168_v4, %v1973_v3  ;;  %v2824_v56 = vld [vmem:[%s5326_s20 + $0x5c] sm:$0xff] }
 0x246   : > { %v2273_v14 = vmul.f32 %v5861_v2, %v2233_v13  ;;  %4806 = vmatmul.msk.bf16.gmra.mxu2 %vm328_vm0, %v1785_v8  ;;  %4836 = vmatmul.msk.bf16.gmra.mxu3 %vm328_vm0, %v2045_v12  ;;  %v2854_v8 = vpack.c.bf16 %v2820_v59, %v2819_v57 }
 0x248   : > { %v2313_v16 = vadd.f32 %v5866_v1, %v2273_v14  ;;  %v1524_v20 = vpop.f32.mrf.mxu0  ;;  %v1689_v21 = vpop.f32.mrf.mxu1 }
 0x249   : > { %v1911_v17 = vpop.f32.mrf.mxu2  ;;  %v2171_v19 = vpop.f32.mrf.mxu3  ;;  %v1690_v31 = vadd.f32 %v1689_v21, %v1524_v20 }
 0x24a   : > { %4854 = vst.msk [vmem:[%s5466_s10 + $0x1a8] sm:$0xff] %vm1247_vm1, %v2313_v16  ;;  %v1974_v18 = vadd.f32 %v1911_v17, %v1688_v15 }
 0x24c   : > { %v2234_v22 = vadd.f32 %v2171_v19, %v1974_v18 }
 0x24e   : > { %v2274_v23 = vmul.f32 %v5861_v2, %v2234_v22  ;;  %v2432_v22 = vld [vmem:[%s5326_s20 + $0x33] sm:$0xff] }
 0x250   : > { %v2314_v30 = vadd.f32 %v5866_v1, %v2274_v23  ;;  %v1527_v38 = vpop.f32.mrf.mxu0  ;;  %v1692_v41 = vpop.f32.mrf.mxu1  ;;  %v2433_v23 = vld [vmem:[%s5326_s20 + $0x3b] sm:$0xff] }
 0x251   : > { %v1913_v34 = vpop.f32.mrf.mxu2  ;;  %v2173_v37 = vpop.f32.mrf.mxu3  ;;  %v1693_v45 = vadd.f32 %v1692_v41, %v1527_v38  ;;  %v2466_v33 = vpack.c.bf16 %v2433_v23, %v2432_v22  ;;  %v2855_v38 = vpack.c.bf16 %v2822_v27, %v2821_v26  ;;  %v2377_v22 = vld [vmem:[%s5326_s20 + $0x52] sm:$0xff]  ;;  %v2378_v23 = vld [vmem:[%s5326_s20 + $0x5a] sm:$0xff] }
 0x252   : > { %4855 = vst.msk [vmem:[%s5466_s10 + $0x1b0] sm:$0xff] %vm1247_vm1, %v2314_v30  ;;  %v1975_v36 = vadd.f32 %v1913_v34, %v1690_v31  ;;  %v3081_v30 = vld [vmem:[%s5326_s20 + $0x45] sm:$0xff]  ;;  %v3082_v31 = vld [vmem:[%s5326_s20 + $0x4d] sm:$0xff] }
 0x253   : > { %4889 = vmatmul.msk.bf16.vlgmr.msra.gmra.mxu0 %vm328_vm0, %v2464_v35  ;;  %4915 = vmatmul.msk.bf16.vlgmr.msra.gmra.mxu1 %vm328_vm0, %v2405_v39 }
 0x254   : > { %v2235_v43 = vadd.f32 %v2173_v37, %v1975_v36  ;;  %v2407_v37 = vpack.c.bf16 %v2374_v25, %v2373_v24  ;;  %v2825_v24 = vld [vmem:[%s5326_s20 + $0x64] sm:$0xff]  ;;  %v2826_v25 = vld [vmem:[%s5326_s20 + $0x6c] sm:$0xff] }
 0x256   : > { %v2275_v44 = vmul.f32 %v5861_v2, %v2235_v43  ;;  %4945 = vmatmul.msk.bf16.vlgmr.msra.gmra.mxu2 %vm328_vm0, %v2853_v40  ;;  %4975 = vmatmul.msk.bf16.vlgmr.msra.gmra.mxu3 %vm328_vm0, %v3113_v42  ;;  %v3115_v40 = vpack.c.bf16 %v3082_v31, %v3081_v30 }
 0x258   : > { %v2315_v46 = vadd.f32 %v5866_v1, %v2275_v44  ;;  %v1529_v50 = vpop.f32.mrf.mxu0  ;;  %v1694_v51 = vpop.f32.mrf.mxu1 }
 0x259   : > { %v1916_v47 = vpop.f32.mrf.mxu2  ;;  %v2176_v49 = vpop.f32.mrf.mxu3  ;;  %v1695_v6 = vadd.f32 %v1694_v51, %v1529_v50 }
 0x25a   : > { %4856 = vst.msk [vmem:[%s5466_s10 + $0x1b8] sm:$0xff] %vm1247_vm1, %v2315_v46  ;;  %v1976_v48 = vadd.f32 %v1916_v47, %v1693_v45 }
 0x25c   : > { %v2236_v52 = vadd.f32 %v2176_v49, %v1976_v48 }
 0x25e   : > { %v2276_v53 = vmul.f32 %v5861_v2, %v2236_v52  ;;  %v2434_v52 = vld [vmem:[%s5326_s20 + $0x43] sm:$0xff] }
 0x260   : > { %v2316_v60 = vadd.f32 %v5866_v1, %v2276_v53  ;;  %v1532_v5 = vpop.f32.mrf.mxu0  ;;  %v1697_v9 = vpop.f32.mrf.mxu1  ;;  %v2435_v53 = vld [vmem:[%s5326_s20 + $0x4b] sm:$0xff] }
 0x261   : > { %v1918_v63 = vpop.f32.mrf.mxu2  ;;  %v2178_v4 = vpop.f32.mrf.mxu3  ;;  %v1698_v13 = vadd.f32 %v1697_v9, %v1532_v5  ;;  %v2467_v62 = vpack.c.bf16 %v2435_v53, %v2434_v52  ;;  %v2856_v5 = vpack.c.bf16 %v2824_v56, %v2823_v55  ;;  %v2380_v52 = vld [vmem:[%s5326_s20 + $0x6a] sm:$0xff]  ;;  %v2827_v53 = vld [vmem:[%s5326_s20 + $0x74] sm:$0xff] }
 0x262   : > { %4857 = vst.msk [vmem:[%s5466_s10 + $0x1c0] sm:$0xff] %vm1247_vm1, %v2316_v60  ;;  %v1977_v3 = vadd.f32 %v1918_v63, %v1695_v6  ;;  %v3083_v60 = vld [vmem:[%s5326_s20 + $0x55] sm:$0xff]  ;;  %v3084_v6 = vld [vmem:[%s5326_s20 + $0x5d] sm:$0xff] }
 0x263   : > { %4890 = vmatmul.msk.bf16.gmra.mxu0 %vm328_vm0, %v2465_v0  ;;  %4916 = vmatmul.msk.bf16.gmra.mxu1 %vm328_vm0, %v2406_v7 }
 0x264   : > { %v2237_v11 = vadd.f32 %v2178_v4, %v1977_v3  ;;  %v2408_v4 = vpack.c.bf16 %v2376_v58, %v2375_v54  ;;  %v2828_v54 = vld [vmem:[%s5326_s20 + $0x7c] sm:$0xff] }
 0x265   : > { %v6175_v58 = vld [vmem:[%s6910_s3] ss:$0 sm:$0xff] }
 0x266   : > { %v2277_v12 = vmul.f32 %v5861_v2, %v2237_v11  ;;  %4946 = vmatmul.msk.bf16.gmra.mxu2 %vm328_vm0, %v2854_v8  ;;  %4976 = vmatmul.msk.bf16.gmra.mxu3 %vm328_vm0, %v3114_v10  ;;  %v3116_v8 = vpack.c.bf16 %v3084_v6, %v3083_v60 }
 0x268   : > { %v2317_v14 = vadd.f32 %v5866_v1, %v2277_v12  ;;  %v1534_v18 = vpop.f32.mrf.mxu0  ;;  %v1699_v19 = vpop.f32.mrf.mxu1 }
 0x269   : > { %v1921_v15 = vpop.f32.mrf.mxu2  ;;  %v2181_v17 = vpop.f32.mrf.mxu3  ;;  %v1700_v29 = vadd.f32 %v1699_v19, %v1534_v18 }
 0x26a   : > { %4858 = vst.msk [vmem:[%s5466_s10 + $0x1c8] sm:$0xff] %vm1247_vm1, %v2317_v14  ;;  %v1978_v16 = vadd.f32 %v1921_v15, %v1698_v13 }
 0x26c   : > { %v2238_v20 = vadd.f32 %v2181_v17, %v1978_v16 }
 0x26e   : > { %v2278_v21 = vmul.f32 %v5861_v2, %v2238_v20  ;;  %v2436_v20 = vld [vmem:[%s5326_s20 + $0x53] sm:$0xff] }
 0x270   : > { %v2318_v28 = vadd.f32 %v5866_v1, %v2278_v21  ;;  %v1537_v36 = vpop.f32.mrf.mxu0  ;;  %v1702_v39 = vpop.f32.mrf.mxu1  ;;  %v2437_v21 = vld [vmem:[%s5326_s20 + $0x5b] sm:$0xff] }
 0x271   : > { %v1923_v32 = vpop.f32.mrf.mxu2  ;;  %v2183_v35 = vpop.f32.mrf.mxu3  ;;  %v1703_v43 = vadd.f32 %v1702_v39, %v1537_v36  ;;  %v2468_v31 = vpack.c.bf16 %v2437_v21, %v2436_v20  ;;  %v2857_v36 = vpack.c.bf16 %v2826_v25, %v2825_v24  ;;  %v2381_v20 = vld [vmem:[%s5326_s20 + $0x72] sm:$0xff]  ;;  %v2382_v21 = vld [vmem:[%s5326_s20 + $0x7a] sm:$0xff] }
 0x272   : > { %4859 = vst.msk [vmem:[%s5466_s10 + $0x1d0] sm:$0xff] %vm1247_vm1, %v2318_v28  ;;  %v1979_v34 = vadd.f32 %v1923_v32, %v1700_v29  ;;  %v3085_v28 = vld [vmem:[%s5326_s20 + $0x65] sm:$0xff]  ;;  %v3086_v29 = vld [vmem:[%s5326_s20 + $0x6d] sm:$0xff] }
 0x273   : > { %4891 = vmatmul.msk.bf16.gmra.mxu0 %vm328_vm0, %v2466_v33  ;;  %4917 = vmatmul.msk.bf16.gmra.mxu1 %vm328_vm0, %v2407_v37 }
 0x274   : > { %v2239_v41 = vadd.f32 %v2183_v35, %v1979_v34  ;;  %v2409_v35 = vpack.c.bf16 %v2378_v23, %v2377_v22  ;;  %v2829_v22 = vld [vmem:[%s5326_s20 + $0x84] sm:$0xff]  ;;  %v2830_v23 = vld [vmem:[%s5326_s20 + $0x8c] sm:$0xff] }
 0x276   : > { %v2279_v42 = vmul.f32 %v5861_v2, %v2239_v41  ;;  %4947 = vmatmul.msk.bf16.gmra.mxu2 %vm328_vm0, %v2855_v38  ;;  %4977 = vmatmul.msk.bf16.gmra.mxu3 %vm328_vm0, %v3115_v40  ;;  %v3117_v38 = vpack.c.bf16 %v3086_v29, %v3085_v28 }
 0x278   : > { %v2319_v44 = vadd.f32 %v5866_v1, %v2279_v42  ;;  %v1539_v48 = vpop.f32.mrf.mxu0  ;;  %v1704_v49 = vpop.f32.mrf.mxu1 }
 0x279   : > { %v1926_v45 = vpop.f32.mrf.mxu2  ;;  %v2186_v47 = vpop.f32.mrf.mxu3  ;;  %v1705_v59 = vadd.f32 %v1704_v49, %v1539_v48  ;;  %v6163_v48 = vld [vmem:[%s6909_s2] ss:$0 sm:$0xff] }
 0x27a   : > { %4860 = vst.msk [vmem:[%s5466_s10 + $0x1d8] sm:$0xff] %vm1247_vm1, %v2319_v44  ;;  %v1980_v46 = vadd.f32 %v1926_v45, %v1703_v43 }
 0x27c   : > { %v2240_v50 = vadd.f32 %v2186_v47, %v1980_v46 }
 0x27e   : > { %v2280_v51 = vmul.f32 %v5861_v2, %v2240_v50  ;;  %v2438_v50 = vld [vmem:[%s5326_s20 + $0x63] sm:$0xff] }
 0x280   : > { %v2320_v57 = vadd.f32 %v5866_v1, %v2280_v51  ;;  %v1542_v3 = vpop.f32.mrf.mxu0  ;;  %v1707_v7 = vpop.f32.mrf.mxu1  ;;  %v2379_v51 = vld [vmem:[%s5326_s20 + $0x62] sm:$0xff] }
 0x281   : > { %v1928_v61 = vpop.f32.mrf.mxu2  ;;  %v2188_v0 = vpop.f32.mrf.mxu3  ;;  %v1708_v11 = vadd.f32 %v1707_v7, %v1542_v3  ;;  %v2858_v3 = vpack.c.bf16 %v2828_v54, %v2827_v53 }
 0x282   : > { %4861 = vst.msk [vmem:[%s5466_s10 + $0x1e0] sm:$0xff] %vm1247_vm1, %v2320_v57  ;;  %v1981_v63 = vadd.f32 %v1928_v61, %v1705_v59  ;;  %v3087_v57 = vld [vmem:[%s5326_s20 + $0x75] sm:$0xff]  ;;  %v3088_v59 = vld [vmem:[%s5326_s20 + $0x7d] sm:$0xff] }
 0x283   : > { %4892 = vmatmul.msk.bf16.gmra.mxu0 %vm328_vm0, %v2467_v62  ;;  %4918 = vmatmul.msk.bf16.gmra.mxu1 %vm328_vm0, %v2408_v4 }
 0x284   : > { %v2241_v9 = vadd.f32 %v2188_v0, %v1981_v63  ;;  %v2410_v0 = vpack.c.bf16 %v2380_v52, %v2379_v51  ;;  %v2831_v51 = vld [vmem:[%s5326_s20 + $0x94] sm:$0xff]  ;;  %v2832_v52 = vld [vmem:[%s5326_s20 + $0x9c] sm:$0xff] }
 0x286   : > { %v2281_v10 = vmul.f32 %v5861_v2, %v2241_v9  ;;  %4948 = vmatmul.msk.bf16.gmra.mxu2 %vm328_vm0, %v2856_v5  ;;  %4978 = vmatmul.msk.bf16.gmra.mxu3 %vm328_vm0, %v3116_v8  ;;  %v3118_v5 = vpack.c.bf16 %v3088_v59, %v3087_v57 }
 0x288   : > { %v2321_v12 = vadd.f32 %v5866_v1, %v2281_v10  ;;  %v1544_v16 = vpop.f32.mrf.mxu0  ;;  %v1709_v17 = vpop.f32.mrf.mxu1 }
 0x289   : > { %v1931_v13 = vpop.f32.mrf.mxu2  ;;  %v2191_v15 = vpop.f32.mrf.mxu3  ;;  %v1710_v27 = vadd.f32 %v1709_v17, %v1544_v16 }
 0x28a   : > { %4862 = vst.msk [vmem:[%s5466_s10 + $0x1e8] sm:$0xff] %vm1247_vm1, %v2321_v12  ;;  %v1982_v14 = vadd.f32 %v1931_v13, %v1708_v11 }
 0x28c   : > { %v2242_v18 = vadd.f32 %v2191_v15, %v1982_v14 }
 0x28e   : > { %v2282_v19 = vmul.f32 %v5861_v2, %v2242_v18  ;;  %v2440_v18 = vld [vmem:[%s5326_s20 + $0x73] sm:$0xff] }
 0x290   : > { %v2322_v26 = vadd.f32 %v5866_v1, %v2282_v19  ;;  %v1547_v34 = vpop.f32.mrf.mxu0  ;;  %v1712_v37 = vpop.f32.mrf.mxu1  ;;  %v2441_v19 = vld [vmem:[%s5326_s20 + $0x7b] sm:$0xff] }
 0x291   : > { %v1933_v30 = vpop.f32.mrf.mxu2  ;;  %v2193_v33 = vpop.f32.mrf.mxu3  ;;  %v1713_v41 = vadd.f32 %v1712_v37, %v1547_v34  ;;  %v2470_v29 = vpack.c.bf16 %v2441_v19, %v2440_v18  ;;  %v2859_v34 = vpack.c.bf16 %v2830_v23, %v2829_v22  ;;  %v2444_v18 = vld [vmem:[%s5326_s20 + $0x93] sm:$0xff]  ;;  %v2445_v19 = vld [vmem:[%s5326_s20 + $0x9b] sm:$0xff]  ;;  %v2833_v22 = vld [vmem:[%s5326_s20 + $0xa4] sm:$0xff] }
 0x292   : > { %4863 = vst.msk [vmem:[%s5466_s10 + $0x1f0] sm:$0xff] %vm1247_vm1, %v2322_v26  ;;  %v1983_v32 = vadd.f32 %v1933_v30, %v1710_v27  ;;  %v3089_v26 = vld [vmem:[%s5326_s20 + $0x85] sm:$0xff]  ;;  %v3090_v27 = vld [vmem:[%s5326_s20 + $0x8d] sm:$0xff] }
 0x293   : > { %4893 = vmatmul.msk.bf16.gmra.mxu0 %vm328_vm0, %v2468_v31  ;;  %4919 = vmatmul.msk.bf16.gmra.mxu1 %vm328_vm0, %v2409_v35  ;;  %v2834_v23 = vld [vmem:[%s5326_s20 + $0xac] sm:$0xff] }
 0x294   : > { %v2243_v39 = vadd.f32 %v2193_v33, %v1983_v32  ;;  %v2411_v33 = vpack.c.bf16 %v2382_v21, %v2381_v20  ;;  %v2385_v20 = vld [vmem:[%s5326_s20 + $0x92] sm:$0xff]  ;;  %v2386_v21 = vld [vmem:[%s5326_s20 + $0x9a] sm:$0xff] }
 0x296   : > { %v2283_v40 = vmul.f32 %v5861_v2, %v2243_v39  ;;  %4949 = vmatmul.msk.bf16.gmra.mxu2 %vm328_vm0, %v2857_v36  ;;  %4979 = vmatmul.msk.bf16.gmra.mxu3 %vm328_vm0, %v3117_v38  ;;  %v3119_v36 = vpack.c.bf16 %v3090_v27, %v3089_v26  ;;  %v3093_v26 = vld [vmem:[%s5326_s20 + $0xa5] sm:$0xff]  ;;  %v3094_v27 = vld [vmem:[%s5326_s20 + $0xad] sm:$0xff] }
 0x298   : > { %v2323_v42 = vadd.f32 %v5866_v1, %v2283_v40  ;;  %v1549_v45 = vpop.f32.mrf.mxu0  ;;  %v1714_v46 = vpop.f32.mrf.mxu1  ;;  %v2439_v1 = vld [vmem:[%s5326_s20 + $0x6b] sm:$0xff] }
 0x299   : > { %v1936_v43 = vpop.f32.mrf.mxu2  ;;  %v2196_v2 = vpop.f32.mrf.mxu3  ;;  %v1715_v56 = vadd.f32 %v1714_v46, %v1549_v45  ;;  %v2469_v6 = vpack.c.bf16 %v2439_v1, %v2438_v50  ;;  %v2383_v50 = vld [vmem:[%s5326_s20 + $0x82] sm:$0xff]  ;;  %v2384_v1 = vld [vmem:[%s5326_s20 + $0x8a] sm:$0xff] }
 0x29a   : > { %4864 = vst.msk [vmem:[%s5466_s10 + $0x1f8] sm:$0xff] %vm1247_vm1, %v2323_v42  ;;  %v1984_v44 = vadd.f32 %v1936_v43, %v1713_v41 }
 0x29c   : > { %v2244_v47 = vadd.f32 %v2196_v2, %v1984_v44 }
 0x29e   : > { %v2284_v49 = vmul.f32 %v6163_v48, %v2244_v47  ;;  %v2442_v47 = vld [vmem:[%s5326_s20 + $0x83] sm:$0xff] }
 0x2a0   : > { %v2324_v55 = vadd.f32 %v6175_v58, %v2284_v49  ;;  %v1552_v63 = vpop.f32.mrf.mxu0  ;;  %v1717_v4 = vpop.f32.mrf.mxu1  ;;  %v2443_v49 = vld [vmem:[%s5326_s20 + $0x8b] sm:$0xff] }
 0x2a1   : > { %v1938_v60 = vpop.f32.mrf.mxu2  ;;  %v2198_v62 = vpop.f32.mrf.mxu3  ;;  %v1718_v9 = vadd.f32 %v1717_v4, %v1552_v63  ;;  %v2471_v59 = vpack.c.bf16 %v2443_v49, %v2442_v47  ;;  %v2860_v63 = vpack.c.bf16 %v2832_v52, %v2831_v51  ;;  %v2387_v51 = vld [vmem:[%s5326_s20 + $0xa2] sm:$0xff]  ;;  %v2388_v52 = vld [vmem:[%s5326_s20 + $0xaa] sm:$0xff] }
 0x2a2   : > { %4865 = vst.msk [vmem:[%s5466_s10 + $0x200] sm:$0xff] %vm1247_vm1, %v2324_v55  ;;  %v1985_v61 = vadd.f32 %v1938_v60, %v1715_v56  ;;  %v3091_v55 = vld [vmem:[%s5326_s20 + $0x95] sm:$0xff]  ;;  %v3092_v56 = vld [vmem:[%s5326_s20 + $0x9d] sm:$0xff] }
 0x2a3   : > { %4894 = vmatmul.msk.bf16.gmra.mxu0 %vm328_vm0, %v2469_v6  ;;  %4920 = vmatmul.msk.bf16.gmra.mxu1 %vm328_vm0, %v2410_v0 }
 0x2a4   : > { %v2245_v7 = vadd.f32 %v2198_v62, %v1985_v61  ;;  %v2412_v62 = vpack.c.bf16 %v2384_v1, %v2383_v50  ;;  %v2446_v50 = vld [vmem:[%s5326_s20 + $0xa3] sm:$0xff]  ;;  %v2447_v1 = vld [vmem:[%s5326_s20 + $0xab] sm:$0xff] }
 0x2a6   : > { %v2285_v8 = vmul.f32 %v6163_v48, %v2245_v7  ;;  %4950 = vmatmul.msk.bf16.gmra.mxu2 %vm328_vm0, %v2858_v3  ;;  %4980 = vmatmul.msk.bf16.gmra.mxu3 %vm328_vm0, %v3118_v5  ;;  %v3120_v3 = vpack.c.bf16 %v3092_v56, %v3091_v55 }
 0x2a8   : > { %v2325_v10 = vadd.f32 %v6175_v58, %v2285_v8  ;;  %v1554_v14 = vpop.f32.mrf.mxu0  ;;  %v1719_v15 = vpop.f32.mrf.mxu1 }
 0x2a9   : > { %v1941_v11 = vpop.f32.mrf.mxu2  ;;  %v2201_v13 = vpop.f32.mrf.mxu3  ;;  %v1720_v25 = vadd.f32 %v1719_v15, %v1554_v14  ;;  %v5217_v14 = vld [vmem:[%s6908_s1 + $0xf0] sm:$0xff] }
 0x2aa   : > { %4866 = vst.msk [vmem:[%s5466_s10 + $0x208] sm:$0xff] %vm1247_vm1, %v2325_v10  ;;  %v1986_v12 = vadd.f32 %v1941_v11, %v1718_v9  ;;  %4294 = vmatpush.bf16.msrb.mxu3 %v5217_v14 }
 0x2ac   : > { %v2246_v16 = vadd.f32 %v2201_v13, %v1986_v12  ;;  %v5215_v13 = vld [vmem:[%s6908_s1 + $0xe0] sm:$0xff] }
 0x2ad   : > { %4034 = vmatpush.bf16.msrb.mxu2 %v5215_v13 }
 0x2ae   : > { %v2286_v17 = vmul.f32 %v6163_v48, %v2246_v16 }
 0x2b0   : > { %v2326_v24 = vadd.f32 %v6175_v58, %v2286_v17  ;;  %v1557_v32 = vpop.f32.mrf.mxu0  ;;  %v1722_v35 = vpop.f32.mrf.mxu1 }
 0x2b1   : > { %v1943_v28 = vpop.f32.mrf.mxu2  ;;  %v2203_v31 = vpop.f32.mrf.mxu3  ;;  %v1723_v39 = vadd.f32 %v1722_v35, %v1557_v32  ;;  %v5213_v35 = vld [vmem:[%s6908_s1 + $0xd0] sm:$0xff] }
 0x2b2   : > { %4867 = vst.msk [vmem:[%s5466_s10 + $0x210] sm:$0xff] %vm1247_vm1, %v2326_v24  ;;  %v1987_v30 = vadd.f32 %v1943_v28, %v1720_v25  ;;  %3645 = vmatpush.bf16.msrb.mxu0 %v5213_v35 }
 0x2b3   : > { %4895 = vmatmul.msk.bf16.gmra.mxu0 %vm328_vm0, %v2470_v29  ;;  %4921 = vmatmul.msk.bf16.gmra.mxu1 %vm328_vm0, %v2411_v33  ;;  %v2472_v29 = vpack.c.bf16 %v2445_v19, %v2444_v18  ;;  %v2413_v33 = vpack.c.bf16 %v2386_v21, %v2385_v20  ;;  %v2448_v18 = vld [vmem:[%s5326_s20 + $0xb3] sm:$0xff]  ;;  %v2449_v19 = vld [vmem:[%s5326_s20 + $0xbb] sm:$0xff] }
 0x2b4   : > { %v2247_v37 = vadd.f32 %v2203_v31, %v1987_v30  ;;  %v2389_v20 = vld [vmem:[%s5326_s20 + $0xb2] sm:$0xff]  ;;  %v2390_v21 = vld [vmem:[%s5326_s20 + $0xba] sm:$0xff] }
 0x2b6   : > { %v2287_v38 = vmul.f32 %v6163_v48, %v2247_v37  ;;  %4951 = vmatmul.msk.bf16.gmra.mxu2 %vm328_vm0, %v2859_v34  ;;  %4981 = vmatmul.msk.bf16.gmra.mxu3 %vm328_vm0, %v3119_v36  ;;  %v2861_v34 = vpack.c.bf16 %v2834_v23, %v2833_v22  ;;  %v5211_v36 = vld [vmem:[%s6908_s1 + $0xc0] sm:$0xff]  ;;  %v2838_v23 = vld [vmem:[%s5326_s20 + $0xcc] sm:$0xff] }
 0x2b7   : > { %3810 = vmatpush.bf16.msrb.mxu1 %v5211_v36  ;;  %v2837_v22 = vld [vmem:[%s5326_s20 + $0xc4] sm:$0xff] }
 0x2b8   : > { %v2327_v40 = vadd.f32 %v6175_v58, %v2287_v38  ;;  %v1559_v44 = vpop.f32.mrf.mxu0  ;;  %v1724_v2 = vpop.f32.mrf.mxu1  ;;  %v3121_v38 = vpack.c.bf16 %v3094_v27, %v3093_v26  ;;  %v3097_v26 = vld [vmem:[%s5326_s20 + $0xc5] sm:$0xff]  ;;  %v3098_v27 = vld [vmem:[%s5326_s20 + $0xcd] sm:$0xff] }
 0x2b9   : > { %v1946_v41 = vpop.f32.mrf.mxu2  ;;  %v2206_v43 = vpop.f32.mrf.mxu3  ;;  %v1725_v54 = vadd.f32 %v1724_v2, %v1559_v44  ;;  %v6265_v2 = vld [vmem:[%s6909_s2] ss:$0 sm:$0xff]  ;;  %v3123_v36 = vpack.c.bf16 %v3098_v27, %v3097_v26 }
 0x2ba   : > { %4868 = vst.msk [vmem:[%s5466_s10 + $0x218] sm:$0xff] %vm1247_vm1, %v2327_v40  ;;  %v1988_v42 = vadd.f32 %v1946_v41, %v1723_v39 }
 0x2bc   : > { %v2248_v45 = vadd.f32 %v2206_v43, %v1988_v42 }
 0x2be   : > { %v2288_v46 = vmul.f32 %v6163_v48, %v2248_v45 }
 0x2c0   : > { %v2328_v53 = vadd.f32 %v6175_v58, %v2288_v46  ;;  %v1562_v61 = vpop.f32.mrf.mxu0  ;;  %v1727_v0 = vpop.f32.mrf.mxu1 }
 0x2c1   : > { %v1948_v57 = vpop.f32.mrf.mxu2  ;;  %v2208_v6 = vpop.f32.mrf.mxu3  ;;  %v1728_v7 = vadd.f32 %v1727_v0, %v1562_v61  ;;  %v2414_v0 = vpack.c.bf16 %v2388_v52, %v2387_v51  ;;  %v2839_v51 = vld [vmem:[%s5326_s20 + $0xd4] sm:$0xff]  ;;  %v2840_v52 = vld [vmem:[%s5326_s20 + $0xdc] sm:$0xff] }
 0x2c2   : > { %4869 = vst.msk [vmem:[%s5466_s10 + $0x220] sm:$0xff] %vm1247_vm1, %v2328_v53  ;;  %v1989_v60 = vadd.f32 %v1948_v57, %v1725_v54  ;;  %v2835_v53 = vld [vmem:[%s5326_s20 + $0xb4] sm:$0xff]  ;;  %v2836_v54 = vld [vmem:[%s5326_s20 + $0xbc] sm:$0xff] }
 0x2c3   : > { %4896 = vmatmul.msk.bf16.gmra.mxu0 %vm328_vm0, %v2471_v59  ;;  %4922 = vmatmul.msk.bf16.gmra.mxu1 %vm328_vm0, %v2412_v62  ;;  %v3095_v57 = vld [vmem:[%s5326_s20 + $0xb5] sm:$0xff]  ;;  %v3096_v59 = vld [vmem:[%s5326_s20 + $0xbd] sm:$0xff] }
 0x2c4   : > { %v2249_v4 = vadd.f32 %v2208_v6, %v1989_v60  ;;  %v2473_v6 = vpack.c.bf16 %v2447_v1, %v2446_v50  ;;  %v2391_v50 = vld [vmem:[%s5326_s20 + $0xc2] sm:$0xff]  ;;  %v2392_v1 = vld [vmem:[%s5326_s20 + $0xca] sm:$0xff] }
 0x2c6   : > { %v2289_v5 = vmul.f32 %v6163_v48, %v2249_v4  ;;  %4952 = vmatmul.msk.bf16.gmra.mxu2 %vm328_vm0, %v2860_v63  ;;  %4982 = vmatmul.msk.bf16.gmra.mxu3 %vm328_vm0, %v3120_v3  ;;  %v2862_v3 = vpack.c.bf16 %v2836_v54, %v2835_v53 }
 0x2c8   : > { %v2329_v8 = vadd.f32 %v6175_v58, %v2289_v5  ;;  %v1564_v12 = vpop.f32.mrf.mxu0  ;;  %v1729_v15 = vpop.f32.mrf.mxu1  ;;  %v3122_v5 = vpack.c.bf16 %v3096_v59, %v3095_v57 }
 0x2c9   : > { %v1951_v9 = vpop.f32.mrf.mxu2  ;;  %v2211_v11 = vpop.f32.mrf.mxu3  ;;  %v1730_v25 = vadd.f32 %v1729_v15, %v1564_v12 }
 0x2ca   : > { %4870 = vst.msk [vmem:[%s5466_s10 + $0x228] sm:$0xff] %vm1247_vm1, %v2329_v8  ;;  %v1990_v10 = vadd.f32 %v1951_v9, %v1728_v7 }
 0x2cc   : > { %v2250_v16 = vadd.f32 %v2211_v11, %v1990_v10 }
 0x2ce   : > { %v2290_v17 = vmul.f32 %v6163_v48, %v2250_v16 }
 0x2d0   : > { %v2330_v24 = vadd.f32 %v6175_v58, %v2290_v17  ;;  %v2562_v32 = vpop.f32.mrf.mxu0  ;;  %v2727_v37 = vpop.f32.mrf.mxu1 }
 0x2d1   : > { %v1953_v28 = vpop.f32.mrf.mxu2  ;;  %v2213_v31 = vpop.f32.mrf.mxu3  ;;  %v2728_v41 = vadd.f32 %v2727_v37, %v2562_v32 }
 0x2d2   : > { %4871 = vst.msk [vmem:[%s5466_s10 + $0x230] sm:$0xff] %vm1247_vm1, %v2330_v24  ;;  %v1991_v30 = vadd.f32 %v1953_v28, %v1730_v25 }
 0x2d3   : > { %4897 = vmatmul.msk.bf16.gmra.mxu0 %vm328_vm0, %v2472_v29  ;;  %4923 = vmatmul.msk.bf16.gmra.mxu1 %vm328_vm0, %v2413_v33  ;;  %v2474_v29 = vpack.c.bf16 %v2449_v19, %v2448_v18  ;;  %v2415_v33 = vpack.c.bf16 %v2390_v21, %v2389_v20  ;;  %v2393_v18 = vld [vmem:[%s5326_s20 + $0xd2] sm:$0xff]  ;;  %v2394_v19 = vld [vmem:[%s5326_s20 + $0xda] sm:$0xff]  ;;  %v2841_v20 = vld [vmem:[%s5326_s20 + $0xe4] sm:$0xff] }
 0x2d4   : > { %v2251_v39 = vadd.f32 %v2213_v31, %v1991_v30  ;;  %v2842_v21 = vld [vmem:[%s5326_s20 + $0xec] sm:$0xff] }
 0x2d6   : > { %v2291_v40 = vmul.f32 %v6163_v48, %v2251_v39  ;;  %4953 = vmatmul.msk.bf16.gmra.mxu2 %vm328_vm0, %v2861_v34  ;;  %4983 = vmatmul.msk.bf16.gmra.mxu3 %vm328_vm0, %v3121_v38  ;;  %v2863_v34 = vpack.c.bf16 %v2838_v23, %v2837_v22 }
 0x2d8   : > { %v2331_v42 = vadd.f32 %v6175_v58, %v2291_v40  ;;  %v2564_v45 = vpop.f32.mrf.mxu0  ;;  %v2729_v46 = vpop.f32.mrf.mxu1  ;;  %v6270_v58 = vld [vmem:[%s6910_s3] ss:$0 sm:$0xff] }
 0x2d9   : > { %v2951_v43 = vpop.f32.mrf.mxu2  ;;  %v3211_v48 = vpop.f32.mrf.mxu3  ;;  %v2730_v56 = vadd.f32 %v2729_v46, %v2564_v45 }
 0x2da   : > { %4872 = vst.msk [vmem:[%s5466_s10 + $0x238] sm:$0xff] %vm1247_vm1, %v2331_v42  ;;  %v3041_v44 = vadd.f32 %v2951_v43, %v2728_v41 }
 0x2dc   : > { %v3301_v47 = vadd.f32 %v3211_v48, %v3041_v44 }
 0x2de   : > { %v3341_v49 = vmul.f32 %v6265_v2, %v3301_v47  ;;  %v2450_v47 = vld [vmem:[%s5326_s20 + $0xc3] sm:$0xff] }
 0x2e0   : > { %v3381_v55 = vadd.f32 %v6270_v58, %v3341_v49  ;;  %v2567_v63 = vpop.f32.mrf.mxu0  ;;  %v2732_v4 = vpop.f32.mrf.mxu1  ;;  %v2451_v49 = vld [vmem:[%s5326_s20 + $0xcb] sm:$0xff] }
 0x2e1   : > { %v2953_v60 = vpop.f32.mrf.mxu2  ;;  %v3213_v62 = vpop.f32.mrf.mxu3  ;;  %v2733_v9 = vadd.f32 %v2732_v4, %v2567_v63  ;;  %v2475_v59 = vpack.c.bf16 %v2451_v49, %v2450_v47  ;;  %v2864_v63 = vpack.c.bf16 %v2840_v52, %v2839_v51  ;;  %v2395_v47 = vld [vmem:[%s5326_s20 + $0xe2] sm:$0xff]  ;;  %v2396_v49 = vld [vmem:[%s5326_s20 + $0xea] sm:$0xff] }
 0x2e2   : > { %4993 = vst.msk [vmem:[%s5466_s10 + $0x240] sm:$0xff] %vm1247_vm1, %v3381_v55  ;;  %v3042_v61 = vadd.f32 %v2953_v60, %v2730_v56  ;;  %v3099_v55 = vld [vmem:[%s5326_s20 + $0xd5] sm:$0xff]  ;;  %v3100_v56 = vld [vmem:[%s5326_s20 + $0xdd] sm:$0xff] }
 0x2e3   : > { %4898 = vmatmul.msk.bf16.gmra.mxu0 %vm328_vm0, %v2473_v6  ;;  %4924 = vmatmul.msk.bf16.gmra.mxu1 %vm328_vm0, %v2414_v0 }
 0x2e4   : > { %v3302_v7 = vadd.f32 %v3213_v62, %v3042_v61  ;;  %v2416_v62 = vpack.c.bf16 %v2392_v1, %v2391_v50  ;;  %v2843_v50 = vld [vmem:[%s5326_s20 + $0xf4] sm:$0xff]  ;;  %v2844_v1 = vld [vmem:[%s5326_s20 + $0xfc] sm:$0xff] }
 0x2e6   : > { %v3342_v8 = vmul.f32 %v6265_v2, %v3302_v7  ;;  %4954 = vmatmul.msk.bf16.gmra.mxu2 %vm328_vm0, %v2862_v3  ;;  %4984 = vmatmul.msk.bf16.gmra.mxu3 %vm328_vm0, %v3122_v5  ;;  %v3124_v3 = vpack.c.bf16 %v3100_v56, %v3099_v55 }
 0x2e8   : > { %v3382_v10 = vadd.f32 %v6270_v58, %v3342_v8  ;;  %v2569_v14 = vpop.f32.mrf.mxu0  ;;  %v2734_v15 = vpop.f32.mrf.mxu1 }
 0x2e9   : > { %v2956_v11 = vpop.f32.mrf.mxu2  ;;  %v3216_v13 = vpop.f32.mrf.mxu3  ;;  %v2735_v25 = vadd.f32 %v2734_v15, %v2569_v14 }
 0x2ea   : > { %4994 = vst.msk [vmem:[%s5466_s10 + $0x248] sm:$0xff] %vm1247_vm1, %v3382_v10  ;;  %v3043_v12 = vadd.f32 %v2956_v11, %v2733_v9 }
 0x2ec   : > { %v3303_v16 = vadd.f32 %v3216_v13, %v3043_v12 }
 0x2ee   : > { %v3343_v17 = vmul.f32 %v6265_v2, %v3303_v16  ;;  %v2452_v16 = vld [vmem:[%s5326_s20 + $0xd3] sm:$0xff] }
 0x2f0   : > { %v3383_v24 = vadd.f32 %v6270_v58, %v3343_v17  ;;  %v2572_v32 = vpop.f32.mrf.mxu0  ;;  %v2737_v35 = vpop.f32.mrf.mxu1  ;;  %v2453_v17 = vld [vmem:[%s5326_s20 + $0xdb] sm:$0xff] }
 0x2f1   : > { %v2958_v28 = vpop.f32.mrf.mxu2  ;;  %v3218_v31 = vpop.f32.mrf.mxu3  ;;  %v2738_v39 = vadd.f32 %v2737_v35, %v2572_v32  ;;  %v2476_v27 = vpack.c.bf16 %v2453_v17, %v2452_v16  ;;  %v2865_v32 = vpack.c.bf16 %v2842_v21, %v2841_v20  ;;  %v2397_v16 = vld [vmem:[%s5326_s20 + $0xf2] sm:$0xff]  ;;  %v2398_v17 = vld [vmem:[%s5326_s20 + $0xfa] sm:$0xff] }
 0x2f2   : > { %4995 = vst.msk [vmem:[%s5466_s10 + $0x250] sm:$0xff] %vm1247_vm1, %v3383_v24  ;;  %v3044_v30 = vadd.f32 %v2958_v28, %v2735_v25  ;;  %v3101_v24 = vld [vmem:[%s5326_s20 + $0xe5] sm:$0xff]  ;;  %v3102_v25 = vld [vmem:[%s5326_s20 + $0xed] sm:$0xff] }
 0x2f3   : > { %4899 = vmatmul.msk.bf16.gmra.mxu0 %vm328_vm0, %v2474_v29  ;;  %4925 = vmatmul.msk.bf16.gmra.mxu1 %vm328_vm0, %v2415_v33 }
 0x2f4   : > { %v3304_v37 = vadd.f32 %v3218_v31, %v3044_v30  ;;  %v2417_v31 = vpack.c.bf16 %v2394_v19, %v2393_v18  ;;  %v2845_v18 = vld [vmem:[%s5326_s20 + $0x104] sm:$0xff]  ;;  %v2846_v19 = vld [vmem:[%s5326_s20 + $0x10c] sm:$0xff] }
 0x2f6   : > { %v3344_v38 = vmul.f32 %v6265_v2, %v3304_v37  ;;  %4955 = vmatmul.msk.bf16.gmra.mxu2 %vm328_vm0, %v2863_v34  ;;  %4985 = vmatmul.msk.bf16.gmra.mxu3 %vm328_vm0, %v3123_v36  ;;  %v3125_v34 = vpack.c.bf16 %v3102_v25, %v3101_v24 }
 0x2f8   : > { %v3384_v40 = vadd.f32 %v6270_v58, %v3344_v38  ;;  %v2574_v44 = vpop.f32.mrf.mxu0  ;;  %v2739_v48 = vpop.f32.mrf.mxu1 }
 0x2f9   : > { %v2961_v41 = vpop.f32.mrf.mxu2  ;;  %v3221_v43 = vpop.f32.mrf.mxu3  ;;  %v2740_v54 = vadd.f32 %v2739_v48, %v2574_v44 }
 0x2fa   : > { %4996 = vst.msk [vmem:[%s5466_s10 + $0x258] sm:$0xff] %vm1247_vm1, %v3384_v40  ;;  %v3045_v42 = vadd.f32 %v2961_v41, %v2738_v39 }
 0x2fc   : > { %v3305_v45 = vadd.f32 %v3221_v43, %v3045_v42 }
 0x2fe   : > { %v3345_v46 = vmul.f32 %v6265_v2, %v3305_v45  ;;  %v2454_v45 = vld [vmem:[%s5326_s20 + $0xe3] sm:$0xff] }
 0x300   : > { %v3385_v53 = vadd.f32 %v6270_v58, %v3345_v46  ;;  %v2577_v61 = vpop.f32.mrf.mxu0  ;;  %v2742_v0 = vpop.f32.mrf.mxu1  ;;  %v2455_v46 = vld [vmem:[%s5326_s20 + $0xeb] sm:$0xff] }
 0x301   : > { %v2963_v57 = vpop.f32.mrf.mxu2  ;;  %v3223_v6 = vpop.f32.mrf.mxu3  ;;  %v2743_v7 = vadd.f32 %v2742_v0, %v2577_v61  ;;  %v2477_v56 = vpack.c.bf16 %v2455_v46, %v2454_v45  ;;  %v2866_v61 = vpack.c.bf16 %v2844_v1, %v2843_v50  ;;  %v2399_v45 = vld [vmem:[%s5326_s20 + $0x102] sm:$0xff]  ;;  %v2400_v46 = vld [vmem:[%s5326_s20 + $0x10a] sm:$0xff] }
 0x302   : > { %4997 = vst.msk [vmem:[%s5466_s10 + $0x260] sm:$0xff] %vm1247_vm1, %v3385_v53  ;;  %v3046_v60 = vadd.f32 %v2963_v57, %v2740_v54  ;;  %v3103_v53 = vld [vmem:[%s5326_s20 + $0xf5] sm:$0xff]  ;;  %v3104_v54 = vld [vmem:[%s5326_s20 + $0xfd] sm:$0xff] }
 0x303   : > { %4900 = vmatmul.msk.bf16.gmra.mxu0 %vm328_vm0, %v2475_v59  ;;  %4926 = vmatmul.msk.bf16.gmra.mxu1 %vm328_vm0, %v2416_v62 }
 0x304   : > { %v3306_v4 = vadd.f32 %v3223_v6, %v3046_v60  ;;  %v2418_v6 = vpack.c.bf16 %v2396_v49, %v2395_v47  ;;  %v2847_v47 = vld [vmem:[%s5326_s20 + $0x114] sm:$0xff]  ;;  %v2848_v49 = vld [vmem:[%s5326_s20 + $0x11c] sm:$0xff] }
 0x306   : > { %v3346_v5 = vmul.f32 %v6265_v2, %v3306_v4  ;;  %4956 = vmatmul.msk.bf16.gmra.mxu2 %vm328_vm0, %v2864_v63  ;;  %4986 = vmatmul.msk.bf16.gmra.mxu3 %vm328_vm0, %v3124_v3  ;;  %v3126_v63 = vpack.c.bf16 %v3104_v54, %v3103_v53 }
 0x308   : > { %v3386_v8 = vadd.f32 %v6270_v58, %v3346_v5  ;;  %v2579_v12 = vpop.f32.mrf.mxu0  ;;  %v2744_v13 = vpop.f32.mrf.mxu1 }
 0x309   : > { %v2966_v9 = vpop.f32.mrf.mxu2  ;;  %v3226_v11 = vpop.f32.mrf.mxu3  ;;  %v2745_v23 = vadd.f32 %v2744_v13, %v2579_v12 }
 0x30a   : > { %4998 = vst.msk [vmem:[%s5466_s10 + $0x268] sm:$0xff] %vm1247_vm1, %v3386_v8  ;;  %v3047_v10 = vadd.f32 %v2966_v9, %v2743_v7 }
 0x30c   : > { %v3307_v14 = vadd.f32 %v3226_v11, %v3047_v10 }
 0x30e   : > { %v3347_v15 = vmul.f32 %v6265_v2, %v3307_v14  ;;  %v2456_v14 = vld [vmem:[%s5326_s20 + $0xf3] sm:$0xff] }
 0x310   : > { %v3387_v22 = vadd.f32 %v6270_v58, %v3347_v15  ;;  %v2582_v30 = vpop.f32.mrf.mxu0  ;;  %v2747_v33 = vpop.f32.mrf.mxu1  ;;  %v2457_v15 = vld [vmem:[%s5326_s20 + $0xfb] sm:$0xff] }
 0x311   : > { %v2968_v26 = vpop.f32.mrf.mxu2  ;;  %v3228_v29 = vpop.f32.mrf.mxu3  ;;  %v2748_v37 = vadd.f32 %v2747_v33, %v2582_v30  ;;  %v2478_v25 = vpack.c.bf16 %v2457_v15, %v2456_v14  ;;  %v2867_v30 = vpack.c.bf16 %v2846_v19, %v2845_v18  ;;  %v2401_v14 = vld [vmem:[%s5326_s20 + $0x112] sm:$0xff]  ;;  %v2402_v15 = vld [vmem:[%s5326_s20 + $0x11a] sm:$0xff] }
 0x312   : > { %4999 = vst.msk [vmem:[%s5466_s10 + $0x270] sm:$0xff] %vm1247_vm1, %v3387_v22  ;;  %v3048_v28 = vadd.f32 %v2968_v26, %v2745_v23  ;;  %v3105_v22 = vld [vmem:[%s5326_s20 + $0x105] sm:$0xff]  ;;  %v3106_v23 = vld [vmem:[%s5326_s20 + $0x10d] sm:$0xff] }
 0x313   : > { %4901 = vmatmul.msk.bf16.gmra.mxu0 %vm328_vm0, %v2476_v27  ;;  %4927 = vmatmul.msk.bf16.gmra.mxu1 %vm328_vm0, %v2417_v31 }
 0x314   : > { %v3308_v35 = vadd.f32 %v3228_v29, %v3048_v28  ;;  %v2419_v29 = vpack.c.bf16 %v2398_v17, %v2397_v16  ;;  %v2849_v16 = vld [vmem:[%s5326_s20 + $0x124] sm:$0xff]  ;;  %v2850_v17 = vld [vmem:[%s5326_s20 + $0x12c] sm:$0xff] }
 0x316   : > { %v3348_v36 = vmul.f32 %v6265_v2, %v3308_v35  ;;  %4957 = vmatmul.msk.bf16.gmra.mxu2 %vm328_vm0, %v2865_v32  ;;  %4987 = vmatmul.msk.bf16.gmra.mxu3 %vm328_vm0, %v3125_v34  ;;  %v3127_v32 = vpack.c.bf16 %v3106_v23, %v3105_v22 }
 0x318   : > { %v3388_v38 = vadd.f32 %v6270_v58, %v3348_v36  ;;  %v2584_v42 = vpop.f32.mrf.mxu0  ;;  %v2749_v43 = vpop.f32.mrf.mxu1 }
 0x319   : > { %v2971_v39 = vpop.f32.mrf.mxu2  ;;  %v3231_v41 = vpop.f32.mrf.mxu3  ;;  %v2750_v52 = vadd.f32 %v2749_v43, %v2584_v42 }
 0x31a   : > { %5000 = vst.msk [vmem:[%s5466_s10 + $0x278] sm:$0xff] %vm1247_vm1, %v3388_v38  ;;  %v3049_v40 = vadd.f32 %v2971_v39, %v2748_v37 }
 0x31c   : > { %v3309_v44 = vadd.f32 %v3231_v41, %v3049_v40 }
 0x31e   : > { %v3349_v48 = vmul.f32 %v6265_v2, %v3309_v44  ;;  %v2458_v44 = vld [vmem:[%s5326_s20 + $0x103] sm:$0xff] }
 0x320   : > { %v3389_v51 = vadd.f32 %v6270_v58, %v3349_v48  ;;  %v2587_v60 = vpop.f32.mrf.mxu0  ;;  %v2752_v62 = vpop.f32.mrf.mxu1  ;;  %v2459_v48 = vld [vmem:[%s5326_s20 + $0x10b] sm:$0xff] }
 0x321   : > { %v2973_v55 = vpop.f32.mrf.mxu2  ;;  %v3233_v59 = vpop.f32.mrf.mxu3  ;;  %v2753_v4 = vadd.f32 %v2752_v62, %v2587_v60  ;;  %v2479_v54 = vpack.c.bf16 %v2459_v48, %v2458_v44  ;;  %v2868_v60 = vpack.c.bf16 %v2848_v49, %v2847_v47  ;;  %v2403_v44 = vld [vmem:[%s5326_s20 + $0x122] sm:$0xff]  ;;  %v2404_v48 = vld [vmem:[%s5326_s20 + $0x12a] sm:$0xff] }
 0x322   : > { %5001 = vst.msk [vmem:[%s5466_s10 + $0x280] sm:$0xff] %vm1247_vm1, %v3389_v51  ;;  %v3050_v57 = vadd.f32 %v2973_v55, %v2750_v52  ;;  %v3107_v51 = vld [vmem:[%s5326_s20 + $0x115] sm:$0xff]  ;;  %v3108_v52 = vld [vmem:[%s5326_s20 + $0x11d] sm:$0xff] }
 0x323   : > { %4902 = vmatmul.msk.bf16.gmra.mxu0 %vm328_vm0, %v2477_v56  ;;  %4928 = vmatmul.msk.bf16.gmra.mxu1 %vm328_vm0, %v2418_v6 }
 0x324   : > { %v3310_v0 = vadd.f32 %v3233_v59, %v3050_v57  ;;  %v2420_v59 = vpack.c.bf16 %v2400_v46, %v2399_v45  ;;  %v2851_v45 = vld [vmem:[%s5326_s20 + $0x134] sm:$0xff]  ;;  %v2852_v46 = vld [vmem:[%s5326_s20 + $0x13c] sm:$0xff] }
 0x326   : > { %v3350_v3 = vmul.f32 %v6265_v2, %v3310_v0  ;;  %4958 = vmatmul.msk.bf16.gmra.mxu2 %vm328_vm0, %v2866_v61  ;;  %4988 = vmatmul.msk.bf16.gmra.mxu3 %vm328_vm0, %v3126_v63  ;;  %v3128_v61 = vpack.c.bf16 %v3108_v52, %v3107_v51 }
 0x328   : > { %v3390_v5 = vadd.f32 %v6270_v58, %v3350_v3  ;;  %v2589_v10 = vpop.f32.mrf.mxu0  ;;  %v2754_v11 = vpop.f32.mrf.mxu1 }
 0x329   : > { %v2976_v7 = vpop.f32.mrf.mxu2  ;;  %v3236_v9 = vpop.f32.mrf.mxu3  ;;  %v2755_v21 = vadd.f32 %v2754_v11, %v2589_v10 }
 0x32a   : > { %5002 = vst.msk [vmem:[%s5466_s10 + $0x288] sm:$0xff] %vm1247_vm1, %v3390_v5  ;;  %v3051_v8 = vadd.f32 %v2976_v7, %v2753_v4 }
 0x32c   : > { %v3311_v12 = vadd.f32 %v3236_v9, %v3051_v8 }
 0x32e   : > { %v3351_v13 = vmul.f32 %v6265_v2, %v3311_v12  ;;  %v2460_v12 = vld [vmem:[%s5326_s20 + $0x113] sm:$0xff] }
 0x330   : > { %v3391_v20 = vadd.f32 %v6270_v58, %v3351_v13  ;;  %v2592_v28 = vpop.f32.mrf.mxu0  ;;  %v2757_v31 = vpop.f32.mrf.mxu1  ;;  %v2461_v13 = vld [vmem:[%s5326_s20 + $0x11b] sm:$0xff] }
 0x331   : > { %v2978_v24 = vpop.f32.mrf.mxu2  ;;  %v3238_v27 = vpop.f32.mrf.mxu3  ;;  %v2758_v35 = vadd.f32 %v2757_v31, %v2592_v28  ;;  %v2480_v23 = vpack.c.bf16 %v2461_v13, %v2460_v12  ;;  %v2869_v28 = vpack.c.bf16 %v2850_v17, %v2849_v16  ;;  %v3454_v12 = vld [vmem:[%s5326_s20 + $0x13] sm:$0xff]  ;;  %v3455_v13 = vld [vmem:[%s5326_s20 + $0x1b] sm:$0xff] }
 0x332   : > { %5003 = vst.msk [vmem:[%s5466_s10 + $0x290] sm:$0xff] %vm1247_vm1, %v3391_v20  ;;  %v3052_v26 = vadd.f32 %v2978_v24, %v2755_v21  ;;  %v3109_v20 = vld [vmem:[%s5326_s20 + $0x125] sm:$0xff]  ;;  %v3110_v21 = vld [vmem:[%s5326_s20 + $0x12d] sm:$0xff] }
 0x333   : > { %4903 = vmatmul.msk.bf16.gmra.mxu0 %vm328_vm0, %v2478_v25  ;;  %4929 = vmatmul.msk.bf16.gmra.mxu1 %vm328_vm0, %v2419_v29 }
 0x334   : > { %v3312_v33 = vadd.f32 %v3238_v27, %v3052_v26  ;;  %v2421_v27 = vpack.c.bf16 %v2402_v15, %v2401_v14  ;;  %v3902_v14 = vld [vmem:[%s5326_s20 + $0x25] sm:$0xff]  ;;  %v3903_v15 = vld [vmem:[%s5326_s20 + $0x2d] sm:$0xff] }
 0x336   : > { %v3352_v34 = vmul.f32 %v6265_v2, %v3312_v33  ;;  %4959 = vmatmul.msk.bf16.gmra.mxu2 %vm328_vm0, %v2867_v30  ;;  %4989 = vmatmul.msk.bf16.gmra.mxu3 %vm328_vm0, %v3127_v32  ;;  %v3129_v30 = vpack.c.bf16 %v3110_v21, %v3109_v20 }
 0x338   : > { %v3392_v36 = vadd.f32 %v6270_v58, %v3352_v34  ;;  %v2594_v40 = vpop.f32.mrf.mxu0  ;;  %v2759_v41 = vpop.f32.mrf.mxu1 }
 0x339   : > { %v2981_v37 = vpop.f32.mrf.mxu2  ;;  %v3241_v39 = vpop.f32.mrf.mxu3  ;;  %v2760_v1 = vadd.f32 %v2759_v41, %v2594_v40 }
 0x33a   : > { %5004 = vst.msk [vmem:[%s5466_s10 + $0x298] sm:$0xff] %vm1247_vm1, %v3392_v36  ;;  %v3053_v38 = vadd.f32 %v2981_v37, %v2758_v35 }
 0x33c   : > { %v3313_v42 = vadd.f32 %v3241_v39, %v3053_v38 }
 0x33e   : > { %v3353_v43 = vmul.f32 %v6265_v2, %v3313_v42  ;;  %v2462_v42 = vld [vmem:[%s5326_s20 + $0x123] sm:$0xff] }
 0x340   : > { %v3393_v50 = vadd.f32 %v6270_v58, %v3353_v43  ;;  %v2597_v57 = vpop.f32.mrf.mxu0  ;;  %v2762_v6 = vpop.f32.mrf.mxu1  ;;  %v2463_v43 = vld [vmem:[%s5326_s20 + $0x12b] sm:$0xff] }
 0x341   : > { %v2983_v53 = vpop.f32.mrf.mxu2  ;;  %v3243_v56 = vpop.f32.mrf.mxu3  ;;  %v2763_v0 = vadd.f32 %v2762_v6, %v2597_v57  ;;  %v2481_v52 = vpack.c.bf16 %v2463_v43, %v2462_v42  ;;  %v2870_v57 = vpack.c.bf16 %v2852_v46, %v2851_v45  ;;  %v3456_v42 = vld [vmem:[%s5326_s20 + $0x23] sm:$0xff]  ;;  %v3457_v43 = vld [vmem:[%s5326_s20 + $0x2b] sm:$0xff] }
 0x342   : > { %5005 = vst.msk [vmem:[%s5466_s10 + $0x2a0] sm:$0xff] %vm1247_vm1, %v3393_v50  ;;  %v3054_v55 = vadd.f32 %v2983_v53, %v2760_v1  ;;  %v3111_v50 = vld [vmem:[%s5326_s20 + $0x135] sm:$0xff]  ;;  %v3112_v1 = vld [vmem:[%s5326_s20 + $0x13d] sm:$0xff] }
 0x343   : > { %4904 = vmatmul.msk.bf16.gmra.mxu0 %vm328_vm0, %v2479_v54  ;;  %4930 = vmatmul.msk.bf16.gmra.mxu1 %vm328_vm0, %v2420_v59 }
 0x344   : > { %v3314_v62 = vadd.f32 %v3243_v56, %v3054_v55  ;;  %v2422_v56 = vpack.c.bf16 %v2404_v48, %v2403_v44  ;;  %v3904_v44 = vld [vmem:[%s5326_s20 + $0x35] sm:$0xff]  ;;  %v3905_v48 = vld [vmem:[%s5326_s20 + $0x3d] sm:$0xff] }
 0x346   : > { %v3354_v63 = vmul.f32 %v6265_v2, %v3314_v62  ;;  %4960 = vmatmul.msk.bf16.gmra.mxu2 %vm328_vm0, %v2868_v60  ;;  %4990 = vmatmul.msk.bf16.gmra.mxu3 %vm328_vm0, %v3128_v61  ;;  %v3130_v60 = vpack.c.bf16 %v3112_v1, %v3111_v50 }
 0x348   : > { %v3394_v3 = vadd.f32 %v6270_v58, %v3354_v63  ;;  %v2599_v8 = vpop.f32.mrf.mxu0  ;;  %v2764_v9 = vpop.f32.mrf.mxu1 }
 0x349   : > { %v2986_v4 = vpop.f32.mrf.mxu2  ;;  %v3246_v7 = vpop.f32.mrf.mxu3  ;;  %v2765_v19 = vadd.f32 %v2764_v9, %v2599_v8 }
 0x34a   : > { %5006 = vst.msk [vmem:[%s5466_s10 + $0x2a8] sm:$0xff] %vm1247_vm1, %v3394_v3  ;;  %v3055_v5 = vadd.f32 %v2986_v4, %v2763_v0 }
 0x34c   : > { %v3315_v10 = vadd.f32 %v3246_v7, %v3055_v5 }
 0x34e   : > { %v3355_v11 = vmul.f32 %v6265_v2, %v3315_v10  ;;  %v3513_v10 = vld [vmem:[%s5326_s20 + $0x14] sm:$0xff] }
 0x350   : > { %v3395_v18 = vadd.f32 %v6270_v58, %v3355_v11  ;;  %v2602_v26 = vpop.f32.mrf.mxu0  ;;  %v2767_v29 = vpop.f32.mrf.mxu1  ;;  %v3514_v11 = vld [vmem:[%s5326_s20 + $0x1c] sm:$0xff] }
 0x351   : > { %v2988_v22 = vpop.f32.mrf.mxu2  ;;  %v3248_v25 = vpop.f32.mrf.mxu3  ;;  %v2768_v33 = vadd.f32 %v2767_v29, %v2602_v26  ;;  %v3549_v21 = vpack.c.bf16 %v3514_v11, %v3513_v10  ;;  %v3938_v26 = vpack.c.bf16 %v3903_v15, %v3902_v14  ;;  %v3458_v10 = vld [vmem:[%s5326_s20 + $0x33] sm:$0xff]  ;;  %v3459_v11 = vld [vmem:[%s5326_s20 + $0x3b] sm:$0xff] }
 0x352   : > { %5007 = vst.msk [vmem:[%s5466_s10 + $0x2b0] sm:$0xff] %vm1247_vm1, %v3395_v18  ;;  %v3056_v24 = vadd.f32 %v2988_v22, %v2765_v19  ;;  %v4162_v18 = vld [vmem:[%s5326_s20 + $0x26] sm:$0xff]  ;;  %v4163_v19 = vld [vmem:[%s5326_s20 + $0x2e] sm:$0xff] }
 0x353   : > { %4905 = vmatmul.msk.bf16.gmra.mxu0 %vm328_vm0, %v2480_v23  ;;  %4931 = vmatmul.msk.bf16.gmra.mxu1 %vm328_vm0, %v2421_v27 }
 0x354   : > { %v3316_v31 = vadd.f32 %v3248_v25, %v3056_v24  ;;  %v3490_v25 = vpack.c.bf16 %v3455_v13, %v3454_v12  ;;  %v3906_v12 = vld [vmem:[%s5326_s20 + $0x45] sm:$0xff]  ;;  %v3907_v13 = vld [vmem:[%s5326_s20 + $0x4d] sm:$0xff] }
 0x356   : > { %v3356_v32 = vmul.f32 %v6265_v2, %v3316_v31  ;;  %4961 = vmatmul.msk.bf16.gmra.mxu2 %vm328_vm0, %v2869_v28  ;;  %4991 = vmatmul.msk.bf16.gmra.mxu3 %vm328_vm0, %v3129_v30  ;;  %v4198_v28 = vpack.c.bf16 %v4163_v19, %v4162_v18 }
 0x358   : > { %v3396_v34 = vadd.f32 %v6270_v58, %v3356_v32  ;;  %v2604_v38 = vpop.f32.mrf.mxu0  ;;  %v2769_v39 = vpop.f32.mrf.mxu1 }
 0x359   : > { %v2991_v35 = vpop.f32.mrf.mxu2  ;;  %v3251_v37 = vpop.f32.mrf.mxu3  ;;  %v2770_v49 = vadd.f32 %v2769_v39, %v2604_v38 }
 0x35a   : > { %5008 = vst.msk [vmem:[%s5466_s10 + $0x2b8] sm:$0xff] %vm1247_vm1, %v3396_v34  ;;  %v3057_v36 = vadd.f32 %v2991_v35, %v2768_v33 }
 0x35c   : > { %v3317_v40 = vadd.f32 %v3251_v37, %v3057_v36 }
 0x35e   : > { %v3357_v41 = vmul.f32 %v6265_v2, %v3317_v40  ;;  %v3515_v40 = vld [vmem:[%s5326_s20 + $0x24] sm:$0xff] }
 0x360   : > { %v3397_v47 = vadd.f32 %v6270_v58, %v3357_v41  ;;  %v2607_v55 = vpop.f32.mrf.mxu0  ;;  %v2772_v59 = vpop.f32.mrf.mxu1  ;;  %v3516_v41 = vld [vmem:[%s5326_s20 + $0x2c] sm:$0xff] }
 0x361   : > { %v2993_v51 = vpop.f32.mrf.mxu2  ;;  %v3253_v54 = vpop.f32.mrf.mxu3  ;;  %v2773_v62 = vadd.f32 %v2772_v59, %v2607_v55  ;;  %v3550_v1 = vpack.c.bf16 %v3516_v41, %v3515_v40  ;;  %v3939_v55 = vpack.c.bf16 %v3905_v48, %v3904_v44  ;;  %v3460_v40 = vld [vmem:[%s5326_s20 + $0x43] sm:$0xff]  ;;  %v3461_v41 = vld [vmem:[%s5326_s20 + $0x4b] sm:$0xff] }
 0x362   : > { %5009 = vst.msk [vmem:[%s5466_s10 + $0x2c0] sm:$0xff] %vm1247_vm1, %v3397_v47  ;;  %v3058_v53 = vadd.f32 %v2993_v51, %v2770_v49  ;;  %v4164_v47 = vld [vmem:[%s5326_s20 + $0x36] sm:$0xff]  ;;  %v4165_v49 = vld [vmem:[%s5326_s20 + $0x3e] sm:$0xff] }
 0x363   : > { %4906 = vmatmul.msk.bf16.gmra.mxu0 %vm328_vm0, %v2481_v52  ;;  %4932 = vmatmul.msk.bf16.gmra.mxu1 %vm328_vm0, %v2422_v56 }
 0x364   : > { %v3318_v6 = vadd.f32 %v3253_v54, %v3058_v53  ;;  %v3491_v54 = vpack.c.bf16 %v3457_v43, %v3456_v42  ;;  %v3908_v42 = vld [vmem:[%s5326_s20 + $0x55] sm:$0xff]  ;;  %v3909_v43 = vld [vmem:[%s5326_s20 + $0x5d] sm:$0xff] }
 0x366   : > { %v3358_v61 = vmul.f32 %v6265_v2, %v3318_v6  ;;  %4962 = vmatmul.msk.bf16.gmra.mxu2 %vm328_vm0, %v2870_v57  ;;  %4992 = vmatmul.msk.bf16.gmra.mxu3 %vm328_vm0, %v3130_v60  ;;  %v4199_v57 = vpack.c.bf16 %v4165_v49, %v4164_v47 }
 0x368   : > { %v3398_v63 = vadd.f32 %v6270_v58, %v3358_v61  ;;  %v2609_v5 = vpop.f32.mrf.mxu0  ;;  %v2774_v7 = vpop.f32.mrf.mxu1 }
 0x369   : > { %v2996_v0 = vpop.f32.mrf.mxu2  ;;  %v3256_v4 = vpop.f32.mrf.mxu3  ;;  %v2775_v17 = vadd.f32 %v2774_v7, %v2609_v5 }
 0x36a   : > { %5010 = vst.msk [vmem:[%s5466_s10 + $0x2c8] sm:$0xff] %vm1247_vm1, %v3398_v63  ;;  %v3059_v3 = vadd.f32 %v2996_v0, %v2773_v62 }
 0x36c   : > { %v3319_v8 = vadd.f32 %v3256_v4, %v3059_v3 }
 0x36e   : > { %v3359_v9 = vmul.f32 %v6265_v2, %v3319_v8  ;;  %v3517_v8 = vld [vmem:[%s5326_s20 + $0x34] sm:$0xff] }
 0x370   : > { %v3399_v16 = vadd.f32 %v6270_v58, %v3359_v9  ;;  %v2612_v24 = vpop.f32.mrf.mxu0  ;;  %v2777_v27 = vpop.f32.mrf.mxu1  ;;  %v3518_v9 = vld [vmem:[%s5326_s20 + $0x3c] sm:$0xff] }
 0x371   : > { %v2998_v20 = vpop.f32.mrf.mxu2  ;;  %v3258_v23 = vpop.f32.mrf.mxu3  ;;  %v2778_v31 = vadd.f32 %v2777_v27, %v2612_v24  ;;  %v3551_v19 = vpack.c.bf16 %v3518_v9, %v3517_v8  ;;  %v3940_v24 = vpack.c.bf16 %v3907_v13, %v3906_v12  ;;  %v3462_v8 = vld [vmem:[%s5326_s20 + $0x53] sm:$0xff]  ;;  %v3463_v9 = vld [vmem:[%s5326_s20 + $0x5b] sm:$0xff] }
 0x372   : > { %5011 = vst.msk [vmem:[%s5466_s10 + $0x2d0] sm:$0xff] %vm1247_vm1, %v3399_v16  ;;  %v3060_v22 = vadd.f32 %v2998_v20, %v2775_v17  ;;  %v4166_v16 = vld [vmem:[%s5326_s20 + $0x46] sm:$0xff]  ;;  %v4167_v17 = vld [vmem:[%s5326_s20 + $0x4e] sm:$0xff] }
 0x373   : > { %5045 = vmatmul.msk.bf16.vlgmr.msrb.gmra.mxu0 %vm328_vm0, %v3549_v21  ;;  %5071 = vmatmul.msk.bf16.vlgmr.msrb.gmra.mxu1 %vm328_vm0, %v3490_v25 }
 0x374   : > { %v3320_v29 = vadd.f32 %v3258_v23, %v3060_v22  ;;  %v3492_v23 = vpack.c.bf16 %v3459_v11, %v3458_v10  ;;  %v3910_v10 = vld [vmem:[%s5326_s20 + $0x65] sm:$0xff]  ;;  %v3911_v11 = vld [vmem:[%s5326_s20 + $0x6d] sm:$0xff] }
 0x376   : > { %v3360_v30 = vmul.f32 %v6265_v2, %v3320_v29  ;;  %5101 = vmatmul.msk.bf16.vlgmr.msrb.gmra.mxu2 %vm328_vm0, %v3938_v26  ;;  %5131 = vmatmul.msk.bf16.vlgmr.msrb.gmra.mxu3 %vm328_vm0, %v4198_v28  ;;  %v4200_v26 = vpack.c.bf16 %v4167_v17, %v4166_v16 }
 0x378   : > { %v3400_v32 = vadd.f32 %v6270_v58, %v3360_v30  ;;  %v2614_v36 = vpop.f32.mrf.mxu0  ;;  %v2779_v37 = vpop.f32.mrf.mxu1 }
 0x379   : > { %v3001_v33 = vpop.f32.mrf.mxu2  ;;  %v3261_v35 = vpop.f32.mrf.mxu3  ;;  %v2780_v46 = vadd.f32 %v2779_v37, %v2614_v36 }
 0x37a   : > { %5012 = vst.msk [vmem:[%s5466_s10 + $0x2d8] sm:$0xff] %vm1247_vm1, %v3400_v32  ;;  %v3061_v34 = vadd.f32 %v3001_v33, %v2778_v31 }
 0x37c   : > { %v3321_v38 = vadd.f32 %v3261_v35, %v3061_v34 }
 0x37e   : > { %v3361_v39 = vmul.f32 %v6265_v2, %v3321_v38  ;;  %v3519_v38 = vld [vmem:[%s5326_s20 + $0x44] sm:$0xff] }
 0x380   : > { %v3401_v45 = vadd.f32 %v6270_v58, %v3361_v39  ;;  %v2617_v53 = vpop.f32.mrf.mxu0  ;;  %v2782_v56 = vpop.f32.mrf.mxu1  ;;  %v3520_v39 = vld [vmem:[%s5326_s20 + $0x4c] sm:$0xff] }
 0x381   : > { %v3003_v50 = vpop.f32.mrf.mxu2  ;;  %v3263_v52 = vpop.f32.mrf.mxu3  ;;  %v2783_v6 = vadd.f32 %v2782_v56, %v2617_v53  ;;  %v3552_v49 = vpack.c.bf16 %v3520_v39, %v3519_v38  ;;  %v3941_v53 = vpack.c.bf16 %v3909_v43, %v3908_v42  ;;  %v3464_v38 = vld [vmem:[%s5326_s20 + $0x63] sm:$0xff]  ;;  %v3465_v39 = vld [vmem:[%s5326_s20 + $0x6b] sm:$0xff] }
 0x382   : > { %5013 = vst.msk [vmem:[%s5466_s10 + $0x2e0] sm:$0xff] %vm1247_vm1, %v3401_v45  ;;  %v3062_v51 = vadd.f32 %v3003_v50, %v2780_v46  ;;  %v4168_v45 = vld [vmem:[%s5326_s20 + $0x56] sm:$0xff]  ;;  %v4169_v46 = vld [vmem:[%s5326_s20 + $0x5e] sm:$0xff] }
 0x383   : > { %5046 = vmatmul.msk.bf16.gmra.mxu0 %vm328_vm0, %v3550_v1  ;;  %5072 = vmatmul.msk.bf16.gmra.mxu1 %vm328_vm0, %v3491_v54 }
 0x384   : > { %v3322_v59 = vadd.f32 %v3263_v52, %v3062_v51  ;;  %v3493_v52 = vpack.c.bf16 %v3461_v41, %v3460_v40  ;;  %v3912_v40 = vld [vmem:[%s5326_s20 + $0x75] sm:$0xff]  ;;  %v3913_v41 = vld [vmem:[%s5326_s20 + $0x7d] sm:$0xff] }
 0x386   : > { %v3362_v60 = vmul.f32 %v6265_v2, %v3322_v59  ;;  %5102 = vmatmul.msk.bf16.gmra.mxu2 %vm328_vm0, %v3939_v55  ;;  %5132 = vmatmul.msk.bf16.gmra.mxu3 %vm328_vm0, %v4199_v57  ;;  %v4201_v55 = vpack.c.bf16 %v4169_v46, %v4168_v45 }
 0x388   : > { %v3402_v61 = vadd.f32 %v6270_v58, %v3362_v60  ;;  %v2619_v3 = vpop.f32.mrf.mxu0  ;;  %v2784_v4 = vpop.f32.mrf.mxu1 }
 0x389   : > { %v3006_v62 = vpop.f32.mrf.mxu2  ;;  %v3266_v0 = vpop.f32.mrf.mxu3  ;;  %v2785_v15 = vadd.f32 %v2784_v4, %v2619_v3 }
 0x38a   : > { %5014 = vst.msk [vmem:[%s5466_s10 + $0x2e8] sm:$0xff] %vm1247_vm1, %v3402_v61  ;;  %v3063_v63 = vadd.f32 %v3006_v62, %v2783_v6 }
 0x38c   : > { %v3323_v5 = vadd.f32 %v3266_v0, %v3063_v63 }
 0x38e   : > { %v3363_v7 = vmul.f32 %v6265_v2, %v3323_v5  ;;  %v3521_v5 = vld [vmem:[%s5326_s20 + $0x54] sm:$0xff] }
 0x390   : > { %v3403_v14 = vadd.f32 %v6270_v58, %v3363_v7  ;;  %v2622_v22 = vpop.f32.mrf.mxu0  ;;  %v2787_v25 = vpop.f32.mrf.mxu1  ;;  %v3522_v7 = vld [vmem:[%s5326_s20 + $0x5c] sm:$0xff] }
 0x391   : > { %v3008_v18 = vpop.f32.mrf.mxu2  ;;  %v3268_v21 = vpop.f32.mrf.mxu3  ;;  %v2788_v29 = vadd.f32 %v2787_v25, %v2622_v22  ;;  %v3553_v17 = vpack.c.bf16 %v3522_v7, %v3521_v5  ;;  %v3942_v22 = vpack.c.bf16 %v3911_v11, %v3910_v10  ;;  %v3466_v5 = vld [vmem:[%s5326_s20 + $0x73] sm:$0xff]  ;;  %v3467_v7 = vld [vmem:[%s5326_s20 + $0x7b] sm:$0xff] }
 0x392   : > { %5015 = vst.msk [vmem:[%s5466_s10 + $0x2f0] sm:$0xff] %vm1247_vm1, %v3403_v14  ;;  %v3064_v20 = vadd.f32 %v3008_v18, %v2785_v15  ;;  %v4170_v14 = vld [vmem:[%s5326_s20 + $0x66] sm:$0xff]  ;;  %v4171_v15 = vld [vmem:[%s5326_s20 + $0x6e] sm:$0xff] }
 0x393   : > { %5047 = vmatmul.msk.bf16.gmra.mxu0 %vm328_vm0, %v3551_v19  ;;  %5073 = vmatmul.msk.bf16.gmra.mxu1 %vm328_vm0, %v3492_v23 }
 0x394   : > { %v3324_v27 = vadd.f32 %v3268_v21, %v3064_v20  ;;  %v3494_v21 = vpack.c.bf16 %v3463_v9, %v3462_v8  ;;  %v3914_v8 = vld [vmem:[%s5326_s20 + $0x85] sm:$0xff]  ;;  %v3915_v9 = vld [vmem:[%s5326_s20 + $0x8d] sm:$0xff] }
 0x396   : > { %v3364_v28 = vmul.f32 %v6265_v2, %v3324_v27  ;;  %5103 = vmatmul.msk.bf16.gmra.mxu2 %vm328_vm0, %v3940_v24  ;;  %5133 = vmatmul.msk.bf16.gmra.mxu3 %vm328_vm0, %v4200_v26  ;;  %v4202_v24 = vpack.c.bf16 %v4171_v15, %v4170_v14 }
 0x398   : > { %v3404_v30 = vadd.f32 %v6270_v58, %v3364_v28  ;;  %v2624_v34 = vpop.f32.mrf.mxu0  ;;  %v2789_v35 = vpop.f32.mrf.mxu1 }
 0x399   : > { %v3011_v31 = vpop.f32.mrf.mxu2  ;;  %v3271_v33 = vpop.f32.mrf.mxu3  ;;  %v2790_v48 = vadd.f32 %v2789_v35, %v2624_v34 }
 0x39a   : > { %5016 = vst.msk [vmem:[%s5466_s10 + $0x2f8] sm:$0xff] %vm1247_vm1, %v3404_v30  ;;  %v3065_v32 = vadd.f32 %v3011_v31, %v2788_v29 }
 0x39c   : > { %v3325_v36 = vadd.f32 %v3271_v33, %v3065_v32 }
 0x39e   : > { %v3365_v37 = vmul.f32 %v6265_v2, %v3325_v36  ;;  %v3523_v36 = vld [vmem:[%s5326_s20 + $0x64] sm:$0xff] }
 0x3a0   : > { %v3405_v44 = vadd.f32 %v6270_v58, %v3365_v37  ;;  %v2627_v51 = vpop.f32.mrf.mxu0  ;;  %v2792_v54 = vpop.f32.mrf.mxu1  ;;  %v3524_v37 = vld [vmem:[%s5326_s20 + $0x6c] sm:$0xff] }
 0x3a1   : > { %v3013_v47 = vpop.f32.mrf.mxu2  ;;  %v3273_v1 = vpop.f32.mrf.mxu3  ;;  %v2793_v59 = vadd.f32 %v2792_v54, %v2627_v51  ;;  %v3554_v46 = vpack.c.bf16 %v3524_v37, %v3523_v36  ;;  %v6573_v54 = vld [vmem:[%s6909_s2] ss:$0 sm:$0xff]  ;;  %v3468_v36 = vld [vmem:[%s5326_s20 + $0x83] sm:$0xff]  ;;  %v3469_v37 = vld [vmem:[%s5326_s20 + $0x8b] sm:$0xff] }
 0x3a2   : > { %5017 = vst.msk [vmem:[%s5466_s10 + $0x300] sm:$0xff] %vm1247_vm1, %v3405_v44  ;;  %v3066_v50 = vadd.f32 %v3013_v47, %v2790_v48  ;;  %v4172_v44 = vld [vmem:[%s5326_s20 + $0x76] sm:$0xff]  ;;  %v4173_v48 = vld [vmem:[%s5326_s20 + $0x7e] sm:$0xff] }
 0x3a3   : > { %5048 = vmatmul.msk.bf16.gmra.mxu0 %vm328_vm0, %v3552_v49  ;;  %5074 = vmatmul.msk.bf16.gmra.mxu1 %vm328_vm0, %v3493_v52  ;;  %v4203_v52 = vpack.c.bf16 %v4173_v48, %v4172_v44 }
 0x3a4   : > { %v3326_v56 = vadd.f32 %v3273_v1, %v3066_v50  ;;  %v3495_v50 = vpack.c.bf16 %v3465_v39, %v3464_v38  ;;  %v3943_v1 = vpack.c.bf16 %v3913_v41, %v3912_v40  ;;  %v3916_v38 = vld [vmem:[%s5326_s20 + $0x95] sm:$0xff]  ;;  %v3917_v39 = vld [vmem:[%s5326_s20 + $0x9d] sm:$0xff] }
 0x3a6   : > { %v3366_v57 = vmul.f32 %v6265_v2, %v3326_v56  ;;  %5104 = vmatmul.msk.bf16.gmra.mxu2 %vm328_vm0, %v3941_v53  ;;  %5134 = vmatmul.msk.bf16.gmra.mxu3 %vm328_vm0, %v4201_v55 }
 0x3a8   : > { %v3406_v60 = vadd.f32 %v6270_v58, %v3366_v57  ;;  %v2629_v63 = vpop.f32.mrf.mxu0  ;;  %v2794_v0 = vpop.f32.mrf.mxu1 }
 0x3a9   : > { %v3016_v6 = vpop.f32.mrf.mxu2  ;;  %v3276_v62 = vpop.f32.mrf.mxu3  ;;  %v2795_v13 = vadd.f32 %v2794_v0, %v2629_v63 }
 0x3aa   : > { %5018 = vst.msk [vmem:[%s5466_s10 + $0x308] sm:$0xff] %vm1247_vm1, %v3406_v60  ;;  %v3067_v61 = vadd.f32 %v3016_v6, %v2793_v59 }
 0x3ac   : > { %v3327_v3 = vadd.f32 %v3276_v62, %v3067_v61 }
 0x3ae   : > { %v3367_v4 = vmul.f32 %v6265_v2, %v3327_v3  ;;  %v3525_v3 = vld [vmem:[%s5326_s20 + $0x74] sm:$0xff] }
 0x3b0   : > { %v3407_v12 = vadd.f32 %v6270_v58, %v3367_v4  ;;  %v2632_v20 = vpop.f32.mrf.mxu0  ;;  %v2797_v23 = vpop.f32.mrf.mxu1  ;;  %v3526_v4 = vld [vmem:[%s5326_s20 + $0x7c] sm:$0xff] }
 0x3b1   : > { %v3018_v16 = vpop.f32.mrf.mxu2  ;;  %v3278_v19 = vpop.f32.mrf.mxu3  ;;  %v2798_v27 = vadd.f32 %v2797_v23, %v2632_v20  ;;  %v3555_v15 = vpack.c.bf16 %v3526_v4, %v3525_v3  ;;  %v3944_v20 = vpack.c.bf16 %v3915_v9, %v3914_v8  ;;  %v3470_v3 = vld [vmem:[%s5326_s20 + $0x93] sm:$0xff]  ;;  %v3471_v4 = vld [vmem:[%s5326_s20 + $0x9b] sm:$0xff] }
 0x3b2   : > { %5019 = vst.msk [vmem:[%s5466_s10 + $0x310] sm:$0xff] %vm1247_vm1, %v3407_v12  ;;  %v3068_v18 = vadd.f32 %v3018_v16, %v2795_v13  ;;  %v4174_v12 = vld [vmem:[%s5326_s20 + $0x86] sm:$0xff]  ;;  %v4175_v13 = vld [vmem:[%s5326_s20 + $0x8e] sm:$0xff] }
 0x3b3   : > { %5049 = vmatmul.msk.bf16.gmra.mxu0 %vm328_vm0, %v3553_v17  ;;  %5075 = vmatmul.msk.bf16.gmra.mxu1 %vm328_vm0, %v3494_v21 }
 0x3b4   : > { %v3328_v25 = vadd.f32 %v3278_v19, %v3068_v18  ;;  %v3496_v19 = vpack.c.bf16 %v3467_v7, %v3466_v5  ;;  %v3918_v5 = vld [vmem:[%s5326_s20 + $0xa5] sm:$0xff]  ;;  %v3919_v7 = vld [vmem:[%s5326_s20 + $0xad] sm:$0xff] }
 0x3b6   : > { %v3368_v26 = vmul.f32 %v6265_v2, %v3328_v25  ;;  %5105 = vmatmul.msk.bf16.gmra.mxu2 %vm328_vm0, %v3942_v22  ;;  %5135 = vmatmul.msk.bf16.gmra.mxu3 %vm328_vm0, %v4202_v24  ;;  %v4204_v22 = vpack.c.bf16 %v4175_v13, %v4174_v12 }
 0x3b8   : > { %v3408_v28 = vadd.f32 %v6270_v58, %v3368_v26  ;;  %v2634_v32 = vpop.f32.mrf.mxu0  ;;  %v2799_v33 = vpop.f32.mrf.mxu1  ;;  %v6562_v58 = vld [vmem:[%s6910_s3] ss:$0 sm:$0xff] }
 0x3b9   : > { %v3021_v29 = vpop.f32.mrf.mxu2  ;;  %v3281_v31 = vpop.f32.mrf.mxu3  ;;  %v2800_v43 = vadd.f32 %v2799_v33, %v2634_v32 }
 0x3ba   : > { %5020 = vst.msk [vmem:[%s5466_s10 + $0x318] sm:$0xff] %vm1247_vm1, %v3408_v28  ;;  %v3069_v30 = vadd.f32 %v3021_v29, %v2798_v27 }
 0x3bc   : > { %v3329_v34 = vadd.f32 %v3281_v31, %v3069_v30 }
 0x3be   : > { %v3369_v35 = vmul.f32 %v6265_v2, %v3329_v34  ;;  %v3527_v34 = vld [vmem:[%s5326_s20 + $0x84] sm:$0xff] }
 0x3c0   : > { %v3409_v42 = vadd.f32 %v6562_v58, %v3369_v35  ;;  %v2637_v49 = vpop.f32.mrf.mxu0  ;;  %v2802_v51 = vpop.f32.mrf.mxu1  ;;  %v3528_v35 = vld [vmem:[%s5326_s20 + $0x8c] sm:$0xff] }
 0x3c1   : > { %v3023_v45 = vpop.f32.mrf.mxu2  ;;  %v3283_v47 = vpop.f32.mrf.mxu3  ;;  %v2803_v56 = vadd.f32 %v2802_v51, %v2637_v49  ;;  %v3556_v48 = vpack.c.bf16 %v3528_v35, %v3527_v34  ;;  %v3945_v49 = vpack.c.bf16 %v3917_v39, %v3916_v38  ;;  %v3472_v34 = vld [vmem:[%s5326_s20 + $0xa3] sm:$0xff]  ;;  %v3473_v35 = vld [vmem:[%s5326_s20 + $0xab] sm:$0xff] }
 0x3c2   : > { %5021 = vst.msk [vmem:[%s5466_s10 + $0x320] sm:$0xff] %vm1247_vm1, %v3409_v42  ;;  %v3070_v2 = vadd.f32 %v3023_v45, %v2800_v43  ;;  %v4176_v42 = vld [vmem:[%s5326_s20 + $0x96] sm:$0xff]  ;;  %v4177_v43 = vld [vmem:[%s5326_s20 + $0x9e] sm:$0xff] }
 0x3c3   : > { %5050 = vmatmul.msk.bf16.gmra.mxu0 %vm328_vm0, %v3554_v46  ;;  %5076 = vmatmul.msk.bf16.gmra.mxu1 %vm328_vm0, %v3495_v50 }
 0x3c4   : > { %v3330_v53 = vadd.f32 %v3283_v47, %v3070_v2  ;;  %v3497_v47 = vpack.c.bf16 %v3469_v37, %v3468_v36  ;;  %v3920_v36 = vld [vmem:[%s5326_s20 + $0xb5] sm:$0xff]  ;;  %v3921_v37 = vld [vmem:[%s5326_s20 + $0xbd] sm:$0xff] }
 0x3c6   : > { %v3370_v55 = vmul.f32 %v6573_v54, %v3330_v53  ;;  %5106 = vmatmul.msk.bf16.gmra.mxu2 %vm328_vm0, %v3943_v1  ;;  %5136 = vmatmul.msk.bf16.gmra.mxu3 %vm328_vm0, %v4203_v52  ;;  %v4205_v1 = vpack.c.bf16 %v4177_v43, %v4176_v42 }
 0x3c8   : > { %v3410_v57 = vadd.f32 %v6562_v58, %v3370_v55  ;;  %v2639_v61 = vpop.f32.mrf.mxu0  ;;  %v2804_v62 = vpop.f32.mrf.mxu1 }
 0x3c9   : > { %v3026_v59 = vpop.f32.mrf.mxu2  ;;  %v3286_v6 = vpop.f32.mrf.mxu3  ;;  %v2805_v11 = vadd.f32 %v2804_v62, %v2639_v61 }
 0x3ca   : > { %5022 = vst.msk [vmem:[%s5466_s10 + $0x328] sm:$0xff] %vm1247_vm1, %v3410_v57  ;;  %v3071_v60 = vadd.f32 %v3026_v59, %v2803_v56 }
 0x3cc   : > { %v3331_v63 = vadd.f32 %v3286_v6, %v3071_v60 }
 0x3ce   : > { %v3371_v0 = vmul.f32 %v6573_v54, %v3331_v63  ;;  %v3529_v63 = vld [vmem:[%s5326_s20 + $0x94] sm:$0xff] }
 0x3d0   : > { %v3411_v10 = vadd.f32 %v6562_v58, %v3371_v0  ;;  %v2642_v18 = vpop.f32.mrf.mxu0  ;;  %v2807_v21 = vpop.f32.mrf.mxu1  ;;  %v3530_v0 = vld [vmem:[%s5326_s20 + $0x9c] sm:$0xff] }
 0x3d1   : > { %v3028_v14 = vpop.f32.mrf.mxu2  ;;  %v3288_v17 = vpop.f32.mrf.mxu3  ;;  %v2808_v25 = vadd.f32 %v2807_v21, %v2642_v18  ;;  %v3557_v13 = vpack.c.bf16 %v3530_v0, %v3529_v63  ;;  %v3946_v18 = vpack.c.bf16 %v3919_v7, %v3918_v5  ;;  %v3474_v63 = vld [vmem:[%s5326_s20 + $0xb3] sm:$0xff]  ;;  %v3475_v0 = vld [vmem:[%s5326_s20 + $0xbb] sm:$0xff] }
 0x3d2   : > { %5023 = vst.msk [vmem:[%s5466_s10 + $0x330] sm:$0xff] %vm1247_vm1, %v3411_v10  ;;  %v3072_v16 = vadd.f32 %v3028_v14, %v2805_v11  ;;  %v4178_v10 = vld [vmem:[%s5326_s20 + $0xa6] sm:$0xff]  ;;  %v4179_v11 = vld [vmem:[%s5326_s20 + $0xae] sm:$0xff] }
 0x3d3   : > { %5051 = vmatmul.msk.bf16.gmra.mxu0 %vm328_vm0, %v3555_v15  ;;  %5077 = vmatmul.msk.bf16.gmra.mxu1 %vm328_vm0, %v3496_v19 }
 0x3d4   : > { %v3332_v23 = vadd.f32 %v3288_v17, %v3072_v16  ;;  %v3498_v17 = vpack.c.bf16 %v3471_v4, %v3470_v3  ;;  %v3922_v3 = vld [vmem:[%s5326_s20 + $0xc5] sm:$0xff]  ;;  %v3923_v4 = vld [vmem:[%s5326_s20 + $0xcd] sm:$0xff] }
 0x3d6   : > { %v3372_v24 = vmul.f32 %v6573_v54, %v3332_v23  ;;  %5107 = vmatmul.msk.bf16.gmra.mxu2 %vm328_vm0, %v3944_v20  ;;  %5137 = vmatmul.msk.bf16.gmra.mxu3 %vm328_vm0, %v4204_v22  ;;  %v4206_v20 = vpack.c.bf16 %v4179_v11, %v4178_v10 }
 0x3d8   : > { %v3412_v26 = vadd.f32 %v6562_v58, %v3372_v24  ;;  %v2644_v30 = vpop.f32.mrf.mxu0  ;;  %v2809_v31 = vpop.f32.mrf.mxu1 }
 0x3d9   : > { %v3031_v27 = vpop.f32.mrf.mxu2  ;;  %v3291_v29 = vpop.f32.mrf.mxu3  ;;  %v2810_v41 = vadd.f32 %v2809_v31, %v2644_v30 }
 0x3da   : > { %5024 = vst.msk [vmem:[%s5466_s10 + $0x338] sm:$0xff] %vm1247_vm1, %v3412_v26  ;;  %v3073_v28 = vadd.f32 %v3031_v27, %v2808_v25  ;;  %v6645_v27 = vld [vmem:[%s6909_s2] ss:$0 sm:$0xff] }
 0x3dc   : > { %v3333_v32 = vadd.f32 %v3291_v29, %v3073_v28 }
 0x3de   : > { %v3373_v33 = vmul.f32 %v6573_v54, %v3333_v32  ;;  %v3531_v32 = vld [vmem:[%s5326_s20 + $0xa4] sm:$0xff] }
 0x3e0   : > { %v3413_v40 = vadd.f32 %v6562_v58, %v3373_v33  ;;  %v2647_v2 = vpop.f32.mrf.mxu0  ;;  %v2812_v50 = vpop.f32.mrf.mxu1  ;;  %v3532_v33 = vld [vmem:[%s5326_s20 + $0xac] sm:$0xff] }
 0x3e1   : > { %v3033_v44 = vpop.f32.mrf.mxu2  ;;  %v3293_v46 = vpop.f32.mrf.mxu3  ;;  %v2813_v53 = vadd.f32 %v2812_v50, %v2647_v2  ;;  %v3558_v43 = vpack.c.bf16 %v3532_v33, %v3531_v32  ;;  %v3947_v2 = vpack.c.bf16 %v3921_v37, %v3920_v36  ;;  %v3476_v32 = vld [vmem:[%s5326_s20 + $0xc3] sm:$0xff]  ;;  %v3477_v33 = vld [vmem:[%s5326_s20 + $0xcb] sm:$0xff] }
 0x3e2   : > { %5025 = vst.msk [vmem:[%s5466_s10 + $0x340] sm:$0xff] %vm1247_vm1, %v3413_v40  ;;  %v3074_v45 = vadd.f32 %v3033_v44, %v2810_v41  ;;  %v4180_v40 = vld [vmem:[%s5326_s20 + $0xb6] sm:$0xff]  ;;  %v4181_v41 = vld [vmem:[%s5326_s20 + $0xbe] sm:$0xff] }
 0x3e3   : > { %5052 = vmatmul.msk.bf16.gmra.mxu0 %vm328_vm0, %v3556_v48  ;;  %5078 = vmatmul.msk.bf16.gmra.mxu1 %vm328_vm0, %v3497_v47 }
 0x3e4   : > { %v3334_v51 = vadd.f32 %v3293_v46, %v3074_v45  ;;  %v3499_v46 = vpack.c.bf16 %v3473_v35, %v3472_v34  ;;  %v3924_v34 = vld [vmem:[%s5326_s20 + $0xd5] sm:$0xff]  ;;  %v3925_v35 = vld [vmem:[%s5326_s20 + $0xdd] sm:$0xff] }
 0x3e6   : > { %v3374_v52 = vmul.f32 %v6573_v54, %v3334_v51  ;;  %5108 = vmatmul.msk.bf16.gmra.mxu2 %vm328_vm0, %v3945_v49  ;;  %5138 = vmatmul.msk.bf16.gmra.mxu3 %vm328_vm0, %v4205_v1  ;;  %v4207_v49 = vpack.c.bf16 %v4181_v41, %v4180_v40 }
 0x3e8   : > { %v3414_v55 = vadd.f32 %v6562_v58, %v3374_v52  ;;  %v2649_v60 = vpop.f32.mrf.mxu0  ;;  %v2814_v6 = vpop.f32.mrf.mxu1 }
 0x3e9   : > { %v3036_v56 = vpop.f32.mrf.mxu2  ;;  %v3296_v59 = vpop.f32.mrf.mxu3  ;;  %v2815_v9 = vadd.f32 %v2814_v6, %v2649_v60 }
 0x3ea   : > { %5026 = vst.msk [vmem:[%s5466_s10 + $0x348] sm:$0xff] %vm1247_vm1, %v3414_v55  ;;  %v3075_v57 = vadd.f32 %v3036_v56, %v2813_v53 }
 0x3ec   : > { %v3335_v61 = vadd.f32 %v3296_v59, %v3075_v57 }
 0x3ee   : > { %v3375_v62 = vmul.f32 %v6573_v54, %v3335_v61  ;;  %v3533_v61 = vld [vmem:[%s5326_s20 + $0xb4] sm:$0xff] }
 0x3f0   : > { %v3415_v8 = vadd.f32 %v6562_v58, %v3375_v62  ;;  %v3647_v16 = vpop.f32.mrf.mxu0  ;;  %v3812_v19 = vpop.f32.mrf.mxu1  ;;  %v3534_v62 = vld [vmem:[%s5326_s20 + $0xbc] sm:$0xff] }
 0x3f1   : > { %v3038_v12 = vpop.f32.mrf.mxu2  ;;  %v3298_v15 = vpop.f32.mrf.mxu3  ;;  %v3813_v23 = vadd.f32 %v3812_v19, %v3647_v16  ;;  %v3559_v11 = vpack.c.bf16 %v3534_v62, %v3533_v61  ;;  %v3948_v16 = vpack.c.bf16 %v3923_v4, %v3922_v3  ;;  %v3478_v61 = vld [vmem:[%s5326_s20 + $0xd3] sm:$0xff]  ;;  %v3479_v62 = vld [vmem:[%s5326_s20 + $0xdb] sm:$0xff] }
 0x3f2   : > { %5027 = vst.msk [vmem:[%s5466_s10 + $0x350] sm:$0xff] %vm1247_vm1, %v3415_v8  ;;  %v3076_v14 = vadd.f32 %v3038_v12, %v2815_v9  ;;  %v4182_v8 = vld [vmem:[%s5326_s20 + $0xc6] sm:$0xff]  ;;  %v4183_v9 = vld [vmem:[%s5326_s20 + $0xce] sm:$0xff] }
 0x3f3   : > { %5053 = vmatmul.msk.bf16.gmra.mxu0 %vm328_vm0, %v3557_v13  ;;  %5079 = vmatmul.msk.bf16.gmra.mxu1 %vm328_vm0, %v3498_v17 }
 0x3f4   : > { %v3336_v21 = vadd.f32 %v3298_v15, %v3076_v14  ;;  %v3500_v15 = vpack.c.bf16 %v3475_v0, %v3474_v63  ;;  %v3926_v63 = vld [vmem:[%s5326_s20 + $0xe5] sm:$0xff]  ;;  %v3927_v0 = vld [vmem:[%s5326_s20 + $0xed] sm:$0xff] }
 0x3f6   : > { %v3376_v22 = vmul.f32 %v6573_v54, %v3336_v21  ;;  %5109 = vmatmul.msk.bf16.gmra.mxu2 %vm328_vm0, %v3946_v18  ;;  %5139 = vmatmul.msk.bf16.gmra.mxu3 %vm328_vm0, %v4206_v20  ;;  %v4208_v18 = vpack.c.bf16 %v4183_v9, %v4182_v8 }
 0x3f8   : > { %v3416_v24 = vadd.f32 %v6562_v58, %v3376_v22  ;;  %v3649_v28 = vpop.f32.mrf.mxu0  ;;  %v3814_v29 = vpop.f32.mrf.mxu1  ;;  %v6650_v58 = vld [vmem:[%s6910_s3] ss:$0 sm:$0xff] }
 0x3f9   : > { %v4036_v25 = vpop.f32.mrf.mxu2  ;;  %v4296_v54 = vpop.f32.mrf.mxu3  ;;  %v3815_v39 = vadd.f32 %v3814_v29, %v3649_v28 }
 0x3fa   : > { %5028 = vst.msk [vmem:[%s5466_s10 + $0x358] sm:$0xff] %vm1247_vm1, %v3416_v24  ;;  %v4126_v26 = vadd.f32 %v4036_v25, %v3813_v23 }
 0x3fc   : > { %v4386_v30 = vadd.f32 %v4296_v54, %v4126_v26 }
 0x3fe   : > { %v4426_v31 = vmul.f32 %v6645_v27, %v4386_v30  ;;  %v3535_v30 = vld [vmem:[%s5326_s20 + $0xc4] sm:$0xff] }
 0x400   : > { %v4466_v38 = vadd.f32 %v6650_v58, %v4426_v31  ;;  %v3652_v45 = vpop.f32.mrf.mxu0  ;;  %v3817_v47 = vpop.f32.mrf.mxu1  ;;  %v3536_v31 = vld [vmem:[%s5326_s20 + $0xcc] sm:$0xff] }
 0x401   : > { %v4038_v42 = vpop.f32.mrf.mxu2  ;;  %v4298_v48 = vpop.f32.mrf.mxu3  ;;  %v3818_v51 = vadd.f32 %v3817_v47, %v3652_v45  ;;  %v3560_v41 = vpack.c.bf16 %v3536_v31, %v3535_v30  ;;  %v3949_v45 = vpack.c.bf16 %v3925_v35, %v3924_v34  ;;  %v3480_v30 = vld [vmem:[%s5326_s20 + $0xe3] sm:$0xff]  ;;  %v3481_v31 = vld [vmem:[%s5326_s20 + $0xeb] sm:$0xff] }
 0x402   : > { %5149 = vst.msk [vmem:[%s5466_s10 + $0x360] sm:$0xff] %vm1247_vm1, %v4466_v38  ;;  %v4127_v44 = vadd.f32 %v4038_v42, %v3815_v39  ;;  %v4184_v38 = vld [vmem:[%s5326_s20 + $0xd6] sm:$0xff]  ;;  %v4185_v39 = vld [vmem:[%s5326_s20 + $0xde] sm:$0xff] }
 0x403   : > { %5054 = vmatmul.msk.bf16.gmra.mxu0 %vm328_vm0, %v3558_v43  ;;  %5080 = vmatmul.msk.bf16.gmra.mxu1 %vm328_vm0, %v3499_v46 }
 0x404   : > { %v4387_v50 = vadd.f32 %v4298_v48, %v4127_v44  ;;  %v3501_v48 = vpack.c.bf16 %v3477_v33, %v3476_v32  ;;  %v3928_v32 = vld [vmem:[%s5326_s20 + $0xf5] sm:$0xff]  ;;  %v3929_v33 = vld [vmem:[%s5326_s20 + $0xfd] sm:$0xff] }
 0x406   : > { %v4427_v1 = vmul.f32 %v6645_v27, %v4387_v50  ;;  %5110 = vmatmul.msk.bf16.gmra.mxu2 %vm328_vm0, %v3947_v2  ;;  %5140 = vmatmul.msk.bf16.gmra.mxu3 %vm328_vm0, %v4207_v49  ;;  %v4209_v2 = vpack.c.bf16 %v4185_v39, %v4184_v38 }
 0x408   : > { %v4467_v52 = vadd.f32 %v6650_v58, %v4427_v1  ;;  %v3654_v57 = vpop.f32.mrf.mxu0  ;;  %v3819_v59 = vpop.f32.mrf.mxu1 }
 0x409   : > { %v4041_v53 = vpop.f32.mrf.mxu2  ;;  %v4301_v56 = vpop.f32.mrf.mxu3  ;;  %v3820_v7 = vadd.f32 %v3819_v59, %v3654_v57 }
 0x40a   : > { %5150 = vst.msk [vmem:[%s5466_s10 + $0x368] sm:$0xff] %vm1247_vm1, %v4467_v52  ;;  %v4128_v55 = vadd.f32 %v4041_v53, %v3818_v51 }
 0x40c   : > { %v4388_v60 = vadd.f32 %v4301_v56, %v4128_v55 }
 0x40e   : > { %v4428_v6 = vmul.f32 %v6645_v27, %v4388_v60  ;;  %v3537_v60 = vld [vmem:[%s5326_s20 + $0xd4] sm:$0xff] }
 0x410   : > { %v4468_v5 = vadd.f32 %v6650_v58, %v4428_v6  ;;  %v3657_v14 = vpop.f32.mrf.mxu0  ;;  %v3822_v17 = vpop.f32.mrf.mxu1  ;;  %v3538_v6 = vld [vmem:[%s5326_s20 + $0xdc] sm:$0xff] }
 0x411   : > { %v4043_v10 = vpop.f32.mrf.mxu2  ;;  %v4303_v13 = vpop.f32.mrf.mxu3  ;;  %v3823_v21 = vadd.f32 %v3822_v17, %v3657_v14  ;;  %v3561_v9 = vpack.c.bf16 %v3538_v6, %v3537_v60  ;;  %v3950_v14 = vpack.c.bf16 %v3927_v0, %v3926_v63  ;;  %v3482_v60 = vld [vmem:[%s5326_s20 + $0xf3] sm:$0xff]  ;;  %v3483_v6 = vld [vmem:[%s5326_s20 + $0xfb] sm:$0xff] }
 0x412   : > { %5151 = vst.msk [vmem:[%s5466_s10 + $0x370] sm:$0xff] %vm1247_vm1, %v4468_v5  ;;  %v4129_v12 = vadd.f32 %v4043_v10, %v3820_v7  ;;  %v4186_v5 = vld [vmem:[%s5326_s20 + $0xe6] sm:$0xff]  ;;  %v4187_v7 = vld [vmem:[%s5326_s20 + $0xee] sm:$0xff] }
 0x413   : > { %5055 = vmatmul.msk.bf16.gmra.mxu0 %vm328_vm0, %v3559_v11  ;;  %5081 = vmatmul.msk.bf16.gmra.mxu1 %vm328_vm0, %v3500_v15 }
 0x414   : > { %v4389_v19 = vadd.f32 %v4303_v13, %v4129_v12  ;;  %v3502_v13 = vpack.c.bf16 %v3479_v62, %v3478_v61  ;;  %v3930_v61 = vld [vmem:[%s5326_s20 + $0x105] sm:$0xff]  ;;  %v3931_v62 = vld [vmem:[%s5326_s20 + $0x10d] sm:$0xff] }
 0x416   : > { %v4429_v20 = vmul.f32 %v6645_v27, %v4389_v19  ;;  %5111 = vmatmul.msk.bf16.gmra.mxu2 %vm328_vm0, %v3948_v16  ;;  %5141 = vmatmul.msk.bf16.gmra.mxu3 %vm328_vm0, %v4208_v18  ;;  %v4210_v16 = vpack.c.bf16 %v4187_v7, %v4186_v5 }
 0x418   : > { %v4469_v22 = vadd.f32 %v6650_v58, %v4429_v20  ;;  %v3659_v26 = vpop.f32.mrf.mxu0  ;;  %v3824_v54 = vpop.f32.mrf.mxu1 }
 0x419   : > { %v4046_v23 = vpop.f32.mrf.mxu2  ;;  %v4306_v25 = vpop.f32.mrf.mxu3  ;;  %v3825_v37 = vadd.f32 %v3824_v54, %v3659_v26 }
 0x41a   : > { %5152 = vst.msk [vmem:[%s5466_s10 + $0x378] sm:$0xff] %vm1247_vm1, %v4469_v22  ;;  %v4130_v24 = vadd.f32 %v4046_v23, %v3823_v21 }
 0x41c   : > { %v4390_v28 = vadd.f32 %v4306_v25, %v4130_v24 }
 0x41e   : > { %v4430_v29 = vmul.f32 %v6645_v27, %v4390_v28  ;;  %v3539_v28 = vld [vmem:[%s5326_s20 + $0xe4] sm:$0xff] }
 0x420   : > { %v4470_v36 = vadd.f32 %v6650_v58, %v4430_v29  ;;  %v3662_v44 = vpop.f32.mrf.mxu0  ;;  %v3827_v46 = vpop.f32.mrf.mxu1  ;;  %v3540_v29 = vld [vmem:[%s5326_s20 + $0xec] sm:$0xff] }
 0x421   : > { %v4048_v40 = vpop.f32.mrf.mxu2  ;;  %v4308_v43 = vpop.f32.mrf.mxu3  ;;  %v3828_v50 = vadd.f32 %v3827_v46, %v3662_v44  ;;  %v3562_v39 = vpack.c.bf16 %v3540_v29, %v3539_v28  ;;  %v3951_v44 = vpack.c.bf16 %v3929_v33, %v3928_v32  ;;  %v3484_v28 = vld [vmem:[%s5326_s20 + $0x103] sm:$0xff]  ;;  %v3485_v29 = vld [vmem:[%s5326_s20 + $0x10b] sm:$0xff] }
 0x422   : > { %5153 = vst.msk [vmem:[%s5466_s10 + $0x380] sm:$0xff] %vm1247_vm1, %v4470_v36  ;;  %v4131_v42 = vadd.f32 %v4048_v40, %v3825_v37  ;;  %v4188_v36 = vld [vmem:[%s5326_s20 + $0xf6] sm:$0xff]  ;;  %v4189_v37 = vld [vmem:[%s5326_s20 + $0xfe] sm:$0xff] }
 0x423   : > { %5056 = vmatmul.msk.bf16.gmra.mxu0 %vm328_vm0, %v3560_v41  ;;  %5082 = vmatmul.msk.bf16.gmra.mxu1 %vm328_vm0, %v3501_v48 }
 0x424   : > { %v4391_v47 = vadd.f32 %v4308_v43, %v4131_v42  ;;  %v3503_v43 = vpack.c.bf16 %v3481_v31, %v3480_v30  ;;  %v3932_v30 = vld [vmem:[%s5326_s20 + $0x115] sm:$0xff]  ;;  %v3933_v31 = vld [vmem:[%s5326_s20 + $0x11d] sm:$0xff] }
 0x426   : > { %v4431_v49 = vmul.f32 %v6645_v27, %v4391_v47  ;;  %5112 = vmatmul.msk.bf16.gmra.mxu2 %vm328_vm0, %v3949_v45  ;;  %5142 = vmatmul.msk.bf16.gmra.mxu3 %vm328_vm0, %v4209_v2  ;;  %v4211_v45 = vpack.c.bf16 %v4189_v37, %v4188_v36 }
 0x428   : > { %v4471_v1 = vadd.f32 %v6650_v58, %v4431_v49  ;;  %v3664_v55 = vpop.f32.mrf.mxu0  ;;  %v3829_v56 = vpop.f32.mrf.mxu1 }
 0x429   : > { %v4051_v51 = vpop.f32.mrf.mxu2  ;;  %v4311_v53 = vpop.f32.mrf.mxu3  ;;  %v3830_v4 = vadd.f32 %v3829_v56, %v3664_v55 }
 0x42a   : > { %5154 = vst.msk [vmem:[%s5466_s10 + $0x388] sm:$0xff] %vm1247_vm1, %v4471_v1  ;;  %v4132_v52 = vadd.f32 %v4051_v51, %v3828_v50 }
 0x42c   : > { %v4392_v57 = vadd.f32 %v4311_v53, %v4132_v52 }
 0x42e   : > { %v4432_v59 = vmul.f32 %v6645_v27, %v4392_v57  ;;  %v3541_v57 = vld [vmem:[%s5326_s20 + $0xf4] sm:$0xff] }
 0x430   : > { %v4472_v3 = vadd.f32 %v6650_v58, %v4432_v59  ;;  %v3667_v12 = vpop.f32.mrf.mxu0  ;;  %v3832_v15 = vpop.f32.mrf.mxu1  ;;  %v3542_v59 = vld [vmem:[%s5326_s20 + $0xfc] sm:$0xff] }
 0x431   : > { %v4053_v8 = vpop.f32.mrf.mxu2  ;;  %v4313_v11 = vpop.f32.mrf.mxu3  ;;  %v3833_v19 = vadd.f32 %v3832_v15, %v3667_v12  ;;  %v3563_v7 = vpack.c.bf16 %v3542_v59, %v3541_v57  ;;  %v3952_v12 = vpack.c.bf16 %v3931_v62, %v3930_v61  ;;  %v3486_v57 = vld [vmem:[%s5326_s20 + $0x113] sm:$0xff]  ;;  %v3487_v59 = vld [vmem:[%s5326_s20 + $0x11b] sm:$0xff] }
 0x432   : > { %5155 = vst.msk [vmem:[%s5466_s10 + $0x390] sm:$0xff] %vm1247_vm1, %v4472_v3  ;;  %v4133_v10 = vadd.f32 %v4053_v8, %v3830_v4  ;;  %v4190_v3 = vld [vmem:[%s5326_s20 + $0x106] sm:$0xff]  ;;  %v4191_v4 = vld [vmem:[%s5326_s20 + $0x10e] sm:$0xff] }
 0x433   : > { %5057 = vmatmul.msk.bf16.gmra.mxu0 %vm328_vm0, %v3561_v9  ;;  %5083 = vmatmul.msk.bf16.gmra.mxu1 %vm328_vm0, %v3502_v13 }
 0x434   : > { %v4393_v17 = vadd.f32 %v4313_v11, %v4133_v10  ;;  %v3504_v11 = vpack.c.bf16 %v3483_v6, %v3482_v60  ;;  %v3934_v60 = vld [vmem:[%s5326_s20 + $0x125] sm:$0xff]  ;;  %v3935_v6 = vld [vmem:[%s5326_s20 + $0x12d] sm:$0xff] }
 0x436   : > { %v4433_v18 = vmul.f32 %v6645_v27, %v4393_v17  ;;  %5113 = vmatmul.msk.bf16.gmra.mxu2 %vm328_vm0, %v3950_v14  ;;  %5143 = vmatmul.msk.bf16.gmra.mxu3 %vm328_vm0, %v4210_v16  ;;  %v4212_v14 = vpack.c.bf16 %v4191_v4, %v4190_v3 }
 0x438   : > { %v4473_v20 = vadd.f32 %v6650_v58, %v4433_v18  ;;  %v3669_v24 = vpop.f32.mrf.mxu0  ;;  %v3834_v25 = vpop.f32.mrf.mxu1 }
 0x439   : > { %v4056_v21 = vpop.f32.mrf.mxu2  ;;  %v4316_v23 = vpop.f32.mrf.mxu3  ;;  %v3835_v35 = vadd.f32 %v3834_v25, %v3669_v24 }
 0x43a   : > { %5156 = vst.msk [vmem:[%s5466_s10 + $0x398] sm:$0xff] %vm1247_vm1, %v4473_v20  ;;  %v4134_v22 = vadd.f32 %v4056_v21, %v3833_v19 }
 0x43c   : > { %v4394_v26 = vadd.f32 %v4316_v23, %v4134_v22 }
 0x43e   : > { %v4434_v54 = vmul.f32 %v6645_v27, %v4394_v26  ;;  %v3543_v26 = vld [vmem:[%s5326_s20 + $0x104] sm:$0xff] }
 0x440   : > { %v4474_v34 = vadd.f32 %v6650_v58, %v4434_v54  ;;  %v3672_v42 = vpop.f32.mrf.mxu0  ;;  %v3837_v48 = vpop.f32.mrf.mxu1  ;;  %v3544_v54 = vld [vmem:[%s5326_s20 + $0x10c] sm:$0xff] }
 0x441   : > { %v4058_v38 = vpop.f32.mrf.mxu2  ;;  %v4318_v41 = vpop.f32.mrf.mxu3  ;;  %v3838_v47 = vadd.f32 %v3837_v48, %v3672_v42  ;;  %v3564_v37 = vpack.c.bf16 %v3544_v54, %v3543_v26  ;;  %v3953_v42 = vpack.c.bf16 %v3933_v31, %v3932_v30  ;;  %v3488_v26 = vld [vmem:[%s5326_s20 + $0x123] sm:$0xff]  ;;  %v3489_v54 = vld [vmem:[%s5326_s20 + $0x12b] sm:$0xff] }
 0x442   : > { %5157 = vst.msk [vmem:[%s5466_s10 + $0x3a0] sm:$0xff] %vm1247_vm1, %v4474_v34  ;;  %v4135_v40 = vadd.f32 %v4058_v38, %v3835_v35  ;;  %v4192_v34 = vld [vmem:[%s5326_s20 + $0x116] sm:$0xff]  ;;  %v4193_v35 = vld [vmem:[%s5326_s20 + $0x11e] sm:$0xff] }
 0x443   : > { %5058 = vmatmul.msk.bf16.gmra.mxu0 %vm328_vm0, %v3562_v39  ;;  %5084 = vmatmul.msk.bf16.gmra.mxu1 %vm328_vm0, %v3503_v43 }
 0x444   : > { %v4395_v46 = vadd.f32 %v4318_v41, %v4135_v40  ;;  %v3505_v41 = vpack.c.bf16 %v3485_v29, %v3484_v28  ;;  %v3936_v28 = vld [vmem:[%s5326_s20 + $0x135] sm:$0xff]  ;;  %v3937_v29 = vld [vmem:[%s5326_s20 + $0x13d] sm:$0xff] }
 0x446   : > { %v4435_v2 = vmul.f32 %v6645_v27, %v4395_v46  ;;  %5114 = vmatmul.msk.bf16.gmra.mxu2 %vm328_vm0, %v3951_v44  ;;  %5144 = vmatmul.msk.bf16.gmra.mxu3 %vm328_vm0, %v4211_v45  ;;  %v4213_v44 = vpack.c.bf16 %v4193_v35, %v4192_v34 }
 0x448   : > { %v4475_v49 = vadd.f32 %v6650_v58, %v4435_v2  ;;  %v3674_v52 = vpop.f32.mrf.mxu0  ;;  %v3839_v53 = vpop.f32.mrf.mxu1 }
 0x449   : > { %v4061_v50 = vpop.f32.mrf.mxu2  ;;  %v4321_v51 = vpop.f32.mrf.mxu3  ;;  %v3840_v0 = vadd.f32 %v3839_v53, %v3674_v52 }
 0x44a   : > { %5158 = vst.msk [vmem:[%s5466_s10 + $0x3a8] sm:$0xff] %vm1247_vm1, %v4475_v49  ;;  %v4136_v1 = vadd.f32 %v4061_v50, %v3838_v47 }
 0x44c   : > { %v4396_v55 = vadd.f32 %v4321_v51, %v4136_v1 }
 0x44e   : > { %v4436_v56 = vmul.f32 %v6645_v27, %v4396_v55  ;;  %v3545_v55 = vld [vmem:[%s5326_s20 + $0x114] sm:$0xff] }
 0x450   : > { %v4476_v63 = vadd.f32 %v6650_v58, %v4436_v56  ;;  %v3677_v10 = vpop.f32.mrf.mxu0  ;;  %v3842_v13 = vpop.f32.mrf.mxu1  ;;  %v3546_v56 = vld [vmem:[%s5326_s20 + $0x11c] sm:$0xff] }
 0x451   : > { %v4063_v5 = vpop.f32.mrf.mxu2  ;;  %v4323_v9 = vpop.f32.mrf.mxu3  ;;  %v3843_v17 = vadd.f32 %v3842_v13, %v3677_v10  ;;  %v3565_v4 = vpack.c.bf16 %v3546_v56, %v3545_v55  ;;  %v3954_v10 = vpack.c.bf16 %v3935_v6, %v3934_v60 }
 0x452   : > { %5159 = vst.msk [vmem:[%s5466_s10 + $0x3b0] sm:$0xff] %vm1247_vm1, %v4476_v63  ;;  %v4137_v8 = vadd.f32 %v4063_v5, %v3840_v0  ;;  %v4194_v63 = vld [vmem:[%s5326_s20 + $0x126] sm:$0xff]  ;;  %v4195_v0 = vld [vmem:[%s5326_s20 + $0x12e] sm:$0xff] }
 0x453   : > { %5059 = vmatmul.msk.bf16.gmra.mxu0 %vm328_vm0, %v3563_v7  ;;  %5085 = vmatmul.msk.bf16.gmra.mxu1 %vm328_vm0, %v3504_v11 }
 0x454   : > { %v4397_v15 = vadd.f32 %v4323_v9, %v4137_v8  ;;  %v3506_v9 = vpack.c.bf16 %v3487_v59, %v3486_v57 }
 0x456   : > { %v4437_v16 = vmul.f32 %v6645_v27, %v4397_v15  ;;  %5115 = vmatmul.msk.bf16.gmra.mxu2 %vm328_vm0, %v3952_v12  ;;  %5145 = vmatmul.msk.bf16.gmra.mxu3 %vm328_vm0, %v4212_v14  ;;  %v4214_v12 = vpack.c.bf16 %v4195_v0, %v4194_v63 }
 0x458   : > { %v4477_v18 = vadd.f32 %v6650_v58, %v4437_v16  ;;  %v3679_v22 = vpop.f32.mrf.mxu0  ;;  %v3844_v23 = vpop.f32.mrf.mxu1 }
 0x459   : > { %v4066_v19 = vpop.f32.mrf.mxu2  ;;  %v4326_v21 = vpop.f32.mrf.mxu3  ;;  %v3845_v33 = vadd.f32 %v3844_v23, %v3679_v22 }
 0x45a   : > { %5160 = vst.msk [vmem:[%s5466_s10 + $0x3b8] sm:$0xff] %vm1247_vm1, %v4477_v18  ;;  %v4138_v20 = vadd.f32 %v4066_v19, %v3843_v17 }
 0x45c   : > { %v4398_v24 = vadd.f32 %v4326_v21, %v4138_v20 }
 0x45e   : > { %v4438_v25 = vmul.f32 %v6645_v27, %v4398_v24  ;;  %v3547_v24 = vld [vmem:[%s5326_s20 + $0x124] sm:$0xff] }
 0x460   : > { %v4478_v32 = vadd.f32 %v6650_v58, %v4438_v25  ;;  %v3682_v40 = vpop.f32.mrf.mxu0  ;;  %v3847_v43 = vpop.f32.mrf.mxu1  ;;  %v3548_v25 = vld [vmem:[%s5326_s20 + $0x12c] sm:$0xff] }
 0x461   : > { %v4068_v36 = vpop.f32.mrf.mxu2  ;;  %v4328_v39 = vpop.f32.mrf.mxu3  ;;  %v3848_v46 = vadd.f32 %v3847_v43, %v3682_v40  ;;  %v3566_v35 = vpack.c.bf16 %v3548_v25, %v3547_v24  ;;  %v3955_v40 = vpack.c.bf16 %v3937_v29, %v3936_v28 }
 0x462   : > { %5161 = vst.msk [vmem:[%s5466_s10 + $0x3c0] sm:$0xff] %vm1247_vm1, %v4478_v32  ;;  %v4139_v38 = vadd.f32 %v4068_v36, %v3845_v33  ;;  %v4196_v32 = vld [vmem:[%s5326_s20 + $0x136] sm:$0xff]  ;;  %v4197_v33 = vld [vmem:[%s5326_s20 + $0x13e] sm:$0xff] }
 0x463   : > { %5060 = vmatmul.msk.bf16.gmra.mxu0 %vm328_vm0, %v3564_v37  ;;  %5086 = vmatmul.msk.bf16.gmra.mxu1 %vm328_vm0, %v3505_v41 }
 0x464   : > { %v4399_v48 = vadd.f32 %v4328_v39, %v4139_v38  ;;  %v3507_v39 = vpack.c.bf16 %v3489_v54, %v3488_v26 }
 0x466   : > { %v4439_v45 = vmul.f32 %v6645_v27, %v4399_v48  ;;  %5116 = vmatmul.msk.bf16.gmra.mxu2 %vm328_vm0, %v3953_v42  ;;  %5146 = vmatmul.msk.bf16.gmra.mxu3 %vm328_vm0, %v4213_v44  ;;  %v4215_v42 = vpack.c.bf16 %v4197_v33, %v4196_v32 }
 0x468   : > { %v4479_v2 = vadd.f32 %v6650_v58, %v4439_v45  ;;  %v3684_v1 = vpop.f32.mrf.mxu0  ;;  %v3849_v51 = vpop.f32.mrf.mxu1 }
 0x469   : > { %v4071_v47 = vpop.f32.mrf.mxu2  ;;  %v4331_v50 = vpop.f32.mrf.mxu3  ;;  %v3850_v62 = vadd.f32 %v3849_v51, %v3684_v1 }
 0x46a   : > { %5162 = vst.msk [vmem:[%s5466_s10 + $0x3c8] sm:$0xff] %vm1247_vm1, %v4479_v2  ;;  %v4140_v49 = vadd.f32 %v4071_v47, %v3848_v46 }
 0x46c   : > { %v4400_v52 = vadd.f32 %v4331_v50, %v4140_v49 }
 0x46e   : > { %v4440_v53 = vmul.f32 %v6645_v27, %v4400_v52 }
 0x470   : > { %v4480_v61 = vadd.f32 %v6650_v58, %v4440_v53  ;;  %v3687_v8 = vpop.f32.mrf.mxu0  ;;  %v3852_v11 = vpop.f32.mrf.mxu1 }
 0x471   : > { %v4073_v3 = vpop.f32.mrf.mxu2  ;;  %v4333_v7 = vpop.f32.mrf.mxu3  ;;  %v3853_v15 = vadd.f32 %v3852_v11, %v3687_v8 }
 0x472   : > { %5163 = vst.msk [vmem:[%s5466_s10 + $0x3d0] sm:$0xff] %vm1247_vm1, %v4480_v61  ;;  %v4141_v5 = vadd.f32 %v4073_v3, %v3850_v62 }
 0x473   : > { %5061 = vmatmul.msk.bf16.gmra.mxu0 %vm328_vm0, %v3565_v4  ;;  %5087 = vmatmul.msk.bf16.gmra.mxu1 %vm328_vm0, %v3506_v9 }
 0x474   : > { %v4401_v13 = vadd.f32 %v4333_v7, %v4141_v5 }
 0x476   : > { %v4441_v14 = vmul.f32 %v6645_v27, %v4401_v13  ;;  %5117 = vmatmul.msk.bf16.gmra.mxu2 %vm328_vm0, %v3954_v10  ;;  %5147 = vmatmul.msk.bf16.gmra.mxu3 %vm328_vm0, %v4214_v12 }
 0x478   : > { %v4481_v16 = vadd.f32 %v6650_v58, %v4441_v14  ;;  %v3689_v20 = vpop.f32.mrf.mxu0  ;;  %v3854_v21 = vpop.f32.mrf.mxu1 }
 0x479   : > { %v4076_v17 = vpop.f32.mrf.mxu2  ;;  %v4336_v19 = vpop.f32.mrf.mxu3  ;;  %v3855_v31 = vadd.f32 %v3854_v21, %v3689_v20 }
 0x47a   : > { %5164 = vst.msk [vmem:[%s5466_s10 + $0x3d8] sm:$0xff] %vm1247_vm1, %v4481_v16  ;;  %v4142_v18 = vadd.f32 %v4076_v17, %v3853_v15 }
 0x47c   : > { %v4402_v22 = vadd.f32 %v4336_v19, %v4142_v18 }
 0x47e   : > { %v4442_v23 = vmul.f32 %v6645_v27, %v4402_v22 }
 0x480   : > { %v4482_v30 = vadd.f32 %v6650_v58, %v4442_v23  ;;  %v3692_v38 = vpop.f32.mrf.mxu0  ;;  %v3857_v41 = vpop.f32.mrf.mxu1 }
 0x481   : > { %v4078_v34 = vpop.f32.mrf.mxu2  ;;  %v4338_v37 = vpop.f32.mrf.mxu3  ;;  %v3858_v48 = vadd.f32 %v3857_v41, %v3692_v38 }
 0x482   : > { %5165 = vst.msk [vmem:[%s5466_s10 + $0x3e0] sm:$0xff] %vm1247_vm1, %v4482_v30  ;;  %v4143_v36 = vadd.f32 %v4078_v34, %v3855_v31 }
 0x483   : > { %5062 = vmatmul.msk.bf16.gmra.mxu0 %vm328_vm0, %v3566_v35  ;;  %5088 = vmatmul.msk.bf16.gmra.mxu1 %vm328_vm0, %v3507_v39 }
 0x484   : > { %v4403_v43 = vadd.f32 %v4338_v37, %v4143_v36 }
 0x486   : > { %v4443_v44 = vmul.f32 %v6645_v27, %v4403_v43  ;;  %5118 = vmatmul.msk.bf16.gmra.mxu2 %vm328_vm0, %v3955_v40  ;;  %5148 = vmatmul.msk.bf16.gmra.mxu3 %vm328_vm0, %v4215_v42 }
 0x488   : > { %v4483_v45 = vadd.f32 %v6650_v58, %v4443_v44  ;;  %v3694_v49 = vpop.f32.mrf.mxu0  ;;  %v3859_v50 = vpop.f32.mrf.mxu1 }
 0x489   : > { %v4081_v46 = vpop.f32.mrf.mxu2  ;;  %v4341_v47 = vpop.f32.mrf.mxu3  ;;  %v3860_v53 = vadd.f32 %v3859_v50, %v3694_v49 }
 0x48a   : > { %5166 = vst.msk [vmem:[%s5466_s10 + $0x3e8] sm:$0xff] %vm1247_vm1, %v4483_v45  ;;  %v4144_v2 = vadd.f32 %v4081_v46, %v3858_v48 }
 0x48c   : > { %v4404_v1 = vadd.f32 %v4341_v47, %v4144_v2 }
 0x48e   : > { %v4444_v51 = vmul.f32 %v6645_v27, %v4404_v1 }
 0x490   : > { %v4484_v52 = vadd.f32 %v6650_v58, %v4444_v51  ;;  %v3697_v59 = vpop.f32.mrf.mxu0  ;;  %v3862_v60 = vpop.f32.mrf.mxu1 }
 0x491   : > { %v4083_v55 = vpop.f32.mrf.mxu2  ;;  %v4343_v57 = vpop.f32.mrf.mxu3  ;;  %v3863_v62 = vadd.f32 %v3862_v60, %v3697_v59 }
 0x492   : > { %5167 = vst.msk [vmem:[%s5466_s10 + $0x3f0] sm:$0xff] %vm1247_vm1, %v4484_v52  ;;  %v4145_v56 = vadd.f32 %v4083_v55, %v3860_v53 }
 0x494   : > { %v4405_v6 = vadd.f32 %v4343_v57, %v4145_v56 }
 0x496   : > { %v4445_v61 = vmul.f32 %v6645_v27, %v4405_v6 }
 0x498   : > { %v4485_v63 = vadd.f32 %v6650_v58, %v4445_v61  ;;  %v3699_v5 = vpop.f32.mrf.mxu0  ;;  %v3864_v7 = vpop.f32.mrf.mxu1 }
 0x499   : > { %v4086_v0 = vpop.f32.mrf.mxu2  ;;  %v4346_v4 = vpop.f32.mrf.mxu3  ;;  %v3865_v11 = vadd.f32 %v3864_v7, %v3699_v5 }
 0x49a   : > { %5168 = vst.msk [vmem:[%s5466_s10 + $0x3f8] sm:$0xff] %vm1247_vm1, %v4485_v63  ;;  %v4146_v3 = vadd.f32 %v4086_v0, %v3863_v62 }
 0x49c   : > { %v4406_v8 = vadd.f32 %v4346_v4, %v4146_v3 }
 0x49e   : > { %v4446_v9 = vmul.f32 %v6645_v27, %v4406_v8 }
 0x4a0   : > { %v4486_v10 = vadd.f32 %v6650_v58, %v4446_v9  ;;  %v3702_v15 = vpop.f32.mrf.mxu0  ;;  %v3867_v16 = vpop.f32.mrf.mxu1 }
 0x4a1   : > { %v4088_v12 = vpop.f32.mrf.mxu2  ;;  %v4348_v14 = vpop.f32.mrf.mxu3  ;;  %v3868_v19 = vadd.f32 %v3867_v16, %v3702_v15 }
 0x4a2   : > { %5169 = vst.msk [vmem:[%s5466_s10 + $0x400] sm:$0xff] %vm1247_vm1, %v4486_v10  ;;  %v4147_v13 = vadd.f32 %v4088_v12, %v3865_v11 }
 0x4a4   : > { %v4407_v17 = vadd.f32 %v4348_v14, %v4147_v13 }
 0x4a6   : > { %v4447_v18 = vmul.f32 %v6645_v27, %v4407_v17 }
 0x4a8   : > { %v4487_v20 = vadd.f32 %v6650_v58, %v4447_v18  ;;  %v3704_v24 = vpop.f32.mrf.mxu0  ;;  %v3869_v25 = vpop.f32.mrf.mxu1 }
 0x4a9   : > { %v4091_v21 = vpop.f32.mrf.mxu2  ;;  %v4351_v23 = vpop.f32.mrf.mxu3  ;;  %v3870_v29 = vadd.f32 %v3869_v25, %v3704_v24 }
 0x4aa   : > { %5170 = vst.msk [vmem:[%s5466_s10 + $0x408] sm:$0xff] %vm1247_vm1, %v4487_v20  ;;  %v4148_v22 = vadd.f32 %v4091_v21, %v3868_v19 }
 0x4ac   : > { %v4408_v26 = vadd.f32 %v4351_v23, %v4148_v22 }
 0x4ae   : > { %v4448_v54 = vmul.f32 %v6645_v27, %v4408_v26 }
 0x4b0   : > { %v4488_v28 = vadd.f32 %v6650_v58, %v4448_v54  ;;  %v3707_v33 = vpop.f32.mrf.mxu0  ;;  %v3872_v34 = vpop.f32.mrf.mxu1 }
 0x4b1   : > { %v4093_v30 = vpop.f32.mrf.mxu2  ;;  %v4353_v32 = vpop.f32.mrf.mxu3  ;;  %v3873_v37 = vadd.f32 %v3872_v34, %v3707_v33 }
 0x4b2   : > { %5171 = vst.msk [vmem:[%s5466_s10 + $0x410] sm:$0xff] %vm1247_vm1, %v4488_v28  ;;  %v4149_v31 = vadd.f32 %v4093_v30, %v3870_v29 }
 0x4b4   : > { %v4409_v35 = vadd.f32 %v4353_v32, %v4149_v31 }
 0x4b6   : > { %v4449_v36 = vmul.f32 %v6645_v27, %v4409_v35 }
 0x4b8   : > { %v4489_v38 = vadd.f32 %v6650_v58, %v4449_v36  ;;  %v3709_v42 = vpop.f32.mrf.mxu0  ;;  %v3874_v43 = vpop.f32.mrf.mxu1 }
 0x4b9   : > { %v4096_v39 = vpop.f32.mrf.mxu2  ;;  %v4356_v41 = vpop.f32.mrf.mxu3  ;;  %v3875_v46 = vadd.f32 %v3874_v43, %v3709_v42 }
 0x4ba   : > { %5172 = vst.msk [vmem:[%s5466_s10 + $0x418] sm:$0xff] %vm1247_vm1, %v4489_v38  ;;  %v4150_v40 = vadd.f32 %v4096_v39, %v3873_v37 }
 0x4bc   : > { %v4410_v44 = vadd.f32 %v4356_v41, %v4150_v40 }
 0x4be   : > { %v4450_v48 = vmul.f32 %v6645_v27, %v4410_v44 }
 0x4c0   : > { %v4490_v45 = vadd.f32 %v6650_v58, %v4450_v48  ;;  %v3712_v50 = vpop.f32.mrf.mxu0  ;;  %v3877_v1 = vpop.f32.mrf.mxu1 }
 0x4c1   : > { %v4098_v2 = vpop.f32.mrf.mxu2  ;;  %v4358_v49 = vpop.f32.mrf.mxu3  ;;  %v3878_v53 = vadd.f32 %v3877_v1, %v3712_v50 }
 0x4c2   : > { %5173 = vst.msk [vmem:[%s5466_s10 + $0x420] sm:$0xff] %vm1247_vm1, %v4490_v45  ;;  %v4151_v47 = vadd.f32 %v4098_v2, %v3875_v46 }
 0x4c4   : > { %v4411_v51 = vadd.f32 %v4358_v49, %v4151_v47 }
 0x4c6   : > { %v4451_v52 = vmul.f32 %v6645_v27, %v4411_v51 }
 0x4c8   : > { %v4491_v55 = vadd.f32 %v6650_v58, %v4451_v52  ;;  %v3714_v60 = vpop.f32.mrf.mxu0  ;;  %v3879_v6 = vpop.f32.mrf.mxu1 }
 0x4c9   : > { %v4101_v56 = vpop.f32.mrf.mxu2  ;;  %v4361_v59 = vpop.f32.mrf.mxu3  ;;  %v3880_v0 = vadd.f32 %v3879_v6, %v3714_v60 }
 0x4ca   : > { %5174 = vst.msk [vmem:[%s5466_s10 + $0x428] sm:$0xff] %vm1247_vm1, %v4491_v55  ;;  %v4152_v57 = vadd.f32 %v4101_v56, %v3878_v53 }
 0x4cc   : > { %v4412_v61 = vadd.f32 %v4361_v59, %v4152_v57 }
 0x4ce   : > { %v4452_v62 = vmul.f32 %v6645_v27, %v4412_v61 }
 0x4d0   : > { %v4492_v63 = vadd.f32 %v6650_v58, %v4452_v62  ;;  %v3717_v7 = vpop.f32.mrf.mxu0  ;;  %v3882_v8 = vpop.f32.mrf.mxu1 }
 0x4d1   : > { %v4103_v3 = vpop.f32.mrf.mxu2  ;;  %v4363_v5 = vpop.f32.mrf.mxu3  ;;  %v3883_v11 = vadd.f32 %v3882_v8, %v3717_v7 }
 0x4d2   : > { %5175 = vst.msk [vmem:[%s5466_s10 + $0x430] sm:$0xff] %vm1247_vm1, %v4492_v63  ;;  %v4153_v4 = vadd.f32 %v4103_v3, %v3880_v0 }
 0x4d4   : > { %v4413_v9 = vadd.f32 %v4363_v5, %v4153_v4 }
 0x4d6   : > { %v4453_v10 = vmul.f32 %v6645_v27, %v4413_v9 }
 0x4d8   : > { %v4493_v12 = vadd.f32 %v6650_v58, %v4453_v10  ;;  %v3719_v16 = vpop.f32.mrf.mxu0  ;;  %v3884_v17 = vpop.f32.mrf.mxu1 }
 0x4d9   : > { %v4106_v13 = vpop.f32.mrf.mxu2  ;;  %v4366_v15 = vpop.f32.mrf.mxu3  ;;  %v3885_v21 = vadd.f32 %v3884_v17, %v3719_v16 }
 0x4da   : > { %5176 = vst.msk [vmem:[%s5466_s10 + $0x438] sm:$0xff] %vm1247_vm1, %v4493_v12  ;;  %v4154_v14 = vadd.f32 %v4106_v13, %v3883_v11 }
 0x4dc   : > { %v4414_v18 = vadd.f32 %v4366_v15, %v4154_v14 }
 0x4de   : > { %v4454_v19 = vmul.f32 %v6645_v27, %v4414_v18 }
 0x4e0   : > { %v4494_v20 = vadd.f32 %v6650_v58, %v4454_v19  ;;  %v3722_v25 = vpop.f32.mrf.mxu0  ;;  %v3887_v26 = vpop.f32.mrf.mxu1 }
 0x4e1   : > { %v4108_v22 = vpop.f32.mrf.mxu2  ;;  %v4368_v24 = vpop.f32.mrf.mxu3  ;;  %v3888_v29 = vadd.f32 %v3887_v26, %v3722_v25 }
 0x4e2   : > { %5177 = vst.msk [vmem:[%s5466_s10 + $0x440] sm:$0xff] %vm1247_vm1, %v4494_v20  ;;  %v4155_v23 = vadd.f32 %v4108_v22, %v3885_v21 }
 0x4e4   : > { %v4415_v54 = vadd.f32 %v4368_v24, %v4155_v23 }
 0x4e6   : > { %v4455_v28 = vmul.f32 %v6645_v27, %v4415_v54 }
 0x4e8   : > { %v4495_v30 = vadd.f32 %v6650_v58, %v4455_v28  ;;  %v3724_v34 = vpop.f32.mrf.mxu0  ;;  %v3889_v35 = vpop.f32.mrf.mxu1 }
 0x4e9   : > { %v4111_v31 = vpop.f32.mrf.mxu2  ;;  %v4371_v33 = vpop.f32.mrf.mxu3  ;;  %v3890_v39 = vadd.f32 %v3889_v35, %v3724_v34 }
 0x4ea   : > { %5178 = vst.msk [vmem:[%s5466_s10 + $0x448] sm:$0xff] %vm1247_vm1, %v4495_v30  ;;  %v4156_v32 = vadd.f32 %v4111_v31, %v3888_v29 }
 0x4ec   : > { %v4416_v36 = vadd.f32 %v4371_v33, %v4156_v32 }
 0x4ee   : > { %v4456_v37 = vmul.f32 %v6645_v27, %v4416_v36 }
 0x4f0   : > { %v4496_v38 = vadd.f32 %v6650_v58, %v4456_v37  ;;  %v3727_v43 = vpop.f32.mrf.mxu0  ;;  %v3892_v44 = vpop.f32.mrf.mxu1 }
 0x4f1   : > { %v4113_v40 = vpop.f32.mrf.mxu2  ;;  %v4373_v42 = vpop.f32.mrf.mxu3  ;;  %v3893_v46 = vadd.f32 %v3892_v44, %v3727_v43 }
 0x4f2   : > { %5179 = vst.msk [vmem:[%s5466_s10 + $0x450] sm:$0xff] %vm1247_vm1, %v4496_v38  ;;  %v4157_v41 = vadd.f32 %v4113_v40, %v3890_v39 }
 0x4f4   : > { %v4417_v48 = vadd.f32 %v4373_v42, %v4157_v41 }
 0x4f6   : > { %v4457_v45 = vmul.f32 %v6645_v27, %v4417_v48 }
 0x4f8   : > { %v4497_v2 = vadd.f32 %v6650_v58, %v4457_v45  ;;  %v3729_v1 = vpop.f32.mrf.mxu0  ;;  %v3894_v51 = vpop.f32.mrf.mxu1 }
 0x4f9   : > { %v4116_v47 = vpop.f32.mrf.mxu2  ;;  %v4376_v50 = vpop.f32.mrf.mxu3  ;;  %v3895_v56 = vadd.f32 %v3894_v51, %v3729_v1 }
 0x4fa   : > { %5180 = vst.msk [vmem:[%s5466_s10 + $0x458] sm:$0xff] %vm1247_vm1, %v4497_v2  ;;  %v4158_v49 = vadd.f32 %v4116_v47, %v3893_v46 }
 0x4fc   : > { %v4418_v52 = vadd.f32 %v4376_v50, %v4158_v49 }
 0x4fe   : > { %v4458_v53 = vmul.f32 %v6645_v27, %v4418_v52 }
 0x500   : > { %v4498_v55 = vadd.f32 %v6650_v58, %v4458_v53  ;;  %v3732_v6 = vpop.f32.mrf.mxu0  ;;  %v3897_v61 = vpop.f32.mrf.mxu1 }
 0x501   : > { %v4118_v57 = vpop.f32.mrf.mxu2  ;;  %v4378_v60 = vpop.f32.mrf.mxu3  ;;  %v3898_v0 = vadd.f32 %v3897_v61, %v3732_v6 }
 0x502   : > { %5181 = vst.msk [vmem:[%s5466_s10 + $0x460] sm:$0xff] %vm1247_vm1, %v4498_v55  ;;  %v4159_v59 = vadd.f32 %v4118_v57, %v3895_v56 }
 0x504   : > { %v4419_v62 = vadd.f32 %v4378_v60, %v4159_v59 }
 0x506   : > { %v4459_v63 = vmul.f32 %v6645_v27, %v4419_v62 }
 0x508   : > { %v4499_v3 = vadd.f32 %v6650_v58, %v4459_v63  ;;  %v3734_v9 = vpop.f32.mrf.mxu0  ;;  %v3899_v10 = vpop.f32.mrf.mxu1 }
 0x509   : > { %v4121_v4 = vpop.f32.mrf.mxu2  ;;  %v4381_v7 = vpop.f32.mrf.mxu3  ;;  %v3900_v13 = vadd.f32 %v3899_v10, %v3734_v9 }
 0x50a   : > { %5182 = vst.msk [vmem:[%s5466_s10 + $0x468] sm:$0xff] %vm1247_vm1, %v4499_v3  ;;  %v4160_v5 = vadd.f32 %v4121_v4, %v3898_v0 }
 0x50c   : > { %v4420_v8 = vadd.f32 %v4381_v7, %v4160_v5 }
 0x50e   : > { %v4460_v11 = vmul.f32 %v6645_v27, %v4420_v8 }
 0x510   : > { %v4500_v12 = vadd.f32 %v6650_v58, %v4460_v11 }
 0x511   : > { %v4123_v14 = vpop.f32.mrf.mxu2  ;;  %v4383_v16 = vpop.f32.mrf.mxu3 }
 0x512   : > { %5183 = vst.msk [vmem:[%s5466_s10 + $0x470] sm:$0xff] %vm1247_vm1, %v4500_v12  ;;  %v4161_v15 = vadd.f32 %v4123_v14, %v3900_v13 }
 0x514   : > { %v4421_v17 = vadd.f32 %v4383_v16, %v4161_v15 }
 0x516   : > { %v4461_v18 = vmul.f32 %v6645_v27, %v4421_v17 }
 0x518   : > { %v4501_v19 = vadd.f32 %v6650_v58, %v4461_v18 }
 0x51a   : > { %5184 = vst.msk [vmem:[%s5466_s10 + $0x478] sm:$0xff] %vm1247_vm1, %v4501_v19 }
 0x51b PF: > { %s14_s15 = sadd.s32 1, %s5249_s15  }
 0x51c   : > { %p11_p4 = scmp.ge.s32.totalorder %s14_s15, 4  }
 0x51e   :  { %13 = sbr.rel (!%p11_p4) target bundleno = 1 (0x1), region = 84 }

</bundles_post_ra>
